<compile_context>
chip_gen: v6e
topology: v6e:2x2x1
jax: 0.10.0
libtpu: 0.0.40
codegen_flags: <defaults>
</compile_context>

<pallas_src>
import jax
import jax.numpy as jnp
from jax.experimental import pallas as pl
from jax.experimental.pallas import tpu as pltpu

F32 = jnp.float32
BF16 = jnp.bfloat16

# ----------------------------- static geometry --------------------------------
H1 = W1 = 28                 # conv1 input (implied by the 128*3*3 fc head)
H2 = W2 = 14                 # conv2 input / NL1 map (after pool1)
H3 = W3 = 7                  # conv3 input / NL2 map (after pool2)
L2, L3 = H2 * W2, H3 * W3    # 196, 49
WP2, WP3 = W2 + 3, W3 + 3    # padded row strides for conv2 / conv3 scratches (17, 10)

# wide-anchor extents: last pre-pool conv row needed is (2*(Ho-1)*Wp + 2*(Wo-1)) + Wp + 1
MACC2 = 2 * (H2 // 2 - 1) * WP2 + 2 * (W2 // 2 - 1) + WP2 + 2     # 235
MACC3 = 2 * (H3 // 2 - 1) * WP3 + 2 * (W3 // 2 - 1) + WP3 + 2     # 56
MV2 = MACC2 - WP2 - 1        # 217
MV3 = MACC3 - WP3 - 1        # 45
MV_NL1 = L2 - W2 - 1         # 181
MV_NL2 = L3 - W3 - 1         # 41
PAD2_ROWS = ((MACC2 + 2 * WP2 + 2) + 7) // 8 * 8                  # 272
PAD3_ROWS = ((MACC3 + 2 * WP3 + 2) + 7) // 8 * 8                  # 80


# ----------------------------- in-kernel helpers -------------------------------

def _pool_pm(t, rs, mv):
    """pm[m] = max over the 2x2 window anchored at row m (row m ~ (h, w), row stride rs)."""
    return jnp.maximum(jnp.maximum(t[0:mv], t[1:mv + 1]),
                       jnp.maximum(t[rs:rs + mv], t[rs + 1:rs + 1 + mv]))


def _conv3x3_bn_relu_pool(x, pad_ref, col_ref, w_ref, b_ref, sel_ref, *, H, W, Cin):
    """3x3/stride-1/pad-1 conv (BN folded) + ReLU + 2x2/stride-2 max pool.

    x:       (H*W, Cin) f32 value, rows in (h, w) row-major order.
    pad_ref: VMEM scratch, zero-padded input flattened with row stride W+3.
    col_ref: VMEM scratch (Macc, 9*Cin) im2col matrix.
    Returns (floor(H/2)*floor(W/2), Cout) f32, pooled rows in (i, j) row-major order.
    """
    Wp = W + 3
    Macc = col_ref.shape[0]
    # zero the padding once per step, then drop the activation rows into place
    pad_ref[...] = jnp.zeros_like(pad_ref)
    for h in range(H):
        r0 = (h + 1) * Wp + 1
        pad_ref[r0:r0 + W, :] = x[h * W:(h + 1) * W, :]
    # im2col: 9 shifted (Macc, Cin) windows -> one (Macc, 9*Cin) slab (single MXU dot)
    for dy in range(3):
        for dx in range(3):
            k = dy * 3 + dx
            off = dy * Wp + dx
            col_ref[:, k * Cin:(k + 1) * Cin] = pad_ref[off:off + Macc, :]
    t = jnp.dot(col_ref[...].astype(BF16), w_ref[...], preferred_element_type=F32)
    t = jnp.maximum(t + b_ref[...], 0.0)                     # BN-folded bias + ReLU
    pm = _pool_pm(t, Wp, Macc - Wp - 1)
    # precomputed 0/1 selection gathers the window anchors at even (h, w)
    return jnp.dot(sel_ref[...], pm.astype(BF16), preferred_element_type=F32)


def _nonlocal_block(x, wpgt_ref, bpgt_ref, ww_ref, bw_ref, sel_ref, *, W, Ci):
    """Embedded-Gaussian NONLocalBlock2D (sub_sample=True, bn_layer=True), one item."""
    L = x.shape[0]
    xb = x.astype(BF16)
    # fused [phi | g | theta] 1x1 projections: one (L, C) x (C, 3*Ci) matmul
    proj = jnp.dot(xb, wpgt_ref[...], preferred_element_type=F32) + bpgt_ref[...]
    pg = proj[:, :2 * Ci]                                    # [phi | g], pooled together
    theta = proj[:, 2 * Ci:]
    pm = _pool_pm(pg, W, L - W - 1)                          # sub_sample MaxPool2d(2)
    pooled = jnp.dot(sel_ref[...], pm.astype(BF16), preferred_element_type=F32)
    phi_p, g_p = pooled[:, :Ci], pooled[:, Ci:]
    f = jax.lax.dot_general(theta.astype(BF16), phi_p.astype(BF16),
                            (((1,), (1,)), ((), ())), preferred_element_type=F32)
    f = f - jnp.max(f, axis=-1, keepdims=True)
    e = jnp.exp(f)
    p = e * pl.reciprocal(jnp.sum(e, axis=-1, keepdims=True), approx=True)
    y = jnp.dot(p.astype(BF16), g_p.astype(BF16), preferred_element_type=F32)
    z = jnp.dot(y.astype(BF16), ww_ref[...], preferred_element_type=F32) + bw_ref[...]
    return x + z                                             # residual


# --------------------------------- the kernel ----------------------------------

def _network_kernel(slab_ref,
                    c1w_ref, c1b_ref,
                    n1w_ref, n1b_ref, n1ww_ref, n1bw_ref, n1sel_ref,
                    c2w_ref, c2b_ref, c2sel_ref,
                    n2w_ref, n2b_ref, n2ww_ref, n2bw_ref, n2sel_ref,
                    c3w_ref, c3b_ref, c3sel_ref,
                    f1w_ref, f1b_ref, f2w_ref, f2b_ref,
                    o_ref,
                    pad2_ref, col2_ref, pad3_ref, col3_ref, feat_ref):
    # ---- conv1 + BN + ReLU + pool: slab holds 4 parity blocks of the 28x28 positions,
    # so pooling is just an elementwise max over the four (196, 32) blocks.
    z = jnp.dot(slab_ref[0], c1w_ref[...], preferred_element_type=F32)     # (784, 32)
    z = jnp.maximum(z + c1b_ref[...], 0.0)
    x = jnp.maximum(jnp.maximum(z[0:L2], z[L2:2 * L2]),
                    jnp.maximum(z[2 * L2:3 * L2], z[3 * L2:4 * L2]))        # (196, 32)
    # ---- NONLocalBlock2D(in_channels=32) ----
    x = _nonlocal_block(x, n1w_ref, n1b_ref, n1ww_ref, n1bw_ref, n1sel_ref, W=W2, Ci=16)
    # ---- conv2 + BN + ReLU + pool -> (49, 64) ----
    x = _conv3x3_bn_relu_pool(x, pad2_ref, col2_ref, c2w_ref, c2b_ref, c2sel_ref,
                              H=H2, W=W2, Cin=32)
    # ---- NONLocalBlock2D(in_channels=64) ----
    x = _nonlocal_block(x, n2w_ref, n2b_ref, n2ww_ref, n2bw_ref, n2sel_ref, W=W3, Ci=32)
    # ---- conv3 + BN + ReLU + pool -> (9, 128) ----
    x = _conv3x3_bn_relu_pool(x, pad3_ref, col3_ref, c3w_ref, c3b_ref, c3sel_ref,
                              H=H3, W=W3, Cin=64)
    # ---- fc head (NCHW flatten folded into fc1's weight at prep time) ----
    for s in range(9):
        feat_ref[:, s * 128:(s + 1) * 128] = x[s:s + 1, :]
    h = jnp.dot(feat_ref[...].astype(BF16), f1w_ref[...], preferred_element_type=F32)
    h = jnp.maximum(h + f1b_ref[...], 0.0)
    # TODO(synk): nn.Dropout(0.5) is the identity in eval mode; no RNG applied here.
    out = jnp.dot(h.astype(BF16), f2w_ref[...], preferred_element_type=F32) + f2b_ref[...]
    o_ref[0] = out.astype(o_ref.dtype)                                     # (1, 128)


# ------------------------------ wrapper / forward -------------------------------

def _conv1_im2col_slab(x_nchw):
    """(B,1,28,28) -> (B, 4*196, 9) bf16 im2col slab: block (a,b) row (ho*14+wo) holds
    the 9 taps of the conv evaluated at pixel (2*ho+a, 2*wo+b)."""
    B = x_nchw.shape[0]
    xp = jnp.pad(x_nchw[:, 0, :, :].astype(F32), ((0, 0), (1, 1), (1, 1)))   # (B,30,30)
    blocks = []
    for a in range(2):
        for b in range(2):
            taps = []
            for dy in range(3):
                for dx in range(3):
                    s = xp[:, a + dy:a + dy + 27:2, b + dx:b + dx + 27:2]    # (B,14,14)
                    taps.append(s.reshape(B, L2))
            blocks.append(jnp.stack(taps, axis=-1))                          # (B,196,9)
    return jnp.concatenate(blocks, axis=1).astype(BF16)                      # (B,784,9)


def network_forward(x_nchw, q):
    B = x_nchw.shape[0]
    slab = _conv1_im2col_slab(x_nchw)

    def wspec(a):
        return pl.BlockSpec(a.shape, lambda i: (0,) * a.ndim)

    weights = [q["c1_w"], q["c1_b"],
               q["n1_w"], q["n1_b"], q["n1_ww"], q["n1_bw"], q["n1_sel"],
               q["c2_w"], q["c2_b"], q["c2_sel"],
               q["n2_w"], q["n2_b"], q["n2_ww"], q["n2_bw"], q["n2_sel"],
               q["c3_w"], q["c3_b"], q["c3_sel"],
               q["fc1_w"], q["fc1_b"], q["fc2_w"], q["fc2_b"]]

    out = pl.pallas_call(
        _network_kernel,
        out_shape=jax.ShapeDtypeStruct((B, 1, 128), F32),
        grid=(B,),
        in_specs=[pl.BlockSpec((1, 4 * L2, 9), lambda i: (i, 0, 0))]
                 + [wspec(w) for w in weights],
        out_specs=pl.BlockSpec((1, 1, 128), lambda i: (i, 0, 0)),
        scratch_shapes=[
            pltpu.VMEM((PAD2_ROWS, 32), F32),     # conv2 zero-padded input
            pltpu.VMEM((MACC2, 9 * 32), F32),     # conv2 im2col slab
            pltpu.VMEM((PAD3_ROWS, 64), F32),     # conv3 zero-padded input
            pltpu.VMEM((MACC3, 9 * 64), F32),     # conv3 im2col slab
            pltpu.VMEM((1, 9 * 128), F32),        # fc flatten buffer
        ],
        compiler_params=pltpu.CompilerParams(dimension_semantics=("parallel",)),
    )(slab, *weights)
    return out[:, 0, :10]


# --------------------------------- parameters -----------------------------------

def init_params(key):
    """Raw, PyTorch-layout parameters (synthetic)."""
    keys = iter(jax.random.split(key, 64))

    def rnd(shape, scale):
        return jax.random.normal(next(keys), shape, F32) * scale

    def conv_p(cin, cout, k):
        fan = cin * k * k
        return {"w": rnd((cout, cin, k, k), (2.0 / fan) ** 0.5), "b": rnd((cout,), 0.05)}

    def bn_p(c):
        return {"gamma": 1.0 + rnd((c,), 0.05), "beta": rnd((c,), 0.05),
                "mean": rnd((c,), 0.05), "var": 1.0 + jnp.abs(rnd((c,), 0.05))}

    def nl_p(c):
        # TODO(synk): NONLocalBlock2D source was not provided; this follows the canonical
        # embedded-Gaussian block (inter_channels=C//2, sub_sample=True, bn_layer=True).
        ci = c // 2
        g = conv_p(c, ci, 1); th = conv_p(c, ci, 1); ph = conv_p(c, ci, 1)
        w = conv_p(ci, c, 1); wbn = bn_p(c)
        return {"g_w": g["w"], "g_b": g["b"],
                "theta_w": th["w"], "theta_b": th["b"],
                "phi_w": ph["w"], "phi_b": ph["b"],
                "w_w": w["w"], "w_b": w["b"],
                "w_bn_gamma": wbn["gamma"], "w_bn_beta": wbn["beta"],
                "w_bn_mean": wbn["mean"], "w_bn_var": wbn["var"]}

    p = {}
    p["conv1"] = conv_p(1, 32, 3);   p["bn1"] = bn_p(32);   p["nl1"] = nl_p(32)
    p["conv2"] = conv_p(32, 64, 3);  p["bn2"] = bn_p(64);   p["nl2"] = nl_p(64)
    p["conv3"] = conv_p(64, 128, 3); p["bn3"] = bn_p(128)
    p["fc1_w"] = rnd((256, 128 * 3 * 3), (2.0 / (128 * 3 * 3)) ** 0.5)
    p["fc1_b"] = rnd((256,), 0.05)
    p["fc2_w"] = rnd((10, 256), (2.0 / 256) ** 0.5)
    p["fc2_b"] = rnd((10,), 0.05)
    return p


def prepare_params(p, eps=1e-5):
    """One-time prep: fold BN, build im2col / fused-projection matmul layouts (bf16),
    precompute the 0/1 pooling selections, fold the NCHW flatten into fc1, pad fc2 to
    a lane-dense 128-wide output."""

    def fold_bn(bp):
        s = bp["gamma"] / jnp.sqrt(bp["var"] + eps)
        return s, bp["beta"] - bp["mean"] * s

    def conv_im2col(cw, cb, bn):
        s, sh = fold_bn(bn)
        cout, cin = cw.shape[0], cw.shape[1]
        wm = jnp.transpose(cw, (2, 3, 1, 0)).reshape(9 * cin, cout) * s[None, :]
        return wm.astype(BF16), (cb * s + sh).reshape(1, cout).astype(F32)

    def pool_sel(Ho, Wo, rs, mv):
        o = jnp.arange(Ho * Wo)
        anchors = 2 * (o // Wo) * rs + 2 * (o % Wo)
        return jax.nn.one_hot(anchors, mv, dtype=BF16)

    def prep_nl(nl):
        C, Ci = nl["w_w"].shape[0], nl["w_w"].shape[1]
        s = nl["w_bn_gamma"] / jnp.sqrt(nl["w_bn_var"] + eps)
        sh = nl["w_bn_beta"] - nl["w_bn_mean"] * s
        wp = nl["phi_w"].reshape(Ci, C).T
        wg = nl["g_w"].reshape(Ci, C).T
        wt = nl["theta_w"].reshape(Ci, C).T
        w = jnp.concatenate([wp, wg, wt], axis=1)                     # [phi | g | theta]
        b = jnp.concatenate([nl["phi_b"], nl["g_b"], nl["theta_b"]]).reshape(1, 3 * Ci)
        return (w.astype(BF16), b.astype(F32),
                (nl["w_w"].reshape(C, Ci).T * s[None, :]).astype(BF16),
                (nl["w_b"] * s + sh).reshape(1, C).astype(F32))

    q = {}
    q["c1_w"], q["c1_b"] = conv_im2col(p["conv1"]["w"], p["conv1"]["b"], p["bn1"])
    q["c2_w"], q["c2_b"] = conv_im2col(p["conv2"]["w"], p["conv2"]["b"], p["bn2"])
    q["c3_w"], q["c3_b"] = conv_im2col(p["conv3"]["w"], p["conv3"]["b"], p["bn3"])

    q["n1_w"], q["n1_b"], q["n1_ww"], q["n1_bw"] = prep_nl(p["nl1"])
    q["n2_w"], q["n2_b"], q["n2_ww"], q["n2_bw"] = prep_nl(p["nl2"])

    q["n1_sel"] = pool_sel(7, 7, W2, MV_NL1)      # (49, 181)
    q["n2_sel"] = pool_sel(3, 3, W3, MV_NL2)      # (9, 41)
    q["c2_sel"] = pool_sel(7, 7, WP2, MV2)        # (49, 217)
    q["c3_sel"] = pool_sel(3, 3, WP3, MV3)        # (9, 45)

    # fc1: torch flattens NCHW (idx = c*9 + s); our feature order is s*128 + c.
    w1 = p["fc1_w"].reshape(256, 128, 9).transpose(2, 1, 0).reshape(9 * 128, 256)
    q["fc1_w"] = w1.astype(BF16)
    q["fc1_b"] = p["fc1_b"].reshape(1, 256).astype(F32)
    # fc2: pad the 10 classes to 128 lanes for a lane-dense store (sliced outside).
    q["fc2_w"] = jnp.pad(p["fc2_w"], ((0, 118), (0, 0))).T.astype(BF16)     # (256, 128)
    q["fc2_b"] = jnp.pad(p["fc2_b"], (0, 118)).reshape(1, 128).astype(F32)
    return q


# ---------------------- pure-XLA reference (sanity check) ----------------------

def _reference_forward(x_nchw, p):
    hp = jax.lax.Precision.HIGHEST

    def conv2d(x, w, b, pad):
        y = jax.lax.conv_general_dilated(x, w, (1, 1), [(pad, pad), (pad, pad)],
                                         dimension_numbers=("NCHW", "OIHW", "NCHW"),
                                         precision=hp)
        return y + b.reshape(1, -1, 1, 1)

    def bn(x, bp):
        s = bp["gamma"] / jnp.sqrt(bp["var"] + 1e-5)
        return x * s.reshape(1, -1, 1, 1) + (bp["beta"] - bp["mean"] * s).reshape(1, -1, 1, 1)

    def pool(x):
        return jax.lax.reduce_window(x, -jnp.inf, jax.lax.max,
                                     (1, 1, 2, 2), (1, 1, 2, 2), "VALID")

    def nl(x, q):
        B, C, H, W = x.shape
        Ci = C // 2
        th = conv2d(x, q["theta_w"], q["theta_b"], 0).reshape(B, Ci, H * W)
        ph = pool(conv2d(x, q["phi_w"], q["phi_b"], 0)).reshape(B, Ci, -1)
        g = pool(conv2d(x, q["g_w"], q["g_b"], 0)).reshape(B, Ci, -1)
        f = jnp.einsum("bci,bcj->bij", th, ph, precision=hp)
        a = jax.nn.softmax(f, axis=-1)
        y = jnp.einsum("bij,bcj->bci", a, g, precision=hp).reshape(B, Ci, H, W)
        z = conv2d(y, q["w_w"], q["w_b"], 0)
        s = q["w_bn_gamma"] / jnp.sqrt(q["w_bn_var"] + 1e-5)
        z = z * s.reshape(1, -1, 1, 1) + (q["w_bn_beta"] - q["w_bn_mean"] * s).reshape(1, -1, 1, 1)
        return z + x

    x = x_nchw
    x = pool(jax.nn.relu(bn(conv2d(x, p["conv1"]["w"], p["conv1"]["b"], 1), p["bn1"])))
    x = nl(x, p["nl1"])
    x = pool(jax.nn.relu(bn(conv2d(x, p["conv2"]["w"], p["conv2"]["b"], 1), p["bn2"])))
    x = nl(x, p["nl2"])
    x = pool(jax.nn.relu(bn(conv2d(x, p["conv3"]["w"], p["conv3"]["b"], 1), p["bn3"])))
    feat = x.reshape(x.shape[0], -1)
    h = jax.nn.relu(jnp.dot(feat, p["fc1_w"].T, precision=hp) + p["fc1_b"])
    return jnp.dot(h, p["fc2_w"].T, precision=hp) + p["fc2_b"]


if __name__ == "__main__":
    key = jax.random.PRNGKey(0)
    k_x, k_p = jax.random.split(key)
    # 28x28 grayscale input is implied by the fc head (128 * 3 * 3 after three 2x2 pools)
    x = jax.random.normal(k_x, (2, 1, 28, 28), F32)          # NCHW like PyTorch
    raw = init_params(k_p)
    params = prepare_params(raw)

    out = jax.jit(network_forward)(x, params)
    jax.block_until_ready(out)
    assert out.shape == (2, 10)

    # sanity check vs a pure-XLA f32 reference (kernel uses bf16 MXU + approx reciprocal)
    ref = _reference_forward(x, raw)
    err = float(jnp.max(jnp.abs(out - ref)))
    tol = 6e-2 * (1.0 + float(jnp.max(jnp.abs(ref))))
    assert err < tol, f"mismatch vs reference: {err} (tol {tol})"
    print("KERNEL_OK")
</pallas_src>

<mosaic_0001>
module attributes {stable_mosaic.version = 11 : i64} {
  func.func @_network_kernel(%arg0: i32, %arg1: memref<1x784x9xbf16, #tpu.memory_space<vmem>>, %arg2: memref<9x32xbf16, #tpu.memory_space<vmem>>, %arg3: memref<1x32xf32, #tpu.memory_space<vmem>>, %arg4: memref<32x48xbf16, #tpu.memory_space<vmem>>, %arg5: memref<1x48xf32, #tpu.memory_space<vmem>>, %arg6: memref<16x32xbf16, #tpu.memory_space<vmem>>, %arg7: memref<1x32xf32, #tpu.memory_space<vmem>>, %arg8: memref<49x181xbf16, #tpu.memory_space<vmem>>, %arg9: memref<288x64xbf16, #tpu.memory_space<vmem>>, %arg10: memref<1x64xf32, #tpu.memory_space<vmem>>, %arg11: memref<49x217xbf16, #tpu.memory_space<vmem>>, %arg12: memref<64x96xbf16, #tpu.memory_space<vmem>>, %arg13: memref<1x96xf32, #tpu.memory_space<vmem>>, %arg14: memref<32x64xbf16, #tpu.memory_space<vmem>>, %arg15: memref<1x64xf32, #tpu.memory_space<vmem>>, %arg16: memref<9x41xbf16, #tpu.memory_space<vmem>>, %arg17: memref<576x128xbf16, #tpu.memory_space<vmem>>, %arg18: memref<1x128xf32, #tpu.memory_space<vmem>>, %arg19: memref<9x45xbf16, #tpu.memory_space<vmem>>, %arg20: memref<1152x256xbf16, #tpu.memory_space<vmem>>, %arg21: memref<1x256xf32, #tpu.memory_space<vmem>>, %arg22: memref<256x128xbf16, #tpu.memory_space<vmem>>, %arg23: memref<1x128xf32, #tpu.memory_space<vmem>>, %arg24: memref<1x1x128xf32, #tpu.memory_space<vmem>>, %arg25: memref<272x32xf32, #tpu.memory_space<vmem>>, %arg26: memref<235x288xf32, #tpu.memory_space<vmem>>, %arg27: memref<80x64xf32, #tpu.memory_space<vmem>>, %arg28: memref<56x576xf32, #tpu.memory_space<vmem>>, %arg29: memref<1x1152xf32, #tpu.memory_space<vmem>>) attributes {dimension_semantics = [#tpu.dimension_semantics<parallel>], iteration_bounds = array<i64: 2>, scalar_prefetch = 0 : i64, scratch_operands = 5 : i64, tpu.core_type = #tpu.core_type<tc>, window_params = [{transform_indices = @transform_0, window_bounds = array<i64: 1, 784, 9>}, {pipeline_mode = #tpu.pipeline_mode<synchronous>, transform_indices = @transform_1, window_bounds = array<i64: 9, 32>}, {pipeline_mode = #tpu.pipeline_mode<synchronous>, transform_indices = @transform_2, window_bounds = array<i64: 1, 32>}, {pipeline_mode = #tpu.pipeline_mode<synchronous>, transform_indices = @transform_3, window_bounds = array<i64: 32, 48>}, {pipeline_mode = #tpu.pipeline_mode<synchronous>, transform_indices = @transform_4, window_bounds = array<i64: 1, 48>}, {pipeline_mode = #tpu.pipeline_mode<synchronous>, transform_indices = @transform_5, window_bounds = array<i64: 16, 32>}, {pipeline_mode = #tpu.pipeline_mode<synchronous>, transform_indices = @transform_6, window_bounds = array<i64: 1, 32>}, {pipeline_mode = #tpu.pipeline_mode<synchronous>, transform_indices = @transform_7, window_bounds = array<i64: 49, 181>}, {pipeline_mode = #tpu.pipeline_mode<synchronous>, transform_indices = @transform_8, window_bounds = array<i64: 288, 64>}, {pipeline_mode = #tpu.pipeline_mode<synchronous>, transform_indices = @transform_9, window_bounds = array<i64: 1, 64>}, {pipeline_mode = #tpu.pipeline_mode<synchronous>, transform_indices = @transform_10, window_bounds = array<i64: 49, 217>}, {pipeline_mode = #tpu.pipeline_mode<synchronous>, transform_indices = @transform_11, window_bounds = array<i64: 64, 96>}, {pipeline_mode = #tpu.pipeline_mode<synchronous>, transform_indices = @transform_12, window_bounds = array<i64: 1, 96>}, {pipeline_mode = #tpu.pipeline_mode<synchronous>, transform_indices = @transform_13, window_bounds = array<i64: 32, 64>}, {pipeline_mode = #tpu.pipeline_mode<synchronous>, transform_indices = @transform_14, window_bounds = array<i64: 1, 64>}, {pipeline_mode = #tpu.pipeline_mode<synchronous>, transform_indices = @transform_15, window_bounds = array<i64: 9, 41>}, {pipeline_mode = #tpu.pipeline_mode<synchronous>, transform_indices = @transform_16, window_bounds = array<i64: 576, 128>}, {pipeline_mode = #tpu.pipeline_mode<synchronous>, transform_indices = @transform_17, window_bounds = array<i64: 1, 128>}, {pipeline_mode = #tpu.pipeline_mode<synchronous>, transform_indices = @transform_18, window_bounds = array<i64: 9, 45>}, {pipeline_mode = #tpu.pipeline_mode<synchronous>, transform_indices = @transform_19, window_bounds = array<i64: 1152, 256>}, {pipeline_mode = #tpu.pipeline_mode<synchronous>, transform_indices = @transform_20, window_bounds = array<i64: 1, 256>}, {pipeline_mode = #tpu.pipeline_mode<synchronous>, transform_indices = @transform_21, window_bounds = array<i64: 256, 128>}, {pipeline_mode = #tpu.pipeline_mode<synchronous>, transform_indices = @transform_22, window_bounds = array<i64: 1, 128>}, {transform_indices = @transform_23, window_bounds = array<i64: 1, 1, 128>}]} {
    %c0 = arith.constant 0 : index
    %c0_0 = arith.constant 0 : index
    %c0_1 = arith.constant 0 : index
    %0 = vector.load %arg1[%c0, %c0_0, %c0_1] : memref<1x784x9xbf16, #tpu.memory_space<vmem>>, vector<1x784x9xbf16>
    %1 = vector.shape_cast %0 : vector<1x784x9xbf16> to vector<784x9xbf16>
    %c0_2 = arith.constant 0 : index
    %c0_3 = arith.constant 0 : index
    %2 = vector.load %arg2[%c0_2, %c0_3] : memref<9x32xbf16, #tpu.memory_space<vmem>>, vector<9x32xbf16>
    %cst = arith.constant dense<0.000000e+00> : vector<784x32xf32>
    %3 = tpu.matmul %1, %2, %cst {dimension_numbers = #tpu.dot_dimension_numbers<[1], [0], [0], [1], [0, 0, 1, 1], [], []>} : vector<784x9xbf16>, vector<9x32xbf16>, vector<784x32xf32> -> vector<784x32xf32>
    %c0_4 = arith.constant 0 : index
    %c0_5 = arith.constant 0 : index
    %4 = vector.load %arg3[%c0_4, %c0_5] : memref<1x32xf32, #tpu.memory_space<vmem>>, vector<1x32xf32>
    %5 = vector.broadcast %4 : vector<1x32xf32> to vector<784x32xf32>
    %6 = arith.addf %3, %5 : vector<784x32xf32>
    %cst_6 = arith.constant 0.000000e+00 : f32
    %7 = vector.broadcast %cst_6 : f32 to vector<784x32xf32>
    %8 = arith.maximumf %6, %7 : vector<784x32xf32>
    %9 = vector.extract_strided_slice %8 {offsets = [0, 0], sizes = [196, 32], strides = [1, 1]} : vector<784x32xf32> to vector<196x32xf32>
    %10 = vector.extract_strided_slice %8 {offsets = [196, 0], sizes = [196, 32], strides = [1, 1]} : vector<784x32xf32> to vector<196x32xf32>
    %11 = arith.maximumf %9, %10 : vector<196x32xf32>
    %12 = vector.extract_strided_slice %8 {offsets = [392, 0], sizes = [196, 32], strides = [1, 1]} : vector<784x32xf32> to vector<196x32xf32>
    %13 = vector.extract_strided_slice %8 {offsets = [588, 0], sizes = [196, 32], strides = [1, 1]} : vector<784x32xf32> to vector<196x32xf32>
    %14 = arith.maximumf %12, %13 : vector<196x32xf32>
    %15 = arith.maximumf %11, %14 : vector<196x32xf32>
    %16 = arith.truncf %15 : vector<196x32xf32> to vector<196x32xbf16>
    %c0_7 = arith.constant 0 : index
    %c0_8 = arith.constant 0 : index
    %17 = vector.load %arg4[%c0_7, %c0_8] : memref<32x48xbf16, #tpu.memory_space<vmem>>, vector<32x48xbf16>
    %cst_9 = arith.constant dense<0.000000e+00> : vector<196x48xf32>
    %18 = tpu.matmul %16, %17, %cst_9 {dimension_numbers = #tpu.dot_dimension_numbers<[1], [0], [0], [1], [0, 0, 1, 1], [], []>} : vector<196x32xbf16>, vector<32x48xbf16>, vector<196x48xf32> -> vector<196x48xf32>
    %c0_10 = arith.constant 0 : index
    %c0_11 = arith.constant 0 : index
    %19 = vector.load %arg5[%c0_10, %c0_11] : memref<1x48xf32, #tpu.memory_space<vmem>>, vector<1x48xf32>
    %20 = vector.broadcast %19 : vector<1x48xf32> to vector<196x48xf32>
    %21 = arith.addf %18, %20 : vector<196x48xf32>
    %22 = vector.extract_strided_slice %21 {offsets = [0, 0], sizes = [196, 32], strides = [1, 1]} : vector<196x48xf32> to vector<196x32xf32>
    %23 = vector.extract_strided_slice %21 {offsets = [0, 32], sizes = [196, 16], strides = [1, 1]} : vector<196x48xf32> to vector<196x16xf32>
    %24 = vector.extract_strided_slice %22 {offsets = [0, 0], sizes = [181, 32], strides = [1, 1]} : vector<196x32xf32> to vector<181x32xf32>
    %25 = vector.extract_strided_slice %22 {offsets = [1, 0], sizes = [181, 32], strides = [1, 1]} : vector<196x32xf32> to vector<181x32xf32>
    %26 = arith.maximumf %24, %25 : vector<181x32xf32>
    %27 = vector.extract_strided_slice %22 {offsets = [14, 0], sizes = [181, 32], strides = [1, 1]} : vector<196x32xf32> to vector<181x32xf32>
    %28 = vector.extract_strided_slice %22 {offsets = [15, 0], sizes = [181, 32], strides = [1, 1]} : vector<196x32xf32> to vector<181x32xf32>
    %29 = arith.maximumf %27, %28 : vector<181x32xf32>
    %30 = arith.maximumf %26, %29 : vector<181x32xf32>
    %c0_12 = arith.constant 0 : index
    %c0_13 = arith.constant 0 : index
    %31 = vector.load %arg8[%c0_12, %c0_13] : memref<49x181xbf16, #tpu.memory_space<vmem>>, vector<49x181xbf16>
    %32 = arith.truncf %30 : vector<181x32xf32> to vector<181x32xbf16>
    %cst_14 = arith.constant dense<0.000000e+00> : vector<49x32xf32>
    %33 = tpu.matmul %31, %32, %cst_14 {dimension_numbers = #tpu.dot_dimension_numbers<[1], [0], [0], [1], [0, 0, 1, 1], [], []>} : vector<49x181xbf16>, vector<181x32xbf16>, vector<49x32xf32> -> vector<49x32xf32>
    %34 = vector.extract_strided_slice %33 {offsets = [0, 0], sizes = [49, 16], strides = [1, 1]} : vector<49x32xf32> to vector<49x16xf32>
    %35 = vector.extract_strided_slice %33 {offsets = [0, 16], sizes = [49, 16], strides = [1, 1]} : vector<49x32xf32> to vector<49x16xf32>
    %36 = arith.truncf %23 : vector<196x16xf32> to vector<196x16xbf16>
    %37 = arith.truncf %34 : vector<49x16xf32> to vector<49x16xbf16>
    %cst_15 = arith.constant dense<0.000000e+00> : vector<196x49xf32>
    %38 = tpu.matmul %36, %37, %cst_15 {dimension_numbers = #tpu.dot_dimension_numbers<[1], [1], [0], [0], [0, 0, 1, 0], [], []>} : vector<196x16xbf16>, vector<49x16xbf16>, vector<196x49xf32> -> vector<196x49xf32>
    %cst_16 = arith.constant dense<0xFF800000> : vector<196xf32>
    %39 = vector.multi_reduction <maximumf>, %38, %cst_16 [1] : vector<196x49xf32> to vector<196xf32>
    %40 = vector.shape_cast %39 : vector<196xf32> to vector<196x1xf32>
    %41 = vector.broadcast %40 : vector<196x1xf32> to vector<196x49xf32>
    %42 = arith.subf %38, %41 : vector<196x49xf32>
    %43 = math.exp %42 : vector<196x49xf32>
    %cst_17 = arith.constant dense<0.000000e+00> : vector<196xf32>
    %44 = vector.multi_reduction <add>, %43, %cst_17 [1] : vector<196x49xf32> to vector<196xf32>
    %45 = vector.shape_cast %44 : vector<196xf32> to vector<196x1xf32>
    %46 = tpu.reciprocal %45 {approx = true} : vector<196x1xf32> -> vector<196x1xf32>
    %47 = vector.broadcast %46 : vector<196x1xf32> to vector<196x49xf32>
    %48 = arith.mulf %43, %47 : vector<196x49xf32>
    %49 = arith.truncf %48 : vector<196x49xf32> to vector<196x49xbf16>
    %50 = arith.truncf %35 : vector<49x16xf32> to vector<49x16xbf16>
    %cst_18 = arith.constant dense<0.000000e+00> : vector<196x16xf32>
    %51 = tpu.matmul %49, %50, %cst_18 {dimension_numbers = #tpu.dot_dimension_numbers<[1], [0], [0], [1], [0, 0, 1, 1], [], []>} : vector<196x49xbf16>, vector<49x16xbf16>, vector<196x16xf32> -> vector<196x16xf32>
    %52 = arith.truncf %51 : vector<196x16xf32> to vector<196x16xbf16>
    %c0_19 = arith.constant 0 : index
    %c0_20 = arith.constant 0 : index
    %53 = vector.load %arg6[%c0_19, %c0_20] : memref<16x32xbf16, #tpu.memory_space<vmem>>, vector<16x32xbf16>
    %cst_21 = arith.constant dense<0.000000e+00> : vector<196x32xf32>
    %54 = tpu.matmul %52, %53, %cst_21 {dimension_numbers = #tpu.dot_dimension_numbers<[1], [0], [0], [1], [0, 0, 1, 1], [], []>} : vector<196x16xbf16>, vector<16x32xbf16>, vector<196x32xf32> -> vector<196x32xf32>
    %c0_22 = arith.constant 0 : index
    %c0_23 = arith.constant 0 : index
    %55 = vector.load %arg7[%c0_22, %c0_23] : memref<1x32xf32, #tpu.memory_space<vmem>>, vector<1x32xf32>
    %56 = vector.broadcast %55 : vector<1x32xf32> to vector<196x32xf32>
    %57 = arith.addf %54, %56 : vector<196x32xf32>
    %58 = arith.addf %15, %57 : vector<196x32xf32>
    %cst_24 = arith.constant 0.000000e+00 : f32
    %59 = vector.broadcast %cst_24 : f32 to vector<272x32xf32>
    %c0_25 = arith.constant 0 : index
    %c0_26 = arith.constant 0 : index
    %60 = vector.load %arg25[%c0_25, %c0_26] : memref<272x32xf32, #tpu.memory_space<vmem>>, vector<272x32xf32>
    tpu.vector_store %arg25[%c0_25, %c0_26], %59 {strides = array<i32>} : memref<272x32xf32, #tpu.memory_space<vmem>>, vector<272x32xf32>,
    %61 = vector.extract_strided_slice %58 {offsets = [0, 0], sizes = [14, 32], strides = [1, 1]} : vector<196x32xf32> to vector<14x32xf32>
    %c18 = arith.constant 18 : index
    %c0_27 = arith.constant 0 : index
    %62 = vector.load %arg25[%c18, %c0_27] : memref<272x32xf32, #tpu.memory_space<vmem>>, vector<14x32xf32>
    tpu.vector_store %arg25[%c18, %c0_27], %61 {strides = array<i32>} : memref<272x32xf32, #tpu.memory_space<vmem>>, vector<14x32xf32>,
    %63 = vector.extract_strided_slice %58 {offsets = [14, 0], sizes = [14, 32], strides = [1, 1]} : vector<196x32xf32> to vector<14x32xf32>
    %c35 = arith.constant 35 : index
    %c0_28 = arith.constant 0 : index
    %64 = vector.load %arg25[%c35, %c0_28] : memref<272x32xf32, #tpu.memory_space<vmem>>, vector<14x32xf32>
    tpu.vector_store %arg25[%c35, %c0_28], %63 {strides = array<i32>} : memref<272x32xf32, #tpu.memory_space<vmem>>, vector<14x32xf32>,
    %65 = vector.extract_strided_slice %58 {offsets = [28, 0], sizes = [14, 32], strides = [1, 1]} : vector<196x32xf32> to vector<14x32xf32>
    %c52 = arith.constant 52 : index
    %c0_29 = arith.constant 0 : index
    %66 = vector.load %arg25[%c52, %c0_29] : memref<272x32xf32, #tpu.memory_space<vmem>>, vector<14x32xf32>
    tpu.vector_store %arg25[%c52, %c0_29], %65 {strides = array<i32>} : memref<272x32xf32, #tpu.memory_space<vmem>>, vector<14x32xf32>,
    %67 = vector.extract_strided_slice %58 {offsets = [42, 0], sizes = [14, 32], strides = [1, 1]} : vector<196x32xf32> to vector<14x32xf32>
    %c69 = arith.constant 69 : index
    %c0_30 = arith.constant 0 : index
    %68 = vector.load %arg25[%c69, %c0_30] : memref<272x32xf32, #tpu.memory_space<vmem>>, vector<14x32xf32>
    tpu.vector_store %arg25[%c69, %c0_30], %67 {strides = array<i32>} : memref<272x32xf32, #tpu.memory_space<vmem>>, vector<14x32xf32>,
    %69 = vector.extract_strided_slice %58 {offsets = [56, 0], sizes = [14, 32], strides = [1, 1]} : vector<196x32xf32> to vector<14x32xf32>
    %c86 = arith.constant 86 : index
    %c0_31 = arith.constant 0 : index
    %70 = vector.load %arg25[%c86, %c0_31] : memref<272x32xf32, #tpu.memory_space<vmem>>, vector<14x32xf32>
    tpu.vector_store %arg25[%c86, %c0_31], %69 {strides = array<i32>} : memref<272x32xf32, #tpu.memory_space<vmem>>, vector<14x32xf32>,
    %71 = vector.extract_strided_slice %58 {offsets = [70, 0], sizes = [14, 32], strides = [1, 1]} : vector<196x32xf32> to vector<14x32xf32>
    %c103 = arith.constant 103 : index
    %c0_32 = arith.constant 0 : index
    %72 = vector.load %arg25[%c103, %c0_32] : memref<272x32xf32, #tpu.memory_space<vmem>>, vector<14x32xf32>
    tpu.vector_store %arg25[%c103, %c0_32], %71 {strides = array<i32>} : memref<272x32xf32, #tpu.memory_space<vmem>>, vector<14x32xf32>,
    %73 = vector.extract_strided_slice %58 {offsets = [84, 0], sizes = [14, 32], strides = [1, 1]} : vector<196x32xf32> to vector<14x32xf32>
    %c120 = arith.constant 120 : index
    %c0_33 = arith.constant 0 : index
    %74 = vector.load %arg25[%c120, %c0_33] : memref<272x32xf32, #tpu.memory_space<vmem>>, vector<14x32xf32>
    tpu.vector_store %arg25[%c120, %c0_33], %73 {strides = array<i32>} : memref<272x32xf32, #tpu.memory_space<vmem>>, vector<14x32xf32>,
    %75 = vector.extract_strided_slice %58 {offsets = [98, 0], sizes = [14, 32], strides = [1, 1]} : vector<196x32xf32> to vector<14x32xf32>
    %c137 = arith.constant 137 : index
    %c0_34 = arith.constant 0 : index
    %76 = vector.load %arg25[%c137, %c0_34] : memref<272x32xf32, #tpu.memory_space<vmem>>, vector<14x32xf32>
    tpu.vector_store %arg25[%c137, %c0_34], %75 {strides = array<i32>} : memref<272x32xf32, #tpu.memory_space<vmem>>, vector<14x32xf32>,
    %77 = vector.extract_strided_slice %58 {offsets = [112, 0], sizes = [14, 32], strides = [1, 1]} : vector<196x32xf32> to vector<14x32xf32>
    %c154 = arith.constant 154 : index
    %c0_35 = arith.constant 0 : index
    %78 = vector.load %arg25[%c154, %c0_35] : memref<272x32xf32, #tpu.memory_space<vmem>>, vector<14x32xf32>
    tpu.vector_store %arg25[%c154, %c0_35], %77 {strides = array<i32>} : memref<272x32xf32, #tpu.memory_space<vmem>>, vector<14x32xf32>,
    %79 = vector.extract_strided_slice %58 {offsets = [126, 0], sizes = [14, 32], strides = [1, 1]} : vector<196x32xf32> to vector<14x32xf32>
    %c171 = arith.constant 171 : index
    %c0_36 = arith.constant 0 : index
    %80 = vector.load %arg25[%c171, %c0_36] : memref<272x32xf32, #tpu.memory_space<vmem>>, vector<14x32xf32>
    tpu.vector_store %arg25[%c171, %c0_36], %79 {strides = array<i32>} : memref<272x32xf32, #tpu.memory_space<vmem>>, vector<14x32xf32>,
    %81 = vector.extract_strided_slice %58 {offsets = [140, 0], sizes = [14, 32], strides = [1, 1]} : vector<196x32xf32> to vector<14x32xf32>
    %c188 = arith.constant 188 : index
    %c0_37 = arith.constant 0 : index
    %82 = vector.load %arg25[%c188, %c0_37] : memref<272x32xf32, #tpu.memory_space<vmem>>, vector<14x32xf32>
    tpu.vector_store %arg25[%c188, %c0_37], %81 {strides = array<i32>} : memref<272x32xf32, #tpu.memory_space<vmem>>, vector<14x32xf32>,
    %83 = vector.extract_strided_slice %58 {offsets = [154, 0], sizes = [14, 32], strides = [1, 1]} : vector<196x32xf32> to vector<14x32xf32>
    %c205 = arith.constant 205 : index
    %c0_38 = arith.constant 0 : index
    %84 = vector.load %arg25[%c205, %c0_38] : memref<272x32xf32, #tpu.memory_space<vmem>>, vector<14x32xf32>
    tpu.vector_store %arg25[%c205, %c0_38], %83 {strides = array<i32>} : memref<272x32xf32, #tpu.memory_space<vmem>>, vector<14x32xf32>,
    %85 = vector.extract_strided_slice %58 {offsets = [168, 0], sizes = [14, 32], strides = [1, 1]} : vector<196x32xf32> to vector<14x32xf32>
    %c222 = arith.constant 222 : index
    %c0_39 = arith.constant 0 : index
    %86 = vector.load %arg25[%c222, %c0_39] : memref<272x32xf32, #tpu.memory_space<vmem>>, vector<14x32xf32>
    tpu.vector_store %arg25[%c222, %c0_39], %85 {strides = array<i32>} : memref<272x32xf32, #tpu.memory_space<vmem>>, vector<14x32xf32>,
    %87 = vector.extract_strided_slice %58 {offsets = [182, 0], sizes = [14, 32], strides = [1, 1]} : vector<196x32xf32> to vector<14x32xf32>
    %c239 = arith.constant 239 : index
    %c0_40 = arith.constant 0 : index
    %88 = vector.load %arg25[%c239, %c0_40] : memref<272x32xf32, #tpu.memory_space<vmem>>, vector<14x32xf32>
    tpu.vector_store %arg25[%c239, %c0_40], %87 {strides = array<i32>} : memref<272x32xf32, #tpu.memory_space<vmem>>, vector<14x32xf32>,
    %c0_41 = arith.constant 0 : index
    %c0_42 = arith.constant 0 : index
    %89 = vector.load %arg25[%c0_41, %c0_42] : memref<272x32xf32, #tpu.memory_space<vmem>>, vector<235x32xf32>
    %c0_43 = arith.constant 0 : index
    %c0_44 = arith.constant 0 : index
    %90 = vector.load %arg26[%c0_43, %c0_44] : memref<235x288xf32, #tpu.memory_space<vmem>>, vector<235x32xf32>
    tpu.vector_store %arg26[%c0_43, %c0_44], %89 {strides = array<i32>} : memref<235x288xf32, #tpu.memory_space<vmem>>, vector<235x32xf32>,
    %c1 = arith.constant 1 : index
    %c0_45 = arith.constant 0 : index
    %91 = vector.load %arg25[%c1, %c0_45] : memref<272x32xf32, #tpu.memory_space<vmem>>, vector<235x32xf32>
    %c0_46 = arith.constant 0 : index
    %c32 = arith.constant 32 : index
    %92 = vector.load %arg26[%c0_46, %c32] : memref<235x288xf32, #tpu.memory_space<vmem>>, vector<235x32xf32>
    tpu.vector_store %arg26[%c0_46, %c32], %91 {strides = array<i32>} : memref<235x288xf32, #tpu.memory_space<vmem>>, vector<235x32xf32>,
    %c2 = arith.constant 2 : index
    %c0_47 = arith.constant 0 : index
    %93 = vector.load %arg25[%c2, %c0_47] : memref<272x32xf32, #tpu.memory_space<vmem>>, vector<235x32xf32>
    %c0_48 = arith.constant 0 : index
    %c64 = arith.constant 64 : index
    %94 = vector.load %arg26[%c0_48, %c64] : memref<235x288xf32, #tpu.memory_space<vmem>>, vector<235x32xf32>
    tpu.vector_store %arg26[%c0_48, %c64], %93 {strides = array<i32>} : memref<235x288xf32, #tpu.memory_space<vmem>>, vector<235x32xf32>,
    %c17 = arith.constant 17 : index
    %c0_49 = arith.constant 0 : index
    %95 = vector.load %arg25[%c17, %c0_49] : memref<272x32xf32, #tpu.memory_space<vmem>>, vector<235x32xf32>
    %c0_50 = arith.constant 0 : index
    %c96 = arith.constant 96 : index
    %96 = vector.load %arg26[%c0_50, %c96] : memref<235x288xf32, #tpu.memory_space<vmem>>, vector<235x32xf32>
    tpu.vector_store %arg26[%c0_50, %c96], %95 {strides = array<i32>} : memref<235x288xf32, #tpu.memory_space<vmem>>, vector<235x32xf32>,
    %c18_51 = arith.constant 18 : index
    %c0_52 = arith.constant 0 : index
    %97 = vector.load %arg25[%c18_51, %c0_52] : memref<272x32xf32, #tpu.memory_space<vmem>>, vector<235x32xf32>
    %c0_53 = arith.constant 0 : index
    %c128 = arith.constant 128 : index
    %98 = vector.load %arg26[%c0_53, %c128] : memref<235x288xf32, #tpu.memory_space<vmem>>, vector<235x32xf32>
    tpu.vector_store %arg26[%c0_53, %c128], %97 {strides = array<i32>} : memref<235x288xf32, #tpu.memory_space<vmem>>, vector<235x32xf32>,
    %c19 = arith.constant 19 : index
    %c0_54 = arith.constant 0 : index
    %99 = vector.load %arg25[%c19, %c0_54] : memref<272x32xf32, #tpu.memory_space<vmem>>, vector<235x32xf32>
    %c0_55 = arith.constant 0 : index
    %c160 = arith.constant 160 : index
    %100 = vector.load %arg26[%c0_55, %c160] : memref<235x288xf32, #tpu.memory_space<vmem>>, vector<235x32xf32>
    tpu.vector_store %arg26[%c0_55, %c160], %99 {strides = array<i32>} : memref<235x288xf32, #tpu.memory_space<vmem>>, vector<235x32xf32>,
    %c34 = arith.constant 34 : index
    %c0_56 = arith.constant 0 : index
    %101 = vector.load %arg25[%c34, %c0_56] : memref<272x32xf32, #tpu.memory_space<vmem>>, vector<235x32xf32>
    %c0_57 = arith.constant 0 : index
    %c192 = arith.constant 192 : index
    %102 = vector.load %arg26[%c0_57, %c192] : memref<235x288xf32, #tpu.memory_space<vmem>>, vector<235x32xf32>
    tpu.vector_store %arg26[%c0_57, %c192], %101 {strides = array<i32>} : memref<235x288xf32, #tpu.memory_space<vmem>>, vector<235x32xf32>,
    %c35_58 = arith.constant 35 : index
    %c0_59 = arith.constant 0 : index
    %103 = vector.load %arg25[%c35_58, %c0_59] : memref<272x32xf32, #tpu.memory_space<vmem>>, vector<235x32xf32>
    %c0_60 = arith.constant 0 : index
    %c224 = arith.constant 224 : index
    %104 = vector.load %arg26[%c0_60, %c224] : memref<235x288xf32, #tpu.memory_space<vmem>>, vector<235x32xf32>
    tpu.vector_store %arg26[%c0_60, %c224], %103 {strides = array<i32>} : memref<235x288xf32, #tpu.memory_space<vmem>>, vector<235x32xf32>,
    %c36 = arith.constant 36 : index
    %c0_61 = arith.constant 0 : index
    %105 = vector.load %arg25[%c36, %c0_61] : memref<272x32xf32, #tpu.memory_space<vmem>>, vector<235x32xf32>
    %c0_62 = arith.constant 0 : index
    %c256 = arith.constant 256 : index
    %106 = vector.load %arg26[%c0_62, %c256] : memref<235x288xf32, #tpu.memory_space<vmem>>, vector<235x32xf32>
    tpu.vector_store %arg26[%c0_62, %c256], %105 {strides = array<i32>} : memref<235x288xf32, #tpu.memory_space<vmem>>, vector<235x32xf32>,
    %c0_63 = arith.constant 0 : index
    %c0_64 = arith.constant 0 : index
    %107 = vector.load %arg26[%c0_63, %c0_64] : memref<235x288xf32, #tpu.memory_space<vmem>>, vector<235x288xf32>
    %108 = arith.truncf %107 : vector<235x288xf32> to vector<235x288xbf16>
    %c0_65 = arith.constant 0 : index
    %c0_66 = arith.constant 0 : index
    %109 = vector.load %arg9[%c0_65, %c0_66] : memref<288x64xbf16, #tpu.memory_space<vmem>>, vector<288x64xbf16>
    %cst_67 = arith.constant dense<0.000000e+00> : vector<235x64xf32>
    %110 = tpu.matmul %108, %109, %cst_67 {dimension_numbers = #tpu.dot_dimension_numbers<[1], [0], [0], [1], [0, 0, 1, 1], [], []>} : vector<235x288xbf16>, vector<288x64xbf16>, vector<235x64xf32> -> vector<235x64xf32>
    %c0_68 = arith.constant 0 : index
    %c0_69 = arith.constant 0 : index
    %111 = vector.load %arg10[%c0_68, %c0_69] : memref<1x64xf32, #tpu.memory_space<vmem>>, vector<1x64xf32>
    %112 = vector.broadcast %111 : vector<1x64xf32> to vector<235x64xf32>
    %113 = arith.addf %110, %112 : vector<235x64xf32>
    %cst_70 = arith.constant 0.000000e+00 : f32
    %114 = vector.broadcast %cst_70 : f32 to vector<235x64xf32>
    %115 = arith.maximumf %113, %114 : vector<235x64xf32>
    %116 = vector.extract_strided_slice %115 {offsets = [0, 0], sizes = [217, 64], strides = [1, 1]} : vector<235x64xf32> to vector<217x64xf32>
    %117 = vector.extract_strided_slice %115 {offsets = [1, 0], sizes = [217, 64], strides = [1, 1]} : vector<235x64xf32> to vector<217x64xf32>
    %118 = arith.maximumf %116, %117 : vector<217x64xf32>
    %119 = vector.extract_strided_slice %115 {offsets = [17, 0], sizes = [217, 64], strides = [1, 1]} : vector<235x64xf32> to vector<217x64xf32>
    %120 = vector.extract_strided_slice %115 {offsets = [18, 0], sizes = [217, 64], strides = [1, 1]} : vector<235x64xf32> to vector<217x64xf32>
    %121 = arith.maximumf %119, %120 : vector<217x64xf32>
    %122 = arith.maximumf %118, %121 : vector<217x64xf32>
    %c0_71 = arith.constant 0 : index
    %c0_72 = arith.constant 0 : index
    %123 = vector.load %arg11[%c0_71, %c0_72] : memref<49x217xbf16, #tpu.memory_space<vmem>>, vector<49x217xbf16>
    %124 = arith.truncf %122 : vector<217x64xf32> to vector<217x64xbf16>
    %cst_73 = arith.constant dense<0.000000e+00> : vector<49x64xf32>
    %125 = tpu.matmul %123, %124, %cst_73 {dimension_numbers = #tpu.dot_dimension_numbers<[1], [0], [0], [1], [0, 0, 1, 1], [], []>} : vector<49x217xbf16>, vector<217x64xbf16>, vector<49x64xf32> -> vector<49x64xf32>
    %126 = arith.truncf %125 : vector<49x64xf32> to vector<49x64xbf16>
    %c0_74 = arith.constant 0 : index
    %c0_75 = arith.constant 0 : index
    %127 = vector.load %arg12[%c0_74, %c0_75] : memref<64x96xbf16, #tpu.memory_space<vmem>>, vector<64x96xbf16>
    %cst_76 = arith.constant dense<0.000000e+00> : vector<49x96xf32>
    %128 = tpu.matmul %126, %127, %cst_76 {dimension_numbers = #tpu.dot_dimension_numbers<[1], [0], [0], [1], [0, 0, 1, 1], [], []>} : vector<49x64xbf16>, vector<64x96xbf16>, vector<49x96xf32> -> vector<49x96xf32>
    %c0_77 = arith.constant 0 : index
    %c0_78 = arith.constant 0 : index
    %129 = vector.load %arg13[%c0_77, %c0_78] : memref<1x96xf32, #tpu.memory_space<vmem>>, vector<1x96xf32>
    %130 = vector.broadcast %129 : vector<1x96xf32> to vector<49x96xf32>
    %131 = arith.addf %128, %130 : vector<49x96xf32>
    %132 = vector.extract_strided_slice %131 {offsets = [0, 0], sizes = [49, 64], strides = [1, 1]} : vector<49x96xf32> to vector<49x64xf32>
    %133 = vector.extract_strided_slice %131 {offsets = [0, 64], sizes = [49, 32], strides = [1, 1]} : vector<49x96xf32> to vector<49x32xf32>
    %134 = vector.extract_strided_slice %132 {offsets = [0, 0], sizes = [41, 64], strides = [1, 1]} : vector<49x64xf32> to vector<41x64xf32>
    %135 = vector.extract_strided_slice %132 {offsets = [1, 0], sizes = [41, 64], strides = [1, 1]} : vector<49x64xf32> to vector<41x64xf32>
    %136 = arith.maximumf %134, %135 : vector<41x64xf32>
    %137 = vector.extract_strided_slice %132 {offsets = [7, 0], sizes = [41, 64], strides = [1, 1]} : vector<49x64xf32> to vector<41x64xf32>
    %138 = vector.extract_strided_slice %132 {offsets = [8, 0], sizes = [41, 64], strides = [1, 1]} : vector<49x64xf32> to vector<41x64xf32>
    %139 = arith.maximumf %137, %138 : vector<41x64xf32>
    %140 = arith.maximumf %136, %139 : vector<41x64xf32>
    %c0_79 = arith.constant 0 : index
    %c0_80 = arith.constant 0 : index
    %141 = vector.load %arg16[%c0_79, %c0_80] : memref<9x41xbf16, #tpu.memory_space<vmem>>, vector<9x41xbf16>
    %142 = arith.truncf %140 : vector<41x64xf32> to vector<41x64xbf16>
    %cst_81 = arith.constant dense<0.000000e+00> : vector<9x64xf32>
    %143 = tpu.matmul %141, %142, %cst_81 {dimension_numbers = #tpu.dot_dimension_numbers<[1], [0], [0], [1], [0, 0, 1, 1], [], []>} : vector<9x41xbf16>, vector<41x64xbf16>, vector<9x64xf32> -> vector<9x64xf32>
    %144 = vector.extract_strided_slice %143 {offsets = [0, 0], sizes = [9, 32], strides = [1, 1]} : vector<9x64xf32> to vector<9x32xf32>
    %145 = vector.extract_strided_slice %143 {offsets = [0, 32], sizes = [9, 32], strides = [1, 1]} : vector<9x64xf32> to vector<9x32xf32>
    %146 = arith.truncf %133 : vector<49x32xf32> to vector<49x32xbf16>
    %147 = arith.truncf %144 : vector<9x32xf32> to vector<9x32xbf16>
    %cst_82 = arith.constant dense<0.000000e+00> : vector<49x9xf32>
    %148 = tpu.matmul %146, %147, %cst_82 {dimension_numbers = #tpu.dot_dimension_numbers<[1], [1], [0], [0], [0, 0, 1, 0], [], []>} : vector<49x32xbf16>, vector<9x32xbf16>, vector<49x9xf32> -> vector<49x9xf32>
    %cst_83 = arith.constant dense<0xFF800000> : vector<49xf32>
    %149 = vector.multi_reduction <maximumf>, %148, %cst_83 [1] : vector<49x9xf32> to vector<49xf32>
    %150 = vector.shape_cast %149 : vector<49xf32> to vector<49x1xf32>
    %151 = vector.broadcast %150 : vector<49x1xf32> to vector<49x9xf32>
    %152 = arith.subf %148, %151 : vector<49x9xf32>
    %153 = math.exp %152 : vector<49x9xf32>
    %cst_84 = arith.constant dense<0.000000e+00> : vector<49xf32>
    %154 = vector.multi_reduction <add>, %153, %cst_84 [1] : vector<49x9xf32> to vector<49xf32>
    %155 = vector.shape_cast %154 : vector<49xf32> to vector<49x1xf32>
    %156 = tpu.reciprocal %155 {approx = true} : vector<49x1xf32> -> vector<49x1xf32>
    %157 = vector.broadcast %156 : vector<49x1xf32> to vector<49x9xf32>
    %158 = arith.mulf %153, %157 : vector<49x9xf32>
    %159 = arith.truncf %158 : vector<49x9xf32> to vector<49x9xbf16>
    %160 = arith.truncf %145 : vector<9x32xf32> to vector<9x32xbf16>
    %cst_85 = arith.constant dense<0.000000e+00> : vector<49x32xf32>
    %161 = tpu.matmul %159, %160, %cst_85 {dimension_numbers = #tpu.dot_dimension_numbers<[1], [0], [0], [1], [0, 0, 1, 1], [], []>} : vector<49x9xbf16>, vector<9x32xbf16>, vector<49x32xf32> -> vector<49x32xf32>
    %162 = arith.truncf %161 : vector<49x32xf32> to vector<49x32xbf16>
    %c0_86 = arith.constant 0 : index
    %c0_87 = arith.constant 0 : index
    %163 = vector.load %arg14[%c0_86, %c0_87] : memref<32x64xbf16, #tpu.memory_space<vmem>>, vector<32x64xbf16>
    %cst_88 = arith.constant dense<0.000000e+00> : vector<49x64xf32>
    %164 = tpu.matmul %162, %163, %cst_88 {dimension_numbers = #tpu.dot_dimension_numbers<[1], [0], [0], [1], [0, 0, 1, 1], [], []>} : vector<49x32xbf16>, vector<32x64xbf16>, vector<49x64xf32> -> vector<49x64xf32>
    %c0_89 = arith.constant 0 : index
    %c0_90 = arith.constant 0 : index
    %165 = vector.load %arg15[%c0_89, %c0_90] : memref<1x64xf32, #tpu.memory_space<vmem>>, vector<1x64xf32>
    %166 = vector.broadcast %165 : vector<1x64xf32> to vector<49x64xf32>
    %167 = arith.addf %164, %166 : vector<49x64xf32>
    %168 = arith.addf %125, %167 : vector<49x64xf32>
    %cst_91 = arith.constant 0.000000e+00 : f32
    %169 = vector.broadcast %cst_91 : f32 to vector<80x64xf32>
    %c0_92 = arith.constant 0 : index
    %c0_93 = arith.constant 0 : index
    %170 = vector.load %arg27[%c0_92, %c0_93] : memref<80x64xf32, #tpu.memory_space<vmem>>, vector<80x64xf32>
    tpu.vector_store %arg27[%c0_92, %c0_93], %169 {strides = array<i32>} : memref<80x64xf32, #tpu.memory_space<vmem>>, vector<80x64xf32>,
    %171 = vector.extract_strided_slice %168 {offsets = [0, 0], sizes = [7, 64], strides = [1, 1]} : vector<49x64xf32> to vector<7x64xf32>
    %c11 = arith.constant 11 : index
    %c0_94 = arith.constant 0 : index
    %172 = vector.load %arg27[%c11, %c0_94] : memref<80x64xf32, #tpu.memory_space<vmem>>, vector<7x64xf32>
    tpu.vector_store %arg27[%c11, %c0_94], %171 {strides = array<i32>} : memref<80x64xf32, #tpu.memory_space<vmem>>, vector<7x64xf32>,
    %173 = vector.extract_strided_slice %168 {offsets = [7, 0], sizes = [7, 64], strides = [1, 1]} : vector<49x64xf32> to vector<7x64xf32>
    %c21 = arith.constant 21 : index
    %c0_95 = arith.constant 0 : index
    %174 = vector.load %arg27[%c21, %c0_95] : memref<80x64xf32, #tpu.memory_space<vmem>>, vector<7x64xf32>
    tpu.vector_store %arg27[%c21, %c0_95], %173 {strides = array<i32>} : memref<80x64xf32, #tpu.memory_space<vmem>>, vector<7x64xf32>,
    %175 = vector.extract_strided_slice %168 {offsets = [14, 0], sizes = [7, 64], strides = [1, 1]} : vector<49x64xf32> to vector<7x64xf32>
    %c31 = arith.constant 31 : index
    %c0_96 = arith.constant 0 : index
    %176 = vector.load %arg27[%c31, %c0_96] : memref<80x64xf32, #tpu.memory_space<vmem>>, vector<7x64xf32>
    tpu.vector_store %arg27[%c31, %c0_96], %175 {strides = array<i32>} : memref<80x64xf32, #tpu.memory_space<vmem>>, vector<7x64xf32>,
    %177 = vector.extract_strided_slice %168 {offsets = [21, 0], sizes = [7, 64], strides = [1, 1]} : vector<49x64xf32> to vector<7x64xf32>
    %c41 = arith.constant 41 : index
    %c0_97 = arith.constant 0 : index
    %178 = vector.load %arg27[%c41, %c0_97] : memref<80x64xf32, #tpu.memory_space<vmem>>, vector<7x64xf32>
    tpu.vector_store %arg27[%c41, %c0_97], %177 {strides = array<i32>} : memref<80x64xf32, #tpu.memory_space<vmem>>, vector<7x64xf32>,
    %179 = vector.extract_strided_slice %168 {offsets = [28, 0], sizes = [7, 64], strides = [1, 1]} : vector<49x64xf32> to vector<7x64xf32>
    %c51 = arith.constant 51 : index
    %c0_98 = arith.constant 0 : index
    %180 = vector.load %arg27[%c51, %c0_98] : memref<80x64xf32, #tpu.memory_space<vmem>>, vector<7x64xf32>
    tpu.vector_store %arg27[%c51, %c0_98], %179 {strides = array<i32>} : memref<80x64xf32, #tpu.memory_space<vmem>>, vector<7x64xf32>,
    %181 = vector.extract_strided_slice %168 {offsets = [35, 0], sizes = [7, 64], strides = [1, 1]} : vector<49x64xf32> to vector<7x64xf32>
    %c61 = arith.constant 61 : index
    %c0_99 = arith.constant 0 : index
    %182 = vector.load %arg27[%c61, %c0_99] : memref<80x64xf32, #tpu.memory_space<vmem>>, vector<7x64xf32>
    tpu.vector_store %arg27[%c61, %c0_99], %181 {strides = array<i32>} : memref<80x64xf32, #tpu.memory_space<vmem>>, vector<7x64xf32>,
    %183 = vector.extract_strided_slice %168 {offsets = [42, 0], sizes = [7, 64], strides = [1, 1]} : vector<49x64xf32> to vector<7x64xf32>
    %c71 = arith.constant 71 : index
    %c0_100 = arith.constant 0 : index
    %184 = vector.load %arg27[%c71, %c0_100] : memref<80x64xf32, #tpu.memory_space<vmem>>, vector<7x64xf32>
    tpu.vector_store %arg27[%c71, %c0_100], %183 {strides = array<i32>} : memref<80x64xf32, #tpu.memory_space<vmem>>, vector<7x64xf32>,
    %c0_101 = arith.constant 0 : index
    %c0_102 = arith.constant 0 : index
    %185 = vector.load %arg27[%c0_101, %c0_102] : memref<80x64xf32, #tpu.memory_space<vmem>>, vector<56x64xf32>
    %c0_103 = arith.constant 0 : index
    %c0_104 = arith.constant 0 : index
    %186 = vector.load %arg28[%c0_103, %c0_104] : memref<56x576xf32, #tpu.memory_space<vmem>>, vector<56x64xf32>
    tpu.vector_store %arg28[%c0_103, %c0_104], %185 {strides = array<i32>} : memref<56x576xf32, #tpu.memory_space<vmem>>, vector<56x64xf32>,
    %c1_105 = arith.constant 1 : index
    %c0_106 = arith.constant 0 : index
    %187 = vector.load %arg27[%c1_105, %c0_106] : memref<80x64xf32, #tpu.memory_space<vmem>>, vector<56x64xf32>
    %c0_107 = arith.constant 0 : index
    %c64_108 = arith.constant 64 : index
    %188 = vector.load %arg28[%c0_107, %c64_108] : memref<56x576xf32, #tpu.memory_space<vmem>>, vector<56x64xf32>
    tpu.vector_store %arg28[%c0_107, %c64_108], %187 {strides = array<i32>} : memref<56x576xf32, #tpu.memory_space<vmem>>, vector<56x64xf32>,
    %c2_109 = arith.constant 2 : index
    %c0_110 = arith.constant 0 : index
    %189 = vector.load %arg27[%c2_109, %c0_110] : memref<80x64xf32, #tpu.memory_space<vmem>>, vector<56x64xf32>
    %c0_111 = arith.constant 0 : index
    %c128_112 = arith.constant 128 : index
    %190 = vector.load %arg28[%c0_111, %c128_112] : memref<56x576xf32, #tpu.memory_space<vmem>>, vector<56x64xf32>
    tpu.vector_store %arg28[%c0_111, %c128_112], %189 {strides = array<i32>} : memref<56x576xf32, #tpu.memory_space<vmem>>, vector<56x64xf32>,
    %c10 = arith.constant 10 : index
    %c0_113 = arith.constant 0 : index
    %191 = vector.load %arg27[%c10, %c0_113] : memref<80x64xf32, #tpu.memory_space<vmem>>, vector<56x64xf32>
    %c0_114 = arith.constant 0 : index
    %c192_115 = arith.constant 192 : index
    %192 = vector.load %arg28[%c0_114, %c192_115] : memref<56x576xf32, #tpu.memory_space<vmem>>, vector<56x64xf32>
    tpu.vector_store %arg28[%c0_114, %c192_115], %191 {strides = array<i32>} : memref<56x576xf32, #tpu.memory_space<vmem>>, vector<56x64xf32>,
    %c11_116 = arith.constant 11 : index
    %c0_117 = arith.constant 0 : index
    %193 = vector.load %arg27[%c11_116, %c0_117] : memref<80x64xf32, #tpu.memory_space<vmem>>, vector<56x64xf32>
    %c0_118 = arith.constant 0 : index
    %c256_119 = arith.constant 256 : index
    %194 = vector.load %arg28[%c0_118, %c256_119] : memref<56x576xf32, #tpu.memory_space<vmem>>, vector<56x64xf32>
    tpu.vector_store %arg28[%c0_118, %c256_119], %193 {strides = array<i32>} : memref<56x576xf32, #tpu.memory_space<vmem>>, vector<56x64xf32>,
    %c12 = arith.constant 12 : index
    %c0_120 = arith.constant 0 : index
    %195 = vector.load %arg27[%c12, %c0_120] : memref<80x64xf32, #tpu.memory_space<vmem>>, vector<56x64xf32>
    %c0_121 = arith.constant 0 : index
    %c320 = arith.constant 320 : index
    %196 = vector.load %arg28[%c0_121, %c320] : memref<56x576xf32, #tpu.memory_space<vmem>>, vector<56x64xf32>
    tpu.vector_store %arg28[%c0_121, %c320], %195 {strides = array<i32>} : memref<56x576xf32, #tpu.memory_space<vmem>>, vector<56x64xf32>,
    %c20 = arith.constant 20 : index
    %c0_122 = arith.constant 0 : index
    %197 = vector.load %arg27[%c20, %c0_122] : memref<80x64xf32, #tpu.memory_space<vmem>>, vector<56x64xf32>
    %c0_123 = arith.constant 0 : index
    %c384 = arith.constant 384 : index
    %198 = vector.load %arg28[%c0_123, %c384] : memref<56x576xf32, #tpu.memory_space<vmem>>, vector<56x64xf32>
    tpu.vector_store %arg28[%c0_123, %c384], %197 {strides = array<i32>} : memref<56x576xf32, #tpu.memory_space<vmem>>, vector<56x64xf32>,
    %c21_124 = arith.constant 21 : index
    %c0_125 = arith.constant 0 : index
    %199 = vector.load %arg27[%c21_124, %c0_125] : memref<80x64xf32, #tpu.memory_space<vmem>>, vector<56x64xf32>
    %c0_126 = arith.constant 0 : index
    %c448 = arith.constant 448 : index
    %200 = vector.load %arg28[%c0_126, %c448] : memref<56x576xf32, #tpu.memory_space<vmem>>, vector<56x64xf32>
    tpu.vector_store %arg28[%c0_126, %c448], %199 {strides = array<i32>} : memref<56x576xf32, #tpu.memory_space<vmem>>, vector<56x64xf32>,
    %c22 = arith.constant 22 : index
    %c0_127 = arith.constant 0 : index
    %201 = vector.load %arg27[%c22, %c0_127] : memref<80x64xf32, #tpu.memory_space<vmem>>, vector<56x64xf32>
    %c0_128 = arith.constant 0 : index
    %c512 = arith.constant 512 : index
    %202 = vector.load %arg28[%c0_128, %c512] : memref<56x576xf32, #tpu.memory_space<vmem>>, vector<56x64xf32>
    tpu.vector_store %arg28[%c0_128, %c512], %201 {strides = array<i32>} : memref<56x576xf32, #tpu.memory_space<vmem>>, vector<56x64xf32>,
    %c0_129 = arith.constant 0 : index
    %c0_130 = arith.constant 0 : index
    %203 = vector.load %arg28[%c0_129, %c0_130] : memref<56x576xf32, #tpu.memory_space<vmem>>, vector<56x576xf32>
    %204 = arith.truncf %203 : vector<56x576xf32> to vector<56x576xbf16>
    %c0_131 = arith.constant 0 : index
    %c0_132 = arith.constant 0 : index
    %205 = vector.load %arg17[%c0_131, %c0_132] : memref<576x128xbf16, #tpu.memory_space<vmem>>, vector<576x128xbf16>
    %cst_133 = arith.constant dense<0.000000e+00> : vector<56x128xf32>
    %206 = tpu.matmul %204, %205, %cst_133 {dimension_numbers = #tpu.dot_dimension_numbers<[1], [0], [0], [1], [0, 0, 1, 1], [], []>} : vector<56x576xbf16>, vector<576x128xbf16>, vector<56x128xf32> -> vector<56x128xf32>
    %c0_134 = arith.constant 0 : index
    %c0_135 = arith.constant 0 : index
    %207 = vector.load %arg18[%c0_134, %c0_135] : memref<1x128xf32, #tpu.memory_space<vmem>>, vector<1x128xf32>
    %208 = vector.broadcast %207 : vector<1x128xf32> to vector<56x128xf32>
    %209 = arith.addf %206, %208 : vector<56x128xf32>
    %cst_136 = arith.constant 0.000000e+00 : f32
    %210 = vector.broadcast %cst_136 : f32 to vector<56x128xf32>
    %211 = arith.maximumf %209, %210 : vector<56x128xf32>
    %212 = vector.extract_strided_slice %211 {offsets = [0, 0], sizes = [45, 128], strides = [1, 1]} : vector<56x128xf32> to vector<45x128xf32>
    %213 = vector.extract_strided_slice %211 {offsets = [1, 0], sizes = [45, 128], strides = [1, 1]} : vector<56x128xf32> to vector<45x128xf32>
    %214 = arith.maximumf %212, %213 : vector<45x128xf32>
    %215 = vector.extract_strided_slice %211 {offsets = [10, 0], sizes = [45, 128], strides = [1, 1]} : vector<56x128xf32> to vector<45x128xf32>
    %216 = vector.extract_strided_slice %211 {offsets = [11, 0], sizes = [45, 128], strides = [1, 1]} : vector<56x128xf32> to vector<45x128xf32>
    %217 = arith.maximumf %215, %216 : vector<45x128xf32>
    %218 = arith.maximumf %214, %217 : vector<45x128xf32>
    %c0_137 = arith.constant 0 : index
    %c0_138 = arith.constant 0 : index
    %219 = vector.load %arg19[%c0_137, %c0_138] : memref<9x45xbf16, #tpu.memory_space<vmem>>, vector<9x45xbf16>
    %220 = arith.truncf %218 : vector<45x128xf32> to vector<45x128xbf16>
    %cst_139 = arith.constant dense<0.000000e+00> : vector<9x128xf32>
    %221 = tpu.matmul %219, %220, %cst_139 {dimension_numbers = #tpu.dot_dimension_numbers<[1], [0], [0], [1], [0, 0, 1, 1], [], []>} : vector<9x45xbf16>, vector<45x128xbf16>, vector<9x128xf32> -> vector<9x128xf32>
    %222 = vector.extract_strided_slice %221 {offsets = [0, 0], sizes = [1, 128], strides = [1, 1]} : vector<9x128xf32> to vector<1x128xf32>
    %c0_140 = arith.constant 0 : index
    %c0_141 = arith.constant 0 : index
    %223 = vector.load %arg29[%c0_140, %c0_141] : memref<1x1152xf32, #tpu.memory_space<vmem>>, vector<1x128xf32>
    tpu.vector_store %arg29[%c0_140, %c0_141], %222 {strides = array<i32>} : memref<1x1152xf32, #tpu.memory_space<vmem>>, vector<1x128xf32>,
    %224 = vector.extract_strided_slice %221 {offsets = [1, 0], sizes = [1, 128], strides = [1, 1]} : vector<9x128xf32> to vector<1x128xf32>
    %c0_142 = arith.constant 0 : index
    %c128_143 = arith.constant 128 : index
    %225 = vector.load %arg29[%c0_142, %c128_143] : memref<1x1152xf32, #tpu.memory_space<vmem>>, vector<1x128xf32>
    tpu.vector_store %arg29[%c0_142, %c128_143], %224 {strides = array<i32>} : memref<1x1152xf32, #tpu.memory_space<vmem>>, vector<1x128xf32>,
    %226 = vector.extract_strided_slice %221 {offsets = [2, 0], sizes = [1, 128], strides = [1, 1]} : vector<9x128xf32> to vector<1x128xf32>
    %c0_144 = arith.constant 0 : index
    %c256_145 = arith.constant 256 : index
    %227 = vector.load %arg29[%c0_144, %c256_145] : memref<1x1152xf32, #tpu.memory_space<vmem>>, vector<1x128xf32>
    tpu.vector_store %arg29[%c0_144, %c256_145], %226 {strides = array<i32>} : memref<1x1152xf32, #tpu.memory_space<vmem>>, vector<1x128xf32>,
    %228 = vector.extract_strided_slice %221 {offsets = [3, 0], sizes = [1, 128], strides = [1, 1]} : vector<9x128xf32> to vector<1x128xf32>
    %c0_146 = arith.constant 0 : index
    %c384_147 = arith.constant 384 : index
    %229 = vector.load %arg29[%c0_146, %c384_147] : memref<1x1152xf32, #tpu.memory_space<vmem>>, vector<1x128xf32>
    tpu.vector_store %arg29[%c0_146, %c384_147], %228 {strides = array<i32>} : memref<1x1152xf32, #tpu.memory_space<vmem>>, vector<1x128xf32>,
    %230 = vector.extract_strided_slice %221 {offsets = [4, 0], sizes = [1, 128], strides = [1, 1]} : vector<9x128xf32> to vector<1x128xf32>
    %c0_148 = arith.constant 0 : index
    %c512_149 = arith.constant 512 : index
    %231 = vector.load %arg29[%c0_148, %c512_149] : memref<1x1152xf32, #tpu.memory_space<vmem>>, vector<1x128xf32>
    tpu.vector_store %arg29[%c0_148, %c512_149], %230 {strides = array<i32>} : memref<1x1152xf32, #tpu.memory_space<vmem>>, vector<1x128xf32>,
    %232 = vector.extract_strided_slice %221 {offsets = [5, 0], sizes = [1, 128], strides = [1, 1]} : vector<9x128xf32> to vector<1x128xf32>
    %c0_150 = arith.constant 0 : index
    %c640 = arith.constant 640 : index
    %233 = vector.load %arg29[%c0_150, %c640] : memref<1x1152xf32, #tpu.memory_space<vmem>>, vector<1x128xf32>
    tpu.vector_store %arg29[%c0_150, %c640], %232 {strides = array<i32>} : memref<1x1152xf32, #tpu.memory_space<vmem>>, vector<1x128xf32>,
    %234 = vector.extract_strided_slice %221 {offsets = [6, 0], sizes = [1, 128], strides = [1, 1]} : vector<9x128xf32> to vector<1x128xf32>
    %c0_151 = arith.constant 0 : index
    %c768 = arith.constant 768 : index
    %235 = vector.load %arg29[%c0_151, %c768] : memref<1x1152xf32, #tpu.memory_space<vmem>>, vector<1x128xf32>
    tpu.vector_store %arg29[%c0_151, %c768], %234 {strides = array<i32>} : memref<1x1152xf32, #tpu.memory_space<vmem>>, vector<1x128xf32>,
    %236 = vector.extract_strided_slice %221 {offsets = [7, 0], sizes = [1, 128], strides = [1, 1]} : vector<9x128xf32> to vector<1x128xf32>
    %c0_152 = arith.constant 0 : index
    %c896 = arith.constant 896 : index
    %237 = vector.load %arg29[%c0_152, %c896] : memref<1x1152xf32, #tpu.memory_space<vmem>>, vector<1x128xf32>
    tpu.vector_store %arg29[%c0_152, %c896], %236 {strides = array<i32>} : memref<1x1152xf32, #tpu.memory_space<vmem>>, vector<1x128xf32>,
    %238 = vector.extract_strided_slice %221 {offsets = [8, 0], sizes = [1, 128], strides = [1, 1]} : vector<9x128xf32> to vector<1x128xf32>
    %c0_153 = arith.constant 0 : index
    %c1024 = arith.constant 1024 : index
    %239 = vector.load %arg29[%c0_153, %c1024] : memref<1x1152xf32, #tpu.memory_space<vmem>>, vector<1x128xf32>
    tpu.vector_store %arg29[%c0_153, %c1024], %238 {strides = array<i32>} : memref<1x1152xf32, #tpu.memory_space<vmem>>, vector<1x128xf32>,
    %c0_154 = arith.constant 0 : index
    %c0_155 = arith.constant 0 : index
    %240 = vector.load %arg29[%c0_154, %c0_155] : memref<1x1152xf32, #tpu.memory_space<vmem>>, vector<1x1152xf32>
    %241 = arith.truncf %240 : vector<1x1152xf32> to vector<1x1152xbf16>
    %c0_156 = arith.constant 0 : index
    %c0_157 = arith.constant 0 : index
    %242 = vector.load %arg20[%c0_156, %c0_157] : memref<1152x256xbf16, #tpu.memory_space<vmem>>, vector<1152x256xbf16>
    %cst_158 = arith.constant dense<0.000000e+00> : vector<1x256xf32>
    %243 = tpu.matmul %241, %242, %cst_158 {dimension_numbers = #tpu.dot_dimension_numbers<[1], [0], [0], [1], [0, 0, 1, 1], [], []>} : vector<1x1152xbf16>, vector<1152x256xbf16>, vector<1x256xf32> -> vector<1x256xf32>
    %c0_159 = arith.constant 0 : index
    %c0_160 = arith.constant 0 : index
    %244 = vector.load %arg21[%c0_159, %c0_160] : memref<1x256xf32, #tpu.memory_space<vmem>>, vector<1x256xf32>
    %245 = arith.addf %243, %244 : vector<1x256xf32>
    %cst_161 = arith.constant 0.000000e+00 : f32
    %246 = vector.broadcast %cst_161 : f32 to vector<1x256xf32>
    %247 = arith.maximumf %245, %246 : vector<1x256xf32>
    %248 = arith.truncf %247 : vector<1x256xf32> to vector<1x256xbf16>
    %c0_162 = arith.constant 0 : index
    %c0_163 = arith.constant 0 : index
    %249 = vector.load %arg22[%c0_162, %c0_163] : memref<256x128xbf16, #tpu.memory_space<vmem>>, vector<256x128xbf16>
    %cst_164 = arith.constant dense<0.000000e+00> : vector<1x128xf32>
    %250 = tpu.matmul %248, %249, %cst_164 {dimension_numbers = #tpu.dot_dimension_numbers<[1], [0], [0], [1], [0, 0, 1, 1], [], []>} : vector<1x256xbf16>, vector<256x128xbf16>, vector<1x128xf32> -> vector<1x128xf32>
    %c0_165 = arith.constant 0 : index
    %c0_166 = arith.constant 0 : index
    %251 = vector.load %arg23[%c0_165, %c0_166] : memref<1x128xf32, #tpu.memory_space<vmem>>, vector<1x128xf32>
    %252 = arith.addf %250, %251 : vector<1x128xf32>
    %c0_167 = arith.constant 0 : index
    %c0_168 = arith.constant 0 : index
    %c0_169 = arith.constant 0 : index
    %253 = vector.load %arg24[%c0_167, %c0_168, %c0_169] : memref<1x1x128xf32, #tpu.memory_space<vmem>>, vector<1x1x128xf32>
    %254 = vector.shape_cast %253 : vector<1x1x128xf32> to vector<1x128xf32>
    %255 = vector.shape_cast %252 : vector<1x128xf32> to vector<1x1x128xf32>
    tpu.vector_store %arg24[%c0_167, %c0_168, %c0_169], %255 {strides = array<i32>} : memref<1x1x128xf32, #tpu.memory_space<vmem>>, vector<1x1x128xf32>,
    return
  }
  func.func @transform_0(%arg0: i32) -> (i32, i32, i32) {
    %c0_i32 = arith.constant 0 : i32
    %c0_i32_0 = arith.constant 0 : i32
    %c0_i32_1 = arith.constant 0 : i32
    return %arg0, %c0_i32, %c0_i32_0 : i32, i32, i32
  }
  func.func @transform_1(%arg0: i32) -> (i32, i32) {
    %c0_i32 = arith.constant 0 : i32
    %c0_i32_0 = arith.constant 0 : i32
    %c0_i32_1 = arith.constant 0 : i32
    return %c0_i32, %c0_i32_0 : i32, i32
  }
  func.func @transform_2(%arg0: i32) -> (i32, i32) {
    %c0_i32 = arith.constant 0 : i32
    %c0_i32_0 = arith.constant 0 : i32
    %c0_i32_1 = arith.constant 0 : i32
    return %c0_i32, %c0_i32_0 : i32, i32
  }
  func.func @transform_3(%arg0: i32) -> (i32, i32) {
    %c0_i32 = arith.constant 0 : i32
    %c0_i32_0 = arith.constant 0 : i32
    %c0_i32_1 = arith.constant 0 : i32
    return %c0_i32, %c0_i32_0 : i32, i32
  }
  func.func @transform_4(%arg0: i32) -> (i32, i32) {
    %c0_i32 = arith.constant 0 : i32
    %c0_i32_0 = arith.constant 0 : i32
    %c0_i32_1 = arith.constant 0 : i32
    return %c0_i32, %c0_i32_0 : i32, i32
  }
  func.func @transform_5(%arg0: i32) -> (i32, i32) {
    %c0_i32 = arith.constant 0 : i32
    %c0_i32_0 = arith.constant 0 : i32
    %c0_i32_1 = arith.constant 0 : i32
    return %c0_i32, %c0_i32_0 : i32, i32
  }
  func.func @transform_6(%arg0: i32) -> (i32, i32) {
    %c0_i32 = arith.constant 0 : i32
    %c0_i32_0 = arith.constant 0 : i32
    %c0_i32_1 = arith.constant 0 : i32
    return %c0_i32, %c0_i32_0 : i32, i32
  }
  func.func @transform_7(%arg0: i32) -> (i32, i32) {
    %c0_i32 = arith.constant 0 : i32
    %c0_i32_0 = arith.constant 0 : i32
    %c0_i32_1 = arith.constant 0 : i32
    return %c0_i32, %c0_i32_0 : i32, i32
  }
  func.func @transform_8(%arg0: i32) -> (i32, i32) {
    %c0_i32 = arith.constant 0 : i32
    %c0_i32_0 = arith.constant 0 : i32
    %c0_i32_1 = arith.constant 0 : i32
    return %c0_i32, %c0_i32_0 : i32, i32
  }
  func.func @transform_9(%arg0: i32) -> (i32, i32) {
    %c0_i32 = arith.constant 0 : i32
    %c0_i32_0 = arith.constant 0 : i32
    %c0_i32_1 = arith.constant 0 : i32
    return %c0_i32, %c0_i32_0 : i32, i32
  }
  func.func @transform_10(%arg0: i32) -> (i32, i32) {
    %c0_i32 = arith.constant 0 : i32
    %c0_i32_0 = arith.constant 0 : i32
    %c0_i32_1 = arith.constant 0 : i32
    return %c0_i32, %c0_i32_0 : i32, i32
  }
  func.func @transform_11(%arg0: i32) -> (i32, i32) {
    %c0_i32 = arith.constant 0 : i32
    %c0_i32_0 = arith.constant 0 : i32
    %c0_i32_1 = arith.constant 0 : i32
    return %c0_i32, %c0_i32_0 : i32, i32
  }
  func.func @transform_12(%arg0: i32) -> (i32, i32) {
    %c0_i32 = arith.constant 0 : i32
    %c0_i32_0 = arith.constant 0 : i32
    %c0_i32_1 = arith.constant 0 : i32
    return %c0_i32, %c0_i32_0 : i32, i32
  }
  func.func @transform_13(%arg0: i32) -> (i32, i32) {
    %c0_i32 = arith.constant 0 : i32
    %c0_i32_0 = arith.constant 0 : i32
    %c0_i32_1 = arith.constant 0 : i32
    return %c0_i32, %c0_i32_0 : i32, i32
  }
  func.func @transform_14(%arg0: i32) -> (i32, i32) {
    %c0_i32 = arith.constant 0 : i32
    %c0_i32_0 = arith.constant 0 : i32
    %c0_i32_1 = arith.constant 0 : i32
    return %c0_i32, %c0_i32_0 : i32, i32
  }
  func.func @transform_15(%arg0: i32) -> (i32, i32) {
    %c0_i32 = arith.constant 0 : i32
    %c0_i32_0 = arith.constant 0 : i32
    %c0_i32_1 = arith.constant 0 : i32
    return %c0_i32, %c0_i32_0 : i32, i32
  }
  func.func @transform_16(%arg0: i32) -> (i32, i32) {
    %c0_i32 = arith.constant 0 : i32
    %c0_i32_0 = arith.constant 0 : i32
    %c0_i32_1 = arith.constant 0 : i32
    return %c0_i32, %c0_i32_0 : i32, i32
  }
  func.func @transform_17(%arg0: i32) -> (i32, i32) {
    %c0_i32 = arith.constant 0 : i32
    %c0_i32_0 = arith.constant 0 : i32
    %c0_i32_1 = arith.constant 0 : i32
    return %c0_i32, %c0_i32_0 : i32, i32
  }
  func.func @transform_18(%arg0: i32) -> (i32, i32) {
    %c0_i32 = arith.constant 0 : i32
    %c0_i32_0 = arith.constant 0 : i32
    %c0_i32_1 = arith.constant 0 : i32
    return %c0_i32, %c0_i32_0 : i32, i32
  }
  func.func @transform_19(%arg0: i32) -> (i32, i32) {
    %c0_i32 = arith.constant 0 : i32
    %c0_i32_0 = arith.constant 0 : i32
    %c0_i32_1 = arith.constant 0 : i32
    return %c0_i32, %c0_i32_0 : i32, i32
  }
  func.func @transform_20(%arg0: i32) -> (i32, i32) {
    %c0_i32 = arith.constant 0 : i32
    %c0_i32_0 = arith.constant 0 : i32
    %c0_i32_1 = arith.constant 0 : i32
    return %c0_i32, %c0_i32_0 : i32, i32
  }
  func.func @transform_21(%arg0: i32) -> (i32, i32) {
    %c0_i32 = arith.constant 0 : i32
    %c0_i32_0 = arith.constant 0 : i32
    %c0_i32_1 = arith.constant 0 : i32
    return %c0_i32, %c0_i32_0 : i32, i32
  }
  func.func @transform_22(%arg0: i32) -> (i32, i32) {
    %c0_i32 = arith.constant 0 : i32
    %c0_i32_0 = arith.constant 0 : i32
    %c0_i32_1 = arith.constant 0 : i32
    return %c0_i32, %c0_i32_0 : i32, i32
  }
  func.func @transform_23(%arg0: i32) -> (i32, i32, i32) {
    %c0_i32 = arith.constant 0 : i32
    %c0_i32_0 = arith.constant 0 : i32
    %c0_i32_1 = arith.constant 0 : i32
    return %arg0, %c0_i32, %c0_i32_0 : i32, i32, i32
  }
}

</mosaic_0001>

<bundles_post_ra>
// kernel: network_forward.1
= control target key start
LH: loop header
LB: loop body
LE: loop exit
PB: predicated region body
PF: predicated region fallthrough
CT: control target
= control target key end

     0   :  { %s14748_s0 = inlined_call_operand.vmem [shape: bf16[2,784,9], index: 0, kind: input, shape index: {}]   ;;  %s14749_s1 = inlined_call_operand.vmem [shape: bf16[9,32], index: 1, kind: input, shape index: {}]   ;;  %s14750_s2 = inlined_call_operand.vmem [shape: f32[1,32], index: 2, kind: input, shape index: {}]   ;;  %s14751_s3 = inlined_call_operand.vmem [shape: bf16[32,48], index: 3, kind: input, shape index: {}]   ;;  %s14752_s4 = inlined_call_operand.vmem [shape: f32[1,48], index: 4, kind: input, shape index: {}]   ;;  %s14753_s5 = inlined_call_operand.vmem [shape: bf16[16,32], index: 5, kind: input, shape index: {}]   ;;  %s14754_s6 = inlined_call_operand.vmem [shape: f32[1,32], index: 6, kind: input, shape index: {}]   ;;  %s14755_s7 = inlined_call_operand.vmem [shape: bf16[49,181], index: 7, kind: input, shape index: {}]   ;;  %s14756_s8 = inlined_call_operand.vmem [shape: bf16[288,64], index: 8, kind: input, shape index: {}]   ;;  %s14757_s9 = inlined_call_operand.vmem [shape: f32[1,64], index: 9, kind: input, shape index: {}]   ;;  %s14758_s10 = inlined_call_operand.vmem [shape: bf16[49,217], index: 10, kind: input, shape index: {}]   ;;  %s14759_s11 = inlined_call_operand.vmem [shape: bf16[64,96], index: 11, kind: input, shape index: {}]   ;;  %s14760_s12 = inlined_call_operand.vmem [shape: f32[1,96], index: 12, kind: input, shape index: {}]   ;;  %s14761_s13 = inlined_call_operand.vmem [shape: bf16[32,64], index: 13, kind: input, shape index: {}]   ;;  %s14762_s14 = inlined_call_operand.vmem [shape: f32[1,64], index: 14, kind: input, shape index: {}]   ;;  %s14763_s15 = inlined_call_operand.vmem [shape: bf16[9,41], index: 15, kind: input, shape index: {}]   ;;  %s14764_s16 = inlined_call_operand.vmem [shape: bf16[576,128], index: 16, kind: input, shape index: {}]   ;;  %s14765_s17 = inlined_call_operand.vmem [shape: f32[1,128], index: 17, kind: input, shape index: {}]   ;;  %s14766_s18 = inlined_call_operand.vmem [shape: bf16[9,45], index: 18, kind: input, shape index: {}]   ;;  %s14767_s19 = inlined_call_operand.vmem [shape: bf16[1152,256], index: 19, kind: input, shape index: {}]   ;;  %s14768_s20 = inlined_call_operand.vmem [shape: f32[1,256], index: 20, kind: input, shape index: {}]   ;;  %s14769_s21 = inlined_call_operand.vmem [shape: bf16[256,128], index: 21, kind: input, shape index: {}]   ;;  %s14770_s22 = inlined_call_operand.vmem [shape: f32[1,128], index: 22, kind: input, shape index: {}]   ;;  %s14771_s23 = inlined_call_operand.hbm [shape: f32[2,1,128], index: 23, kind: output, shape index: {}]  }
   0x1   :  { %14804 = sst [smem:[#allocation21_spill]] %s14748_s0 }
   0x2   :  { %14805 = sst [smem:[#allocation22_spill]] %s14749_s1 }
   0x3   :  { %14806 = sst [smem:[#allocation23_spill]] %s14750_s2 }
   0x4   :  { %14807 = sst [smem:[#allocation24_spill]] %s14751_s3 }
   0x5   :  { %14808 = sst [smem:[#allocation25_spill]] %s14752_s4 }
   0x6   :  { %14809 = sst [smem:[#allocation26_spill]] %s14753_s5 }
   0x7   :  { %14810 = sst [smem:[#allocation27_spill]] %s14754_s6 }
   0x8   :  { %14811 = sst [smem:[#allocation28_spill]] %s14755_s7 }
   0x9   :  { %14812 = sst [smem:[#allocation29_spill]] %s14756_s8 }
   0xa   :  { %14813 = sst [smem:[#allocation30_spill]] %s14757_s9 }
   0xb   :  { %14814 = sst [smem:[#allocation31_spill]] %s14758_s10 }
   0xc   :  { %28 = vsyncpa [#allocation8], 0 }
   0xd   :  { %30 = vsyncpa [#allocation8 + $0x1], 0  ;;  %s11177_s4 = smov 0   ;;  %s11179_s30 = smov 0  }
   0xe   :  { %s11181_s24 = smov 0   ;;  %s11183_s25 = smov 0  }
   0xf LB: > { %14815 = sst [smem:[#allocation10_spill]] %s11041_s24  ;;  %s11198_s5 = sadd.s32 4294967295, %s11045_s25   ;;  %s11045_s25 = sphi %s11183_s25, %s14864_s25   ;;  %s11041_s24 = sphi %s11181_s24, %s14866_s24   ;;  %s11037_s30 = sphi %s11179_s30, %s14868_s30   ;;  %s11033_s4 = sphi %s11177_s4, %s14867_s4  }
  0x10   : > { %s9026_s1 = sadd.s32 4294967294, %s11045_s25   ;;  %s11202_s26 = sadd.s32 1, %s11045_s25  }
  0x11   : > { %14816 = sst [smem:[#allocation11_spill]] %s11202_s26  ;;  %s531_s2 = sadd.s32 1, %s11041_s24 }
  0x12   : > { %s528_s6 = ssub.s32 %s11045_s25, %s11202_s26  ;;  %p541_p0 = scmp.ne.s32.totalorder %s11041_s24, %s11037_s30 }
  0x13   : > { %p529_p1 = scmp.eq.s32.totalorder %s528_s6, 0  ;;  %p542_p2 = scmp.eq.s32.totalorder %s11198_s5, 1 }
  0x14   : > { %p547_p3 = scmp.ne.s32.totalorder %s11037_s30, %s11033_s4  ;;  %p548_p4 = scmp.eq.s32.totalorder %s9026_s1, 1 }
  0x15   : > { %s11213_s27 = scalar_select %p529_p1, %s11041_s24, %s531_s2  }
  0x16   : > { %p11215_p5 = por %p542_p2, %p541_p0  ;;  %p11219_p6 = por %p548_p4, %p547_p3 }
  0x17   : > { %14817 = sst [smem:[#allocation12_spill]] %s11213_s27  ;;  %p9029_p7 = scmp.ge.s32.totalorder %s11045_s25, 1 }
  0x18   : > { %p640_p8 = scmp.lt.s32.totalorder %s11045_s25, 3 }
  0x1a   : > { %p641_p9 = pnand %p9029_p7, %p640_p8 }
  0x1c   : > { %644 = sbr.rel (%p641_p9) target bundleno = 5536 (0x15a0), region = 112 }
  0x21   : > { %vm1214_vm0 = vcmask 1043456   ;;  %v14778_v0 = vmov 0.0   ;;  %s14820_s0 = sld [smem:[#allocation22_spill]]  ;;  %vm1215_vm1 = vcmask 1044480   ;;  %p703_p10 = scmp.lt.s32.totalorder %s11198_s5, 1  ;;  %v14776_v2 = vmov 65535  }
  0x22   : > { %9857 = vmatprep.subr.bf16.mxu0 %v14778_v0  ;;  %10433 = vmatprep.subr.bf16.mxu1 %v14778_v0  ;;  %v1216_v3 = vsel %vm1214_vm0, 4294967295, %v14776_v2  ;;  %vm11049_vm2 = vmmov 0   ;;  %vm1066_vm3 = vcmask 72704   ;;  %s14822_s3 = sld [smem:[#allocation21_spill]]  ;;  %vm2053_vm4 = vcmask 261120   ;;  %s11052_s24 = smov 112  }
  0x23   : > { %9859 = vmatprep.mubr.msk.bf16.mxu0 %vm11049_vm2, %v14778_v0  ;;  %10051 = vmatprep.mubr.msk.bf16.mxu1 %vm11049_vm2, %v14778_v0  ;;  %v11237_v4 = vsel %vm1215_vm1, %v1216_v3, 0  ;;  %s704_s1 = scalar_select %p703_p10, %s11198_s5, 1  ;;  %3567 = vst.msk [vmem:[#allocation2] sm:$0xff] %vm2053_vm4, %v14778_v0  ;;  %3568 = vst.msk [vmem:[#allocation2 + $0x8] sm:$0xff] %vm2053_vm4, %v14778_v0  ;;  %vm2526_vm5 = vcmask 433152   ;;  %vm2252_vm6 = vcmask 1046528  }
  0x24   : > { %14821 = vst [vmem:[#allocation13_spill] sm:$0xff] %v11237_v4  ;;  %s14823_s6 = sld [smem:[#allocation23_spill]]  ;;  %3569 = vst.msk [vmem:[#allocation2 + $0x10] sm:$0xff] %vm2053_vm4, %v14778_v0  ;;  %vm2380_vm7 = vcmask 1041408   ;;  %vm2539_vm8 = vcmask 1042432   ;;  %vm2665_vm9 = vcmask 130048  }
  0x25   : > { %s10436_s2 = smul.u32 392, %s704_s1  ;;  %s14825_s1 = sld [smem:[#allocation24_spill]]  ;;  %3570 = vst.msk [vmem:[#allocation2 + $0x18] sm:$0xff] %vm2053_vm4, %v14778_v0  ;;  %3571 = vst.msk [vmem:[#allocation2 + $0x20] sm:$0xff] %vm2053_vm4, %v14778_v0  ;;  %vm2853_vm10 = vcmask 400384   ;;  %vm3197_vm11 = vcmask 1040384  }
  0x26   : > { %3572 = vst.msk [vmem:[#allocation2 + $0x28] sm:$0xff] %vm2053_vm4, %v14778_v0  ;;  %3573 = vst.msk [vmem:[#allocation2 + $0x30] sm:$0xff] %vm2053_vm4, %v14778_v0  ;;  %vm2926_vm12 = vcmask 396288   ;;  %s14801_s29 = smov 64   ;;  %s14848_s8 = sld [smem:[#allocation29_spill]]  ;;  %vm3853_vm13 = vcmask 523520  }
  0x27   : > { %v10485_v1 = vld [vmem:[%s14820_s0] sm:$0x1f]   ;;  %3574 = vst.msk [vmem:[#allocation2 + $0x38] sm:$0xff] %vm2053_vm4, %v14778_v0  ;;  %3575 = vst.msk [vmem:[#allocation2 + $0x40] sm:$0xff] %vm2053_vm4, %v14778_v0  ;;  %vm4035_vm14 = vcmask 785920   ;;  %s14849_s27 = sld [smem:[#allocation27_spill]] }
  0x28   : > { %v1219_v5 = vand.u32 %v10485_v1, %v11237_v4  ;;  %s11244_s0 = scalar_lea.vmem %s14822_s3, %s10436_s2  ;;  %3576 = vst.msk [vmem:[#allocation2 + $0x48] sm:$0xff] %vm2053_vm4, %v14778_v0  ;;  %3577 = vst.msk [vmem:[#allocation2 + $0x50] sm:$0xff] %vm2053_vm4, %v14778_v0  ;;  %s14790_s2 = smov 96   ;;  %vm3602_vm15 = vcmask 259072   ;;  %vm3607_vm1 = vcmask 257024  }
  0x29   : > { %v10486_v6 = vld [vmem:[%s11244_s0] sm:$0xff]   ;;  %v10487_v7 = vld [vmem:[%s11244_s0 + $0x8] sm:$0xff]   ;;  %v10488_v8 = vld [vmem:[%s11244_s0 + $0x10] sm:$0xff]   ;;  %3578 = vst.msk [vmem:[#allocation2 + $0x58] sm:$0xff] %vm2053_vm4, %v14778_v0  ;;  %s14858_s9 = sld [smem:[#allocation30_spill]]  ;;  %s9476_s3 = sshll.u32 %s11198_s5, 4 }
  0x2a   : > { %9858 = vmatpush3.bf16.msra.mxu0 %v1219_v5  ;;  %10434 = vmatpush3.bf16.msra.mxu1 %v1219_v5  ;;  %v10489_v9 = vld [vmem:[%s11244_s0 + $0x18] sm:$0xff]   ;;  %v10490_v10 = vld [vmem:[%s11244_s0 + $0x20] sm:$0xff]   ;;  %v10491_v11 = vld [vmem:[%s11244_s0 + $0x28] sm:$0xff]   ;;  %3579 = vst.msk [vmem:[#allocation2 + $0x60] sm:$0xff] %vm2053_vm4, %v14778_v0  ;;  %s14859_s10 = sld [smem:[#allocation31_spill]]  ;;  %s11056_s5 = smov [#allocation7]  }
  0x2b   : > { %10055 = vmatprep.subr.bf16.mxu1 %v14778_v0  ;;  %v10492_v12 = vld [vmem:[%s11244_s0 + $0x30] sm:$0xff]   ;;  %v10493_v13 = vld [vmem:[%s11244_s0 + $0x38] sm:$0xff]   ;;  %v10494_v14 = vld [vmem:[%s11244_s0 + $0x40] sm:$0xff]   ;;  %3580 = vst.msk [vmem:[#allocation2 + $0x68] sm:$0xff] %vm2053_vm4, %v14778_v0 }
  0x2c   : > { %v10495_v15 = vld [vmem:[%s11244_s0 + $0x48] sm:$0xff]   ;;  %v10496_v16 = vld [vmem:[%s11244_s0 + $0x50] sm:$0xff]   ;;  %v10497_v17 = vld [vmem:[%s11244_s0 + $0x58] sm:$0xff]   ;;  %3581 = vst.msk [vmem:[#allocation2 + $0x70] sm:$0xff] %vm2053_vm4, %v14778_v0 }
  0x2d   : > { %9860 = vmatmul.mubr.msk.bf16.vlgmr.msra.gmra.mxu0 %vm1066_vm3, %v10486_v6  ;;  %v10498_v18 = vld [vmem:[%s11244_s0 + $0x60] sm:$0xff]   ;;  %v10499_v19 = vld [vmem:[%s11244_s0 + $0x68] sm:$0xff]   ;;  %v10500_v20 = vld [vmem:[%s11244_s0 + $0x70] sm:$0xff]   ;;  %3582 = vst.msk [vmem:[#allocation2 + $0x78] sm:$0xff] %vm2053_vm4, %v14778_v0 }
  0x2e   : > { %9863 = vmatprep.mubr.msk.bf16.mxu0 %vm11049_vm2, %v14778_v0  ;;  %v10501_v21 = vld [vmem:[%s11244_s0 + $0x78] sm:$0xff]   ;;  %v10502_v22 = vld [vmem:[%s11244_s0 + $0x80] sm:$0xff]   ;;  %v10503_v23 = vld [vmem:[%s11244_s0 + $0x88] sm:$0xff]   ;;  %3583 = vst.msk [vmem:[#allocation2 + $0x80] sm:$0xff] %vm2053_vm4, %v14778_v0 }
  0x2f   : > { %v10504_v24 = vld [vmem:[%s11244_s0 + $0x90] sm:$0xff]   ;;  %v10505_v25 = vld [vmem:[%s11244_s0 + $0x98] sm:$0xff]   ;;  %v10522_v26 = vld [vmem:[%s11244_s0 + $0x180] sm:$0xff]   ;;  %3584 = vst.msk [vmem:[#allocation2 + $0x88] sm:$0xff] %vm2053_vm4, %v14778_v0 }
  0x30   : > { %10052 = vmatmul.mubr.msk.bf16.vlgmr.msra.gmra.mxu1 %vm1066_vm3, %v10522_v26  ;;  %v10506_v27 = vld [vmem:[%s11244_s0 + $0xa0] sm:$0xff]   ;;  %v10507_v28 = vld [vmem:[%s11244_s0 + $0xa8] sm:$0xff]   ;;  %v10508_v29 = vld [vmem:[%s11244_s0 + $0xb0] sm:$0xff]   ;;  %3585 = vst.msk [vmem:[#allocation2 + $0x90] sm:$0xff] %vm2053_vm4, %v14778_v0 }
  0x31   : > { %10059 = vmatprep.mubr.msk.bf16.mxu1 %vm11049_vm2, %v14778_v0  ;;  %v10509_v30 = vld [vmem:[%s11244_s0 + $0xb8] sm:$0xff]   ;;  %v10510_v31 = vld [vmem:[%s11244_s0 + $0xc0] sm:$0xff]   ;;  %v10511_v35 = vld [vmem:[%s11244_s0 + $0xc8] sm:$0xff]   ;;  %3586 = vst.msk [vmem:[#allocation2 + $0x98] sm:$0xff] %vm2053_vm4, %v14778_v0 }
  0x32   : > { %v10512_v40 = vld [vmem:[%s11244_s0 + $0xd0] sm:$0xff]   ;;  %v10513_v45 = vld [vmem:[%s11244_s0 + $0xd8] sm:$0xff]   ;;  %v10514_v50 = vld [vmem:[%s11244_s0 + $0xe0] sm:$0xff]   ;;  %3587 = vst.msk [vmem:[#allocation2 + $0xa0] sm:$0xff] %vm2053_vm4, %v14778_v0 }
  0x33   : > { %v10515_v55 = vld [vmem:[%s11244_s0 + $0xe8] sm:$0xff]   ;;  %v10516_v60 = vld [vmem:[%s11244_s0 + $0xf0] sm:$0xff]   ;;  %v10517_v3 = vld [vmem:[%s11244_s0 + $0xf8] sm:$0xff]   ;;  %3588 = vst.msk [vmem:[#allocation2 + $0xa8] sm:$0xff] %vm2053_vm4, %v14778_v0 }
  0x34   : > { %3589 = vst.msk [vmem:[#allocation2 + $0xb0] sm:$0xff] %vm2053_vm4, %v14778_v0  ;;  %3590 = vst.msk [vmem:[#allocation2 + $0xb8] sm:$0xff] %vm2053_vm4, %v14778_v0 }
  0x35   : > { %9864 = vmatmul.mubr.msk.bf16.gmra.mxu0 %vm1066_vm3, %v10487_v7  ;;  %3591 = vst.msk [vmem:[#allocation2 + $0xc0] sm:$0xff] %vm2053_vm4, %v14778_v0  ;;  %3592 = vst.msk [vmem:[#allocation2 + $0xc8] sm:$0xff] %vm2053_vm4, %v14778_v0 }
  0x36   : > { %9867 = vmatprep.mubr.msk.bf16.mxu0 %vm11049_vm2, %v14778_v0  ;;  %3593 = vst.msk [vmem:[#allocation2 + $0xd0] sm:$0xff] %vm2053_vm4, %v14778_v0  ;;  %3594 = vst.msk [vmem:[#allocation2 + $0xd8] sm:$0xff] %vm2053_vm4, %v14778_v0 }
  0x37   : > { %3595 = vst.msk [vmem:[#allocation2 + $0xe0] sm:$0xff] %vm2053_vm4, %v14778_v0  ;;  %3596 = vst.msk [vmem:[#allocation2 + $0xe8] sm:$0xff] %vm2053_vm4, %v14778_v0 }
  0x38   : > { %3597 = vst.msk [vmem:[#allocation2 + $0xf0] sm:$0xff] %vm2053_vm4, %v14778_v0  ;;  %3598 = vst.msk [vmem:[#allocation2 + $0xf8] sm:$0xff] %vm2053_vm4, %v14778_v0 }
  0x39   : > { %3599 = vst.msk [vmem:[#allocation2 + $0x100] sm:$0xff] %vm2053_vm4, %v14778_v0  ;;  %3600 = vst.msk [vmem:[#allocation2 + $0x108] sm:$0xff] %vm2053_vm4, %v14778_v0 }
  0x3d   : > { %9868 = vmatmul.mubr.msk.bf16.gmra.mxu0 %vm1066_vm3, %v10488_v8 }
  0x3e   : > { %9871 = vmatprep.mubr.msk.bf16.mxu0 %vm11049_vm2, %v14778_v0 }
  0x45   : > { %9872 = vmatmul.mubr.msk.bf16.gmra.mxu0 %vm1066_vm3, %v10489_v9  ;;  %v10518_v9 = vld [vmem:[%s11244_s0 + $0x100] sm:$0xff]  }
  0x46   : > { %9875 = vmatprep.mubr.msk.bf16.mxu0 %vm11049_vm2, %v14778_v0 }
  0x4d   : > { %9876 = vmatmul.mubr.msk.bf16.gmra.mxu0 %vm1066_vm3, %v10490_v10 }
  0x4e   : > { %9879 = vmatprep.mubr.msk.bf16.mxu0 %vm11049_vm2, %v14778_v0 }
  0x55   : > { %9880 = vmatmul.mubr.msk.bf16.gmra.mxu0 %vm1066_vm3, %v10491_v11 }
  0x56   : > { %9883 = vmatprep.mubr.msk.bf16.mxu0 %vm11049_vm2, %v14778_v0 }
  0x5d   : > { %9884 = vmatmul.mubr.msk.bf16.gmra.mxu0 %vm1066_vm3, %v10492_v12 }
  0x5e   : > { %9887 = vmatprep.mubr.msk.bf16.mxu0 %vm11049_vm2, %v14778_v0 }
  0x65   : > { %9888 = vmatmul.mubr.msk.bf16.gmra.mxu0 %vm1066_vm3, %v10493_v13 }
  0x66   : > { %9891 = vmatprep.mubr.msk.bf16.mxu0 %vm11049_vm2, %v14778_v0 }
  0x6d   : > { %9892 = vmatmul.mubr.msk.bf16.gmra.mxu0 %vm1066_vm3, %v10494_v14  ;;  %v10519_v14 = vld [vmem:[%s11244_s0 + $0x108] sm:$0xff]  }
  0x6e   : > { %9895 = vmatprep.mubr.msk.bf16.mxu0 %vm11049_vm2, %v14778_v0 }
  0x75   : > { %9896 = vmatmul.mubr.msk.bf16.gmra.mxu0 %vm1066_vm3, %v10495_v15 }
  0x76   : > { %9899 = vmatprep.mubr.msk.bf16.mxu0 %vm11049_vm2, %v14778_v0 }
  0x7d   : > { %9900 = vmatmul.mubr.msk.bf16.gmra.mxu0 %vm1066_vm3, %v10496_v16 }
  0x7e   : > { %9903 = vmatprep.mubr.msk.bf16.mxu0 %vm11049_vm2, %v14778_v0 }
  0x85   : > { %9904 = vmatmul.mubr.msk.bf16.gmra.mxu0 %vm1066_vm3, %v10497_v17 }
  0x86   : > { %9907 = vmatprep.mubr.msk.bf16.mxu0 %vm11049_vm2, %v14778_v0 }
  0x8d   : > { %9908 = vmatmul.mubr.msk.bf16.gmra.mxu0 %vm1066_vm3, %v10498_v18 }
  0x8e   : > { %9911 = vmatprep.mubr.msk.bf16.mxu0 %vm11049_vm2, %v14778_v0 }
  0x95   : > { %9912 = vmatmul.mubr.msk.bf16.gmra.mxu0 %vm1066_vm3, %v10499_v19  ;;  %v10520_v19 = vld [vmem:[%s11244_s0 + $0x110] sm:$0xff]  }
  0x96   : > { %9915 = vmatprep.mubr.msk.bf16.mxu0 %vm11049_vm2, %v14778_v0 }
  0x9d   : > { %9916 = vmatmul.mubr.msk.bf16.gmra.mxu0 %vm1066_vm3, %v10500_v20 }
  0x9e   : > { %9919 = vmatprep.mubr.msk.bf16.mxu0 %vm11049_vm2, %v14778_v0 }
  0xa5   : > { %9920 = vmatmul.mubr.msk.bf16.gmra.mxu0 %vm1066_vm3, %v10501_v21 }
  0xa6   : > { %9923 = vmatprep.mubr.msk.bf16.mxu0 %vm11049_vm2, %v14778_v0 }
  0xad   : > { %9924 = vmatmul.mubr.msk.bf16.gmra.mxu0 %vm1066_vm3, %v10502_v22 }
  0xae   : > { %9927 = vmatprep.mubr.msk.bf16.mxu0 %vm11049_vm2, %v14778_v0 }
  0xb5   : > { %9928 = vmatmul.mubr.msk.bf16.gmra.mxu0 %vm1066_vm3, %v10503_v23 }
  0xb6   : > { %9931 = vmatprep.mubr.msk.bf16.mxu0 %vm11049_vm2, %v14778_v0 }
  0xbd   : > { %9932 = vmatmul.mubr.msk.bf16.gmra.mxu0 %vm1066_vm3, %v10504_v24  ;;  %v10521_v24 = vld [vmem:[%s11244_s0 + $0x118] sm:$0xff]  }
  0xbe   : > { %9935 = vmatprep.mubr.msk.bf16.mxu0 %vm11049_vm2, %v14778_v0 }
  0xc5   : > { %9936 = vmatmul.mubr.msk.bf16.gmra.mxu0 %vm1066_vm3, %v10505_v25 }
  0xc6   : > { %9939 = vmatprep.mubr.msk.bf16.mxu0 %vm11049_vm2, %v14778_v0 }
  0xcd   : > { %9940 = vmatmul.mubr.msk.bf16.gmra.mxu0 %vm1066_vm3, %v10506_v27 }
  0xce   : > { %9943 = vmatprep.mubr.msk.bf16.mxu0 %vm11049_vm2, %v14778_v0 }
  0xd5   : > { %9944 = vmatmul.mubr.msk.bf16.gmra.mxu0 %vm1066_vm3, %v10507_v28 }
  0xd6   : > { %9947 = vmatprep.mubr.msk.bf16.mxu0 %vm11049_vm2, %v14778_v0 }
  0xdd   : > { %9948 = vmatmul.mubr.msk.bf16.gmra.mxu0 %vm1066_vm3, %v10508_v29  ;;  %v10523_v29 = vld [vmem:[%s11244_s0 + $0x120] sm:$0xff]  }
  0xde   : > { %9951 = vmatprep.mubr.msk.bf16.mxu0 %vm11049_vm2, %v14778_v0 }
  0xe5   : > { %9952 = vmatmul.mubr.msk.bf16.gmra.mxu0 %vm1066_vm3, %v10509_v30 }
  0xe6   : > { %9955 = vmatprep.mubr.msk.bf16.mxu0 %vm11049_vm2, %v14778_v0 }
  0xed   : > { %v11348_v32 = vpop.f32.mrf.mxu0  ;;  %9956 = vmatmul.mubr.msk.bf16.gmra.mxu0 %vm1066_vm3, %v10510_v31  ;;  %v11447_v31 = vld [vmem:[%s14823_s6] ss:$0 sm:$0xff] }
  0xee   : > { %9959 = vmatprep.mubr.msk.bf16.mxu0 %vm11049_vm2, %v14778_v0 }
  0xef   : > { %v9861_v33 = vpop.f32.mrf.mxu0 }
  0xf1   : > { %v11353_v34 = vpop.f32.mrf.mxu0 }
  0xf3   : > { %v9862_v36 = vpop.f32.mrf.mxu0 }
  0xf5   : > { %v11356_v37 = vpop.f32.mrf.mxu0  ;;  %9960 = vmatmul.mubr.msk.bf16.gmra.mxu0 %vm1066_vm3, %v10511_v35 }
  0xf6   : > { %9963 = vmatprep.mubr.msk.bf16.mxu0 %vm11049_vm2, %v14778_v0 }
  0xf7   : > { %v9865_v38 = vpop.f32.mrf.mxu0 }
  0xf9   : > { %v11361_v39 = vpop.f32.mrf.mxu0 }
  0xfb   : > { %v9866_v41 = vpop.f32.mrf.mxu0 }
  0xfd   : > { %v11364_v42 = vpop.f32.mrf.mxu0  ;;  %9964 = vmatmul.mubr.msk.bf16.gmra.mxu0 %vm1066_vm3, %v10512_v40  ;;  %v10524_v40 = vld [vmem:[%s11244_s0 + $0x128] sm:$0xff]  }
  0xfe   : > { %9967 = vmatprep.mubr.msk.bf16.mxu0 %vm11049_vm2, %v14778_v0 }
  0xff   : > { %v9869_v43 = vpop.f32.mrf.mxu0 }
 0x101   : > { %v11369_v44 = vpop.f32.mrf.mxu0 }
 0x103   : > { %v9870_v46 = vpop.f32.mrf.mxu0 }
 0x105   : > { %v11372_v47 = vpop.f32.mrf.mxu0  ;;  %9968 = vmatmul.mubr.msk.bf16.gmra.mxu0 %vm1066_vm3, %v10513_v45  ;;  %v1256_v45 = vadd.f32 %v11447_v31, %v11348_v32 }
 0x106   : > { %9971 = vmatprep.mubr.msk.bf16.mxu0 %vm11049_vm2, %v14778_v0 }
 0x107   : > { %v9873_v48 = vpop.f32.mrf.mxu0 }
 0x109   : > { %v11377_v49 = vpop.f32.mrf.mxu0 }
 0x10b   : > { %v9874_v51 = vpop.f32.mrf.mxu0 }
 0x10d   : > { %v11380_v52 = vpop.f32.mrf.mxu0  ;;  %9972 = vmatmul.mubr.msk.bf16.gmra.mxu0 %vm1066_vm3, %v10514_v50 }
 0x10e   : > { %9975 = vmatprep.mubr.msk.bf16.mxu0 %vm11049_vm2, %v14778_v0 }
 0x10f   : > { %v9877_v53 = vpop.f32.mrf.mxu0 }
 0x111   : > { %v11385_v54 = vpop.f32.mrf.mxu0 }
 0x113   : > { %v9878_v56 = vpop.f32.mrf.mxu0 }
 0x114   : > { %v1646_v56 = vmax.f32 %v1256_v45, 0.0  ;;  %v1272_v45 = vadd.f32 %v11447_v31, %v11364_v42  ;;  %v1275_v42 = vadd.f32 %v11447_v31, %v11369_v44 }
 0x115   : > { %v11388_v57 = vpop.f32.mrf.mxu0  ;;  %9976 = vmatmul.mubr.msk.bf16.gmra.mxu0 %vm1066_vm3, %v10515_v55 }
 0x116   : > { %9979 = vmatprep.mubr.msk.bf16.mxu0 %vm11049_vm2, %v14778_v0 }
 0x117   : > { %v9881_v58 = vpop.f32.mrf.mxu0 }
 0x118   : > { %v1259_v58 = vadd.f32 %v11447_v31, %v11353_v34 }
 0x119   : > { %v11393_v59 = vpop.f32.mrf.mxu0 }
 0x11b   : > { %v9882_v61 = vpop.f32.mrf.mxu0 }
 0x11d   : > { %v11396_v62 = vpop.f32.mrf.mxu0  ;;  %9980 = vmatmul.mubr.msk.bf16.gmra.mxu0 %vm1066_vm3, %v10516_v60 }
 0x11e   : > { %9983 = vmatprep.mubr.msk.bf16.mxu0 %vm11049_vm2, %v14778_v0 }
 0x11f   : > { %v9885_v63 = vpop.f32.mrf.mxu0 }
 0x121   : > { %v11401_v1 = vpop.f32.mrf.mxu0 }
 0x123   : > { %v9886_v5 = vpop.f32.mrf.mxu0 }
 0x124   : > { %v10525_v5 = vld [vmem:[%s11244_s0 + $0x130] sm:$0xff]  }
 0x125   : > { %v11404_v6 = vpop.f32.mrf.mxu0  ;;  %9984 = vmatmul.mubr.msk.bf16.gmra.mxu0 %vm1066_vm3, %v10517_v3 }
 0x126   : > { %9987 = vmatprep.mubr.msk.bf16.mxu0 %vm11049_vm2, %v14778_v0 }
 0x127   : > { %v9889_v7 = vpop.f32.mrf.mxu0 }
 0x129   : > { %v11409_v8 = vpop.f32.mrf.mxu0 }
 0x12b   : > { %v9890_v10 = vpop.f32.mrf.mxu0 }
 0x12c   : > { %v1647_v10 = vmax.f32 %v1259_v58, 0.0 }
 0x12d   : > { %v11412_v11 = vpop.f32.mrf.mxu0  ;;  %9988 = vmatmul.mubr.msk.bf16.gmra.mxu0 %vm1066_vm3, %v10518_v9 }
 0x12e   : > { %9991 = vmatprep.mubr.msk.bf16.mxu0 %vm11049_vm2, %v14778_v0 }
 0x12f   : > { %v9893_v12 = vpop.f32.mrf.mxu0 }
 0x130   : > { %v1264_v12 = vadd.f32 %v11447_v31, %v11356_v37  ;;  %v1267_v37 = vadd.f32 %v11447_v31, %v11361_v39 }
 0x131   : > { %v11417_v13 = vpop.f32.mrf.mxu0 }
 0x133   : > { %v9894_v15 = vpop.f32.mrf.mxu0 }
 0x135   : > { %v11420_v16 = vpop.f32.mrf.mxu0  ;;  %9992 = vmatmul.mubr.msk.bf16.gmra.mxu0 %vm1066_vm3, %v10519_v14 }
 0x136   : > { %9995 = vmatprep.mubr.msk.bf16.mxu0 %vm11049_vm2, %v14778_v0 }
 0x137   : > { %v9897_v17 = vpop.f32.mrf.mxu0 }
 0x139   : > { %v11425_v18 = vpop.f32.mrf.mxu0 }
 0x13b   : > { %v9898_v20 = vpop.f32.mrf.mxu0 }
 0x13d   : > { %v11428_v21 = vpop.f32.mrf.mxu0  ;;  %9996 = vmatmul.mubr.msk.bf16.gmra.mxu0 %vm1066_vm3, %v10520_v19 }
 0x13e   : > { %9999 = vmatprep.mubr.msk.bf16.mxu0 %vm11049_vm2, %v14778_v0 }
 0x13f   : > { %v9901_v22 = vpop.f32.mrf.mxu0 }
 0x141   : > { %v11433_v23 = vpop.f32.mrf.mxu0 }
 0x143   : > { %v9902_v25 = vpop.f32.mrf.mxu0 }
 0x145   : > { %v11436_v26 = vpop.f32.mrf.mxu0  ;;  %10000 = vmatmul.mubr.msk.bf16.gmra.mxu0 %vm1066_vm3, %v10521_v24  ;;  %v1648_v24 = vmax.f32 %v1264_v12, 0.0  ;;  %v1280_v12 = vadd.f32 %v11447_v31, %v11372_v47  ;;  %v1283_v47 = vadd.f32 %v11447_v31, %v11377_v49 }
 0x146   : > { %10003 = vmatprep.mubr.msk.bf16.mxu0 %vm11049_vm2, %v14778_v0 }
 0x147   : > { %v9905_v27 = vpop.f32.mrf.mxu0 }
 0x149   : > { %v11441_v28 = vpop.f32.mrf.mxu0 }
 0x14b   : > { %v9906_v30 = vpop.f32.mrf.mxu0 }
 0x14d   : > { %v1351_v33 = vpop.f32.mrf.mxu0  ;;  %10004 = vmatmul.mubr.msk.bf16.gmra.mxu0 %vm1066_vm3, %v10523_v29 }
 0x14e   : > { %v11451_v35 = vadd.f32 %v11447_v31, %v1351_v33  ;;  %10007 = vmatprep.mubr.msk.bf16.mxu0 %vm11049_vm2, %v14778_v0 }
 0x14f   : > { %v9909_v36 = vpop.f32.mrf.mxu0 }
 0x150   : > { %v14780_v41 = vmax.f32 %v11451_v35, 0.0  ;;  %v10526_v36 = vld [vmem:[%s11244_s0 + $0x138] sm:$0xff]  }
 0x151   : > { %v1354_v38 = vpop.f32.mrf.mxu0 }
 0x152   : > { %v1355_v43 = vadd.f32 %v11447_v31, %v1354_v38  ;;  %v1769_v51 = vrot.slane %v14780_v41, 4 }
 0x153   : > { %v9910_v46 = vpop.f32.mrf.mxu0 }
 0x154   : > { %v1671_v48 = vmax.f32 %v1355_v43, 0.0  ;;  %v1649_v43 = vmax.f32 %v1267_v37, 0.0 }
 0x155   : > { %v1359_v50 = vpop.f32.mrf.mxu0  ;;  %10008 = vmatmul.mubr.msk.bf16.gmra.mxu0 %vm1066_vm3, %v10524_v40 }
 0x156   : > { %v1770_v53 = vrot.slane %v1671_v48, 4  ;;  %v1360_v55 = vadd.f32 %v11447_v31, %v1359_v50  ;;  %10011 = vmatprep.mubr.msk.bf16.mxu0 %vm11049_vm2, %v14778_v0 }
 0x157   : > { %v9913_v32 = vpop.f32.mrf.mxu0 }
 0x158   : > { %v1771_v60 = vsel %vm1214_vm0, %v1769_v51, %v1770_v53  ;;  %v1672_v61 = vmax.f32 %v1360_v55, 0.0 }
 0x159   : > { %v11469_v63 = vmax.f32 %v1646_v56, %v1771_v60  ;;  %v1362_v3 = vpop.f32.mrf.mxu0  ;;  %v1650_v56 = vmax.f32 %v1272_v45, 0.0  ;;  %v1288_v45 = vadd.f32 %v11447_v31, %v11380_v52  ;;  %v1291_v52 = vadd.f32 %v11447_v31, %v11385_v54 }
 0x15a   : > { %v1772_v7 = vrot.slane %v1672_v61, 4  ;;  %v1363_v9 = vadd.f32 %v11447_v31, %v1362_v3 }
 0x15b   : > { %v9914_v14 = vpop.f32.mrf.mxu0 }
 0x15c   : > { %v1773_v15 = vsel %vm1214_vm0, %v1770_v53, %v1772_v7  ;;  %v1673_v34 = vmax.f32 %v1363_v9, 0.0 }
 0x15d   : > { %v11476_v17 = vmax.f32 %v1647_v10, %v1773_v15  ;;  %v1367_v19 = vpop.f32.mrf.mxu0  ;;  %10012 = vmatmul.mubr.msk.bf16.gmra.mxu0 %vm1066_vm3, %v10525_v5  ;;  %v10527_v5 = vld [vmem:[%s11244_s0 + $0x140] sm:$0xff]   ;;  %v1651_v10 = vmax.f32 %v1275_v42, 0.0 }
 0x15e   : > { %v1774_v20 = vrot.slane %v1673_v34, 4  ;;  %v1368_v22 = vadd.f32 %v11447_v31, %v1367_v19  ;;  %10015 = vmatprep.mubr.msk.bf16.mxu0 %vm11049_vm2, %v14778_v0 }
 0x15f   : > { %v9917_v25 = vpop.f32.mrf.mxu0 }
 0x160   : > { %v1775_v27 = vsel %vm1214_vm0, %v1772_v7, %v1774_v20  ;;  %v1674_v29 = vmax.f32 %v1368_v22, 0.0 }
 0x161   : > { %v11485_v30 = vmax.f32 %v1648_v24, %v1775_v27  ;;  %v1370_v33 = vpop.f32.mrf.mxu0  ;;  %v1652_v24 = vmax.f32 %v1280_v12, 0.0  ;;  %v1296_v12 = vadd.f32 %v11447_v31, %v11388_v57  ;;  %v1299_v57 = vadd.f32 %v11447_v31, %v11393_v59 }
 0x162   : > { %v1776_v38 = vrot.slane %v1674_v29, 4  ;;  %v1371_v40 = vadd.f32 %v11447_v31, %v1370_v33 }
 0x163   : > { %v9918_v46 = vpop.f32.mrf.mxu0 }
 0x164   : > { %v1777_v48 = vsel %vm1214_vm0, %v1774_v20, %v1776_v38  ;;  %v1675_v39 = vmax.f32 %v1371_v40, 0.0 }
 0x165   : > { %v11492_v50 = vmax.f32 %v1649_v43, %v1777_v48  ;;  %v1375_v51 = vpop.f32.mrf.mxu0  ;;  %10016 = vmatmul.mubr.msk.bf16.gmra.mxu0 %vm1066_vm3, %v10526_v36  ;;  %v10528_v36 = vld [vmem:[%s11244_s0 + $0x148] sm:$0xff]   ;;  %v1653_v43 = vmax.f32 %v1283_v47, 0.0 }
 0x166   : > { %v1778_v53 = vrot.slane %v1675_v39, 4  ;;  %v1376_v55 = vadd.f32 %v11447_v31, %v1375_v51  ;;  %10019 = vmatprep.mubr.msk.bf16.mxu0 %vm11049_vm2, %v14778_v0 }
 0x167   : > { %v9921_v58 = vpop.f32.mrf.mxu0 }
 0x168   : > { %v1779_v32 = vsel %vm1214_vm0, %v1776_v38, %v1778_v53  ;;  %v1676_v60 = vmax.f32 %v1376_v55, 0.0 }
 0x169   : > { %v11501_v61 = vmax.f32 %v1650_v56, %v1779_v32  ;;  %v1378_v3 = vpop.f32.mrf.mxu0  ;;  %v1654_v56 = vmax.f32 %v1288_v45, 0.0  ;;  %v1304_v45 = vadd.f32 %v11447_v31, %v11396_v62  ;;  %v1307_v62 = vadd.f32 %v11447_v31, %v11401_v1 }
 0x16a   : > { %v1780_v7 = vrot.slane %v1676_v60, 4  ;;  %v1379_v9 = vadd.f32 %v11447_v31, %v1378_v3  ;;  %v1312_v1 = vadd.f32 %v11447_v31, %v11404_v6 }
 0x16b   : > { %v9922_v14 = vpop.f32.mrf.mxu0 }
 0x16c   : > { %v1781_v15 = vsel %vm1214_vm0, %v1778_v53, %v1780_v7  ;;  %v1677_v44 = vmax.f32 %v1379_v9, 0.0  ;;  %v1660_v6 = vmax.f32 %v1312_v1, 0.0 }
 0x16d   : > { %v11508_v34 = vmax.f32 %v1651_v10, %v1781_v15  ;;  %v1383_v19 = vpop.f32.mrf.mxu0  ;;  %10020 = vmatmul.mubr.msk.bf16.gmra.mxu0 %vm1066_vm3, %v10527_v5  ;;  %v10529_v5 = vld [vmem:[%s11244_s0 + $0x150] sm:$0xff]   ;;  %v1655_v10 = vmax.f32 %v1291_v52, 0.0  ;;  %v1658_v52 = vmax.f32 %v1304_v45, 0.0 }
 0x16e   : > { %v1782_v20 = vrot.slane %v1677_v44, 4  ;;  %v1384_v22 = vadd.f32 %v11447_v31, %v1383_v19  ;;  %10023 = vmatprep.mubr.msk.bf16.mxu0 %vm11049_vm2, %v14778_v0 }
 0x16f   : > { %v9925_v37 = vpop.f32.mrf.mxu0 }
 0x170   : > { %v1783_v25 = vsel %vm1214_vm0, %v1780_v7, %v1782_v20  ;;  %v1678_v27 = vmax.f32 %v1384_v22, 0.0 }
 0x171   : > { %v11517_v29 = vmax.f32 %v1652_v24, %v1783_v25  ;;  %v1386_v33 = vpop.f32.mrf.mxu0  ;;  %v1656_v24 = vmax.f32 %v1296_v12, 0.0 }
 0x172   : > { %v1784_v38 = vrot.slane %v1678_v27, 4  ;;  %v1387_v40 = vadd.f32 %v11447_v31, %v1386_v33 }
 0x173   : > { %v9926_v46 = vpop.f32.mrf.mxu0 }
 0x174   : > { %v1785_v48 = vsel %vm1214_vm0, %v1782_v20, %v1784_v38  ;;  %v1679_v49 = vmax.f32 %v1387_v40, 0.0 }
 0x175   : > { %v11524_v39 = vmax.f32 %v1653_v43, %v1785_v48  ;;  %v1391_v51 = vpop.f32.mrf.mxu0  ;;  %10024 = vmatmul.mubr.msk.bf16.gmra.mxu0 %vm1066_vm3, %v10528_v36  ;;  %v10530_v36 = vld [vmem:[%s11244_s0 + $0x158] sm:$0xff]   ;;  %v1657_v43 = vmax.f32 %v1299_v57, 0.0 }
 0x176   : > { %v1786_v53 = vrot.slane %v1679_v49, 4  ;;  %v1392_v55 = vadd.f32 %v11447_v31, %v1391_v51  ;;  %10027 = vmatprep.mubr.msk.bf16.mxu0 %vm11049_vm2, %v14778_v0 }
 0x177   : > { %v9929_v42 = vpop.f32.mrf.mxu0 }
 0x178   : > { %v1787_v58 = vsel %vm1214_vm0, %v1784_v38, %v1786_v53  ;;  %v1680_v32 = vmax.f32 %v1392_v55, 0.0 }
 0x179   : > { %v11533_v60 = vmax.f32 %v1654_v56, %v1787_v58  ;;  %v1394_v3 = vpop.f32.mrf.mxu0  ;;  %v1639_v56 = vpop.f32.mrf.mxu1 }
 0x17a   : > { %v1788_v7 = vrot.slane %v1680_v32, 4  ;;  %v1395_v9 = vadd.f32 %v11447_v31, %v1394_v3  ;;  %v1640_v3 = vadd.f32 %v11447_v31, %v1639_v56 }
 0x17b   : > { %v9930_v14 = vpop.f32.mrf.mxu0 }
 0x17c   : > { %v1789_v15 = vsel %vm1214_vm0, %v1786_v53, %v1788_v7  ;;  %v1681_v54 = vmax.f32 %v1395_v9, 0.0 }
 0x17d   : > { %v11540_v44 = vmax.f32 %v1655_v10, %v1789_v15  ;;  %v1399_v19 = vpop.f32.mrf.mxu0  ;;  %10028 = vmatmul.mubr.msk.bf16.gmra.mxu0 %vm1066_vm3, %v10529_v5  ;;  %v10053_v5 = vpop.f32.mrf.mxu1  ;;  %v10531_v10 = vld [vmem:[%s11244_s0 + $0x160] sm:$0xff]   ;;  %v1742_v15 = vmax.f32 %v1640_v3, 0.0 }
 0x17e   : > { %v1790_v20 = vrot.slane %v1681_v54, 4  ;;  %v1400_v22 = vadd.f32 %v11447_v31, %v1399_v19  ;;  %10031 = vmatprep.mubr.msk.bf16.mxu0 %vm11049_vm2, %v14778_v0  ;;  %v1659_v19 = vmax.f32 %v1307_v62, 0.0 }
 0x17f   : > { %v9933_v47 = vpop.f32.mrf.mxu0  ;;  %v1642_v54 = vpop.f32.mrf.mxu1 }
 0x180   : > { %v1791_v37 = vsel %vm1214_vm0, %v1788_v7, %v1790_v20  ;;  %v1682_v25 = vmax.f32 %v1400_v22, 0.0  ;;  %v1643_v22 = vadd.f32 %v11447_v31, %v1642_v54 }
 0x181   : > { %v11549_v27 = vmax.f32 %v1656_v24, %v1791_v37  ;;  %v1402_v33 = vpop.f32.mrf.mxu0  ;;  %v10054_v47 = vpop.f32.mrf.mxu1 }
 0x182   : > { %v1792_v38 = vrot.slane %v1682_v25, 4  ;;  %v1403_v40 = vadd.f32 %v11447_v31, %v1402_v33  ;;  %v11577_v33 = vrot.slane %v1742_v15, 4 }
 0x183   : > { %v9934_v46 = vpop.f32.mrf.mxu0 }
 0x184   : > { %v1793_v48 = vsel %vm1214_vm0, %v1790_v20, %v1792_v38  ;;  %v1683_v49 = vmax.f32 %v1403_v40, 0.0  ;;  %14824 = vst [vmem:[#allocation14_spill] sm:$0xff] %v11577_v33 }
 0x185   : > { %v11556_v59 = vmax.f32 %v1657_v43, %v1793_v48  ;;  %v1407_v51 = vpop.f32.mrf.mxu0  ;;  %10032 = vmatmul.mubr.msk.bf16.gmra.mxu0 %vm1066_vm3, %v10530_v36  ;;  %v1743_v36 = vmax.f32 %v1643_v22, 0.0  ;;  %v1315_v43 = vadd.f32 %v11447_v31, %v11409_v8  ;;  %v1320_v8 = vadd.f32 %v11447_v31, %v11412_v11  ;;  %v10533_v22 = vld [vmem:[%s11244_s0 + $0x170] sm:$0xff]  }
 0x186   : > { %v1794_v53 = vrot.slane %v1683_v49, 4  ;;  %v1408_v55 = vadd.f32 %v11447_v31, %v1407_v51  ;;  %10035 = vmatprep.mubr.msk.bf16.mxu0 %vm11049_vm2, %v14778_v0  ;;  %v1323_v11 = vadd.f32 %v11447_v31, %v11417_v13 }
 0x187   : > { %v9937_v42 = vpop.f32.mrf.mxu0  ;;  %v11584_v46 = vrot.slane %v1743_v36, 4 }
 0x188   : > { %v1795_v58 = vsel %vm1214_vm0, %v1792_v38, %v1794_v53  ;;  %v1684_v32 = vmax.f32 %v1408_v55, 0.0  ;;  %v10532_v55 = vld [vmem:[%s11244_s0 + $0x168] sm:$0xff]   ;;  %v1661_v42 = vmax.f32 %v1315_v43, 0.0  ;;  %v1663_v47 = vmax.f32 %v1323_v11, 0.0 }
 0x189   : > { %v11566_v7 = vmax.f32 %v1658_v52, %v1795_v58  ;;  %v1410_v9 = vpop.f32.mrf.mxu0  ;;  %v11593_v56 = vsel %vm1214_vm0, %v11577_v33, %v11584_v46 }
 0x18a   : > { %v1796_v12 = vrot.slane %v1684_v32, 4  ;;  %v1411_v14 = vadd.f32 %v11447_v31, %v1410_v9 }
 0x18b   : > { %v9938_v20 = vpop.f32.mrf.mxu0 }
 0x18c   : > { %v1797_v24 = vsel %vm1214_vm0, %v1794_v53, %v1796_v12  ;;  %v1685_v57 = vmax.f32 %v1411_v14, 0.0  ;;  %v1662_v14 = vmax.f32 %v1320_v8, 0.0  ;;  %v10534_v8 = vld [vmem:[%s11244_s0 + $0x178] sm:$0xff]   ;;  %s14841_s0 = sld [smem:[#allocation25_spill]] }
 0x18d   : > { %v11574_v37 = vmax.f32 %v1659_v19, %v1797_v24  ;;  %v1415_v25 = vpop.f32.mrf.mxu0  ;;  %10036 = vmatmul.mubr.msk.bf16.gmra.mxu0 %vm1066_vm3, %v10531_v10 }
 0x18e   : > { %v1798_v38 = vrot.slane %v1685_v57, 4  ;;  %v1416_v40 = vadd.f32 %v11447_v31, %v1415_v25  ;;  %10039 = vmatprep.mubr.msk.bf16.mxu0 %vm11049_vm2, %v14778_v0  ;;  %v1328_v25 = vadd.f32 %v11447_v31, %v11420_v16  ;;  %v10535_v16 = vld [vmem:[%s14825_s1 + $0x8] sm:$0xff]  }
 0x18f   : > { %v9941_v45 = vpop.f32.mrf.mxu0  ;;  %10056 = vmatpush3.bf16.msra.mxu1 %v10535_v16 }
 0x190   : > { %v1799_v48 = vsel %vm1214_vm0, %v1796_v12, %v1798_v38  ;;  %v1686_v49 = vmax.f32 %v1416_v40, 0.0  ;;  %10057 = vmatprep.subr.bf16.mxu1 %v14778_v0 }
 0x191   : > { %v11587_v51 = vmax.f32 %v1660_v6, %v1799_v48  ;;  %v1418_v53 = vpop.f32.mrf.mxu0  ;;  %v1664_v48 = vmax.f32 %v1328_v25, 0.0 }
 0x192   : > { %v1800_v52 = vrot.slane %v1686_v49, 4  ;;  %v1419_v62 = vadd.f32 %v11447_v31, %v1418_v53  ;;  %v1331_v49 = vadd.f32 %v11447_v31, %v11425_v18  ;;  %v1336_v18 = vadd.f32 %v11447_v31, %v11428_v21 }
 0x193   : > { %v9942_v58 = vpop.f32.mrf.mxu0 }
 0x194   : > { %v1801_v32 = vsel %vm1214_vm0, %v1798_v38, %v1800_v52  ;;  %v1687_v3 = vmax.f32 %v1419_v62, 0.0 }
 0x195   : > { %v11599_v5 = vmax.f32 %v1661_v42, %v1801_v32  ;;  %v1423_v9 = vpop.f32.mrf.mxu0  ;;  %10040 = vmatmul.mubr.msk.bf16.gmra.mxu0 %vm1066_vm3, %v10532_v55 }
 0x196   : > { %v1802_v10 = vrot.slane %v1687_v3, 4  ;;  %v1424_v12 = vadd.f32 %v11447_v31, %v1423_v9  ;;  %10043 = vmatprep.mubr.msk.bf16.mxu0 %vm11049_vm2, %v14778_v0  ;;  %v10536_v3 = vld [vmem:[%s14825_s1] sm:$0xff]   ;;  %v1665_v9 = vmax.f32 %v1331_v49, 0.0  ;;  %s11053_s1 = smov 32  }
 0x197   : > { %v9945_v15 = vpop.f32.mrf.mxu0  ;;  %10058 = vmatpush3.bf16.msra.mxu1 %v10536_v3 }
 0x198   : > { %v1803_v54 = vsel %vm1214_vm0, %v1800_v52, %v1802_v10  ;;  %v1688_v19 = vmax.f32 %v1424_v12, 0.0 }
 0x199   : > { %v11608_v1 = vmax.f32 %v1662_v14, %v1803_v54  ;;  %v1426_v20 = vpop.f32.mrf.mxu0 }
 0x19a   : > { %v1804_v24 = vrot.slane %v1688_v19, 4  ;;  %v1427_v57 = vadd.f32 %v11447_v31, %v1426_v20  ;;  %v1666_v20 = vmax.f32 %v1336_v18, 0.0 }
 0x19b   : > { %v9946_v36 = vpop.f32.mrf.mxu0 }
 0x19c   : > { %v1805_v38 = vsel %vm1214_vm0, %v1802_v10, %v1804_v24  ;;  %v1689_v40 = vmax.f32 %v1427_v57, 0.0 }
 0x19d   : > { %v11615_v13 = vmax.f32 %v1663_v47, %v1805_v38  ;;  %v1431_v6 = vpop.f32.mrf.mxu0  ;;  %10044 = vmatmul.mubr.msk.bf16.gmra.mxu0 %vm1066_vm3, %v10533_v22  ;;  %v1339_v22 = vadd.f32 %v11447_v31, %v11433_v23 }
 0x19e   : > { %v1806_v43 = vrot.slane %v1689_v40, 4  ;;  %v1432_v45 = vadd.f32 %v11447_v31, %v1431_v6  ;;  %10047 = vmatprep.mubr.msk.bf16.mxu0 %vm11049_vm2, %v14778_v0  ;;  %v1344_v40 = vadd.f32 %v11447_v31, %v11436_v26 }
 0x19f   : > { %v9949_v53 = vpop.f32.mrf.mxu0  ;;  %v1667_v38 = vmax.f32 %v1339_v22, 0.0 }
 0x1a0   : > { %v1807_v55 = vsel %vm1214_vm0, %v1804_v24, %v1806_v43  ;;  %v1690_v52 = vmax.f32 %v1432_v45, 0.0 }
 0x1a1   : > { %v11627_v62 = vmax.f32 %v1664_v48, %v1807_v55  ;;  %v1434_v42 = vpop.f32.mrf.mxu0  ;;  %v1668_v55 = vmax.f32 %v1344_v40, 0.0 }
 0x1a2   : > { %v1808_v58 = vrot.slane %v1690_v52, 4  ;;  %v1435_v32 = vadd.f32 %v11447_v31, %v1434_v42  ;;  %v1347_v52 = vadd.f32 %v11447_v31, %v11441_v28 }
 0x1a3   : > { %v9950_v10 = vpop.f32.mrf.mxu0 }
 0x1a4   : > { %v1809_v12 = vsel %vm1214_vm0, %v1806_v43, %v1808_v58  ;;  %v1691_v14 = vmax.f32 %v1435_v32, 0.0 }
 0x1a5   : > { %v11638_v11 = vmax.f32 %v1665_v9, %v1809_v12  ;;  %v1439_v15 = vpop.f32.mrf.mxu0  ;;  %10048 = vmatmul.mubr.msk.bf16.gmra.mxu0 %vm1066_vm3, %v10534_v8  ;;  %v1669_v9 = vmax.f32 %v1347_v52, 0.0 }
 0x1a6   : > { %v1810_v54 = vrot.slane %v1691_v14, 4  ;;  %v1440_v19 = vadd.f32 %v11447_v31, %v1439_v15 }
 0x1a7   : > { %v9953_v24 = vpop.f32.mrf.mxu0 }
 0x1a8   : > { %v1811_v21 = vsel %vm1214_vm0, %v1808_v58, %v1810_v54  ;;  %v1692_v23 = vmax.f32 %v1440_v19, 0.0 }
 0x1a9   : > { %v11713_v57 = vmax.f32 %v1666_v20, %v1811_v21  ;;  %v1442_v47 = vpop.f32.mrf.mxu0 }
 0x1aa   : > { %v1812_v25 = vrot.slane %v1692_v23, 4  ;;  %v1443_v36 = vadd.f32 %v11447_v31, %v1442_v47 }
 0x1ab   : > { %14826 = vst [vmem:[#allocation15_spill] sm:$0xff] %v11713_v57  ;;  %v9954_v6 = vpop.f32.mrf.mxu0 }
 0x1ac   : > { %v1813_v43 = vsel %vm1214_vm0, %v1810_v54, %v1812_v25  ;;  %v1693_v45 = vmax.f32 %v1443_v36, 0.0 }
 0x1ad   : > { %v11719_v16 = vmax.f32 %v1667_v38, %v1813_v43  ;;  %v1447_v48 = vpop.f32.mrf.mxu0 }
 0x1ae   : > { %v1814_v49 = vrot.slane %v1693_v45, 4  ;;  %v1448_v53 = vadd.f32 %v11447_v31, %v1447_v48 }
 0x1af   : > { %14827 = vst [vmem:[#allocation16_spill] sm:$0xff] %v11719_v16  ;;  %v9957_v42 = vpop.f32.mrf.mxu0 }
 0x1b0   : > { %v1815_v8 = vsel %vm1214_vm0, %v1812_v25, %v1814_v49  ;;  %v1694_v58 = vmax.f32 %v1448_v53, 0.0 }
 0x1b1   : > { %v11725_v32 = vmax.f32 %v1668_v55, %v1815_v8  ;;  %v11727_v26 = vpop.f32.mrf.mxu0 }
 0x1b2   : > { %v1816_v3 = vrot.slane %v1694_v58, 4 }
 0x1b3   : > { %14828 = vst [vmem:[#allocation17_spill] sm:$0xff] %v11725_v32  ;;  %v9958_v18 = vpop.f32.mrf.mxu0 }
 0x1b4   : > { %v1817_v10 = vsel %vm1214_vm0, %v1814_v49, %v1816_v3 }
 0x1b5   : > { %v11730_v12 = vpop.f32.mrf.mxu0  ;;  %v1866_v14 = vmax.f32 %v1669_v9, %v1817_v10 }
 0x1b7   : > { %v9961_v15 = vpop.f32.mrf.mxu0 }
 0x1b9   : > { %v11732_v54 = vpop.f32.mrf.mxu0 }
 0x1bb   : > { %v9962_v28 = vpop.f32.mrf.mxu0 }
 0x1bd   : > { %v11734_v19 = vpop.f32.mrf.mxu0 }
 0x1bf   : > { %v9965_v20 = vpop.f32.mrf.mxu0 }
 0x1c1   : > { %v11736_v22 = vpop.f32.mrf.mxu0 }
 0x1c3   : > { %v9966_v24 = vpop.f32.mrf.mxu0 }
 0x1c5   : > { %v11738_v21 = vpop.f32.mrf.mxu0 }
 0x1c7   : > { %v9969_v23 = vpop.f32.mrf.mxu0 }
 0x1c9   : > { %v11740_v47 = vpop.f32.mrf.mxu0 }
 0x1cb   : > { %v9970_v25 = vpop.f32.mrf.mxu0 }
 0x1cd   : > { %v11742_v36 = vpop.f32.mrf.mxu0 }
 0x1cf   : > { %v9973_v38 = vpop.f32.mrf.mxu0 }
 0x1d1   : > { %v11744_v40 = vpop.f32.mrf.mxu0 }
 0x1d3   : > { %v9974_v6 = vpop.f32.mrf.mxu0 }
 0x1d5   : > { %v11746_v43 = vpop.f32.mrf.mxu0 }
 0x1d7   : > { %v9977_v45 = vpop.f32.mrf.mxu0 }
 0x1d9   : > { %v11748_v48 = vpop.f32.mrf.mxu0 }
 0x1db   : > { %v9978_v49 = vpop.f32.mrf.mxu0 }
 0x1dd   : > { %v11750_v53 = vpop.f32.mrf.mxu0 }
 0x1df   : > { %v9981_v55 = vpop.f32.mrf.mxu0 }
 0x1e1   : > { %v11752_v52 = vpop.f32.mrf.mxu0 }
 0x1e3   : > { %v9982_v42 = vpop.f32.mrf.mxu0 }
 0x1e5   : > { %v11754_v8 = vpop.f32.mrf.mxu0 }
 0x1e7   : > { %v9985_v58 = vpop.f32.mrf.mxu0 }
 0x1e9   : > { %v11756_v9 = vpop.f32.mrf.mxu0 }
 0x1eb   : > { %v9986_v18 = vpop.f32.mrf.mxu0 }
 0x1ed   : > { %v11758_v10 = vpop.f32.mrf.mxu0 }
 0x1ef   : > { %v9989_v15 = vpop.f32.mrf.mxu0 }
 0x1f1   : > { %v11760_v28 = vpop.f32.mrf.mxu0 }
 0x1f3   : > { %v9990_v20 = vpop.f32.mrf.mxu0 }
 0x1f5   : > { %v11762_v24 = vpop.f32.mrf.mxu0 }
 0x1f7   : > { %v9993_v23 = vpop.f32.mrf.mxu0 }
 0x1f9   : > { %v11764_v25 = vpop.f32.mrf.mxu0 }
 0x1fb   : > { %v9994_v38 = vpop.f32.mrf.mxu0 }
 0x1fd   : > { %v11766_v6 = vpop.f32.mrf.mxu0 }
 0x1ff   : > { %v9997_v45 = vpop.f32.mrf.mxu0 }
 0x201   : > { %v11768_v49 = vpop.f32.mrf.mxu0 }
 0x203   : > { %v9998_v55 = vpop.f32.mrf.mxu0 }
 0x205   : > { %v11770_v42 = vpop.f32.mrf.mxu0 }
 0x207   : > { %v10001_v58 = vpop.f32.mrf.mxu0 }
 0x208   : > { %v14830_v58 = vmax.f32 %v11451_v35, 0.0  ;;  %v1456_v35 = vadd.f32 %v11447_v31, %v11730_v12 }
 0x209   : > { %v11772_v18 = vpop.f32.mrf.mxu0 }
 0x20a   : > { %v1867_v33 = vmax.f32 %v14830_v58, %v1816_v3 }
 0x20b   : > { %v10002_v15 = vpop.f32.mrf.mxu0 }
 0x20d   : > { %v1543_v2 = vpop.f32.mrf.mxu0 }
 0x20e   : > { %v1544_v20 = vadd.f32 %v11447_v31, %v1543_v2 }
 0x20f   : > { %v10005_v0 = vpop.f32.mrf.mxu0 }
 0x210   : > { %v1718_v23 = vmax.f32 %v1544_v20, 0.0  ;;  %v1451_v0 = vadd.f32 %v11447_v31, %v11727_v26 }
 0x211   : > { %v1546_v41 = vpop.f32.mrf.mxu0 }
 0x212   : > { %v1990_v38 = vmax.f32 %v1718_v23, %v11593_v56  ;;  %v1547_v4 = vadd.f32 %v11447_v31, %v1546_v41 }
 0x213   : > { %v10006_v45 = vpop.f32.mrf.mxu0 }
 0x214   : > { %v11777_v32 = vmax.f32 %v1866_v14, %v1990_v38  ;;  %v1719_v55 = vmax.f32 %v1547_v4, 0.0  ;;  %v1695_v38 = vmax.f32 %v1451_v0, 0.0 }
 0x215   : > { %v1551_v16 = vpop.f32.mrf.mxu0 }
 0x216   : > { %14829 = vst [vmem:[#allocation18_spill] sm:$0xff] %v11777_v32  ;;  %v1991_v15 = vmax.f32 %v1719_v55, %v11584_v46  ;;  %v1552_v57 = vadd.f32 %v11447_v31, %v1551_v16  ;;  %v1893_v23 = vrot.slane %v1719_v55, 4 }
 0x217   : > { %v10009_v2 = vpop.f32.mrf.mxu0 }
 0x218   : > { %v11785_v20 = vmax.f32 %v1867_v33, %v1991_v15  ;;  %v1720_v56 = vmax.f32 %v1552_v57, 0.0  ;;  %v1696_v15 = vmax.f32 %v1456_v35, 0.0  ;;  %v1459_v57 = vadd.f32 %v11447_v31, %v11732_v54 }
 0x219   : > { %v1554_v41 = vpop.f32.mrf.mxu0 }
 0x21a   : > { %14831 = vst [vmem:[#allocation19_spill] sm:$0xff] %v11785_v20  ;;  %v1894_v14 = vrot.slane %v1720_v56, 4  ;;  %v1555_v4 = vadd.f32 %v11447_v31, %v1554_v41 }
 0x21b   : > { %v10010_v3 = vpop.f32.mrf.mxu0 }
 0x21c   : > { %v1895_v46 = vsel %vm1214_vm0, %v1893_v23, %v1894_v14  ;;  %v1721_v16 = vmax.f32 %v1555_v4, 0.0  ;;  %v1464_v3 = vadd.f32 %v11447_v31, %v11734_v19 }
 0x21d   : > { %v1967_v45 = vmax.f32 %v1695_v38, %v1895_v46  ;;  %v1559_v58 = vpop.f32.mrf.mxu0  ;;  %v1697_v38 = vmax.f32 %v1459_v57, 0.0  ;;  %v1467_v57 = vadd.f32 %v11447_v31, %v11736_v22  ;;  %v1472_v22 = vadd.f32 %v11447_v31, %v11738_v21 }
 0x21e   : > { %v1896_v26 = vrot.slane %v1721_v16, 4  ;;  %v1560_v33 = vadd.f32 %v11447_v31, %v1559_v58 }
 0x21f   : > { %v11795_v55 = vmax.f32 %v11469_v63, %v1967_v45  ;;  %v10013_v0 = vpop.f32.mrf.mxu0 }
 0x220   : > { %v1897_v2 = vsel %vm1214_vm0, %v1894_v14, %v1896_v26  ;;  %v1722_v12 = vmax.f32 %v1560_v33, 0.0 }
 0x221   : > { %v1968_v56 = vmax.f32 %v1696_v15, %v1897_v2  ;;  %v1562_v41 = vpop.f32.mrf.mxu0  ;;  %v1698_v15 = vmax.f32 %v1464_v3, 0.0  ;;  %v14832_v2 = vmov 0.0  }
 0x222   : > { %v1898_v23 = vrot.slane %v1722_v12, 4  ;;  %v1563_v4 = vadd.f32 %v11447_v31, %v1562_v41 }
 0x223   : > { %v11802_v35 = vmax.f32 %v11476_v17, %v1968_v56  ;;  %v10014_v54 = vpop.f32.mrf.mxu0 }
 0x224   : > { %v1899_v63 = vsel %vm1214_vm0, %v1896_v26, %v1898_v23  ;;  %v1723_v46 = vmax.f32 %v1563_v4, 0.0 }
 0x225   : > { %v2017_v14 = vpack.c.bf16 %v11802_v35, %v11795_v55  ;;  %v1969_v16 = vmax.f32 %v1697_v38, %v1899_v63  ;;  %v1567_v45 = vpop.f32.mrf.mxu0  ;;  %v1699_v38 = vmax.f32 %v1467_v57, 0.0 }
 0x226   : > { %v1900_v58 = vrot.slane %v1723_v46, 4  ;;  %v1568_v33 = vadd.f32 %v11447_v31, %v1567_v45 }
 0x227   : > { %v11811_v19 = vmax.f32 %v11485_v30, %v1969_v16  ;;  %v10017_v17 = vpop.f32.mrf.mxu0  ;;  %10060 = vmatmul.mubr.msk.bf16.vlgmr.msra.gmra.mxu1 %vm2053_vm4, %v2017_v14 }
 0x228   : > { %v1901_v26 = vsel %vm1214_vm0, %v1898_v23, %v1900_v58  ;;  %v1724_v0 = vmax.f32 %v1568_v33, 0.0  ;;  %10063 = vmatprep.mubr.msk.bf16.mxu1 %vm11049_vm2, %v14832_v2  ;;  %v1700_v33 = vmax.f32 %v1472_v22, 0.0 }
 0x229   : > { %v1970_v12 = vmax.f32 %v1698_v15, %v1901_v26  ;;  %v1570_v56 = vpop.f32.mrf.mxu0  ;;  %v1475_v15 = vadd.f32 %v11447_v31, %v11740_v47  ;;  %v1480_v47 = vadd.f32 %v11447_v31, %v11742_v36 }
 0x22a   : > { %v1902_v41 = vrot.slane %v1724_v0, 4  ;;  %v1571_v4 = vadd.f32 %v11447_v31, %v1570_v56 }
 0x22b   : > { %v11821_v30 = vmax.f32 %v11492_v50, %v1970_v12  ;;  %v10018_v3 = vpop.f32.mrf.mxu0  ;;  %v1701_v56 = vmax.f32 %v1475_v15, 0.0 }
 0x22c   : > { %v1903_v54 = vsel %vm1214_vm0, %v1900_v58, %v1902_v41  ;;  %v1725_v23 = vmax.f32 %v1571_v4, 0.0 }
 0x22d   : > { %v1971_v63 = vmax.f32 %v1699_v38, %v1903_v54  ;;  %v1575_v46 = vpop.f32.mrf.mxu0  ;;  %v2018_v14 = vpack.c.bf16 %v11821_v30, %v11811_v19 }
 0x22e   : > { %v1904_v16 = vrot.slane %v1725_v23, 4  ;;  %v1576_v45 = vadd.f32 %v11447_v31, %v1575_v46  ;;  %v1702_v46 = vmax.f32 %v1480_v47, 0.0 }
 0x22f   : > { %v11830_v21 = vmax.f32 %v11501_v61, %v1971_v63  ;;  %v10021_v50 = vpop.f32.mrf.mxu0  ;;  %10064 = vmatmul.mubr.msk.bf16.gmra.mxu1 %vm2053_vm4, %v2018_v14  ;;  %v1483_v14 = vadd.f32 %v11447_v31, %v11744_v40  ;;  %v1488_v40 = vadd.f32 %v11447_v31, %v11746_v43 }
 0x230   : > { %v1905_v58 = vsel %vm1214_vm0, %v1902_v41, %v1904_v16  ;;  %v1726_v57 = vmax.f32 %v1576_v45, 0.0  ;;  %10067 = vmatprep.mubr.msk.bf16.mxu1 %vm11049_vm2, %v14832_v2 }
 0x231   : > { %v1972_v17 = vmax.f32 %v1700_v33, %v1905_v58  ;;  %v1578_v26 = vpop.f32.mrf.mxu0 }
 0x232   : > { %v1906_v0 = vrot.slane %v1726_v57, 4  ;;  %v1579_v12 = vadd.f32 %v11447_v31, %v1578_v26  ;;  %v1703_v57 = vmax.f32 %v1483_v14, 0.0 }
 0x233   : > { %v11840_v61 = vmax.f32 %v11508_v34, %v1972_v17  ;;  %v10022_v4 = vpop.f32.mrf.mxu0 }
 0x234   : > { %v1907_v38 = vsel %vm1214_vm0, %v1904_v16, %v1906_v0  ;;  %v1727_v41 = vmax.f32 %v1579_v12, 0.0 }
 0x235   : > { %v1973_v22 = vmax.f32 %v1701_v56, %v1907_v38  ;;  %v1583_v3 = vpop.f32.mrf.mxu0  ;;  %v2019_v54 = vpack.c.bf16 %v11840_v61, %v11830_v21 }
 0x236   : > { %v1908_v23 = vrot.slane %v1727_v41, 4  ;;  %v1584_v63 = vadd.f32 %v11447_v31, %v1583_v3  ;;  %v1704_v41 = vmax.f32 %v1488_v40, 0.0 }
 0x237   : > { %v11849_v36 = vmax.f32 %v11517_v29, %v1973_v22  ;;  %v10025_v34 = vpop.f32.mrf.mxu0  ;;  %10068 = vmatmul.mubr.msk.bf16.gmra.mxu1 %vm2053_vm4, %v2019_v54  ;;  %v1491_v22 = vadd.f32 %v11447_v31, %v11748_v48  ;;  %v1496_v48 = vadd.f32 %v11447_v31, %v11750_v53 }
 0x238   : > { %v1909_v16 = vsel %vm1214_vm0, %v1906_v0, %v1908_v23  ;;  %v1728_v45 = vmax.f32 %v1584_v63, 0.0  ;;  %10071 = vmatprep.mubr.msk.bf16.mxu1 %vm11049_vm2, %v14832_v2 }
 0x239   : > { %v1974_v33 = vmax.f32 %v1702_v46, %v1909_v16  ;;  %v1586_v15 = vpop.f32.mrf.mxu0  ;;  %v1705_v34 = vmax.f32 %v1491_v22, 0.0 }
 0x23a   : > { %v1910_v50 = vrot.slane %v1728_v45, 4  ;;  %v1587_v58 = vadd.f32 %v11447_v31, %v1586_v15 }
 0x23b   : > { %v11859_v29 = vmax.f32 %v11524_v39, %v1974_v33  ;;  %v10026_v17 = vpop.f32.mrf.mxu0 }
 0x23c   : > { %v1911_v26 = vsel %vm1214_vm0, %v1908_v23, %v1910_v50  ;;  %v1729_v0 = vmax.f32 %v1587_v58, 0.0  ;;  %v1706_v17 = vmax.f32 %v1496_v48, 0.0 }
 0x23d   : > { %v1975_v12 = vmax.f32 %v1703_v57, %v1911_v26  ;;  %v1591_v56 = vpop.f32.mrf.mxu0  ;;  %v2020_v47 = vpack.c.bf16 %v11859_v29, %v11849_v36  ;;  %v1499_v26 = vadd.f32 %v11447_v31, %v11752_v52  ;;  %v1504_v52 = vadd.f32 %v11447_v31, %v11754_v8 }
 0x23e   : > { %v1912_v4 = vrot.slane %v1729_v0, 4  ;;  %v1592_v38 = vadd.f32 %v11447_v31, %v1591_v56 }
 0x23f   : > { %v11868_v43 = vmax.f32 %v11533_v60, %v1975_v12  ;;  %v10029_v39 = vpop.f32.mrf.mxu0  ;;  %10072 = vmatmul.mubr.msk.bf16.gmra.mxu1 %vm2053_vm4, %v2020_v47  ;;  %v1708_v8 = vmax.f32 %v1504_v52, 0.0 }
 0x240   : > { %v1913_v3 = vsel %vm1214_vm0, %v1910_v50, %v1912_v4  ;;  %v1730_v54 = vmax.f32 %v1592_v38, 0.0  ;;  %10075 = vmatprep.mubr.msk.bf16.mxu1 %vm11049_vm2, %v14832_v2 }
 0x241   : > { %v1976_v23 = vmax.f32 %v1704_v41, %v1913_v3  ;;  %v1594_v63 = vpop.f32.mrf.mxu0  ;;  %v1707_v41 = vmax.f32 %v1499_v26, 0.0 }
 0x242   : > { %v1914_v46 = vrot.slane %v1730_v54, 4  ;;  %v1595_v14 = vadd.f32 %v11447_v31, %v1594_v63 }
 0x243   : > { %v11878_v60 = vmax.f32 %v11540_v44, %v1976_v23  ;;  %v10030_v16 = vpop.f32.mrf.mxu0 }
 0x244   : > { %v1915_v45 = vsel %vm1214_vm0, %v1912_v4, %v1914_v46  ;;  %v1731_v33 = vmax.f32 %v1595_v14, 0.0  ;;  %v11905_v14 = vld [vmem:[%s14823_s6] ss:$0 sm:$0xff]  ;;  %s14842_s6 = sld [smem:[#allocation28_spill]] }
 0x245   : > { %v1977_v15 = vmax.f32 %v1705_v34, %v1915_v45  ;;  %v1599_v50 = vpop.f32.mrf.mxu0  ;;  %v2021_v58 = vpack.c.bf16 %v11878_v60, %v11868_v43 }
 0x246   : > { %v1916_v57 = vrot.slane %v1731_v33, 4  ;;  %v1600_v40 = vadd.f32 %v11447_v31, %v1599_v50 }
 0x247   : > { %v11887_v53 = vmax.f32 %v11549_v27, %v1977_v15  ;;  %v10033_v44 = vpop.f32.mrf.mxu0  ;;  %10076 = vmatmul.mubr.msk.bf16.gmra.mxu1 %vm2053_vm4, %v2021_v58 }
 0x248   : > { %v1917_v0 = vsel %vm1214_vm0, %v1914_v46, %v1916_v57  ;;  %v1732_v12 = vmax.f32 %v1600_v40, 0.0  ;;  %10079 = vmatprep.mubr.msk.bf16.mxu1 %vm11049_vm2, %v14832_v2 }
 0x249   : > { %v1978_v56 = vmax.f32 %v1706_v17, %v1917_v0  ;;  %v1602_v47 = vpop.f32.mrf.mxu0 }
 0x24a   : > { %v1918_v4 = vrot.slane %v1732_v12, 4  ;;  %v1603_v38 = vadd.f32 %v11447_v31, %v1602_v47 }
 0x24b   : > { %v11897_v27 = vmax.f32 %v11556_v59, %v1978_v56  ;;  %v10034_v22 = vpop.f32.mrf.mxu0  ;;  %v1507_v59 = vadd.f32 %v11905_v14, %v11756_v9  ;;  %v1512_v9 = vadd.f32 %v11905_v14, %v11758_v10 }
 0x24c   : > { %v1919_v39 = vsel %vm1214_vm0, %v1916_v57, %v1918_v4  ;;  %v1733_v3 = vmax.f32 %v1603_v38, 0.0  ;;  %v1515_v38 = vadd.f32 %v11905_v14, %v11760_v28  ;;  %v1520_v28 = vadd.f32 %v11905_v14, %v11762_v24 }
 0x24d   : > { %v1979_v54 = vmax.f32 %v1707_v41, %v1919_v39  ;;  %v1607_v23 = vpop.f32.mrf.mxu0  ;;  %v2022_v63 = vpack.c.bf16 %v11897_v27, %v11887_v53  ;;  %v1709_v57 = vmax.f32 %v1507_v59, 0.0 }
 0x24e   : > { %v1920_v46 = vrot.slane %v1733_v3, 4  ;;  %v1608_v31 = vadd.f32 %v11905_v14, %v1607_v23  ;;  %v1711_v23 = vmax.f32 %v1515_v38, 0.0 }
 0x24f   : > { %v11911_v34 = vmax.f32 %v11566_v7, %v1979_v54  ;;  %v10037_v48 = vpop.f32.mrf.mxu0  ;;  %10080 = vmatmul.mubr.msk.bf16.gmra.mxu1 %vm2053_vm4, %v2022_v63 }
 0x250   : > { %v1921_v16 = vsel %vm1214_vm0, %v1918_v4, %v1920_v46  ;;  %v1734_v45 = vmax.f32 %v1608_v31, 0.0  ;;  %10083 = vmatprep.mubr.msk.bf16.mxu1 %vm11049_vm2, %v14832_v2  ;;  %v1710_v4 = vmax.f32 %v1512_v9, 0.0 }
 0x251   : > { %v1980_v33 = vmax.f32 %v1708_v8, %v1921_v16  ;;  %v1610_v15 = vpop.f32.mrf.mxu0 }
 0x252   : > { %v1922_v50 = vrot.slane %v1734_v45, 4  ;;  %v1611_v58 = vadd.f32 %v11905_v14, %v1610_v15  ;;  %v1523_v15 = vadd.f32 %v11905_v14, %v11764_v25  ;;  %v1528_v25 = vadd.f32 %v11905_v14, %v11766_v6 }
 0x253   : > { %v11921_v7 = vmax.f32 %v11574_v37, %v1980_v33  ;;  %v10038_v40 = vpop.f32.mrf.mxu0  ;;  %v1712_v33 = vmax.f32 %v1520_v28, 0.0 }
 0x254   : > { %v1923_v17 = vsel %vm1214_vm0, %v1920_v46, %v1922_v50  ;;  %v1735_v26 = vmax.f32 %v1611_v58, 0.0 }
 0x255   : > { %v1981_v44 = vmax.f32 %v1709_v57, %v1923_v17  ;;  %v1615_v0 = vpop.f32.mrf.mxu0  ;;  %v2023_v12 = vpack.c.bf16 %v11921_v7, %v11911_v34 }
 0x256   : > { %v1924_v56 = vrot.slane %v1735_v26, 4  ;;  %v1616_v47 = vadd.f32 %v11905_v14, %v1615_v0  ;;  %v1713_v26 = vmax.f32 %v1523_v15, 0.0 }
 0x257   : > { %v11930_v10 = vmax.f32 %v11587_v51, %v1981_v44  ;;  %v10041_v37 = vpop.f32.mrf.mxu0  ;;  %10084 = vmatmul.mubr.msk.bf16.gmra.mxu1 %vm2053_vm4, %v2023_v12 }
 0x258   : > { %v1925_v41 = vsel %vm1214_vm0, %v1922_v50, %v1924_v56  ;;  %v1736_v52 = vmax.f32 %v1616_v47, 0.0  ;;  %10087 = vmatprep.mubr.msk.bf16.mxu1 %vm11049_vm2, %v14832_v2 }
 0x259   : > { %v1982_v22 = vmax.f32 %v1710_v4, %v1925_v41  ;;  %v1618_v39 = vpop.f32.mrf.mxu0  ;;  %v1714_v41 = vmax.f32 %v1528_v25, 0.0 }
 0x25a   : > { %v1926_v3 = vrot.slane %v1736_v52, 4  ;;  %v1619_v54 = vadd.f32 %v11905_v14, %v1618_v39  ;;  %v1531_v52 = vadd.f32 %v11905_v14, %v11768_v49  ;;  %v1536_v49 = vadd.f32 %v11905_v14, %v11770_v42 }
 0x25b   : > { %v11940_v51 = vmax.f32 %v11599_v5, %v1982_v22  ;;  %v10042_v63 = vpop.f32.mrf.mxu0 }
 0x25c   : > { %v1927_v46 = vsel %vm1214_vm0, %v1924_v56, %v1926_v3  ;;  %v1737_v31 = vmax.f32 %v1619_v54, 0.0  ;;  %v1715_v63 = vmax.f32 %v1531_v52, 0.0 }
 0x25d   : > { %v1983_v8 = vmax.f32 %v1711_v23, %v1927_v46  ;;  %v1623_v59 = vpop.f32.mrf.mxu0  ;;  %v2024_v48 = vpack.c.bf16 %v11940_v51, %v11930_v10 }
 0x25e   : > { %v1928_v16 = vrot.slane %v1737_v31, 4  ;;  %v1624_v45 = vadd.f32 %v11905_v14, %v1623_v59 }
 0x25f   : > { %v11949_v24 = vmax.f32 %v11608_v1, %v1983_v8  ;;  %v10045_v5 = vpop.f32.mrf.mxu0  ;;  %10088 = vmatmul.mubr.msk.bf16.gmra.mxu1 %vm2053_vm4, %v2024_v48 }
 0x260   : > { %v1929_v50 = vsel %vm1214_vm0, %v1926_v3, %v1928_v16  ;;  %v1738_v58 = vmax.f32 %v1624_v45, 0.0  ;;  %10091 = vmatprep.mubr.msk.bf16.mxu1 %vm11049_vm2, %v14832_v2  ;;  %v14834_v5 = vld [vmem:[#allocation15_spill] sm:$0xff] }
 0x261   : > { %v1984_v57 = vmax.f32 %v1712_v33, %v1929_v50  ;;  %v1626_v9 = vpop.f32.mrf.mxu0  ;;  %v1716_v33 = vmax.f32 %v1536_v49, 0.0 }
 0x262   : > { %v1930_v40 = vrot.slane %v1738_v58, 4  ;;  %v1627_v17 = vadd.f32 %v11905_v14, %v1626_v9 }
 0x263   : > { %v11959_v1 = vmax.f32 %v11615_v13, %v1984_v57  ;;  %v10046_v44 = vpop.f32.mrf.mxu0  ;;  %v14837_v57 = vld [vmem:[#allocation16_spill] sm:$0xff] }
 0x264   : > { %v1931_v0 = vsel %vm1214_vm0, %v1928_v16, %v1930_v40  ;;  %v1739_v12 = vmax.f32 %v1627_v17, 0.0  ;;  %v2029_v44 = vpack.c.bf16 %v11785_v20, %v11785_v20 }
 0x265   : > { %v1985_v56 = vmax.f32 %v1713_v26, %v1931_v0  ;;  %v1631_v47 = vpop.f32.mrf.mxu0  ;;  %v2025_v4 = vpack.c.bf16 %v11959_v1, %v11949_v24  ;;  %v14788_v0 = vmov 0  }
 0x266   : > { %v1932_v38 = vrot.slane %v1739_v12, 4  ;;  %v1632_v37 = vadd.f32 %v11905_v14, %v1631_v47  ;;  %2545 = vmatprep.subr.bf16.mxu1 %v14788_v0  ;;  %v12017_v12 = vld [vmem:[%s14841_s0] ss:$0 sm:$0xff] }
 0x267   : > { %v11968_v6 = vmax.f32 %v11627_v62, %v1985_v56  ;;  %v10049_v13 = vpop.f32.mrf.mxu0  ;;  %10092 = vmatmul.mubr.msk.bf16.gmra.mxu1 %vm2053_vm4, %v2025_v4  ;;  %v1539_v62 = vadd.f32 %v11905_v14, %v11772_v18 }
 0x268   : > { %v1933_v22 = vsel %vm1214_vm0, %v1930_v40, %v1932_v38  ;;  %v1740_v39 = vmax.f32 %v1632_v37, 0.0  ;;  %10095 = vmatprep.mubr.msk.bf16.mxu1 %vm11049_vm2, %v14832_v2  ;;  %v14839_v40 = vld [vmem:[#allocation17_spill] sm:$0xff] }
 0x269   : > { %v1986_v3 = vmax.f32 %v1714_v41, %v1933_v22  ;;  %v1634_v54 = vpop.f32.mrf.mxu0  ;;  %v1717_v15 = vmax.f32 %v1539_v62, 0.0 }
 0x26a   : > { %v1934_v23 = vrot.slane %v1740_v39, 4  ;;  %v1635_v28 = vadd.f32 %v11905_v14, %v1634_v54 }
 0x26b   : > { %v11980_v46 = vmax.f32 %v11638_v11, %v1986_v3  ;;  %v10050_v31 = vpop.f32.mrf.mxu0  ;;  %v14836_v11 = vld [vmem:[#allocation14_spill] sm:$0xff] }
 0x26c   : > { %v1935_v8 = vsel %vm1214_vm0, %v1932_v38, %v1934_v23  ;;  %v1741_v59 = vmax.f32 %v1635_v28, 0.0  ;;  %v10539_v38 = vld [vmem:[%s14842_s6 + $0x4] ss:$8 sps:$4 sm:$0xff]  }
 0x26d   : > { %14833 = vst [vmem:[#allocation20_spill] sm:$0xff] %v11980_v46  ;;  %v1987_v48 = vmax.f32 %v1715_v63, %v1935_v8  ;;  %v2026_v16 = vpack.c.bf16 %v11980_v46, %v11968_v6 }
 0x26e   : > { %v1936_v45 = vrot.slane %v1741_v59, 4 }
 0x26f   : > { %v11986_v50 = vmax.f32 %v14834_v5, %v1987_v48  ;;  %10096 = vmatmul.mubr.msk.bf16.gmra.mxu1 %vm2053_vm4, %v2026_v16 }
 0x270   : > { %v1937_v42 = vsel %vm1214_vm0, %v1934_v23, %v1936_v45  ;;  %v1939_v18 = vsel %vm1214_vm0, %v1936_v45, %v14836_v11  ;;  %10099 = vmatprep.mubr.msk.bf16.mxu1 %vm11049_vm2, %v14832_v2  ;;  %vm3604_vm0 = vcmask 261126  }
 0x271   : > { %14835 = vst [vmem:[#allocation15_spill] sm:$0xff] %v11986_v50  ;;  %v1988_v14 = vmax.f32 %v1716_v33, %v1937_v42  ;;  %v1989_v58 = vmax.f32 %v1717_v15, %v1939_v18 }
 0x273   : > { %v11995_v9 = vmax.f32 %v14837_v57, %v1988_v14  ;;  %v11998_v17 = vmax.f32 %v14839_v40, %v1989_v58 }
 0x275   : > { %14838 = vst [vmem:[#allocation14_spill] sm:$0xff] %v11995_v9  ;;  %14840 = vst [vmem:[#allocation16_spill] sm:$0xff] %v11998_v17  ;;  %v2027_v26 = vpack.c.bf16 %v11995_v9, %v11986_v50  ;;  %v2028_v25 = vpack.c.bf16 %v11777_v32, %v11998_v17 }
 0x277   : > { %10100 = vmatmul.mubr.msk.bf16.gmra.mxu1 %vm2053_vm4, %v2027_v26 }
 0x278   : > { %10103 = vmatprep.mubr.msk.bf16.mxu1 %vm11049_vm2, %v14832_v2 }
 0x27f   : > { %10104 = vmatmul.mubr.msk.bf16.gmra.mxu1 %vm2053_vm4, %v2028_v25 }
 0x280   : > { %10107 = vmatprep.mubr.msk.bf16.mxu1 %vm11049_vm2, %v14832_v2 }
 0x287   : > { %10108 = vmatmul.mubr.msk.bf16.gmra.mxu1 %vm2053_vm4, %v2029_v44 }
 0x288   : > { %9155 = vmatprep.mubr.msk.bf16.mxu1 %vm2526_vm5, %v10539_v38 }
 0x2e7   : > { %v2127_v56 = vpop.f32.mrf.mxu1 }
 0x2e8   : > { %v2128_v4 = vadd.f32 %v12017_v12, %v2127_v56 }
 0x2e9   : > { %v10061_v47 = vpop.f32.mrf.mxu1 }
 0x2ea   : > { %v2253_v13 = vrot.slane %v2128_v4, 1 }
 0x2eb   : > { %v2130_v37 = vpop.f32.mrf.mxu1 }
 0x2ec   : > { %v2131_v41 = vadd.f32 %v12017_v12, %v2130_v37 }
 0x2ed   : > { %v10062_v52 = vpop.f32.mrf.mxu1 }
 0x2ee   : > { %v2254_v22 = vrot.slane %v2131_v41, 1  ;;  %v2609_v39 = vpack.c.bf16 %v2131_v41, %v2128_v4 }
 0x2ef   : > { %v2135_v3 = vpop.f32.mrf.mxu1 }
 0x2f0   : > { %v2255_v54 = vsel %vm2252_vm6, %v2253_v13, %v2254_v22  ;;  %v2136_v23 = vadd.f32 %v12017_v12, %v2135_v3  ;;  %2639 = vrot.lane.b32.xlu0 %v2609_v39, %s14790_s2 }
 0x2f1   : > { %v2321_v28 = vmax.f32 %v2128_v4, %v2255_v54  ;;  %v10065_v63 = vpop.f32.mrf.mxu1 }
 0x2f2   : > { %v2256_v49 = vrot.slane %v2136_v23, 1 }
 0x2f3   : > { %v2138_v62 = vpop.f32.mrf.mxu1 }
 0x2f4   : > { %v2257_v31 = vsel %vm2252_vm6, %v2254_v22, %v2256_v49  ;;  %v2139_v8 = vadd.f32 %v12017_v12, %v2138_v62 }
 0x2f5   : > { %v2322_v59 = vmax.f32 %v2131_v41, %v2257_v31  ;;  %v10066_v48 = vpop.f32.mrf.mxu1 }
 0x2f6   : > { %v2258_v16 = vrot.slane %v2139_v8, 1  ;;  %v2610_v45 = vpack.c.bf16 %v2139_v8, %v2136_v23 }
 0x2f7   : > { %v2143_v33 = vpop.f32.mrf.mxu1  ;;  %v2381_v14 = vrot.slane %v2322_v59, 6 }
 0x2f8   : > { %v2259_v15 = vsel %vm2252_vm6, %v2256_v49, %v2258_v16  ;;  %v2144_v5 = vadd.f32 %v12017_v12, %v2143_v33  ;;  %2641 = vrot.lane.b32.xlu0 %v2610_v45, %s14790_s2 }
 0x2f9   : > { %v2323_v42 = vmax.f32 %v2136_v23, %v2259_v15  ;;  %v10069_v11 = vpop.f32.mrf.mxu1 }
 0x2fa   : > { %v2260_v18 = vrot.slane %v2144_v5, 1 }
 0x2fb   : > { %v2382_v58 = vrot.slane %v2323_v42, 6  ;;  %v2146_v57 = vpop.f32.mrf.mxu1 }
 0x2fc   : > { %v2261_v40 = vsel %vm2252_vm6, %v2258_v16, %v2260_v18  ;;  %v2147_v26 = vadd.f32 %v12017_v12, %v2146_v57 }
 0x2fd   : > { %v2324_v25 = vmax.f32 %v2139_v8, %v2261_v40  ;;  %v10070_v44 = vpop.f32.mrf.mxu1  ;;  %v2383_v56 = vsel %vm2380_vm7, %v2381_v14, %v2382_v58 }
 0x2fe   : > { %v2262_v47 = vrot.slane %v2147_v26, 1  ;;  %v2611_v4 = vpack.c.bf16 %v2147_v26, %v2144_v5  ;;  %v2451_v38 = vmax.f32 %v2321_v28, %v2383_v56 }
 0x2ff   : > { %v2384_v37 = vrot.slane %v2324_v25, 6  ;;  %v2151_v41 = vpop.f32.mrf.mxu1 }
 0x300   : > { %v2263_v52 = vsel %vm2252_vm6, %v2260_v18, %v2262_v47  ;;  %v2152_v13 = vadd.f32 %v12017_v12, %v2151_v41  ;;  %2643 = vrot.lane.b32.xlu1 %v2611_v4, %s14790_s2 }
 0x301   : > { %v2325_v22 = vmax.f32 %v2144_v5, %v2263_v52  ;;  %v10073_v39 = vpop.f32.mrf.mxu1  ;;  %v2385_v3 = vsel %vm2380_vm7, %v2382_v58, %v2384_v37 }
 0x302   : > { %v2264_v54 = vrot.slane %v2152_v13, 1  ;;  %v2452_v23 = vmax.f32 %v2322_v59, %v2385_v3 }
 0x303   : > { %v2386_v63 = vrot.slane %v2325_v22, 6  ;;  %v2154_v49 = vpop.f32.mrf.mxu1 }
 0x304   : > { %v2265_v62 = vsel %vm2252_vm6, %v2262_v47, %v2264_v54  ;;  %v2155_v28 = vadd.f32 %v12017_v12, %v2154_v49  ;;  %v12042_v31 = vpack.c.bf16 %v2452_v23, %v2451_v38 }
 0x305   : > { %v2326_v8 = vmax.f32 %v2147_v26, %v2265_v62  ;;  %v10074_v48 = vpop.f32.mrf.mxu1  ;;  %v2387_v16 = vsel %vm2380_vm7, %v2384_v37, %v2386_v63 }
 0x306   : > { %v2266_v45 = vrot.slane %v2155_v28, 1  ;;  %v2612_v33 = vpack.c.bf16 %v2155_v28, %v2152_v13  ;;  %v2453_v15 = vmax.f32 %v2323_v42, %v2387_v16 }
 0x307   : > { %v2388_v5 = vrot.slane %v2326_v8, 6  ;;  %v2159_v11 = vpop.f32.mrf.mxu1 }
 0x308   : > { %v2267_v18 = vsel %vm2252_vm6, %v2264_v54, %v2266_v45  ;;  %v2160_v59 = vadd.f32 %v12017_v12, %v2159_v11  ;;  %2645 = vrot.lane.b32.xlu1 %v2612_v33, %s14790_s2 }
 0x309   : > { %v2327_v14 = vmax.f32 %v2152_v13, %v2267_v18  ;;  %v10077_v58 = vpop.f32.mrf.mxu1  ;;  %v2389_v57 = vsel %vm2380_vm7, %v2386_v63, %v2388_v5 }
 0x30a   : > { %v2268_v40 = vrot.slane %v2160_v59, 1  ;;  %v2454_v26 = vmax.f32 %v2324_v25, %v2389_v57 }
 0x30b   : > { %v2390_v44 = vrot.slane %v2327_v14, 6  ;;  %v2162_v56 = vpop.f32.mrf.mxu1 }
 0x30c   : > { %v2269_v47 = vsel %vm2252_vm6, %v2266_v45, %v2268_v40  ;;  %v2163_v42 = vadd.f32 %v12017_v12, %v2162_v56  ;;  %v12051_v4 = vpack.c.bf16 %v2454_v26, %v2453_v15 }
 0x30d   : > { %v2328_v38 = vmax.f32 %v2155_v28, %v2269_v47  ;;  %v10078_v37 = vpop.f32.mrf.mxu1  ;;  %v2391_v41 = vsel %vm2380_vm7, %v2388_v5, %v2390_v44 }
 0x30e   : > { %v2270_v52 = vrot.slane %v2163_v42, 1  ;;  %v2613_v39 = vpack.c.bf16 %v2163_v42, %v2160_v59  ;;  %v2455_v13 = vmax.f32 %v2325_v22, %v2391_v41 }
 0x30f   : > { %v2392_v3 = vrot.slane %v2328_v38, 6  ;;  %v2167_v54 = vpop.f32.mrf.mxu1 }
 0x310   : > { %v2271_v23 = vsel %vm2252_vm6, %v2268_v40, %v2270_v52  ;;  %v12056_v25 = vadd.f32 %v12017_v12, %v2167_v54  ;;  %2647 = vrot.lane.b32.xlu0 %v2613_v39, %s14790_s2 }
 0x311   : > { %v12059_v63 = vmax.f32 %v2160_v59, %v2271_v23  ;;  %v10081_v49 = vpop.f32.mrf.mxu1  ;;  %v2393_v62 = vsel %vm2380_vm7, %v2390_v44, %v2392_v3 }
 0x312   : > { %v2272_v28 = vrot.slane %v12056_v25, 1  ;;  %v2456_v48 = vmax.f32 %v2326_v8, %v2393_v62 }
 0x313   : > { %v2394_v16 = vrot.slane %v12059_v63, 6  ;;  %v2170_v22 = vpop.f32.mrf.mxu1 }
 0x314   : > { %v2273_v45 = vsel %vm2252_vm6, %v2270_v52, %v2272_v28  ;;  %v12068_v33 = vadd.f32 %v12017_v12, %v2170_v22  ;;  %v12070_v15 = vpack.c.bf16 %v2456_v48, %v2455_v13 }
 0x315   : > { %v12072_v5 = vmax.f32 %v2163_v42, %v2273_v45  ;;  %v10082_v11 = vpop.f32.mrf.mxu1  ;;  %v2395_v18 = vsel %vm2380_vm7, %v2392_v3, %v2394_v16 }
 0x316   : > { %v2614_v8 = vpack.c.bf16 %v12068_v33, %v12056_v25  ;;  %v2457_v59 = vmax.f32 %v2327_v14, %v2395_v18 }
 0x317   : > { %v14786_v58 = vrot.slane %v12072_v5, 6  ;;  %v2175_v57 = vpop.f32.mrf.mxu1 }
 0x318   : > { %2649 = vrot.lane.b32.xlu1 %v2614_v8, %s14790_s2  ;;  %v2176_v47 = vadd.f32 %v12017_v12, %v2175_v57 }
 0x319   : > { %v10085_v40 = vpop.f32.mrf.mxu1  ;;  %v2397_v26 = vsel %vm2380_vm7, %v2394_v16, %v14786_v58 }
 0x31a   : > { %v2458_v44 = vmax.f32 %v2328_v38, %v2397_v26 }
 0x31b   : > { %v2178_v56 = vpop.f32.mrf.mxu1 }
 0x31c   : > { %v2179_v42 = vadd.f32 %v12017_v12, %v2178_v56  ;;  %v12084_v37 = vpack.c.bf16 %v2458_v44, %v2457_v59 }
 0x31d   : > { %v10086_v41 = vpop.f32.mrf.mxu1 }
 0x31e   : > { %v2615_v14 = vpack.c.bf16 %v2179_v42, %v2176_v47  ;;  %v2278_v44 = vrot.slane %v2179_v42, 1 }
 0x31f   : > { %v2183_v52 = vpop.f32.mrf.mxu1 }
 0x320   : > { %2651 = vrot.lane.b32.xlu0 %v2615_v14, %s14790_s2  ;;  %v2184_v3 = vadd.f32 %v12017_v12, %v2183_v52 }
 0x321   : > { %v10089_v39 = vpop.f32.mrf.mxu1 }
 0x322   : > { %v2280_v8 = vrot.slane %v2184_v3, 1 }
 0x323   : > { %v2186_v13 = vpop.f32.mrf.mxu1 }
 0x324   : > { %v2187_v54 = vadd.f32 %v12017_v12, %v2186_v13 }
 0x325   : > { %v10090_v23 = vpop.f32.mrf.mxu1 }
 0x326   : > { %v2616_v38 = vpack.c.bf16 %v2187_v54, %v2184_v3  ;;  %v2282_v45 = vrot.slane %v2187_v54, 1  ;;  %v2276_v23 = vrot.slane %v2176_v47, 1 }
 0x327   : > { %v2191_v49 = vpop.f32.mrf.mxu1 }
 0x328   : > { %v2192_v62 = vadd.f32 %v12017_v12, %v2191_v49  ;;  %2653 = vrot.lane.b32.xlu1 %v2616_v38, %s14790_s2  ;;  %v2283_v56 = vsel %vm2252_vm6, %v2280_v8, %v2282_v45  ;;  %v2281_v38 = vsel %vm2252_vm6, %v2278_v44, %v2280_v8 }
 0x329   : > { %v10093_v48 = vpop.f32.mrf.mxu1 }
 0x32a   : > { %v2284_v16 = vrot.slane %v2192_v62, 1  ;;  %v2335_v48 = vmax.f32 %v2184_v3, %v2283_v56 }
 0x32b   : > { %v2194_v22 = vpop.f32.mrf.mxu1 }
 0x32c   : > { %v2195_v11 = vadd.f32 %v12017_v12, %v2194_v22  ;;  %v2285_v59 = vsel %vm2252_vm6, %v2282_v45, %v2284_v16 }
 0x32d   : > { %v10094_v18 = vpop.f32.mrf.mxu1  ;;  %v2336_v52 = vmax.f32 %v2187_v54, %v2285_v59  ;;  %v2334_v59 = vmax.f32 %v2179_v42, %v2281_v38 }
 0x32e   : > { %v2286_v57 = vrot.slane %v2195_v11, 1  ;;  %v2617_v40 = vpack.c.bf16 %v2195_v11, %v2192_v62  ;;  %v2279_v18 = vsel %vm2252_vm6, %v2276_v23, %v2278_v44 }
 0x32f   : > { %v2199_v26 = vpop.f32.mrf.mxu1  ;;  %v2404_v38 = vrot.slane %v2334_v59, 6 }
 0x330   : > { %v2287_v41 = vsel %vm2252_vm6, %v2284_v16, %v2286_v57  ;;  %v12096_v14 = vadd.f32 %v12017_v12, %v2199_v26  ;;  %2655 = vrot.lane.b32.xlu0 %v2617_v40, %s14790_s2  ;;  %v2274_v16 = vrot.slane %v12068_v33, 1  ;;  %v2408_v40 = vrot.slane %v2336_v52, 6 }
 0x331   : > { %v12099_v39 = vmax.f32 %v2192_v62, %v2287_v41  ;;  %v10097_v13 = vpop.f32.mrf.mxu1  ;;  %v2333_v41 = vmax.f32 %v2176_v47, %v2279_v18 }
 0x332   : > { %v14787_v49 = vrot.slane %v12096_v14, 1  ;;  %v2277_v3 = vsel %vm2252_vm6, %v2274_v16, %v2276_v23  ;;  %v2406_v13 = vrot.slane %v2335_v48, 6  ;;  %v2275_v42 = vsel %vm2252_vm6, %v2272_v28, %v2274_v16 }
 0x333   : > { %v2410_v22 = vrot.slane %v12099_v39, 6  ;;  %v2202_v45 = vpop.f32.mrf.mxu1 }
 0x334   : > { %v2289_v54 = vsel %vm2252_vm6, %v2286_v57, %v14787_v49  ;;  %v12110_v62 = vadd.f32 %v12017_v12, %v2202_v45  ;;  %v2409_v45 = vsel %vm2380_vm7, %v2406_v13, %v2408_v40  ;;  %v2402_v49 = vrot.slane %v2333_v41, 6 }
 0x335   : > { %v12112_v8 = vmax.f32 %v2195_v11, %v2289_v54  ;;  %v10098_v26 = vpop.f32.mrf.mxu1  ;;  %v2411_v57 = vsel %vm2380_vm7, %v2408_v40, %v2410_v22  ;;  %v2332_v11 = vmax.f32 %v12068_v33, %v2277_v3  ;;  %v2407_v28 = vsel %vm2380_vm7, %v2404_v38, %v2406_v13 }
 0x336   : > { %v2618_v56 = vpack.c.bf16 %v12110_v62, %v12096_v14  ;;  %v2465_v18 = vmax.f32 %v2335_v48, %v2411_v57  ;;  %v2331_v26 = vmax.f32 %v12056_v25, %v2275_v42  ;;  %v2405_v40 = vsel %vm2380_vm7, %v2402_v49, %v2404_v38 }
 0x337   : > { %v2412_v44 = vrot.slane %v12112_v8, 6  ;;  %v2207_v58 = vpop.f32.mrf.mxu1  ;;  %v14843_v13 = vmov 0   ;;  %v2462_v42 = vmax.f32 %v2332_v11, %v2405_v40 }
 0x338   : > { %2657 = vrot.lane.b32.xlu1 %v2618_v56, %s14790_s2  ;;  %v12131_v16 = vadd.f32 %v12017_v12, %v2207_v58  ;;  %v2464_v56 = vmax.f32 %v2334_v59, %v2409_v45  ;;  %v2398_v48 = vrot.slane %v2331_v26, 6 }
 0x339   : > { %v10101_v23 = vpop.f32.mrf.mxu1  ;;  %v2413_v47 = vsel %vm2380_vm7, %v2410_v22, %v2412_v44 }
 0x33a   : > { %v2466_v54 = vmax.f32 %v2336_v52, %v2413_v47  ;;  %v2400_v23 = vrot.slane %v2332_v11, 6  ;;  %v2463_v52 = vmax.f32 %v2333_v41, %v2407_v28  ;;  %v14844_v41 = vrot.slane %v12072_v5, 6 }
 0x33b   : > { %v2210_v0 = vpop.f32.mrf.mxu1 }
 0x33c   : > { %v12134_v33 = vadd.f32 %v12017_v12, %v2210_v0  ;;  %v2488_v3 = vpack.c.bf16 %v2466_v54, %v2465_v18  ;;  %v2403_v58 = vsel %vm2380_vm7, %v2400_v23, %v2402_v49  ;;  %v2487_v0 = vpack.c.bf16 %v2464_v56, %v2463_v52 }
 0x33d   : > { %v10102_v22 = vpop.f32.mrf.mxu1  ;;  %v2401_v47 = vsel %vm2380_vm7, %v2398_v48, %v2400_v23  ;;  %v2461_v38 = vmax.f32 %v2331_v26, %v2403_v58  ;;  %v2399_v18 = vsel %vm2380_vm7, %v14844_v41, %v2398_v48 }
 0x33e   : > { %2546 = vmatpush1.bf16.msra.mxu1 %v2488_v3  ;;  %v2619_v25 = vpack.c.bf16 %v12134_v33, %v12131_v16  ;;  %v2460_v3 = vmax.f32 %v12072_v5, %v2401_v47  ;;  %v2459_v23 = vmax.f32 %v12059_v63, %v2399_v18  ;;  %v2292_v18 = vrot.slane %v12131_v16, 1 }
 0x33f   : > { %v2215_v57 = vpop.f32.mrf.mxu1  ;;  %2547 = vmatprep.subr.bf16.mxu1 %v14843_v13  ;;  %v2486_v28 = vpack.c.bf16 %v2462_v42, %v2461_v38  ;;  %v2294_v38 = vrot.slane %v12134_v33, 1 }
 0x340   : > { %2659 = vrot.lane.b32.xlu0 %v2619_v25, %s14790_s2  ;;  %v2216_v54 = vadd.f32 %v12017_v12, %v2215_v57  ;;  %v2485_v40 = vpack.c.bf16 %v2460_v3, %v2459_v23 }
 0x341   : > { %v10105_v59 = vpop.f32.mrf.mxu1 }
 0x342   : > { %2548 = vmatpush1.bf16.msra.mxu1 %v2487_v0  ;;  %v2296_v59 = vrot.slane %v2216_v54, 1 }
 0x343   : > { %v2218_v45 = vpop.f32.mrf.mxu1  ;;  %2549 = vmatprep.subr.bf16.mxu1 %v14843_v13 }
 0x344   : > { %v2219_v49 = vadd.f32 %v12017_v12, %v2218_v45 }
 0x345   : > { %v10106_v11 = vpop.f32.mrf.mxu1 }
 0x346   : > { %2550 = vmatpush1.bf16.msra.mxu1 %v2486_v28  ;;  %v2620_v56 = vpack.c.bf16 %v2219_v49, %v2216_v54  ;;  %v2346_v52 = vrot.slane %v2219_v49, 1  ;;  %v2343_v28 = vmax.f32 %v2216_v54, %v2296_v59  ;;  %v2295_v11 = vsel %vm2252_vm6, %v2292_v18, %v2294_v38 }
 0x347   : > { %v2223_v26 = vpop.f32.mrf.mxu1  ;;  %2551 = vmatprep.subr.bf16.mxu1 %v14843_v13 }
 0x348   : > { %v2224_v22 = vadd.f32 %v12017_v12, %v2223_v26  ;;  %2661 = vrot.lane.b32.xlu1 %v2620_v56, %s14790_s2  ;;  %v2347_v45 = vsel %vm2252_vm6, %v2296_v59, %v2346_v52 }
 0x349   : > { %v10109_v25 = vpop.f32.mrf.mxu1  ;;  %v2353_v3 = vmax.f32 %v2216_v54, %v2347_v45 }
 0x34a   : > { %v2348_v48 = vrot.slane %v2224_v22, 1  ;;  %2552 = vmatpush1.bf16.msra.mxu1 %v2485_v40  ;;  %v2621_v57 = vpack.c.bf16 %v2224_v22, %v2224_v22  ;;  %v2341_v40 = vmax.f32 %v12131_v16, %v2295_v11  ;;  %v14846_v25 = vrot.slane %v12096_v14, 1  ;;  %v10537_v11 = vld [vmem:[%s14842_s6] ss:$8 sps:$4 sm:$0xff]  }
 0x34b   : > { %v2226_v58 = vpop.f32.mrf.mxu1  ;;  %2553 = vmatprep.subr.bf16.mxu1 %v14843_v13  ;;  %v2422_v54 = vrot.slane %v2353_v3, 6 }
 0x34c   : > { %v2349_v5 = vsel %vm2252_vm6, %v2346_v52, %v2348_v48  ;;  %v2355_v0 = vmax.f32 %v2224_v22, %v2348_v48  ;;  %2663 = vrot.lane.b32.xlu0 %v2621_v57, %s14790_s2  ;;  %v14845_v22 = vmov 65535   ;;  %s14847_s2 = sld [smem:[#allocation26_spill]] }
 0x34d   : > { %v2354_v63 = vmax.f32 %v2219_v49, %v2349_v5  ;;  %v10110_v42 = vpop.f32.mrf.mxu1  ;;  %v2297_v49 = vsel %vm2252_vm6, %v2294_v38, %v2296_v59 }
 0x34e   : > { %v2426_v12 = vrot.slane %v2355_v0, 6  ;;  %2554 = vmatpush1.bf16.msra.mxu1 %v12084_v37  ;;  %v2290_v37 = vrot.slane %v12110_v62, 1  ;;  %v2342_v23 = vmax.f32 %v12134_v33, %v2297_v49  ;;  %v2418_v0 = vrot.slane %v2341_v40, 6 }
 0x34f   : > { %v2424_v47 = vrot.slane %v2354_v63, 6  ;;  %2555 = vmatprep.subr.bf16.mxu1 %v14843_v13 }
 0x350   : > { %v2293_v26 = vsel %vm2252_vm6, %v2290_v37, %v2292_v18  ;;  %v2291_v52 = vsel %vm2252_vm6, %v14846_v25, %v2290_v37  ;;  %v2420_v58 = vrot.slane %v2342_v23, 6 }
 0x351   : > { %v2427_v41 = vsel %vm2380_vm7, %v2424_v47, %v2426_v12  ;;  %v2340_v33 = vmax.f32 %v12110_v62, %v2293_v26  ;;  %v2339_v5 = vmax.f32 %v12096_v14, %v2291_v52 }
 0x352   : > { %2556 = vmatpush1.bf16.msra.mxu1 %v12070_v15  ;;  %v2473_v56 = vmax.f32 %v2343_v28, %v2427_v41  ;;  %v2540_v15 = vsel %vm2380_vm7, 4294967295, %v14845_v22  ;;  %v2423_v16 = vsel %vm2380_vm7, %v2420_v58, %v2422_v54  ;;  %v2421_v12 = vsel %vm2380_vm7, %v2418_v0, %v2420_v58 }
 0x353   : > { %2557 = vmatprep.subr.bf16.mxu1 %v14843_v13  ;;  %v2541_v57 = vsel %vm2539_vm8, %v2540_v15, 0  ;;  %v2416_v59 = vrot.slane %v2340_v33, 6  ;;  %v2471_v62 = vmax.f32 %v2341_v40, %v2423_v16  ;;  %v2414_v38 = vrot.slane %v2339_v5, 6 }
 0x354   : > { %v2492_v48 = vpack.c.bf16 %v2473_v56, %v2473_v56  ;;  %v2470_v45 = vmax.f32 %v2340_v33, %v2421_v12  ;;  %v10540_v56 = vld [vmem:[%s14842_s6 + $0x14] ss:$8 sps:$4 sm:$0xff]   ;;  %vm3614_vm8 = vcmask 261122  }
 0x355   : > { %v2417_v14 = vsel %vm2380_vm7, %v2414_v38, %v2416_v59  ;;  %v2415_v18 = vsel %vm2380_vm7, %v2412_v44, %v2414_v38  ;;  %v2480_v44 = vld [vmem:[%s14842_s6 + $0x30] sm:$0x11] }
 0x356   : > { %2558 = vmatpush1.bf16.msra.mxu1 %v12051_v4  ;;  %v2425_v4 = vsel %vm2380_vm7, %v2422_v54, %v2424_v47  ;;  %v2543_v63 = vand.u32 %v2541_v57, %v2492_v48  ;;  %v2419_v47 = vsel %vm2380_vm7, %v2416_v59, %v2418_v0  ;;  %v2468_v49 = vmax.f32 %v12112_v8, %v2417_v14  ;;  %v10543_v8 = vld [vmem:[%s14842_s6 + $0x24] ss:$8 sps:$4 sm:$0xff]  }
 0x357   : > { %2559 = vmatprep.subr.bf16.mxu1 %v14843_v13  ;;  %v2472_v42 = vmax.f32 %v2342_v23, %v2425_v4  ;;  %v2469_v41 = vmax.f32 %v2339_v5, %v2419_v47  ;;  %v2467_v3 = vmax.f32 %v12099_v39, %v2415_v18  ;;  %v10542_v39 = vld [vmem:[%s14842_s6 + $0x10] ss:$8 sps:$4 sm:$0xff]   ;;  %v10545_v23 = vld [vmem:[%s14842_s6 + $0x20] ss:$8 sps:$4 sm:$0xff]   ;;  %v9154_v26 = vcombine.high %v2480_v44, %v2480_v44 }
 0x358   : > { %v9153_v15 = vcombine.low %v2480_v44, %v2480_v44  ;;  %vm3612_vm7 = vcmask 254976  }
 0x359   : > { %v2490_v28 = vpack.c.bf16 %v2470_v45, %v2469_v41  ;;  %v2489_v37 = vpack.c.bf16 %v2468_v49, %v2467_v3 }
 0x35a   : > { %2560 = vmatpush1.bf16.msra.mxu1 %v12042_v31  ;;  %v2491_v31 = vpack.c.bf16 %v2472_v42, %v2471_v62 }
 0x35b   : > { %2569 = vmatprep.subr.bf16.mxu1 %v14843_v13 }
 0x35e   : > { %2570 = vmatpush2.bf16.msra.mxu1 %v2543_v63 }
 0x35f   : > { %2571 = vmatprep.subr.bf16.mxu1 %v14843_v13 }
 0x362   : > { %2572 = vmatpush2.bf16.msra.mxu1 %v2491_v31 }
 0x363   : > { %2573 = vmatprep.subr.bf16.mxu1 %v14843_v13 }
 0x366   : > { %2574 = vmatpush2.bf16.msra.mxu1 %v2490_v28  ;;  %v2640_v28 = vpop.permute.xlu0 %2639 }
 0x367   : > { %2575 = vmatprep.subr.bf16.mxu1 %v14843_v13 }
 0x36a   : > { %2576 = vmatpush2.bf16.msra.mxu1 %v2489_v37  ;;  %v2642_v49 = vpop.permute.xlu0 %2641 }
 0x36b   : > { %10111 = vmatprep.subr.bf16.mxu1 %v14832_v2 }
 0x36d   : > { %2578 = vmatmul.mubr.bf16.vlgmr.msra.gmra.mxu1 %v10537_v11 }
 0x36e   : > { %9156 = vmatprep.mubr.msk.bf16.mxu1 %vm2526_vm5, %v10540_v56 }
 0x372   : > { %v2644_v3 = vpop.permute.xlu1 %2643 }
 0x375   : > { %2586 = vmatmul.mubr.bf16.gmra.mxu1 %v10542_v39 }
 0x376   : > { %9157 = vmatprep.mubr.msk.bf16.mxu1 %vm2526_vm5, %v10543_v8 }
 0x37a   : > { %v2646_v37 = vpop.permute.xlu1 %2645 }
 0x37d   : > { %2594 = vmatmul.mubr.bf16.gmra.mxu1 %v10545_v23 }
 0x37e   : > { %9158 = vmatprep.mubr.msk.bf16.mxu1 %vm2526_vm5, %v9154_v26  ;;  %vm3609_vm5 = vcmask 261124  }
 0x382   : > { %v2648_v11 = vpop.permute.xlu0 %2647 }
 0x385   : > { %2602 = vmatmul.mubr.bf16.gmra.mxu1 %v9153_v15 }
 0x386   : > { %10119 = vmatprep.mubr.msk.bf16.mxu1 %vm11049_vm2, %v14832_v2 }
 0x38a   : > { %v2650_v56 = vpop.permute.xlu1 %2649 }
 0x392   : > { %v2652_v39 = vpop.permute.xlu0 %2651 }
 0x39a   : > { %v2654_v8 = vpop.permute.xlu1 %2653 }
 0x3a2   : > { %v2656_v44 = vpop.permute.xlu0 %2655 }
 0x3aa   : > { %v2658_v23 = vpop.permute.xlu1 %2657 }
 0x3b2   : > { %v2660_v26 = vpop.permute.xlu0 %2659 }
 0x3ba   : > { %v2662_v15 = vpop.permute.xlu1 %2661 }
 0x42d   : > { %v2579_v40 = vpop.f32.mrf.mxu1 }
 0x42f   : > { %v2581_v54 = vpop.f32.mrf.mxu1 }
 0x431   : > { %v2582_v25 = vpop.f32.mrf.mxu1 }
 0x432   : > { %v12234_v41 = vpack.c.bf16 %v2582_v25, %v2579_v40  ;;  %v2664_v40 = vpop.permute.xlu0 %2663 }
 0x433   : > { %v2584_v52 = vpop.f32.mrf.mxu1 }
 0x434   : > { %v2706_v18 = vsel %vm2665_vm9, %v12234_v41, 0 }
 0x435   : > { %v2587_v48 = vpop.f32.mrf.mxu1 }
 0x437   : > { %v2589_v33 = vpop.f32.mrf.mxu1 }
 0x439   : > { %v2590_v57 = vpop.f32.mrf.mxu1 }
 0x43a   : > { %v12229_v45 = vpack.c.bf16 %v2590_v57, %v2587_v48 }
 0x43b   : > { %v2592_v58 = vpop.f32.mrf.mxu1 }
 0x43c   : > { %v2709_v14 = vsel %vm2665_vm9, %v12229_v45, 0 }
 0x43d   : > { %v2595_v4 = vpop.f32.mrf.mxu1 }
 0x43f   : > { %v2597_v5 = vpop.f32.mrf.mxu1 }
 0x441   : > { %v2598_v0 = vpop.f32.mrf.mxu1 }
 0x442   : > { %v12224_v47 = vpack.c.bf16 %v2598_v0, %v2595_v4 }
 0x443   : > { %v2600_v16 = vpop.f32.mrf.mxu1 }
 0x444   : > { %v2712_v31 = vsel %vm2665_vm9, %v12224_v47, 0 }
 0x445   : > { %v2603_v63 = vpop.f32.mrf.mxu1 }
 0x446   : > { %v12219_v42 = vpack.c.bf16 %v2603_v63, %v2603_v63 }
 0x447   : > { %v2605_v59 = vpop.f32.mrf.mxu1 }
 0x448   : > { %v2715_v12 = vsel %vm2665_vm9, %v12219_v42, 0 }
 0x449   : > { %v2606_v62 = vpop.f32.mrf.mxu1  ;;  %10112 = vmatpush3.bf16.xpose.msra.mxu1 %v2715_v12 }
 0x44a   : > { %10113 = vmatprep.subr.bf16.mxu1 %v14832_v2 }
 0x44b   : > { %v2607_v38 = vpop.f32.mrf.mxu1 }
 0x451   : > { %10114 = vmatpush3.bf16.xpose.msra.mxu1 %v2712_v31 }
 0x452   : > { %10115 = vmatprep.subr.bf16.mxu1 %v14832_v2 }
 0x459   : > { %10116 = vmatpush3.bf16.xpose.msra.mxu1 %v2709_v14 }
 0x45a   : > { %10117 = vmatprep.subr.bf16.mxu1 %v14832_v2 }
 0x461   : > { %10118 = vmatpush3.bf16.xpose.msra.mxu1 %v2706_v18 }
 0x462   : > { %10171 = vmatprep.subr.bf16.mxu1 %v14832_v2 }
 0x468   : > { %10120 = vmatmul.mubr.msk.bf16.vlgmr.msra.gmra.mxu1 %vm2665_vm9, %v2640_v28 }
 0x469   : > { %10123 = vmatprep.mubr.msk.bf16.mxu1 %vm11049_vm2, %v14832_v2 }
 0x470   : > { %10124 = vmatmul.mubr.msk.bf16.gmra.mxu1 %vm2665_vm9, %v2642_v49 }
 0x471   : > { %10127 = vmatprep.mubr.msk.bf16.mxu1 %vm11049_vm2, %v14832_v2 }
 0x478   : > { %10128 = vmatmul.mubr.msk.bf16.gmra.mxu1 %vm2665_vm9, %v2644_v3 }
 0x479   : > { %10131 = vmatprep.mubr.msk.bf16.mxu1 %vm11049_vm2, %v14832_v2 }
 0x480   : > { %10132 = vmatmul.mubr.msk.bf16.gmra.mxu1 %vm2665_vm9, %v2646_v37 }
 0x481   : > { %10135 = vmatprep.mubr.msk.bf16.mxu1 %vm11049_vm2, %v14832_v2 }
 0x488   : > { %10136 = vmatmul.mubr.msk.bf16.gmra.mxu1 %vm2665_vm9, %v2648_v11 }
 0x489   : > { %10139 = vmatprep.mubr.msk.bf16.mxu1 %vm11049_vm2, %v14832_v2 }
 0x490   : > { %10140 = vmatmul.mubr.msk.bf16.gmra.mxu1 %vm2665_vm9, %v2650_v56 }
 0x491   : > { %10143 = vmatprep.mubr.msk.bf16.mxu1 %vm11049_vm2, %v14832_v2 }
 0x498   : > { %10144 = vmatmul.mubr.msk.bf16.gmra.mxu1 %vm2665_vm9, %v2652_v39 }
 0x499   : > { %10147 = vmatprep.mubr.msk.bf16.mxu1 %vm11049_vm2, %v14832_v2 }
 0x4a0   : > { %10148 = vmatmul.mubr.msk.bf16.gmra.mxu1 %vm2665_vm9, %v2654_v8 }
 0x4a1   : > { %10151 = vmatprep.mubr.msk.bf16.mxu1 %vm11049_vm2, %v14832_v2 }
 0x4a8   : > { %10152 = vmatmul.mubr.msk.bf16.gmra.mxu1 %vm2665_vm9, %v2656_v44 }
 0x4a9   : > { %10155 = vmatprep.mubr.msk.bf16.mxu1 %vm11049_vm2, %v14832_v2 }
 0x4b0   : > { %10156 = vmatmul.mubr.msk.bf16.gmra.mxu1 %vm2665_vm9, %v2658_v23 }
 0x4b1   : > { %10159 = vmatprep.mubr.msk.bf16.mxu1 %vm11049_vm2, %v14832_v2 }
 0x4b8   : > { %10160 = vmatmul.mubr.msk.bf16.gmra.mxu1 %vm2665_vm9, %v2660_v26 }
 0x4b9   : > { %10163 = vmatprep.mubr.msk.bf16.mxu1 %vm11049_vm2, %v14832_v2 }
 0x4c0   : > { %10164 = vmatmul.mubr.msk.bf16.gmra.mxu1 %vm2665_vm9, %v2662_v15 }
 0x4c1   : > { %10167 = vmatprep.mubr.msk.bf16.mxu1 %vm11049_vm2, %v14832_v2 }
 0x4c8   : > { %10168 = vmatmul.mubr.msk.bf16.gmra.mxu1 %vm2665_vm9, %v2664_v40 }
 0x4c9   : > { %10179 = vmatprep.mubr.msk.bf16.mxu1 %vm11049_vm2, %v14832_v2 }
 0x528   : > { %v12278_v54 = vpop.f32.mrf.mxu1 }
 0x529   : > { %v2854_v25 = vsel %vm2853_vm10, %v12278_v54, -inf }
 0x52a   : > { %2855 = vmax.xlane.f32.xlu1 %v2854_v25  ;;  %v10121_v52 = vpop.f32.mrf.mxu1 }
 0x52c   : > { %v12282_v48 = vpop.f32.mrf.mxu1 }
 0x52d   : > { %v2857_v33 = vsel %vm2853_vm10, %v12282_v48, -inf }
 0x52e   : > { %2858 = vmax.xlane.f32.xlu0 %v2857_v33  ;;  %v10122_v57 = vpop.f32.mrf.mxu1 }
 0x530   : > { %v12286_v58 = vpop.f32.mrf.mxu1 }
 0x531   : > { %v2860_v4 = vsel %vm2853_vm10, %v12286_v58, -inf }
 0x532   : > { %2861 = vmax.xlane.f32.xlu0 %v2860_v4  ;;  %v10125_v5 = vpop.f32.mrf.mxu1 }
 0x534   : > { %v12290_v0 = vpop.f32.mrf.mxu1 }
 0x535   : > { %v2863_v16 = vsel %vm2853_vm10, %v12290_v0, -inf }
 0x536   : > { %2864 = vmax.xlane.f32.xlu1 %v2863_v16  ;;  %v10126_v63 = vpop.f32.mrf.mxu1 }
 0x538   : > { %v12294_v59 = vpop.f32.mrf.mxu1 }
 0x53a   : > { %v10129_v12 = vpop.f32.mrf.mxu1 }
 0x53c   : > { %v12296_v62 = vpop.f32.mrf.mxu1 }
 0x53d   : > { %v2869_v38 = vsel %vm2853_vm10, %v12296_v62, -inf }
 0x53e   : > { %2870 = vmax.xlane.f32.xlu1 %v2869_v38  ;;  %v10130_v31 = vpop.f32.mrf.mxu1  ;;  %v2866_v38 = vsel %vm2853_vm10, %v12294_v59, -inf }
 0x540   : > { %v12300_v14 = vpop.f32.mrf.mxu1 }
 0x542   : > { %v10133_v18 = vpop.f32.mrf.mxu1 }
 0x544   : > { %v12302_v28 = vpop.f32.mrf.mxu1 }
 0x545   : > { %v2875_v49 = vsel %vm2853_vm10, %v12302_v28, -inf }
 0x546   : > { %2876 = vmax.xlane.f32.xlu1 %v2875_v49  ;;  %v10134_v3 = vpop.f32.mrf.mxu1  ;;  %v2872_v49 = vsel %vm2853_vm10, %v12300_v14, -inf }
 0x548   : > { %3153 = vrot.lane.b32.xlu0 %v12219_v42, %s11052_s24  ;;  %v12308_v37 = vpop.f32.mrf.mxu1 }
 0x54a   : > { %v10137_v11 = vpop.f32.mrf.mxu1 }
 0x54c   : > { %v12310_v56 = vpop.f32.mrf.mxu1 }
 0x54d   : > { %v2881_v39 = vsel %vm2853_vm10, %v12310_v56, -inf }
 0x54e   : > { %2882 = vmax.xlane.f32.xlu1 %v2881_v39  ;;  %v10138_v8 = vpop.f32.mrf.mxu1 }
 0x54f   : > { %v2878_v8 = vsel %vm2853_vm10, %v12308_v37, -inf }
 0x550   : > { %v12314_v44 = vpop.f32.mrf.mxu1 }
 0x552   : > { %v10141_v23 = vpop.f32.mrf.mxu1 }
 0x554   : > { %v12316_v26 = vpop.f32.mrf.mxu1 }
 0x555   : > { %v2887_v15 = vsel %vm2853_vm10, %v12316_v26, -inf }
 0x556   : > { %2888 = vmax.xlane.f32.xlu1 %v2887_v15  ;;  %v10142_v42 = vpop.f32.mrf.mxu1 }
 0x557   : > { %v2884_v42 = vsel %vm2853_vm10, %v12314_v44, -inf }
 0x558   : > { %v12320_v40 = vpop.f32.mrf.mxu1 }
 0x55a   : > { %v10145_v25 = vpop.f32.mrf.mxu1 }
 0x55c   : > { %v12322_v52 = vpop.f32.mrf.mxu1 }
 0x55d   : > { %v2893_v33 = vsel %vm2853_vm10, %v12322_v52, -inf }
 0x55e   : > { %2894 = vmax.xlane.f32.xlu1 %v2893_v33  ;;  %v10146_v57 = vpop.f32.mrf.mxu1 }
 0x560   : > { %v12326_v4 = vpop.f32.mrf.mxu1 }
 0x562   : > { %v10149_v5 = vpop.f32.mrf.mxu1 }
 0x563   : > { %v2890_v5 = vsel %vm2853_vm10, %v12320_v40, -inf }
 0x564   : > { %v12328_v16 = vpop.f32.mrf.mxu1 }
 0x565   : > { %v2899_v63 = vsel %vm2853_vm10, %v12328_v16, -inf }
 0x566   : > { %2900 = vmax.xlane.f32.xlu1 %v2899_v63  ;;  %v10150_v12 = vpop.f32.mrf.mxu1 }
 0x567   : > { %2867 = vmax.xlane.f32.xlu0 %v2866_v38  ;;  %v2896_v38 = vsel %vm2853_vm10, %v12326_v4, -inf }
 0x568   : > { %v12334_v31 = vpop.f32.mrf.mxu1 }
 0x56a   : > { %v10153_v18 = vpop.f32.mrf.mxu1 }
 0x56b   : > { %2873 = vmax.xlane.f32.xlu0 %v2872_v49 }
 0x56c   : > { %v12338_v3 = vpop.f32.mrf.mxu1 }
 0x56d   : > { %v2905_v11 = vsel %vm2853_vm10, %v12338_v3, -inf }
 0x56e   : > { %2906 = vmax.xlane.f32.xlu1 %v2905_v11  ;;  %v10154_v39 = vpop.f32.mrf.mxu1 }
 0x56f   : > { %2879 = vmax.xlane.f32.xlu0 %v2878_v8  ;;  %v2902_v39 = vsel %vm2853_vm10, %v12334_v31, -inf }
 0x570   : > { %v12344_v23 = vpop.f32.mrf.mxu1 }
 0x572   : > { %v10157_v15 = vpop.f32.mrf.mxu1 }
 0x573   : > { %2885 = vmax.xlane.f32.xlu0 %v2884_v42 }
 0x574   : > { %v12348_v25 = vpop.f32.mrf.mxu1 }
 0x575   : > { %v2911_v33 = vsel %vm2853_vm10, %v12348_v25, -inf }
 0x576   : > { %2912 = vmax.xlane.f32.xlu1 %v2911_v33  ;;  %v10158_v57 = vpop.f32.mrf.mxu1  ;;  %v2908_v33 = vsel %vm2853_vm10, %v12344_v23, -inf }
 0x577   : > { %2891 = vmax.xlane.f32.xlu0 %v2890_v5 }
 0x578   : > { %v12354_v63 = vpop.f32.mrf.mxu1 }
 0x57a   : > { %v10161_v12 = vpop.f32.mrf.mxu1 }
 0x57b   : > { %2897 = vmax.xlane.f32.xlu0 %v2896_v38  ;;  %v2914_v38 = vsel %vm2853_vm10, %v12354_v63, -inf }
 0x57c   : > { %v12358_v18 = vpop.f32.mrf.mxu1 }
 0x57d   : > { %v2917_v49 = vsel %vm2853_vm10, %v12358_v18, -inf }
 0x57e   : > { %2918 = vmax.xlane.f32.xlu1 %v2917_v49  ;;  %v10162_v11 = vpop.f32.mrf.mxu1 }
 0x57f   : > { %2903 = vmax.xlane.f32.xlu0 %v2902_v39 }
 0x580   : > { %v12364_v8 = vpop.f32.mrf.mxu1 }
 0x581   : > { %v2920_v15 = vsel %vm2853_vm10, %v12364_v8, -inf }
 0x582   : > { %2921 = vmax.xlane.f32.xlu1 %v2920_v15  ;;  %v10165_v42 = vpop.f32.mrf.mxu1 }
 0x583   : > { %2909 = vmax.xlane.f32.xlu0 %v2908_v33 }
 0x584   : > { %v12370_v57 = vpop.f32.mrf.mxu1 }
 0x585   : > { %v2923_v5 = vsel %vm2853_vm10, %v12370_v57, -inf }
 0x586   : > { %2924 = vmax.xlane.f32.xlu1 %v2923_v5  ;;  %v10166_v12 = vpop.f32.mrf.mxu1 }
 0x587   : > { %2915 = vmax.xlane.f32.xlu0 %v2914_v38  ;;  %v3199_v38 = vsel %vm3197_vm11, 65535, %v14843_v13 }
 0x588   : > { %v12376_v49 = vpop.f32.mrf.mxu1 }
 0x58a   : > { %v10169_v11 = vpop.f32.mrf.mxu1 }
 0x58c   : > { %v2850_v39 = vpop.f32.mrf.mxu1 }
 0x58e   : > { %v10170_v15 = vpop.f32.mrf.mxu1 }
 0x5b3   : > { %v2856_v42 = vpop.xlane.xlu1 %2855 }
 0x5b4   : > { %v2930_v22 = vsub.f32 %v12278_v54, %v2856_v42 }
 0x5b6   : > { %v2955_v33 = vmul.f32 1.442695, %v2930_v22 }
 0x5b7   : > { %v2859_v20 = vpop.xlane.xlu0 %2858 }
 0x5b8   : > { %10854 = vpow2.f32 %v2955_v33  ;;  %v2931_v32 = vsub.f32 %v12282_v48, %v2859_v20 }
 0x5ba   : > { %v2957_v17 = vmul.f32 1.442695, %v2931_v32 }
 0x5bb   : > { %v2862_v5 = vpop.xlane.xlu0 %2861 }
 0x5bc   : > { %10856 = vpow2.f32 %v2957_v17  ;;  %v2932_v12 = vsub.f32 %v12286_v58, %v2862_v5 }
 0x5be   : > { %v2959_v11 = vmul.f32 1.442695, %v2932_v12 }
 0x5bf   : > { %v3154_v39 = vpop.permute.xlu0 %3153  ;;  %v2865_v15 = vpop.xlane.xlu1 %2864 }
 0x5c0   : > { %10858 = vpow2.f32 %v2959_v11  ;;  %v3201_v9 = vand.u32 %v3199_v38, %v3154_v39  ;;  %v2933_v22 = vsub.f32 %v12290_v0, %v2865_v15 }
 0x5c2   : > { %v2961_v54 = vmul.f32 1.442695, %v2933_v22  ;;  %10172 = vmatpush3.bf16.msra.mxu1 %v3201_v9 }
 0x5c3   : > { %10173 = vmatprep.subr.bf16.mxu1 %v14832_v2 }
 0x5c4   : > { %10860 = vpow2.f32 %v2961_v54 }
 0x5c5   : > { %v12385_v32 = vpop.eup %10854 }
 0x5c6   : > { %v3005_v20 = vsel %vm2853_vm10, %v12385_v32, 0.0 }
 0x5c7   : > { %3006 = vadd.xlane.f32.xlu0 %v3005_v20  ;;  %v2871_v33 = vpop.xlane.xlu1 %2870 }
 0x5c8   : > { %v2935_v12 = vsub.f32 %v12296_v62, %v2871_v33 }
 0x5c9   : > { %v12389_v17 = vpop.eup %10856 }
 0x5ca   : > { %v3008_v48 = vsel %vm2853_vm10, %v12389_v17, 0.0  ;;  %v2965_v15 = vmul.f32 1.442695, %v2935_v12 }
 0x5cb   : > { %3009 = vadd.xlane.f32.xlu1 %v3008_v48 }
 0x5cd   : > { %v12393_v58 = vpop.eup %10858 }
 0x5ce   : > { %v3011_v9 = vsel %vm2853_vm10, %v12393_v58, 0.0 }
 0x5cf   : > { %3012 = vadd.xlane.f32.xlu0 %v3011_v9  ;;  %v12405_v5 = vpop.xlane.xlu1 %2876 }
 0x5d1   : > { %v12397_v0 = vpop.eup %10860 }
 0x5d2   : > { %v3014_v42 = vsel %vm2853_vm10, %v12397_v0, 0.0 }
 0x5d3   : > { %3015 = vadd.xlane.f32.xlu1 %v3014_v42 }
 0x5d7   : > { %v2883_v38 = vpop.xlane.xlu1 %2882 }
 0x5d8   : > { %v2939_v62 = vsub.f32 %v12310_v56, %v2883_v38 }
 0x5da   : > { %v2973_v46 = vmul.f32 1.442695, %v2939_v62 }
 0x5df   : > { %v2889_v54 = vpop.xlane.xlu1 %2888 }
 0x5e5   : > { %3149 = vrot.lane.b32.xlu0 %v12229_v45, %s11052_s24 }
 0x5e7   : > { %v2895_v9 = vpop.xlane.xlu1 %2894 }
 0x5e9   : > { %3147 = vrot.lane.b32.xlu0 %v12234_v41, %s11052_s24 }
 0x5ef   : > { %v2901_v50 = vpop.xlane.xlu1 %2900 }
 0x5f0   : > { %v2868_v11 = vpop.xlane.xlu0 %2867 }
 0x5f1   : > { %v2934_v39 = vsub.f32 %v12294_v59, %v2868_v11  ;;  %v2941_v59 = vsub.f32 %v12316_v26, %v2889_v54  ;;  %v2945_v54 = vsub.f32 %v12328_v16, %v2901_v50 }
 0x5f3   : > { %v2963_v22 = vmul.f32 1.442695, %v2934_v39 }
 0x5f4   : > { %v2874_v20 = vpop.xlane.xlu0 %2873 }
 0x5f5   : > { %10862 = vpow2.f32 %v2963_v22  ;;  %v2936_v48 = vsub.f32 %v12300_v14, %v2874_v20  ;;  %v2977_v14 = vmul.f32 1.442695, %v2941_v59 }
 0x5f6   : > { %10864 = vpow2.f32 %v2965_v15  ;;  %v2943_v15 = vsub.f32 %v12322_v52, %v2895_v9  ;;  %v2985_v52 = vmul.f32 1.442695, %v2945_v54 }
 0x5f7   : > { %v2967_v45 = vmul.f32 1.442695, %v2936_v48  ;;  %v2907_v12 = vpop.xlane.xlu1 %2906 }
 0x5f8   : > { %v2880_v42 = vpop.xlane.xlu0 %2879  ;;  %v2981_v38 = vmul.f32 1.442695, %v2943_v15  ;;  %v2947_v48 = vsub.f32 %v12338_v3, %v2907_v12 }
 0x5f9   : > { %10866 = vpow2.f32 %v2967_v45  ;;  %v2938_v41 = vsub.f32 %v12308_v37, %v2880_v42  ;;  %v2927_v45 = vsel %vm2926_vm12, %v12376_v49, -inf }
 0x5fa   : > { %v2989_v50 = vmul.f32 1.442695, %v2947_v48  ;;  %v2937_v48 = vsub.f32 %v12302_v28, %v12405_v5 }
 0x5fb   : > { %v2971_v33 = vmul.f32 1.442695, %v2938_v41 }
 0x5fd   : > { %10868 = vpow2.f32 %v2971_v33 }
 0x5fe   : > { %10870 = vpow2.f32 %v2973_v46 }
 0x5ff   : > { %v2913_v22 = vpop.xlane.xlu1 %2912  ;;  %10872 = vpow2.f32 %v2977_v14 }
 0x600   : > { %10874 = vpow2.f32 %v2981_v38  ;;  %v2949_v16 = vsub.f32 %v12348_v25, %v2913_v22 }
 0x601   : > { %10876 = vpow2.f32 %v2985_v52 }
 0x602   : > { %v12413_v11 = vpop.eup %10862  ;;  %10878 = vpow2.f32 %v2989_v50  ;;  %v2993_v3 = vmul.f32 1.442695, %v2949_v16 }
 0x603   : > { %v12415_v39 = vpop.eup %10864  ;;  %v3017_v37 = vsel %vm2853_vm10, %v12413_v11, 0.0 }
 0x604   : > { %3018 = vadd.xlane.f32.xlu1 %v3017_v37  ;;  %v3020_v26 = vsel %vm2853_vm10, %v12415_v39, 0.0  ;;  %10880 = vpow2.f32 %v2993_v3 }
 0x606   : > { %v12420_v56 = vpop.eup %10866 }
 0x607   : > { %v3023_v46 = vsel %vm2853_vm10, %v12420_v56, 0.0  ;;  %v2919_v20 = vpop.xlane.xlu1 %2918 }
 0x608   : > { %3024 = vadd.xlane.f32.xlu0 %v3023_v46  ;;  %3021 = vadd.xlane.f32.xlu1 %v3020_v26  ;;  %v2951_v33 = vsub.f32 %v12358_v18, %v2919_v20  ;;  %v2886_v18 = vpop.xlane.xlu0 %2885 }
 0x609   : > { %v2940_v3 = vsub.f32 %v12314_v44, %v2886_v18 }
 0x60a   : > { %v12430_v9 = vpop.eup %10868  ;;  %v2997_v15 = vmul.f32 1.442695, %v2951_v33 }
 0x60b   : > { %v12432_v42 = vpop.xlane.xlu1 %2921  ;;  %v3029_v41 = vsel %vm2853_vm10, %v12430_v9, 0.0  ;;  %v12437_v62 = vpop.eup %10870 }
 0x60c   : > { %2928 = vmax.xlane.f32.xlu0 %v2927_v45  ;;  %v3032_v59 = vsel %vm2853_vm10, %v12437_v62, 0.0  ;;  %v12442_v12 = vpop.eup %10872  ;;  %10882 = vpow2.f32 %v2997_v15  ;;  %v2892_v20 = vpop.xlane.xlu0 %2891 }
 0x60d   : > { %v3038_v37 = vsel %vm2853_vm10, %v12442_v12, 0.0  ;;  %v12447_v22 = vpop.eup %10874  ;;  %v2942_v28 = vsub.f32 %v12320_v40, %v2892_v20 }
 0x60e   : > { %v3044_v38 = vsel %vm2853_vm10, %v12447_v22, 0.0  ;;  %v12453_v54 = vpop.eup %10876 }
 0x60f   : > { %v2925_v14 = vpop.xlane.xlu1 %2924  ;;  %v12457_v46 = vpop.eup %10878 }
 0x610   : > { %3030 = vadd.xlane.f32.xlu0 %v3029_v41  ;;  %v2953_v25 = vsub.f32 %v12370_v57, %v2925_v14  ;;  %v3050_v57 = vsel %vm2853_vm10, %v12453_v54, 0.0  ;;  %v2898_v45 = vpop.xlane.xlu0 %2897  ;;  %v2969_v41 = vmul.f32 1.442695, %v2937_v48  ;;  %v2975_v14 = vmul.f32 1.442695, %v2940_v3 }
 0x611   : > { %v12461_v52 = vpop.eup %10880 }
 0x612   : > { %v3001_v26 = vmul.f32 1.442695, %v2953_v25  ;;  %v3062_v50 = vsel %vm2853_vm10, %v12461_v52, 0.0  ;;  %v2979_v25 = vmul.f32 1.442695, %v2942_v28 }
 0x614   : > { %3033 = vadd.xlane.f32.xlu0 %v3032_v59  ;;  %10884 = vpow2.f32 %v3001_v26  ;;  %v2904_v5 = vpop.xlane.xlu0 %2903 }
 0x615   : > { %10886 = vpow2.f32 %v2969_v41  ;;  %v2946_v26 = vsub.f32 %v12334_v31, %v2904_v5  ;;  %v2952_v31 = vsub.f32 %v12364_v8, %v12432_v42 }
 0x616   : > { %10888 = vpow2.f32 %v2975_v14 }
 0x617   : > { %10890 = vpow2.f32 %v2979_v25  ;;  %v2999_v3 = vmul.f32 1.442695, %v2952_v31 }
 0x618   : > { %3039 = vadd.xlane.f32.xlu0 %v3038_v37  ;;  %v2944_v37 = vsub.f32 %v12326_v4, %v2898_v45  ;;  %v2910_v44 = vpop.xlane.xlu0 %2909 }
 0x619   : > { %3151 = vrot.lane.b32.xlu1 %v12224_v47, %s11052_s24  ;;  %v3056_v47 = vsel %vm2853_vm10, %v12457_v46, 0.0  ;;  %v12467_v16 = vpop.eup %10882  ;;  %s14851_s24 = smov 64  }
 0x61a   : > { %v3068_v33 = vsel %vm2853_vm10, %v12467_v16, 0.0  ;;  %v2983_v18 = vmul.f32 1.442695, %v2944_v37 }
 0x61c   : > { %3045 = vadd.xlane.f32.xlu0 %v3044_v38  ;;  %10892 = vpow2.f32 %v2983_v18  ;;  %v2987_v38 = vmul.f32 1.442695, %v2946_v26  ;;  %v2916_v20 = vpop.xlane.xlu0 %2915 }
 0x61d   : > { %v2950_v48 = vsub.f32 %v12354_v63, %v2916_v20 }
 0x61e   : > { %10894 = vpow2.f32 %v2987_v38 }
 0x620   : > { %3051 = vadd.xlane.f32.xlu0 %v3050_v57  ;;  %v2948_v57 = vsub.f32 %v12344_v23, %v2910_v44 }
 0x621   : > { %v12472_v59 = vpop.eup %10884 }
 0x622   : > { %v3074_v15 = vsel %vm2853_vm10, %v12472_v59, 0.0  ;;  %v12480_v40 = vpop.eup %10886 }
 0x623   : > { %v3026_v4 = vsel %vm2853_vm10, %v12480_v40, 0.0  ;;  %v12485_v45 = vpop.eup %10888 }
 0x624   : > { %3057 = vadd.xlane.f32.xlu0 %v3056_v47  ;;  %v2991_v47 = vmul.f32 1.442695, %v2948_v57  ;;  %v3035_v23 = vsel %vm2853_vm10, %v12485_v45, 0.0  ;;  %v12491_v41 = vpop.eup %10890 }
 0x625   : > { %v3041_v63 = vsel %vm2853_vm10, %v12491_v41, 0.0 }
 0x626   : > { %10896 = vpow2.f32 %v2991_v47 }
 0x628   : > { %3063 = vadd.xlane.f32.xlu0 %v3062_v50  ;;  %v2995_v50 = vmul.f32 1.442695, %v2950_v48 }
 0x62a   : > { %10898 = vpow2.f32 %v2995_v50 }
 0x62b   : > { %10900 = vpow2.f32 %v2999_v3 }
 0x62c   : > { %3069 = vadd.xlane.f32.xlu0 %v3068_v33  ;;  %v12495_v33 = vpop.eup %10892 }
 0x62d   : > { %v3047_v8 = vsel %vm2853_vm10, %v12495_v33, 0.0  ;;  %v12499_v42 = vpop.eup %10894 }
 0x62e   : > { %v3053_v14 = vsel %vm2853_vm10, %v12499_v42, 0.0 }
 0x630   : > { %3075 = vadd.xlane.f32.xlu0 %v3074_v15 }
 0x633   : > { %v12503_v28 = vpop.eup %10896 }
 0x634   : > { %v3059_v5 = vsel %vm2853_vm10, %v12503_v28, 0.0 }
 0x637   : > { %v12507_v15 = vpop.eup %10898 }
 0x638   : > { %v3065_v25 = vsel %vm2853_vm10, %v12507_v15, 0.0  ;;  %v12511_v37 = vpop.eup %10900 }
 0x639   : > { %v3071_v44 = vsel %vm2853_vm10, %v12511_v37, 0.0 }
 0x63d   : > { %3027 = vadd.xlane.f32.xlu1 %v3026_v4 }
 0x641   : > { %3036 = vadd.xlane.f32.xlu1 %v3035_v23 }
 0x645   : > { %3042 = vadd.xlane.f32.xlu1 %v3041_v63 }
 0x649   : > { %3048 = vadd.xlane.f32.xlu1 %v3047_v8 }
 0x64d   : > { %3054 = vadd.xlane.f32.xlu1 %v3053_v14 }
 0x650   : > { %v3007_v18 = vpop.xlane.xlu0 %3006 }
 0x651   : > { %3060 = vadd.xlane.f32.xlu1 %v3059_v5 }
 0x654   : > { %v3010_v38 = vpop.xlane.xlu1 %3009 }
 0x655   : > { %3066 = vadd.xlane.f32.xlu1 %v3065_v25  ;;  %10902 = vrcp.f32 %v3010_v38 }
 0x656   : > { %10904 = vrcp.f32 %v3007_v18 }
 0x658   : > { %v3013_v26 = vpop.xlane.xlu0 %3012 }
 0x659   : > { %3072 = vadd.xlane.f32.xlu1 %v3071_v44 }
 0x65c   : > { %v3150_v57 = vpop.permute.xlu0 %3149  ;;  %v3016_v20 = vpop.xlane.xlu1 %3015 }
 0x65d   : > { %10906 = vrcp.f32 %v3016_v20 }
 0x65e   : > { %10908 = vrcp.f32 %v3013_v26 }
 0x660   : > { %v3148_v47 = vpop.permute.xlu0 %3147 }
 0x662   : > { %v10903_v63 = vpop.eup %10902 }
 0x663   : > { %v10905_v14 = vpop.eup %10904  ;;  %v3106_v5 = vmul.f32 %v10903_v63, %v12389_v17 }
 0x664   : > { %v3105_v25 = vmul.f32 %v10905_v14, %v12385_v32 }
 0x666   : > { %v3130_v44 = vpack.c.bf16 %v3106_v5, %v3105_v25 }
 0x68d   : > { %v3019_v48 = vpop.xlane.xlu1 %3018 }
 0x691   : > { %v3025_v4 = vpop.xlane.xlu0 %3024  ;;  %v3022_v31 = vpop.xlane.xlu1 %3021 }
 0x695   : > { %v3152_v50 = vpop.permute.xlu1 %3151  ;;  %v2929_v23 = vpop.xlane.xlu0 %2928 }
 0x696   : > { %v2954_v3 = vsub.f32 %v12376_v49, %v2929_v23  ;;  %10174 = vmatpush3.bf16.msra.mxu1 %v3152_v50  ;;  %v10907_v49 = vpop.eup %10906 }
 0x697   : > { %10175 = vmatprep.subr.bf16.mxu1 %v14832_v2  ;;  %v10909_v18 = vpop.eup %10908  ;;  %v3108_v26 = vmul.f32 %v10907_v49, %v12397_v0 }
 0x698   : > { %v3003_v8 = vmul.f32 1.442695, %v2954_v3  ;;  %v3107_v17 = vmul.f32 %v10909_v18, %v12393_v58 }
 0x699   : > { %v3031_v58 = vpop.xlane.xlu0 %3030 }
 0x69a   : > { %10910 = vpow2.f32 %v3003_v8  ;;  %10176 = vmatpush3.bf16.msra.mxu1 %v3150_v57  ;;  %v3131_v57 = vpack.c.bf16 %v3108_v26, %v3107_v17 }
 0x69b   : > { %10912 = vrcp.f32 %v3022_v31  ;;  %10177 = vmatprep.subr.bf16.mxu1 %v14832_v2 }
 0x69c   : > { %10914 = vrcp.f32 %v3019_v48 }
 0x69d   : > { %10916 = vrcp.f32 %v3025_v4  ;;  %v3034_v23 = vpop.xlane.xlu0 %3033 }
 0x69e   : > { %10178 = vmatpush3.bf16.msra.mxu1 %v3148_v47 }
 0x69f   : > { %10231 = vmatprep.subr.bf16.mxu1 %v14832_v2 }
 0x6a1   : > { %10180 = vmatmul.mubr.msk.bf16.vlgmr.msra.gmra.mxu1 %vm2853_vm10, %v3130_v44  ;;  %v3040_v8 = vpop.xlane.xlu0 %3039 }
 0x6a2   : > { %10183 = vmatprep.mubr.msk.bf16.mxu1 %vm11049_vm2, %v14832_v2 }
 0x6a5   : > { %v3046_v49 = vpop.xlane.xlu0 %3045 }
 0x6a7   : > { %v12526_v38 = vpop.eup %10910 }
 0x6a8   : > { %v10913_v32 = vpop.eup %10912  ;;  %v3077_v20 = vsel %vm2926_vm12, %v12526_v38, 0.0  ;;  %vm3883_vm12 = vcmask 518400  }
 0x6a9   : > { %10184 = vmatmul.mubr.msk.bf16.gmra.mxu1 %vm2853_vm10, %v3131_v57  ;;  %3078 = vadd.xlane.f32.xlu1 %v3077_v20  ;;  %v10915_v47 = vpop.eup %10914  ;;  %v3110_v48 = vmul.f32 %v10913_v32, %v12415_v39  ;;  %v3052_v32 = vpop.xlane.xlu0 %3051 }
 0x6aa   : > { %10187 = vmatprep.mubr.msk.bf16.mxu1 %vm11049_vm2, %v14832_v2  ;;  %v3109_v0 = vmul.f32 %v10915_v47, %v12413_v11  ;;  %v10917_v63 = vpop.eup %10916 }
 0x6ab   : > { %v3111_v11 = vmul.f32 %v10917_v63, %v12420_v56 }
 0x6ac   : > { %v3132_v31 = vpack.c.bf16 %v3110_v48, %v3109_v0 }
 0x6b1   : > { %10188 = vmatmul.mubr.msk.bf16.gmra.mxu1 %vm2853_vm10, %v3132_v31 }
 0x6b2   : > { %10191 = vmatprep.mubr.msk.bf16.mxu1 %vm11049_vm2, %v14832_v2 }
 0x6c6   : > { %v3028_v50 = vpop.xlane.xlu1 %3027 }
 0x6c7   : > { %10918 = vrcp.f32 %v3028_v50 }
 0x6c8   : > { %10920 = vrcp.f32 %v3034_v23 }
 0x6c9   : > { %10922 = vrcp.f32 %v3031_v58  ;;  %v3058_v58 = vpop.xlane.xlu0 %3057 }
 0x6ca   : > { %v3037_v3 = vpop.xlane.xlu1 %3036 }
 0x6cb   : > { %10924 = vrcp.f32 %v3037_v3 }
 0x6cc   : > { %10926 = vrcp.f32 %v3040_v8 }
 0x6cd   : > { %v3064_v8 = vpop.xlane.xlu0 %3063 }
 0x6ce   : > { %v3043_v44 = vpop.xlane.xlu1 %3042 }
 0x6cf   : > { %10928 = vrcp.f32 %v3043_v44 }
 0x6d0   : > { %10930 = vrcp.f32 %v3046_v49 }
 0x6d2   : > { %v3049_v57 = vpop.xlane.xlu1 %3048 }
 0x6d3   : > { %10932 = vrcp.f32 %v3049_v57 }
 0x6d4   : > { %v10919_v39 = vpop.eup %10918  ;;  %10934 = vrcp.f32 %v3052_v32 }
 0x6d5   : > { %v3112_v14 = vmul.f32 %v10919_v39, %v12480_v40  ;;  %v10921_v25 = vpop.eup %10920 }
 0x6d6   : > { %v10923_v4 = vpop.eup %10922  ;;  %v3114_v18 = vmul.f32 %v10921_v25, %v12437_v62  ;;  %v10548_v62 = vld [vmem:[%s14847_s2] sm:$0xff]   ;;  %v3055_v0 = vpop.xlane.xlu1 %3054  ;;  %s14850_s2 = smov 96  }
 0x6d7   : > { %v3133_v5 = vpack.c.bf16 %v3112_v14, %v3111_v11  ;;  %v3113_v26 = vmul.f32 %v10923_v4, %v12430_v9  ;;  %10232 = vmatpush3.bf16.msra.mxu1 %v10548_v62  ;;  %10936 = vrcp.f32 %v3055_v0  ;;  %v3070_v25 = vpop.xlane.xlu0 %3069 }
 0x6d8   : > { %v10925_v56 = vpop.eup %10924  ;;  %10285 = vmatprep.subr.bf16.mxu1 %v14832_v2  ;;  %10938 = vrcp.f32 %v3058_v58 }
 0x6d9   : > { %10192 = vmatmul.mubr.msk.bf16.gmra.mxu1 %vm2853_vm10, %v3133_v5  ;;  %v3134_v17 = vpack.c.bf16 %v3114_v18, %v3113_v26  ;;  %v10927_v40 = vpop.eup %10926  ;;  %v3115_v20 = vmul.f32 %v10925_v56, %v12485_v45 }
 0x6da   : > { %10195 = vmatprep.mubr.msk.bf16.mxu1 %vm11049_vm2, %v14832_v2  ;;  %v3116_v9 = vmul.f32 %v10927_v40, %v12442_v12  ;;  %v3061_v3 = vpop.xlane.xlu1 %3060 }
 0x6db   : > { %10940 = vrcp.f32 %v3061_v3  ;;  %v3076_v26 = vpop.xlane.xlu0 %3075 }
 0x6dc   : > { %v3135_v47 = vpack.c.bf16 %v3116_v9, %v3115_v20  ;;  %v10929_v48 = vpop.eup %10928  ;;  %10942 = vrcp.f32 %v3064_v8 }
 0x6dd   : > { %v10931_v31 = vpop.eup %10930  ;;  %v3117_v45 = vmul.f32 %v10929_v48, %v12491_v41 }
 0x6de   : > { %v3118_v50 = vmul.f32 %v10931_v31, %v12447_v22  ;;  %v3067_v5 = vpop.xlane.xlu1 %3066 }
 0x6df   : > { %10944 = vrcp.f32 %v3067_v5 }
 0x6e0   : > { %v3136_v12 = vpack.c.bf16 %v3118_v50, %v3117_v45  ;;  %v10933_v23 = vpop.eup %10932  ;;  %10946 = vrcp.f32 %v3070_v25 }
 0x6e1   : > { %10196 = vmatmul.mubr.msk.bf16.gmra.mxu1 %vm2853_vm10, %v3134_v17  ;;  %v10935_v63 = vpop.eup %10934  ;;  %v3119_v39 = vmul.f32 %v10933_v23, %v12495_v33 }
 0x6e2   : > { %10199 = vmatprep.mubr.msk.bf16.mxu1 %vm11049_vm2, %v14832_v2  ;;  %v3120_v11 = vmul.f32 %v10935_v63, %v12453_v54  ;;  %v3073_v18 = vpop.xlane.xlu1 %3072 }
 0x6e3   : > { %10948 = vrcp.f32 %v3073_v18 }
 0x6e4   : > { %v3137_v41 = vpack.c.bf16 %v3120_v11, %v3119_v39  ;;  %v10937_v14 = vpop.eup %10936  ;;  %10950 = vrcp.f32 %v3076_v26 }
 0x6e5   : > { %v10939_v22 = vpop.eup %10938  ;;  %v3121_v44 = vmul.f32 %v10937_v14, %v12499_v42 }
 0x6e6   : > { %v3122_v4 = vmul.f32 %v10939_v22, %v12457_v46 }
 0x6e8   : > { %v3138_v33 = vpack.c.bf16 %v3122_v4, %v3121_v44  ;;  %v10941_v49 = vpop.eup %10940 }
 0x6e9   : > { %10200 = vmatmul.mubr.msk.bf16.gmra.mxu1 %vm2853_vm10, %v3135_v47  ;;  %v10943_v54 = vpop.eup %10942  ;;  %v3123_v17 = vmul.f32 %v10941_v49, %v12503_v28 }
 0x6ea   : > { %10203 = vmatprep.mubr.msk.bf16.mxu1 %vm11049_vm2, %v14832_v2  ;;  %v3124_v56 = vmul.f32 %v10943_v54, %v12461_v52 }
 0x6ec   : > { %v3139_v42 = vpack.c.bf16 %v3124_v56, %v3123_v17  ;;  %v10945_v57 = vpop.eup %10944  ;;  %v3703_v17 = vld [vmem:[#allocation2 + $0x1] sm:$0xff] }
 0x6ed   : > { %v10947_v46 = vpop.eup %10946  ;;  %v3125_v40 = vmul.f32 %v10945_v57, %v12507_v15  ;;  %3763 = vrot.lane.b32.xlu1 %v3703_v17, %s11053_s1  ;;  %v3704_v57 = vld [vmem:[#allocation2 + $0x9] sm:$0xff] }
 0x6ee   : > { %v3126_v32 = vmul.f32 %v10947_v46, %v12467_v16  ;;  %v3885_v46 = vld [vmem:[#allocation2 + $0x2] sm:$0xff]  ;;  %3765 = vrot.lane.b32.xlu0 %v3704_v57, %s11053_s1 }
 0x6f0   : > { %v3140_v20 = vpack.c.bf16 %v3126_v32, %v3125_v40  ;;  %v10949_v62 = vpop.eup %10948 }
 0x6f1   : > { %10204 = vmatmul.mubr.msk.bf16.gmra.mxu1 %vm2853_vm10, %v3136_v12  ;;  %v10951_v28 = vpop.eup %10950  ;;  %v3127_v52 = vmul.f32 %v10949_v62, %v12511_v37  ;;  %3945 = vrot.lane.b32.xlu1 %v3885_v46, %s14801_s29  ;;  %v3886_v62 = vld [vmem:[#allocation2 + $0xa] sm:$0xff]  ;;  %v10551_v46 = vld [vmem:[%s14848_s8 + $0x78] sm:$0xff]  }
 0x6f2   : > { %10207 = vmatprep.mubr.msk.bf16.mxu1 %vm11049_vm2, %v14832_v2  ;;  %v3128_v9 = vmul.f32 %v10951_v28, %v12472_v59  ;;  %v4517_v28 = vld [vmem:[#allocation2 + $0x102] sm:$0xff]  ;;  %3947 = vrot.lane.b32.xlu0 %v3886_v62, %s14801_s29 }
 0x6f3   : > { %9592 = vmatprep.subr.bf16.mxu0 %v10551_v46  ;;  %v3643_v62 = vld [vmem:[#allocation2 + $0x8] sm:$0xff]  ;;  %v10561_v46 = vld [vmem:[%s14848_s8 + $0x50] sm:$0xff]  }
 0x6f4   : > { %v3141_v47 = vpack.c.bf16 %v3128_v9, %v3127_v52  ;;  %3673 = vst.msk [vmem:[#allocation3 + $0x18] sm:$0xff] %vm2053_vm4, %v3643_v62 }
 0x6f5   : > { %4605 = vrot.lane.b32.xlu1 %v4517_v28, %s14801_s29 }
 0x6f9   : > { %10208 = vmatmul.mubr.msk.bf16.gmra.mxu1 %vm2853_vm10, %v3137_v41 }
 0x6fa   : > { %10211 = vmatprep.mubr.msk.bf16.mxu1 %vm11049_vm2, %v14832_v2 }
 0x701   : > { %10212 = vmatmul.mubr.msk.bf16.gmra.mxu1 %vm2853_vm10, %v3138_v33 }
 0x702   : > { %10215 = vmatprep.mubr.msk.bf16.mxu1 %vm11049_vm2, %v14832_v2 }
 0x709   : > { %10216 = vmatmul.mubr.msk.bf16.gmra.mxu1 %vm2853_vm10, %v3139_v42 }
 0x70a   : > { %10219 = vmatprep.mubr.msk.bf16.mxu1 %vm11049_vm2, %v14832_v2 }
 0x711   : > { %10220 = vmatmul.mubr.msk.bf16.gmra.mxu1 %vm2853_vm10, %v3140_v20 }
 0x712   : > { %10223 = vmatprep.mubr.msk.bf16.mxu1 %vm11049_vm2, %v14832_v2 }
 0x719   : > { %10224 = vmatmul.mubr.msk.bf16.gmra.mxu1 %vm2853_vm10, %v3141_v47  ;;  %v4518_v47 = vld [vmem:[#allocation2 + $0x10a] sm:$0x7] }
 0x71a   : > { %10227 = vmatprep.mubr.msk.bf16.mxu1 %vm11049_vm2, %v14832_v2  ;;  %4607 = vrot.lane.b32.xlu0 %v4518_v47, %s14801_s29  ;;  %v12656_v47 = vld [vmem:[%s14849_s27] ss:$0 sm:$0xff]  ;;  %s701_s29 = sand.u32 1, %s11037_s30  }
 0x71b   : > { %s702_s6 = scalar_lea.vmem [#allocation7], %s701_s29 }
 0x71c   : > { %s8971_s26 = sshll.u32 %s702_s6, 4  ;;  %s8972_s26 = int_to_ptr.vmem [resolvable:$true] %s8971_s26 }
 0x732   : > { %v3079_v15 = vpop.xlane.xlu1 %3078 }
 0x733   : > { %10952 = vrcp.f32 %v3079_v15 }
 0x740   : > { %v10953_v16 = vpop.eup %10952 }
 0x741   : > { %v3129_v48 = vmul.f32 %v10953_v16, %v12526_v38 }
 0x743   : > { %v3142_v0 = vpack.c.bf16 %v3129_v48, %v3129_v48 }
 0x745   : > { %10228 = vmatmul.mubr.msk.bf16.gmra.mxu1 %vm2853_vm10, %v3142_v0  ;;  %vm3701_vm10 = vcmask 256000  }
 0x746   : > { %10233 = vmatprep.mubr.msk.bf16.mxu1 %vm11049_vm2, %v14832_v2 }
 0x760   : > { %v3766_v28 = vpop.permute.xlu0 %3765 }
 0x761   : > { %v3237_v37 = vpop.f32.mrf.mxu1  ;;  %3855 = vst.msk [vmem:[#allocation3 + $0x18] sm:$0xff] %vm3853_vm13, %v3766_v28 }
 0x763   : > { %v10181_v31 = vpop.f32.mrf.mxu1 }
 0x765   : > { %v3240_v59 = vpop.f32.mrf.mxu1 }
 0x766   : > { %v3339_v58 = vpack.c.bf16 %v3240_v59, %v3237_v37 }
 0x767   : > { %v10182_v45 = vpop.f32.mrf.mxu1 }
 0x768   : > { %10234 = vmatmul.mubr.msk.bf16.vlgmr.msra.gmra.mxu1 %vm2665_vm9, %v3339_v58 }
 0x769   : > { %v3245_v50 = vpop.f32.mrf.mxu1  ;;  %10237 = vmatprep.mubr.msk.bf16.mxu1 %vm11049_vm2, %v14832_v2 }
 0x76b   : > { %v10185_v12 = vpop.f32.mrf.mxu1 }
 0x76d   : > { %v3248_v23 = vpop.f32.mrf.mxu1 }
 0x76e   : > { %v3340_v38 = vpack.c.bf16 %v3248_v23, %v3245_v50  ;;  %v10549_v50 = vld [vmem:[%s14848_s8 + $0x88] sm:$0xff]  }
 0x76f   : > { %v10186_v3 = vpop.f32.mrf.mxu1  ;;  %10286 = vmatpush3.bf16.msra.mxu1 %v10549_v50 }
 0x770   : > { %10238 = vmatmul.mubr.msk.bf16.gmra.mxu1 %vm2665_vm9, %v3340_v38  ;;  %10287 = vmatprep.subr.bf16.mxu1 %v14832_v2  ;;  %v10550_v3 = vld [vmem:[%s14848_s8 + $0x80] sm:$0xff]  }
 0x771   : > { %v3253_v63 = vpop.f32.mrf.mxu1  ;;  %10241 = vmatprep.mubr.msk.bf16.mxu1 %vm11049_vm2, %v14832_v2 }
 0x773   : > { %v10189_v8 = vpop.f32.mrf.mxu1  ;;  %10288 = vmatpush3.bf16.msra.mxu1 %v10550_v3 }
 0x775   : > { %v3256_v39 = vpop.f32.mrf.mxu1 }
 0x776   : > { %v3341_v11 = vpack.c.bf16 %v3256_v39, %v3253_v63 }
 0x777   : > { %v10190_v41 = vpop.f32.mrf.mxu1 }
 0x778   : > { %10242 = vmatmul.mubr.msk.bf16.gmra.mxu1 %vm2665_vm9, %v3341_v11 }
 0x779   : > { %10245 = vmatprep.mubr.msk.bf16.mxu1 %vm11049_vm2, %v14832_v2 }
 0x799   : > { %v3261_v14 = vpop.f32.mrf.mxu1 }
 0x79b   : > { %v10193_v5 = vpop.f32.mrf.mxu1 }
 0x79d   : > { %v3264_v22 = vpop.f32.mrf.mxu1 }
 0x79e   : > { %v3342_v25 = vpack.c.bf16 %v3264_v22, %v3261_v14 }
 0x79f   : > { %v10194_v44 = vpop.f32.mrf.mxu1 }
 0x7a0   : > { %10246 = vmatmul.mubr.msk.bf16.gmra.mxu1 %vm2665_vm9, %v3342_v25 }
 0x7a1   : > { %v3269_v4 = vpop.f32.mrf.mxu1  ;;  %10249 = vmatprep.mubr.msk.bf16.mxu1 %vm11049_vm2, %v14832_v2 }
 0x7a3   : > { %v10197_v33 = vpop.f32.mrf.mxu1 }
 0x7a5   : > { %v3272_v49 = vpop.f32.mrf.mxu1 }
 0x7a6   : > { %v3343_v18 = vpack.c.bf16 %v3272_v49, %v3269_v4 }
 0x7a7   : > { %v10198_v54 = vpop.f32.mrf.mxu1 }
 0x7a8   : > { %10250 = vmatmul.mubr.msk.bf16.gmra.mxu1 %vm2665_vm9, %v3343_v18 }
 0x7a9   : > { %v3277_v26 = vpop.f32.mrf.mxu1  ;;  %10253 = vmatprep.mubr.msk.bf16.mxu1 %vm11049_vm2, %v14832_v2 }
 0x7ab   : > { %v10201_v56 = vpop.f32.mrf.mxu1 }
 0x7ad   : > { %v3280_v42 = vpop.f32.mrf.mxu1 }
 0x7ae   : > { %v3344_v40 = vpack.c.bf16 %v3280_v42, %v3277_v26 }
 0x7af   : > { %v10202_v32 = vpop.f32.mrf.mxu1 }
 0x7b0   : > { %10254 = vmatmul.mubr.msk.bf16.gmra.mxu1 %vm2665_vm9, %v3344_v40  ;;  %v10552_v40 = vld [vmem:[%s14848_s8 + $0x38] sm:$0xff]   ;;  %v3764_v32 = vpop.permute.xlu1 %3763 }
 0x7b1   : > { %v3285_v20 = vpop.f32.mrf.mxu1  ;;  %10257 = vmatprep.mubr.msk.bf16.mxu1 %vm11049_vm2, %v14832_v2  ;;  %9593 = vmatpush3.bf16.msra.mxu0 %v10552_v40 }
 0x7b3   : > { %v10205_v52 = vpop.f32.mrf.mxu1 }
 0x7b4   : > { %v3946_v52 = vpop.permute.xlu1 %3945 }
 0x7b5   : > { %v3288_v9 = vpop.f32.mrf.mxu1 }
 0x7b6   : > { %v3345_v15 = vpack.c.bf16 %v3288_v9, %v3285_v20  ;;  %v3642_v20 = vld [vmem:[#allocation2] sm:$0xff]  ;;  %v3948_v9 = vpop.permute.xlu0 %3947 }
 0x7b7   : > { %v10206_v16 = vpop.f32.mrf.mxu1  ;;  %3672 = vst.msk [vmem:[#allocation3] sm:$0xff] %vm2053_vm4, %v3642_v20 }
 0x7b8   : > { %10258 = vmatmul.mubr.msk.bf16.gmra.mxu1 %vm2665_vm9, %v3345_v15  ;;  %3854 = vst.msk [vmem:[#allocation3] sm:$0xff] %vm3853_vm13, %v3764_v32 }
 0x7b9   : > { %v3293_v48 = vpop.f32.mrf.mxu1  ;;  %10261 = vmatprep.mubr.msk.bf16.mxu1 %vm11049_vm2, %v14832_v2  ;;  %4036 = vst.msk [vmem:[#allocation3] sm:$0xff] %vm4035_vm14, %v3946_v52  ;;  %4037 = vst.msk [vmem:[#allocation3 + $0x18] sm:$0xff] %vm4035_vm14, %v3948_v9  ;;  %v10563_v9 = vld [vmem:[%s14848_s8 + $0x48] sm:$0xff]  }
 0x7bb   : > { %v10209_v0 = vpop.f32.mrf.mxu1 }
 0x7bd   : > { %v3296_v37 = vpop.f32.mrf.mxu1 }
 0x7be   : > { %v3346_v31 = vpack.c.bf16 %v3296_v37, %v3293_v48 }
 0x7bf   : > { %v10210_v59 = vpop.f32.mrf.mxu1 }
 0x7c0   : > { %10262 = vmatmul.mubr.msk.bf16.gmra.mxu1 %vm2665_vm9, %v3346_v31 }
 0x7c1   : > { %v3301_v58 = vpop.f32.mrf.mxu1  ;;  %10265 = vmatprep.mubr.msk.bf16.mxu1 %vm11049_vm2, %v14832_v2 }
 0x7c3   : > { %v10213_v45 = vpop.f32.mrf.mxu1 }
 0x7c4   : > { %v10553_v45 = vld [vmem:[%s14848_s8 + $0x70] sm:$0xff]  }
 0x7c5   : > { %v3304_v12 = vpop.f32.mrf.mxu1  ;;  %9594 = vmatprep.subr.bf16.mxu0 %v10553_v45 }
 0x7c6   : > { %v3347_v23 = vpack.c.bf16 %v3304_v12, %v3301_v58  ;;  %v10554_v12 = vld [vmem:[%s14848_s8 + $0x30] sm:$0xff]  }
 0x7c7   : > { %v10214_v38 = vpop.f32.mrf.mxu1  ;;  %9595 = vmatpush3.bf16.msra.mxu0 %v10554_v12 }
 0x7c8   : > { %10266 = vmatmul.mubr.msk.bf16.gmra.mxu1 %vm2665_vm9, %v3347_v23 }
 0x7c9   : > { %v3309_v63 = vpop.f32.mrf.mxu1  ;;  %10269 = vmatprep.mubr.msk.bf16.mxu1 %vm11049_vm2, %v14832_v2 }
 0x7cb   : > { %v10217_v8 = vpop.f32.mrf.mxu1 }
 0x7cd   : > { %v3312_v39 = vpop.f32.mrf.mxu1 }
 0x7ce   : > { %v3348_v11 = vpack.c.bf16 %v3312_v39, %v3309_v63 }
 0x7cf   : > { %v10218_v41 = vpop.f32.mrf.mxu1 }
 0x7d0   : > { %10270 = vmatmul.mubr.msk.bf16.gmra.mxu1 %vm2665_vm9, %v3348_v11  ;;  %v10556_v41 = vld [vmem:[%s14848_s8 + $0x28] sm:$0xff]  }
 0x7d1   : > { %v3317_v14 = vpop.f32.mrf.mxu1  ;;  %10273 = vmatprep.mubr.msk.bf16.mxu1 %vm11049_vm2, %v14832_v2 }
 0x7d3   : > { %v10221_v5 = vpop.f32.mrf.mxu1 }
 0x7d5   : > { %v3320_v22 = vpop.f32.mrf.mxu1 }
 0x7d6   : > { %v3349_v25 = vpack.c.bf16 %v3320_v22, %v3317_v14 }
 0x7d7   : > { %v10222_v44 = vpop.f32.mrf.mxu1 }
 0x7d8   : > { %10274 = vmatmul.mubr.msk.bf16.gmra.mxu1 %vm2665_vm9, %v3349_v25 }
 0x7d9   : > { %v3325_v4 = vpop.f32.mrf.mxu1  ;;  %10277 = vmatprep.mubr.msk.bf16.mxu1 %vm11049_vm2, %v14832_v2 }
 0x7db   : > { %v10225_v33 = vpop.f32.mrf.mxu1 }
 0x7dd   : > { %v3328_v49 = vpop.f32.mrf.mxu1 }
 0x7de   : > { %v3350_v18 = vpack.c.bf16 %v3328_v49, %v3325_v4 }
 0x7df   : > { %v10226_v54 = vpop.f32.mrf.mxu1 }
 0x7e0   : > { %10278 = vmatmul.mubr.msk.bf16.gmra.mxu1 %vm2665_vm9, %v3350_v18  ;;  %v10559_v18 = vld [vmem:[%s14848_s8 + $0x58] sm:$0xff]  }
 0x7e1   : > { %10281 = vmatprep.mubr.msk.bf16.mxu1 %vm11049_vm2, %v14832_v2 }
 0x805   : > { %v3333_v26 = vpop.f32.mrf.mxu1 }
 0x806   : > { %v3351_v17 = vpack.c.bf16 %v3333_v26, %v3333_v26 }
 0x807   : > { %v10229_v56 = vpop.f32.mrf.mxu1 }
 0x808   : > { %10282 = vmatmul.mubr.msk.bf16.gmra.mxu1 %vm2665_vm9, %v3351_v17  ;;  %vm4217_vm9 = vcmask 1048320  }
 0x809   : > { %v3336_v42 = vpop.f32.mrf.mxu1  ;;  %10289 = vmatprep.mubr.msk.bf16.mxu1 %vm11049_vm2, %v14832_v2 }
 0x80b   : > { %v10230_v57 = vpop.f32.mrf.mxu1 }
 0x828   : > { %v3440_v15 = vpop.f32.mrf.mxu1 }
 0x829   : > { %v3441_v16 = vadd.f32 %v12656_v47, %v3440_v15 }
 0x82a   : > { %v10235_v48 = vpop.f32.mrf.mxu1 }
 0x82b   : > { %v3542_v0 = vadd.f32 %v3441_v16, %v11795_v55 }
 0x82c   : > { %v3443_v37 = vpop.f32.mrf.mxu1 }
 0x82d   : > { %3601 = vst.msk [vmem:[#allocation2 + $0x12] sm:$0xff] %vm2053_vm4, %v3542_v0  ;;  %v3444_v31 = vadd.f32 %v12656_v47, %v3443_v37  ;;  %v10564_v37 = vld [vmem:[%s14848_s8 + $0x8] sm:$0xff]  }
 0x82e   : > { %v10236_v59 = vpop.f32.mrf.mxu1 }
 0x82f   : > { %v3543_v58 = vadd.f32 %v3444_v31, %v11802_v35  ;;  %v10555_v35 = vld [vmem:[%s14848_s8 + $0x68] sm:$0xff]   ;;  %v10565_v31 = vld [vmem:[%s14848_s8 + $0x40] sm:$0xff]  }
 0x830   : > { %v3448_v50 = vpop.f32.mrf.mxu1  ;;  %9596 = vmatprep.subr.bf16.mxu0 %v10555_v35 }
 0x831   : > { %3603 = vst.msk [vmem:[#allocation2 + $0x1a] sm:$0x3f] %vm3602_vm15, %v3543_v58  ;;  %v3449_v55 = vadd.f32 %v12656_v47, %v3448_v50  ;;  %9597 = vmatpush3.bf16.msra.mxu0 %v10556_v41 }
 0x832   : > { %3605 = vst.msk [vmem:[#allocation2 + $0x1d] sm:$0xc0] %vm3604_vm0, %v3543_v58  ;;  %v10239_v23 = vpop.f32.mrf.mxu1 }
 0x833   : > { %v3544_v38 = vadd.f32 %v3449_v55, %v11811_v19  ;;  %v10557_v19 = vld [vmem:[%s14848_s8 + $0x60] sm:$0xff]  }
 0x834   : > { %v3451_v3 = vpop.f32.mrf.mxu1  ;;  %v4067_v63 = vld [vmem:[#allocation2 + $0x11] sm:$0xff]  ;;  %9598 = vmatprep.subr.bf16.mxu0 %v10557_v19 }
 0x835   : > { %v3887_v8 = vld [vmem:[#allocation2 + $0x12] sm:$0xff]  ;;  %3606 = vst.msk [vmem:[#allocation2 + $0x25] sm:$0xff] %vm2053_vm4, %v3544_v38  ;;  %v3452_v11 = vadd.f32 %v12656_v47, %v3451_v3  ;;  %4127 = vrot.lane.b32.xlu1 %v4067_v63, %s14850_s2  ;;  %v10566_v38 = vld [vmem:[%s14848_s8] sm:$0xff]  }
 0x836   : > { %v3644_v39 = vld [vmem:[#allocation2 + $0x10] sm:$0xff]  ;;  %4279 = vst.msk [vmem:[#allocation3 + $0x8] sm:$0xff] %vm2053_vm4, %v3887_v8  ;;  %v10240_v14 = vpop.f32.mrf.mxu1 }
 0x837   : > { %3674 = vst.msk [vmem:[#allocation3 + $0x30] sm:$0xff] %vm2053_vm4, %v3644_v39  ;;  %v3545_v5 = vadd.f32 %v3452_v11, %v11821_v30  ;;  %v10558_v30 = vld [vmem:[%s14848_s8 + $0x20] sm:$0xff]  }
 0x838   : > { %v3456_v22 = vpop.f32.mrf.mxu1  ;;  %v4309_v25 = vld [vmem:[#allocation2 + $0x13] sm:$0xff]  ;;  %9599 = vmatpush3.bf16.msra.mxu0 %v10558_v30  ;;  %v4310_v28 = vld [vmem:[#allocation2 + $0x1b] sm:$0xff] }
 0x839   : > { %3608 = vst.msk [vmem:[#allocation2 + $0x2d] sm:$0xf] %vm3607_vm1, %v3545_v5  ;;  %v3457_v44 = vadd.f32 %v12656_v47, %v3456_v22  ;;  %3767 = vrot.lane.b32.xlu1 %v4067_v63, %s11053_s1  ;;  %4369 = vrot.lane.b32.xlu0 %v4309_v25, %s11053_s1  ;;  %v3888_v4 = vld [vmem:[#allocation2 + $0x1a] sm:$0xff] }
 0x83a   : > { %3610 = vst.msk [vmem:[#allocation2 + $0x30] sm:$0xf0] %vm3609_vm5, %v3545_v5  ;;  %v3645_v33 = vld [vmem:[#allocation2 + $0x18] sm:$0xff]  ;;  %v10243_v49 = vpop.f32.mrf.mxu1  ;;  %9600 = vmatprep.subr.bf16.mxu0 %v10559_v18 }
 0x83b   : > { %4280 = vst.msk [vmem:[#allocation3 + $0x20] sm:$0xff] %vm2053_vm4, %v3888_v4  ;;  %3675 = vst.msk [vmem:[#allocation3 + $0x48] sm:$0xff] %vm2053_vm4, %v3645_v33  ;;  %v3546_v54 = vadd.f32 %v3457_v44, %v11830_v21  ;;  %v4068_v56 = vld [vmem:[#allocation2 + $0x19] sm:$0xff] }
 0x83c   : > { %v4849_v26 = vld [vmem:[#allocation2 + $0x24] sm:$0xff]  ;;  %v3459_v17 = vpop.f32.mrf.mxu1  ;;  %v10560_v21 = vld [vmem:[%s14848_s8 + $0x18] sm:$0xff]  }
 0x83d   : > { %v12704_v42 = vld [vmem:[#allocation2 + $0x22] sm:$0xff]  ;;  %4879 = vst.msk [vmem:[#allocation3 + $0x10] sm:$0xff] %vm2053_vm4, %v4849_v26  ;;  %3611 = vst.msk [vmem:[#allocation2 + $0x38] sm:$0xff] %vm2053_vm4, %v3546_v54  ;;  %v3460_v57 = vadd.f32 %v12656_v47, %v3459_v17  ;;  %3949 = vrot.lane.b32.xlu1 %v3887_v8, %s14851_s24  ;;  %4129 = vrot.lane.b32.xlu0 %v4068_v56, %s14850_s2 }
 0x83e   : > { %4281 = vst.msk [vmem:[#allocation3 + $0x38] sm:$0xff] %vm2053_vm4, %v12704_v42  ;;  %v10244_v40 = vpop.f32.mrf.mxu1  ;;  %v3646_v32 = vld [vmem:[#allocation2 + $0x20] sm:$0xff]  ;;  %9601 = vmatpush3.bf16.msra.mxu0 %v10560_v21 }
 0x83f   : > { %v3547_v20 = vadd.f32 %v3460_v57, %v11840_v61  ;;  %3676 = vst.msk [vmem:[#allocation3 + $0x60] sm:$0xff] %vm2053_vm4, %v3646_v32  ;;  %9602 = vmatprep.subr.bf16.mxu0 %v10561_v46  ;;  %v10562_v61 = vld [vmem:[%s14848_s8 + $0x10] sm:$0xff]   ;;  %v4669_v58 = vld [vmem:[#allocation2 + $0x23] sm:$0xff] }
 0x840   : > { %v4850_v62 = vld [vmem:[#allocation2 + $0x2c] sm:$0xff]  ;;  %v4069_v8 = vld [vmem:[#allocation2 + $0x21] sm:$0xff] }
 0x841   : > { %v4490_v52 = vld [vmem:[#allocation2 + $0x2a] sm:$0xff]  ;;  %4880 = vst.msk [vmem:[#allocation3 + $0x28] sm:$0xff] %vm2053_vm4, %v4850_v62  ;;  %4371 = vrot.lane.b32.xlu1 %v4310_v28, %s11053_s1  ;;  %3769 = vrot.lane.b32.xlu0 %v4068_v56, %s11053_s1 }
 0x842   : > { %3613 = vst.msk [vmem:[#allocation2 + $0x40] sm:$0x3] %vm3612_vm7, %v3547_v20  ;;  %v3647_v15 = vld [vmem:[#allocation2 + $0x28] sm:$0xff]  ;;  %v3648_v16 = vld [vmem:[#allocation2 + $0x30] sm:$0xff]  ;;  %9603 = vmatpush3.bf16.msra.mxu0 %v10562_v61 }
 0x843   : > { %3615 = vst.msk [vmem:[#allocation2 + $0x43] sm:$0xfc] %vm3614_vm8, %v3547_v20  ;;  %9604 = vmatprep.subr.bf16.mxu0 %v10563_v9  ;;  %v4670_v63 = vld [vmem:[#allocation2 + $0x2b] sm:$0xff] }
 0x844   : > { %4282 = vst.msk [vmem:[#allocation3 + $0x50] sm:$0xff] %vm2053_vm4, %v4490_v52  ;;  %3677 = vst.msk [vmem:[#allocation3 + $0x78] sm:$0xff] %vm2053_vm4, %v3647_v15  ;;  %v4851_v48 = vld [vmem:[#allocation2 + $0x34] sm:$0xff]  ;;  %v4911_v45 = vld [vmem:[#allocation3 + $0x10] sm:$0xff] }
 0x845   : > { %3678 = vst.msk [vmem:[#allocation3 + $0x90] sm:$0xff] %vm2053_vm4, %v3648_v16  ;;  %v12735_v0 = vld [vmem:[#allocation2 + $0x32] sm:$0xff]  ;;  %4881 = vst.msk [vmem:[#allocation3 + $0x40] sm:$0xff] %vm2053_vm4, %v4851_v48  ;;  %3951 = vrot.lane.b32.xlu0 %v3888_v4, %s14851_s24  ;;  %4549 = vrot.lane.b32.xlu1 %v12704_v42, %s14851_s24  ;;  %v4070_v19 = vld [vmem:[#allocation2 + $0x29] sm:$0xff] }
 0x846   : > { %4283 = vst.msk [vmem:[#allocation3 + $0x68] sm:$0xff] %vm2053_vm4, %v12735_v0  ;;  %v3649_v59 = vld [vmem:[#allocation2 + $0x38] sm:$0xff]  ;;  %9605 = vmatpush3.bf16.msra.mxu0 %v10564_v37 }
 0x847   : > { %3679 = vst.msk [vmem:[#allocation3 + $0xa8] sm:$0xff] %vm2053_vm4, %v3649_v59  ;;  %9606 = vmatprep.subr.bf16.mxu0 %v10565_v31  ;;  %v4671_v5 = vld [vmem:[#allocation2 + $0x33] sm:$0xff] }
 0x848   : > { %v4914_v12 = vld [vmem:[#allocation3 + $0x28] sm:$0xff] }
 0x849   : > { %v4852_v50 = vld [vmem:[#allocation2 + $0x3c] sm:$0xff]  ;;  %4729 = vrot.lane.b32.xlu1 %v4669_v58, %s14850_s2  ;;  %4551 = vrot.lane.b32.xlu0 %v4490_v52, %s14851_s24  ;;  %v5001_v35 = vpack.c.bf16 %v4914_v12, %v4911_v45  ;;  %v4071_v26 = vld [vmem:[#allocation2 + $0x31] sm:$0xff] }
 0x84a   : > { %v12750_v55 = vld [vmem:[#allocation2 + $0x3a] sm:$0xff]  ;;  %4882 = vst.msk [vmem:[#allocation3 + $0x58] sm:$0xff] %vm2053_vm4, %v4852_v50  ;;  %v12755_v23 = vld [vmem:[#allocation2 + $0x42] sm:$0xff]  ;;  %9607 = vmatpush3.bf16.msra.mxu0 %v10566_v38 }
 0x84b   : > { %4284 = vst.msk [vmem:[#allocation3 + $0x80] sm:$0xff] %vm2053_vm4, %v12750_v55  ;;  %4285 = vst.msk [vmem:[#allocation3 + $0x98] sm:$0xff] %vm2053_vm4, %v12755_v23  ;;  %10290 = vmatmul.mubr.msk.bf16.vlgmr.msra.gmra.mxu1 %vm2053_vm4, %v5001_v35  ;;  %v3650_v3 = vld [vmem:[#allocation2 + $0x40] sm:$0xff]  ;;  %5936 = vmatprep.subr.bf16.mxu0 %v14843_v13 }
 0x84c   : > { %10293 = vmatprep.mubr.msk.bf16.mxu1 %vm11049_vm2, %v14832_v2  ;;  %3680 = vst.msk [vmem:[#allocation3 + $0xc0] sm:$0xff] %vm2053_vm4, %v3650_v3  ;;  %v4917_v39 = vld [vmem:[#allocation3 + $0x40] sm:$0xff]  ;;  %v4672_v33 = vld [vmem:[#allocation2 + $0x3b] sm:$0xff] }
 0x84d   : > { %4373 = vrot.lane.b32.xlu1 %v4669_v58, %s11053_s1  ;;  %4731 = vrot.lane.b32.xlu0 %v4670_v63, %s14850_s2 }
 0x851   : > { %v4920_v11 = vld [vmem:[#allocation3 + $0x58] sm:$0xff]  ;;  %4131 = vrot.lane.b32.xlu1 %v4069_v8, %s14850_s2  ;;  %4375 = vrot.lane.b32.xlu0 %v4670_v63, %s11053_s1 }
 0x852   : > { %v5004_v41 = vpack.c.bf16 %v4920_v11, %v4917_v39 }
 0x854   : > { %10294 = vmatmul.mubr.msk.bf16.gmra.mxu1 %vm2053_vm4, %v5004_v41 }
 0x855   : > { %10297 = vmatprep.mubr.msk.bf16.mxu1 %vm11049_vm2, %v14832_v2  ;;  %3771 = vrot.lane.b32.xlu1 %v4069_v8, %s11053_s1 }
 0x856   : > { %4133 = vrot.lane.b32.xlu0 %v4070_v19, %s14850_s2 }
 0x859   : > { %3953 = vrot.lane.b32.xlu1 %v12704_v42, %s14851_s24  ;;  %v4072_v42 = vld [vmem:[#allocation2 + $0x39] sm:$0xff] }
 0x85a   : > { %3773 = vrot.lane.b32.xlu0 %v4070_v19, %s11053_s1 }
 0x85d   : > { %4553 = vrot.lane.b32.xlu1 %v12735_v0, %s14851_s24 }
 0x85e   : > { %3955 = vrot.lane.b32.xlu0 %v4490_v52, %s14851_s24 }
 0x860   : > { %v3464_v14 = vpop.f32.mrf.mxu1 }
 0x861   : > { %v3465_v22 = vadd.f32 %v12656_v47, %v3464_v14  ;;  %4733 = vrot.lane.b32.xlu1 %v4671_v5, %s14850_s2 }
 0x862   : > { %4555 = vrot.lane.b32.xlu0 %v12750_v55, %s14851_s24  ;;  %v10247_v25 = vpop.f32.mrf.mxu1 }
 0x863   : > { %v3548_v44 = vadd.f32 %v3465_v22, %v11849_v36 }
 0x864   : > { %v3467_v4 = vpop.f32.mrf.mxu1 }
 0x865   : > { %3616 = vst.msk [vmem:[#allocation2 + $0x4b] sm:$0xff] %vm2053_vm4, %v3548_v44  ;;  %v3468_v30 = vadd.f32 %v12656_v47, %v3467_v4  ;;  %4377 = vrot.lane.b32.xlu1 %v4671_v5, %s11053_s1 }
 0x866   : > { %4735 = vrot.lane.b32.xlu0 %v4672_v33, %s14850_s2  ;;  %v10248_v49 = vpop.f32.mrf.mxu1 }
 0x867   : > { %v3549_v18 = vadd.f32 %v3468_v30, %v11859_v29 }
 0x868   : > { %v3472_v54 = vpop.f32.mrf.mxu1 }
 0x869   : > { %3617 = vst.msk [vmem:[#allocation2 + $0x56] sm:$0xff] %vm2053_vm4, %v3549_v18  ;;  %v3473_v17 = vadd.f32 %v12656_v47, %v3472_v54  ;;  %4135 = vrot.lane.b32.xlu1 %v4071_v26, %s14850_s2 }
 0x86a   : > { %4379 = vrot.lane.b32.xlu0 %v4672_v33, %s11053_s1  ;;  %v10251_v36 = vpop.f32.mrf.mxu1 }
 0x86b   : > { %v3550_v56 = vadd.f32 %v3473_v17, %v11868_v43 }
 0x86c   : > { %v4853_v57 = vld [vmem:[#allocation2 + $0x44] sm:$0xff]  ;;  %v4854_v21 = vld [vmem:[#allocation2 + $0x4c] sm:$0xff]  ;;  %v3475_v46 = vpop.f32.mrf.mxu1 }
 0x86d   : > { %v12799_v40 = vld [vmem:[#allocation2 + $0x4a] sm:$0xff]  ;;  %4883 = vst.msk [vmem:[#allocation3 + $0x70] sm:$0xff] %vm2053_vm4, %v4853_v57  ;;  %4884 = vst.msk [vmem:[#allocation3 + $0x88] sm:$0xff] %vm2053_vm4, %v4854_v21  ;;  %v3476_v29 = vadd.f32 %v12656_v47, %v3475_v46  ;;  %3775 = vrot.lane.b32.xlu1 %v4071_v26, %s11053_s1  ;;  %v4073_v26 = vld [vmem:[#allocation2 + $0x41] sm:$0xff] }
 0x86e   : > { %3618 = vst.msk [vmem:[#allocation2 + $0x5e] sm:$0x3f] %vm3602_vm15, %v3550_v56  ;;  %4137 = vrot.lane.b32.xlu0 %v4072_v42, %s14850_s2  ;;  %v3651_v43 = vld [vmem:[#allocation2 + $0x48] sm:$0xff]  ;;  %v10252_v32 = vpop.f32.mrf.mxu1 }
 0x86f   : > { %3619 = vst.msk [vmem:[#allocation2 + $0x61] sm:$0xc0] %vm3604_vm0, %v3550_v56  ;;  %v3551_v20 = vadd.f32 %v3476_v29, %v11878_v60  ;;  %v4674_v11 = vld [vmem:[#allocation2 + $0x4b] sm:$0xff] }
 0x870   : > { %4286 = vst.msk [vmem:[#allocation3 + $0xb0] sm:$0xff] %vm2053_vm4, %v12799_v40  ;;  %3681 = vst.msk [vmem:[#allocation3 + $0xd8] sm:$0xff] %vm2053_vm4, %v3651_v43  ;;  %v4855_v62 = vld [vmem:[#allocation2 + $0x54] sm:$0xff]  ;;  %v3480_v28 = vpop.f32.mrf.mxu1  ;;  %v4074_v57 = vld [vmem:[#allocation2 + $0x49] sm:$0xff] }
 0x871   : > { %v12812_v52 = vld [vmem:[#allocation2 + $0x52] sm:$0xff]  ;;  %4885 = vst.msk [vmem:[#allocation3 + $0xa0] sm:$0xff] %vm2053_vm4, %v4855_v62  ;;  %3620 = vst.msk [vmem:[#allocation2 + $0x69] sm:$0xff] %vm2053_vm4, %v3551_v20  ;;  %v3481_v61 = vadd.f32 %v12656_v47, %v3480_v28  ;;  %3957 = vrot.lane.b32.xlu1 %v12735_v0, %s14851_s24 }
 0x872   : > { %3777 = vrot.lane.b32.xlu0 %v4072_v42, %s11053_s1  ;;  %4287 = vst.msk [vmem:[#allocation3 + $0xc8] sm:$0xff] %vm2053_vm4, %v12812_v52  ;;  %v3652_v9 = vld [vmem:[#allocation2 + $0x50] sm:$0xff]  ;;  %v10255_v60 = vpop.f32.mrf.mxu1 }
 0x873   : > { %3682 = vst.msk [vmem:[#allocation3 + $0xf0] sm:$0xff] %vm2053_vm4, %v3652_v9  ;;  %v3552_v15 = vadd.f32 %v3481_v61, %v11887_v53 }
 0x874   : > { %v3483_v48 = vpop.f32.mrf.mxu1  ;;  %v4923_v37 = vld [vmem:[#allocation3 + $0x70] sm:$0xff]  ;;  %v4926_v31 = vld [vmem:[#allocation3 + $0x88] sm:$0xff] }
 0x875   : > { %v4856_v16 = vld [vmem:[#allocation2 + $0x5c] sm:$0xff]  ;;  %3621 = vst.msk [vmem:[#allocation2 + $0x71] sm:$0xf] %vm3607_vm1, %v3552_v15  ;;  %v3484_v0 = vadd.f32 %v12656_v47, %v3483_v48  ;;  %4557 = vrot.lane.b32.xlu1 %v12755_v23, %s14851_s24  ;;  %v5007_v59 = vpack.c.bf16 %v4926_v31, %v4923_v37 }
 0x876   : > { %4886 = vst.msk [vmem:[#allocation3 + $0xb8] sm:$0xff] %vm2053_vm4, %v4856_v16  ;;  %3959 = vrot.lane.b32.xlu0 %v12750_v55, %s14851_s24  ;;  %v12832_v53 = vld [vmem:[#allocation2 + $0x5a] sm:$0xff]  ;;  %v10256_v58 = vpop.f32.mrf.mxu1  ;;  %v4673_v55 = vld [vmem:[#allocation2 + $0x43] sm:$0xff] }
 0x877   : > { %3622 = vst.msk [vmem:[#allocation2 + $0x74] sm:$0xf0] %vm3609_vm5, %v3552_v15  ;;  %v3653_v45 = vld [vmem:[#allocation2 + $0x58] sm:$0xff]  ;;  %v3654_v50 = vld [vmem:[#allocation2 + $0x60] sm:$0xff]  ;;  %v3553_v12 = vadd.f32 %v3484_v0, %v11897_v27  ;;  %10298 = vmatmul.mubr.msk.bf16.gmra.mxu1 %vm2053_vm4, %v5007_v59 }
 0x878   : > { %4288 = vst.msk [vmem:[#allocation3 + $0xe0] sm:$0xff] %vm2053_vm4, %v12832_v53  ;;  %3683 = vst.msk [vmem:[#allocation3 + $0x108] sm:$0xff] %vm2053_vm4, %v3653_v45  ;;  %v4857_v35 = vld [vmem:[#allocation2 + $0x64] sm:$0xff]  ;;  %v3488_v38 = vpop.f32.mrf.mxu1  ;;  %10301 = vmatprep.mubr.msk.bf16.mxu1 %vm11049_vm2, %v14832_v2  ;;  %v4929_v41 = vld [vmem:[#allocation3 + $0xa0] sm:$0xff] }
 0x879   : > { %3684 = vst.msk [vmem:[#allocation3 + $0x120] sm:$0xff] %vm2053_vm4, %v3654_v50  ;;  %4887 = vst.msk [vmem:[#allocation3 + $0xd0] sm:$0xff] %vm2053_vm4, %v4857_v35  ;;  %v3489_v3 = vadd.f32 %v12656_v47, %v3488_v38  ;;  %4737 = vrot.lane.b32.xlu1 %v4673_v55, %s14850_s2  ;;  %v12848_v27 = vld [vmem:[#allocation2 + $0x62] sm:$0xff] }
 0x87a   : > { %3623 = vst.msk [vmem:[#allocation2 + $0x7c] sm:$0xff] %vm2053_vm4, %v3553_v12  ;;  %4559 = vrot.lane.b32.xlu0 %v12799_v40, %s14851_s24  ;;  %v3655_v63 = vld [vmem:[#allocation2 + $0x68] sm:$0xff]  ;;  %v10259_v8 = vpop.f32.mrf.mxu1  ;;  %4289 = vst.msk [vmem:[#allocation3 + $0xf8] sm:$0xff] %vm2053_vm4, %v12848_v27 }
 0x87b   : > { %3685 = vst.msk [vmem:[#allocation3 + $0x138] sm:$0xff] %vm2053_vm4, %v3655_v63  ;;  %v3554_v39 = vadd.f32 %v3489_v3, %v11911_v34 }
 0x87c   : > { %v4858_v19 = vld [vmem:[#allocation2 + $0x6c] sm:$0xff]  ;;  %v3491_v5 = vpop.f32.mrf.mxu1 }
 0x87d   : > { %v4932_v22 = vld [vmem:[#allocation3 + $0xb8] sm:$0xff]  ;;  %4888 = vst.msk [vmem:[#allocation3 + $0xe8] sm:$0xff] %vm2053_vm4, %v4858_v19  ;;  %v3492_v25 = vadd.f32 %v12656_v47, %v3491_v5  ;;  %4381 = vrot.lane.b32.xlu1 %v4673_v55, %s11053_s1  ;;  %v3656_v30 = vld [vmem:[#allocation2 + $0x70] sm:$0xff]  ;;  %v4676_v5 = vld [vmem:[#allocation2 + $0x5b] sm:$0xff] }
 0x87e   : > { %v4859_v14 = vld [vmem:[#allocation2 + $0x74] sm:$0xff]  ;;  %3624 = vst.msk [vmem:[#allocation2 + $0x84] sm:$0x3] %vm3612_vm7, %v3554_v39  ;;  %4739 = vrot.lane.b32.xlu0 %v4674_v11, %s14850_s2  ;;  %v5010_v34 = vpack.c.bf16 %v4932_v22, %v4929_v41  ;;  %v12861_v44 = vld [vmem:[#allocation2 + $0x6a] sm:$0xff]  ;;  %v10260_v33 = vpop.f32.mrf.mxu1 }
 0x87f   : > { %4889 = vst.msk [vmem:[#allocation3 + $0x100] sm:$0xff] %vm2053_vm4, %v4859_v14  ;;  %v12863_v4 = vld [vmem:[#allocation2 + $0x72] sm:$0xff]  ;;  %4290 = vst.msk [vmem:[#allocation3 + $0x110] sm:$0xff] %vm2053_vm4, %v12861_v44  ;;  %v3555_v49 = vadd.f32 %v3492_v25, %v11921_v7 }
 0x880   : > { %3625 = vst.msk [vmem:[#allocation2 + $0x87] sm:$0xfc] %vm3614_vm8, %v3554_v39  ;;  %10302 = vmatmul.mubr.msk.bf16.gmra.mxu1 %vm2053_vm4, %v5010_v34  ;;  %v3496_v54 = vpop.f32.mrf.mxu1  ;;  %v4935_v29 = vld [vmem:[#allocation3 + $0xd0] sm:$0xff]  ;;  %v4675_v39 = vld [vmem:[#allocation2 + $0x53] sm:$0xff] }
 0x881   : > { %4291 = vst.msk [vmem:[#allocation3 + $0x128] sm:$0xff] %vm2053_vm4, %v12863_v4  ;;  %3686 = vst.msk [vmem:[#allocation3 + $0x150] sm:$0xff] %vm2053_vm4, %v3656_v30  ;;  %v4860_v18 = vld [vmem:[#allocation2 + $0x7c] sm:$0xff]  ;;  %10305 = vmatprep.mubr.msk.bf16.mxu1 %vm11049_vm2, %v14832_v2  ;;  %v3497_v36 = vadd.f32 %v12656_v47, %v3496_v54  ;;  %4139 = vrot.lane.b32.xlu1 %v4073_v26, %s14850_s2  ;;  %v14852_v54 = vld [vmem:[#allocation20_spill] sm:$0xff] }
 0x882   : > { %v12874_v17 = vld [vmem:[#allocation2 + $0x7a] sm:$0xff]  ;;  %4890 = vst.msk [vmem:[#allocation3 + $0x118] sm:$0xff] %vm2053_vm4, %v4860_v18  ;;  %3626 = vst.msk [vmem:[#allocation2 + $0x8f] sm:$0xff] %vm2053_vm4, %v3555_v49  ;;  %4383 = vrot.lane.b32.xlu0 %v4674_v11, %s11053_s1  ;;  %v10263_v56 = vpop.f32.mrf.mxu1 }
 0x883   : > { %4292 = vst.msk [vmem:[#allocation3 + $0x140] sm:$0xff] %vm2053_vm4, %v12874_v17  ;;  %v3657_v7 = vld [vmem:[#allocation2 + $0x78] sm:$0xff]  ;;  %v3556_v42 = vadd.f32 %v3497_v36, %v11930_v10 }
 0x884   : > { %3687 = vst.msk [vmem:[#allocation3 + $0x168] sm:$0xff] %vm2053_vm4, %v3657_v7  ;;  %v3499_v46 = vpop.f32.mrf.mxu1  ;;  %v4938_v43 = vld [vmem:[#allocation3 + $0xe8] sm:$0xff] }
 0x885   : > { %3627 = vst.msk [vmem:[#allocation2 + $0x9a] sm:$0xff] %vm2053_vm4, %v3556_v42  ;;  %v3500_v32 = vadd.f32 %v12656_v47, %v3499_v46  ;;  %3779 = vrot.lane.b32.xlu1 %v4073_v26, %s11053_s1  ;;  %v5013_v20 = vpack.c.bf16 %v4938_v43, %v4935_v29  ;;  %v3658_v10 = vld [vmem:[#allocation2 + $0x80] sm:$0xff]  ;;  %v4075_v56 = vld [vmem:[#allocation2 + $0x51] sm:$0xff] }
 0x886   : > { %4141 = vrot.lane.b32.xlu0 %v4074_v57, %s14850_s2  ;;  %v10264_v28 = vpop.f32.mrf.mxu1  ;;  %3688 = vst.msk [vmem:[#allocation3 + $0x180] sm:$0xff] %vm2053_vm4, %v3658_v10  ;;  %v4941_v45 = vld [vmem:[#allocation3 + $0x100] sm:$0xff] }
 0x887   : > { %v4861_v21 = vld [vmem:[#allocation2 + $0x84] sm:$0xff]  ;;  %v3557_v61 = vadd.f32 %v3500_v32, %v11940_v51  ;;  %v4076_v28 = vld [vmem:[#allocation2 + $0x59] sm:$0xff] }
 0x888   : > { %4891 = vst.msk [vmem:[#allocation3 + $0x130] sm:$0xff] %vm2053_vm4, %v4861_v21  ;;  %v12890_v62 = vld [vmem:[#allocation2 + $0x82] sm:$0xff]  ;;  %10306 = vmatmul.mubr.msk.bf16.gmra.mxu1 %vm2053_vm4, %v5013_v20  ;;  %v3504_v60 = vpop.f32.mrf.mxu1 }
 0x889   : > { %4293 = vst.msk [vmem:[#allocation3 + $0x158] sm:$0xff] %vm2053_vm4, %v12890_v62  ;;  %v4862_v9 = vld [vmem:[#allocation2 + $0x8c] sm:$0xff]  ;;  %10309 = vmatprep.mubr.msk.bf16.mxu1 %vm11049_vm2, %v14832_v2  ;;  %v3505_v16 = vadd.f32 %v12656_v47, %v3504_v60  ;;  %3961 = vrot.lane.b32.xlu1 %v12755_v23, %s14851_s24  ;;  %v14853_v32 = vld [vmem:[#allocation15_spill] sm:$0xff] }
 0x88a   : > { %v12899_v15 = vld [vmem:[#allocation2 + $0x8a] sm:$0xff]  ;;  %4892 = vst.msk [vmem:[#allocation3 + $0x148] sm:$0xff] %vm2053_vm4, %v4862_v9  ;;  %3781 = vrot.lane.b32.xlu0 %v4074_v57, %s11053_s1  ;;  %v12908_v51 = vld [vmem:[#allocation2 + $0x92] sm:$0xff]  ;;  %v10267_v48 = vpop.f32.mrf.mxu1 }
 0x88b   : > { %3628 = vst.msk [vmem:[#allocation2 + $0xa2] sm:$0x3f] %vm3602_vm15, %v3557_v61  ;;  %v4944_v37 = vld [vmem:[#allocation3 + $0x118] sm:$0xff]  ;;  %v3660_v0 = vld [vmem:[#allocation2 + $0x90] sm:$0xff]  ;;  %v3558_v59 = vadd.f32 %v3505_v16, %v11949_v24 }
 0x88c   : > { %3629 = vst.msk [vmem:[#allocation2 + $0xa5] sm:$0xc0] %vm3604_vm0, %v3557_v61  ;;  %v3659_v31 = vld [vmem:[#allocation2 + $0x88] sm:$0xff]  ;;  %v4863_v23 = vld [vmem:[#allocation2 + $0x94] sm:$0xff]  ;;  %v3507_v58 = vpop.f32.mrf.mxu1  ;;  %v5016_v24 = vpack.c.bf16 %v4944_v37, %v4941_v45 }
 0x88d   : > { %4294 = vst.msk [vmem:[#allocation3 + $0x170] sm:$0xff] %vm2053_vm4, %v12899_v15  ;;  %4295 = vst.msk [vmem:[#allocation3 + $0x188] sm:$0xff] %vm2053_vm4, %v12908_v51  ;;  %v12917_v50 = vld [vmem:[#allocation2 + $0x9a] sm:$0xff]  ;;  %v3508_v12 = vadd.f32 %v12656_v47, %v3507_v58  ;;  %4561 = vrot.lane.b32.xlu1 %v12812_v52, %s14851_s24 }
 0x88e   : > { %3689 = vst.msk [vmem:[#allocation3 + $0x198] sm:$0xff] %vm2053_vm4, %v3659_v31  ;;  %3690 = vst.msk [vmem:[#allocation3 + $0x1b0] sm:$0xff] %vm2053_vm4, %v3660_v0  ;;  %3963 = vrot.lane.b32.xlu0 %v12799_v40, %s14851_s24  ;;  %v3661_v35 = vld [vmem:[#allocation2 + $0x98] sm:$0xff]  ;;  %v10268_v38 = vpop.f32.mrf.mxu1 }
 0x88f   : > { %4893 = vst.msk [vmem:[#allocation3 + $0x160] sm:$0xff] %vm2053_vm4, %v4863_v23  ;;  %3630 = vst.msk [vmem:[#allocation2 + $0xad] sm:$0xff] %vm2053_vm4, %v3558_v59  ;;  %v3559_v55 = vadd.f32 %v3508_v12, %v11959_v1  ;;  %v4947_v34 = vld [vmem:[#allocation3 + $0x130] sm:$0xff] }
 0x890   : > { %4296 = vst.msk [vmem:[#allocation3 + $0x1a0] sm:$0xff] %vm2053_vm4, %v12917_v50  ;;  %3691 = vst.msk [vmem:[#allocation3 + $0x1c8] sm:$0xff] %vm2053_vm4, %v3661_v35  ;;  %10310 = vmatmul.mubr.msk.bf16.gmra.mxu1 %vm2053_vm4, %v5016_v24  ;;  %v3512_v8 = vpop.f32.mrf.mxu1  ;;  %v14854_v0 = vld [vmem:[#allocation14_spill] sm:$0xff]  ;;  %v12996_v24 = vpop.permute.xlu1 %4605 }
 0x891   : > { %10313 = vmatprep.mubr.msk.bf16.mxu1 %vm11049_vm2, %v14832_v2  ;;  %3631 = vst.msk [vmem:[#allocation2 + $0xb5] sm:$0xf] %vm3607_vm1, %v3559_v55  ;;  %v3513_v40 = vadd.f32 %v12656_v47, %v3512_v8  ;;  %4741 = vrot.lane.b32.xlu1 %v4675_v39, %s14850_s2  ;;  %v4950_v41 = vld [vmem:[#allocation3 + $0x148] sm:$0xff] }
 0x892   : > { %v4864_v3 = vld [vmem:[#allocation2 + $0x9c] sm:$0xff]  ;;  %3632 = vst.msk [vmem:[#allocation2 + $0xb8] sm:$0xf0] %vm3609_vm5, %v3559_v55  ;;  %4563 = vrot.lane.b32.xlu0 %v12832_v53, %s14851_s24  ;;  %v10271_v11 = vpop.f32.mrf.mxu1  ;;  %v5019_v49 = vpack.c.bf16 %v4950_v41, %v4947_v34  ;;  %vm6633_vm5 = vcmask 523269  }
 0x893   : > { %v4865_v63 = vld [vmem:[#allocation2 + $0xa4] sm:$0xff]  ;;  %4894 = vst.msk [vmem:[#allocation3 + $0x178] sm:$0xff] %vm2053_vm4, %v4864_v3  ;;  %v3560_v14 = vadd.f32 %v3513_v40, %v11968_v6 }
 0x894   : > { %4895 = vst.msk [vmem:[#allocation3 + $0x190] sm:$0xff] %vm2053_vm4, %v4865_v63  ;;  %v12941_v1 = vld [vmem:[#allocation2 + $0xa2] sm:$0xff]  ;;  %v3515_v25 = vpop.f32.mrf.mxu1  ;;  %v14855_v63 = vld [vmem:[#allocation16_spill] sm:$0xff] }
 0x895   : > { %4297 = vst.msk [vmem:[#allocation3 + $0x1b8] sm:$0xff] %vm2053_vm4, %v12941_v1  ;;  %v3662_v19 = vld [vmem:[#allocation2 + $0xa0] sm:$0xff]  ;;  %3633 = vst.msk [vmem:[#allocation2 + $0xc0] sm:$0xff] %vm2053_vm4, %v3560_v14  ;;  %v3516_v30 = vadd.f32 %v12656_v47, %v3515_v25  ;;  %4385 = vrot.lane.b32.xlu1 %v4675_v39, %s11053_s1  ;;  %v13014_v14 = vpop.permute.xlu0 %4607 }
 0x896   : > { %3692 = vst.msk [vmem:[#allocation3 + $0x1e0] sm:$0xff] %vm2053_vm4, %v3662_v19  ;;  %v4866_v22 = vld [vmem:[#allocation2 + $0xac] sm:$0xff]  ;;  %4743 = vrot.lane.b32.xlu0 %v4676_v5, %s14850_s2  ;;  %v10272_v18 = vpop.f32.mrf.mxu1  ;;  %v4077_v39 = vld [vmem:[#allocation2 + $0x61] sm:$0xff] }
 0x897   : > { %v12947_v33 = vld [vmem:[#allocation2 + $0xaa] sm:$0xff]  ;;  %4896 = vst.msk [vmem:[#allocation3 + $0x1a8] sm:$0xff] %vm2053_vm4, %v4866_v22  ;;  %v3561_v26 = vadd.f32 %v3516_v30, %v14852_v54  ;;  %v14856_v30 = vld [vmem:[#allocation18_spill] sm:$0xff] }
 0x898   : > { %4298 = vst.msk [vmem:[#allocation3 + $0x1d0] sm:$0xff] %vm2053_vm4, %v12947_v33  ;;  %v3663_v6 = vld [vmem:[#allocation2 + $0xa8] sm:$0xff]  ;;  %10314 = vmatmul.mubr.msk.bf16.gmra.mxu1 %vm2053_vm4, %v5019_v49  ;;  %v4867_v36 = vld [vmem:[#allocation2 + $0xb4] sm:$0xff]  ;;  %v3520_v7 = vpop.f32.mrf.mxu1 }
 0x899   : > { %3693 = vst.msk [vmem:[#allocation3 + $0x1f8] sm:$0xff] %vm2053_vm4, %v3663_v6  ;;  %10317 = vmatprep.mubr.msk.bf16.mxu1 %vm11049_vm2, %v14832_v2  ;;  %4897 = vst.msk [vmem:[#allocation3 + $0x1c0] sm:$0xff] %vm2053_vm4, %v4867_v36  ;;  %v3521_v42 = vadd.f32 %v12656_v47, %v3520_v7  ;;  %4143 = vrot.lane.b32.xlu1 %v4075_v56, %s14850_s2  ;;  %v12967_v57 = vld [vmem:[#allocation2 + $0xb2] sm:$0xff] }
 0x89a   : > { %3634 = vst.msk [vmem:[#allocation2 + $0xc8] sm:$0x3] %vm3612_vm7, %v3561_v26  ;;  %4387 = vrot.lane.b32.xlu0 %v4676_v5, %s11053_s1  ;;  %v10275_v21 = vpop.f32.mrf.mxu1  ;;  %v4956_v46 = vld [vmem:[#allocation3 + $0x178] sm:$0xff]  ;;  %v3664_v29 = vld [vmem:[#allocation2 + $0xb0] sm:$0xff]  ;;  %v3665_v43 = vld [vmem:[#allocation2 + $0xb8] sm:$0xff]  ;;  %vm6623_vm7 = vcmask 522240  }
 0x89b   : > { %3635 = vst.msk [vmem:[#allocation2 + $0xcb] sm:$0xfc] %vm3614_vm8, %v3561_v26  ;;  %v3562_v20 = vadd.f32 %v3521_v42, %v14853_v32  ;;  %v4953_v9 = vld [vmem:[#allocation3 + $0x160] sm:$0xff]  ;;  %v4959_v41 = vld [vmem:[#allocation3 + $0x190] sm:$0xff]  ;;  %vm6625_vm8 = vcmask 523271  }
 0x89c   : > { %4299 = vst.msk [vmem:[#allocation3 + $0x1e8] sm:$0xff] %vm2053_vm4, %v12967_v57  ;;  %3694 = vst.msk [vmem:[#allocation3 + $0x210] sm:$0xff] %vm2053_vm4, %v3664_v29  ;;  %v4868_v10 = vld [vmem:[#allocation2 + $0xbc] sm:$0xff]  ;;  %v3523_v61 = vpop.f32.mrf.mxu1  ;;  %v5022_v48 = vpack.c.bf16 %v4956_v46, %v4953_v9 }
 0x89d   : > { %3695 = vst.msk [vmem:[#allocation3 + $0x228] sm:$0xff] %vm2053_vm4, %v3665_v43  ;;  %v12974_v60 = vld [vmem:[#allocation2 + $0xba] sm:$0xff]  ;;  %4898 = vst.msk [vmem:[#allocation3 + $0x1d8] sm:$0xff] %vm2053_vm4, %v4868_v10  ;;  %v3524_v16 = vadd.f32 %v12656_v47, %v3523_v61  ;;  %3783 = vrot.lane.b32.xlu1 %v4075_v56, %s11053_s1  ;;  %v4677_v10 = vld [vmem:[#allocation2 + $0x63] sm:$0xff] }
 0x89e   : > { %3636 = vst.msk [vmem:[#allocation2 + $0xd3] sm:$0xff] %vm2053_vm4, %v3562_v20  ;;  %4145 = vrot.lane.b32.xlu0 %v4076_v28, %s14850_s2  ;;  %4300 = vst.msk [vmem:[#allocation3 + $0x200] sm:$0xff] %vm2053_vm4, %v12974_v60  ;;  %v3666_v37 = vld [vmem:[#allocation2 + $0xc0] sm:$0xff]  ;;  %v10276_v31 = vpop.f32.mrf.mxu1  ;;  %v4962_v55 = vld [vmem:[#allocation3 + $0x1a8] sm:$0xff] }
 0x89f   : > { %3696 = vst.msk [vmem:[#allocation3 + $0x240] sm:$0xff] %vm2053_vm4, %v3666_v37  ;;  %v3563_v59 = vadd.f32 %v3524_v16, %v14854_v0  ;;  %v5025_v5 = vpack.c.bf16 %v4962_v55, %v4959_v41  ;;  %v4678_v37 = vld [vmem:[#allocation2 + $0x6b] sm:$0xff] }
 0x8a0   : > { %10318 = vmatmul.mubr.msk.bf16.gmra.mxu1 %vm2053_vm4, %v5022_v48  ;;  %v3528_v58 = vpop.f32.mrf.mxu1  ;;  %v4965_v42 = vld [vmem:[#allocation3 + $0x1c0] sm:$0xff] }
 0x8a1   : > { %v4869_v23 = vld [vmem:[#allocation2 + $0xc4] sm:$0xff]  ;;  %10321 = vmatprep.mubr.msk.bf16.mxu1 %vm11049_vm2, %v14832_v2  ;;  %3637 = vst.msk [vmem:[#allocation2 + $0xde] sm:$0xff] %vm2053_vm4, %v3563_v59  ;;  %v3529_v12 = vadd.f32 %v12656_v47, %v3528_v58  ;;  %3965 = vrot.lane.b32.xlu1 %v12812_v52, %s14851_s24 }
 0x8a2   : > { %v12988_v45 = vld [vmem:[#allocation2 + $0xc2] sm:$0xff]  ;;  %4899 = vst.msk [vmem:[#allocation3 + $0x1f0] sm:$0xff] %vm2053_vm4, %v4869_v23  ;;  %3785 = vrot.lane.b32.xlu0 %v4076_v28, %s11053_s1  ;;  %v12998_v35 = vld [vmem:[#allocation2 + $0xca] sm:$0xff]  ;;  %v10279_v38 = vpop.f32.mrf.mxu1 }
 0x8a3   : > { %4301 = vst.msk [vmem:[#allocation3 + $0x218] sm:$0xff] %vm2053_vm4, %v12988_v45  ;;  %4302 = vst.msk [vmem:[#allocation3 + $0x230] sm:$0xff] %vm2053_vm4, %v12998_v35  ;;  %v3667_v3 = vld [vmem:[#allocation2 + $0xc8] sm:$0xff]  ;;  %v3564_v8 = vadd.f32 %v3529_v12, %v14855_v63 }
 0x8a4   : > { %3697 = vst.msk [vmem:[#allocation3 + $0x258] sm:$0xff] %vm2053_vm4, %v3667_v3  ;;  %v3531_v11 = vpop.f32.mrf.mxu1  ;;  %v4968_v26 = vld [vmem:[#allocation3 + $0x1d8] sm:$0xff] }
 0x8a5   : > { %v4870_v52 = vld [vmem:[#allocation2 + $0xcc] sm:$0xff]  ;;  %v4871_v40 = vld [vmem:[#allocation2 + $0xd4] sm:$0xff]  ;;  %3638 = vst.msk [vmem:[#allocation2 + $0xe6] sm:$0x3f] %vm3602_vm15, %v3564_v8  ;;  %v3532_v19 = vadd.f32 %v12656_v47, %v3531_v11  ;;  %4147 = vrot.lane.b32.xlu1 %v4077_v39, %s14850_s2  ;;  %v5028_v21 = vpack.c.bf16 %v4968_v26, %v4965_v42  ;;  %vm4065_vm15 = vcmask 780800  }
 0x8a6   : > { %4900 = vst.msk [vmem:[#allocation3 + $0x208] sm:$0xff] %vm2053_vm4, %v4870_v52  ;;  %4901 = vst.msk [vmem:[#allocation3 + $0x220] sm:$0xff] %vm2053_vm4, %v4871_v40  ;;  %3967 = vrot.lane.b32.xlu0 %v12832_v53, %s14851_s24  ;;  %v13016_v22 = vld [vmem:[#allocation2 + $0xd2] sm:$0xff]  ;;  %v10280_v25 = vpop.f32.mrf.mxu1  ;;  %v4078_v53 = vld [vmem:[#allocation2 + $0x69] sm:$0xff] }
 0x8a7   : > { %3639 = vst.msk [vmem:[#allocation2 + $0xe9] sm:$0xc0] %vm3604_vm0, %v3564_v8  ;;  %v3668_v34 = vld [vmem:[#allocation2 + $0xd0] sm:$0xff]  ;;  %v3565_v49 = vadd.f32 %v3532_v19, %v14856_v30  ;;  %v4128_v6 = vpop.permute.xlu1 %4127  ;;  %v4680_v40 = vld [vmem:[#allocation2 + $0x7b] sm:$0xff]  ;;  %vm4247_vm0 = vcmask 1043200  }
 0x8a8   : > { %4303 = vst.msk [vmem:[#allocation3 + $0x248] sm:$0xff] %vm2053_vm4, %v13016_v22  ;;  %10322 = vmatmul.mubr.msk.bf16.gmra.mxu1 %vm2053_vm4, %v5025_v5  ;;  %3698 = vst.msk [vmem:[#allocation3 + $0x270] sm:$0xff] %vm2053_vm4, %v3668_v34  ;;  %v4872_v47 = vld [vmem:[#allocation2 + $0xdc] sm:$0xff] }
 0x8a9   : > { %4218 = vst.msk [vmem:[#allocation3] sm:$0xff] %vm4217_vm9, %v4128_v6  ;;  %10325 = vmatprep.mubr.msk.bf16.mxu1 %vm11049_vm2, %v14832_v2  ;;  %v13026_v18 = vld [vmem:[#allocation2 + $0xda] sm:$0xff]  ;;  %3787 = vrot.lane.b32.xlu1 %v4077_v39, %s11053_s1  ;;  %v4079_v6 = vld [vmem:[#allocation2 + $0x71] sm:$0xff] }
 0x8aa   : > { %4902 = vst.msk [vmem:[#allocation3 + $0x238] sm:$0xff] %vm2053_vm4, %v4872_v47  ;;  %3640 = vst.msk [vmem:[#allocation2 + $0xf1] sm:$0xff] %vm2053_vm4, %v3565_v49  ;;  %4149 = vrot.lane.b32.xlu0 %v4078_v53, %s14850_s2  ;;  %v3669_v54 = vld [vmem:[#allocation2 + $0xd8] sm:$0xff]  ;;  %v4971_v31 = vld [vmem:[#allocation3 + $0x1f0] sm:$0xff] }
 0x8ab   : > { %4304 = vst.msk [vmem:[#allocation3 + $0x260] sm:$0xff] %vm2053_vm4, %v13026_v18  ;;  %3699 = vst.msk [vmem:[#allocation3 + $0x288] sm:$0xff] %vm2053_vm4, %v3669_v54  ;;  %v3768_v36 = vpop.permute.xlu1 %3767  ;;  %v4370_v7 = vpop.permute.xlu0 %4369  ;;  %v10983_v54 = vld [vmem:[%s14849_s27] ss:$0 sm:$0xff] }
 0x8ac   : > { %v4873_v56 = vld [vmem:[#allocation2 + $0xe4] sm:$0xff]  ;;  %3856 = vst.msk [vmem:[#allocation3 + $0x30] sm:$0xff] %vm3853_vm13, %v3768_v36  ;;  %4459 = vst.msk [vmem:[#allocation3 + $0x8] sm:$0xff] %vm3853_vm13, %v4370_v7 }
 0x8ad   : > { %4903 = vst.msk [vmem:[#allocation3 + $0x250] sm:$0xff] %vm2053_vm4, %v4873_v56  ;;  %4565 = vrot.lane.b32.xlu1 %v12848_v27, %s14851_s24  ;;  %v13041_v46 = vld [vmem:[#allocation2 + $0xe2] sm:$0xff]  ;;  %v4974_v9 = vld [vmem:[#allocation3 + $0x208] sm:$0xff]  ;;  %v4977_v55 = vld [vmem:[#allocation3 + $0x220] sm:$0xff] }
 0x8ae   : > { %3789 = vrot.lane.b32.xlu0 %v4078_v53, %s11053_s1  ;;  %4305 = vst.msk [vmem:[#allocation3 + $0x278] sm:$0xff] %vm2053_vm4, %v13041_v46  ;;  %v3671_v32 = vld [vmem:[#allocation2 + $0xe8] sm:$0x7]  ;;  %v3670_v20 = vld [vmem:[#allocation2 + $0xe0] sm:$0xff]  ;;  %v5031_v0 = vpack.c.bf16 %v4974_v9, %v4971_v31 }
 0x8af   : > { %v3950_v29 = vpop.permute.xlu1 %3949  ;;  %v4130_v43 = vpop.permute.xlu0 %4129  ;;  %3702 = vst.msk [vmem:[#allocation3 + $0x2b8] sm:$0x7] %vm3701_vm10, %v3671_v32  ;;  %v14857_v56 = vld [vmem:[#allocation19_spill] sm:$0xff]  ;;  %v4080_v32 = vld [vmem:[#allocation2 + $0x79] sm:$0xff] }
 0x8b0   : > { %10326 = vmatmul.mubr.msk.bf16.gmra.mxu1 %vm2053_vm4, %v5028_v21  ;;  %4038 = vst.msk [vmem:[#allocation3 + $0x30] sm:$0xff] %vm4035_vm14, %v3950_v29  ;;  %v4909_v53 = vld [vmem:[#allocation3] sm:$0xff] }
 0x8b1   : > { %v4874_v28 = vld [vmem:[#allocation2 + $0xec] sm:$0xff]  ;;  %4219 = vst.msk [vmem:[#allocation3 + $0x18] sm:$0xff] %vm4217_vm9, %v4130_v43  ;;  %10329 = vmatprep.mubr.msk.bf16.mxu1 %vm11049_vm2, %v14832_v2  ;;  %4745 = vrot.lane.b32.xlu1 %v4677_v10, %s14850_s2 }
 0x8b2   : > { %v13050_v61 = vld [vmem:[#allocation2 + $0xea] sm:$0xff]  ;;  %3700 = vst.msk [vmem:[#allocation3 + $0x2a0] sm:$0xff] %vm2053_vm4, %v3670_v20  ;;  %4904 = vst.msk [vmem:[#allocation3 + $0x268] sm:$0xff] %vm2053_vm4, %v4874_v28  ;;  %4567 = vrot.lane.b32.xlu0 %v12861_v44, %s14851_s24 }
 0x8b3   : > { %4306 = vst.msk [vmem:[#allocation3 + $0x290] sm:$0xff] %vm2053_vm4, %v13050_v61  ;;  %v4372_v16 = vpop.permute.xlu1 %4371  ;;  %v3770_v48 = vpop.permute.xlu0 %3769  ;;  %v4980_v58 = vld [vmem:[#allocation3 + $0x238] sm:$0xff] }
 0x8b4   : > { %4460 = vst.msk [vmem:[#allocation3 + $0x20] sm:$0xff] %vm3853_vm13, %v4372_v16  ;;  %3857 = vst.msk [vmem:[#allocation3 + $0x48] sm:$0xff] %vm3853_vm13, %v3770_v48  ;;  %v5034_v3 = vpack.c.bf16 %v4980_v58, %v4977_v55  ;;  %v4983_v11 = vld [vmem:[#allocation3 + $0x250] sm:$0xff] }
 0x8b5   : > { %4389 = vrot.lane.b32.xlu1 %v4677_v10, %s11053_s1 }
 0x8b6   : > { %4747 = vrot.lane.b32.xlu0 %v4678_v37, %s14850_s2 }
 0x8b7   : > { %v3952_v59 = vpop.permute.xlu0 %3951  ;;  %v4550_v23 = vpop.permute.xlu1 %4549 }
 0x8b8   : > { %10330 = vmatmul.mubr.msk.bf16.gmra.mxu1 %vm2053_vm4, %v5031_v0  ;;  %4039 = vst.msk [vmem:[#allocation3 + $0x48] sm:$0xff] %vm4035_vm14, %v3952_v59  ;;  %4639 = vst.msk [vmem:[#allocation3 + $0x8] sm:$0xff] %vm4035_vm14, %v4550_v23  ;;  %v4912_v19 = vld [vmem:[#allocation3 + $0x18] sm:$0xff] }
 0x8b9   : > { %10333 = vmatprep.mubr.msk.bf16.mxu1 %vm11049_vm2, %v14832_v2  ;;  %3969 = vrot.lane.b32.xlu1 %v12848_v27, %s14851_s24  ;;  %v4679_v27 = vld [vmem:[#allocation2 + $0x73] sm:$0xff]  ;;  %v4999_v36 = vpack.c.bf16 %v4912_v19, %v4909_v53  ;;  %v4681_v23 = vld [vmem:[#allocation2 + $0x83] sm:$0xff] }
 0x8ba   : > { %4391 = vrot.lane.b32.xlu0 %v4678_v37, %s11053_s1  ;;  %v4986_v39 = vld [vmem:[#allocation3 + $0x268] sm:$0xff] }
 0x8bb   : > { %v4730_v12 = vpop.permute.xlu1 %4729  ;;  %v4552_v38 = vpop.permute.xlu0 %4551  ;;  %v5037_v41 = vpack.c.bf16 %v4986_v39, %v4983_v11 }
 0x8bc   : > { %4819 = vst.msk [vmem:[#allocation3 + $0x8] sm:$0xff] %vm4217_vm9, %v4730_v12  ;;  %v4682_v12 = vld [vmem:[#allocation2 + $0x8b] sm:$0xff] }
 0x8bd   : > { %4640 = vst.msk [vmem:[#allocation3 + $0x20] sm:$0xff] %vm4035_vm14, %v4552_v38  ;;  %4569 = vrot.lane.b32.xlu1 %v12863_v4, %s14851_s24 }
 0x8be   : > { %3971 = vrot.lane.b32.xlu0 %v12861_v44, %s14851_s24 }
 0x8bf   : > { %v4374_v63 = vpop.permute.xlu1 %4373  ;;  %v4732_v8 = vpop.permute.xlu0 %4731 }
 0x8c0   : > { %10334 = vmatmul.mubr.msk.bf16.gmra.mxu1 %vm2053_vm4, %v5034_v3  ;;  %4461 = vst.msk [vmem:[#allocation3 + $0x38] sm:$0xff] %vm3853_vm13, %v4374_v63 }
 0x8c1   : > { %4820 = vst.msk [vmem:[#allocation3 + $0x20] sm:$0xff] %vm4217_vm9, %v4732_v8  ;;  %10337 = vmatprep.mubr.msk.bf16.mxu1 %vm11049_vm2, %v14832_v2  ;;  %4749 = vrot.lane.b32.xlu1 %v4679_v27, %s14850_s2 }
 0x8c2   : > { %4571 = vrot.lane.b32.xlu0 %v12874_v17, %s14851_s24 }
 0x8c3   : > { %v4132_v44 = vpop.permute.xlu1 %4131  ;;  %v4376_v52 = vpop.permute.xlu0 %4375  ;;  %v4910_v34 = vld [vmem:[#allocation3 + $0x8] sm:$0xff] }
 0x8c4   : > { %4220 = vst.msk [vmem:[#allocation3 + $0x30] sm:$0xff] %vm4217_vm9, %v4132_v44 }
 0x8c5   : > { %4462 = vst.msk [vmem:[#allocation3 + $0x50] sm:$0xff] %vm3853_vm13, %v4376_v52  ;;  %4393 = vrot.lane.b32.xlu1 %v4679_v27, %s11053_s1  ;;  %v4081_v52 = vld [vmem:[#allocation2 + $0x81] sm:$0xff] }
 0x8c6   : > { %4751 = vrot.lane.b32.xlu0 %v4680_v40, %s14850_s2 }
 0x8c7   : > { %v3772_v5 = vpop.permute.xlu1 %3771 }
 0x8c8   : > { %v4134_v25 = vpop.permute.xlu0 %4133  ;;  %10338 = vmatmul.mubr.msk.bf16.gmra.mxu1 %vm2053_vm4, %v5037_v41  ;;  %v4913_v30 = vld [vmem:[#allocation3 + $0x20] sm:$0xff]  ;;  %3858 = vst.msk [vmem:[#allocation3 + $0x60] sm:$0xff] %vm3853_vm13, %v3772_v5  ;;  %v3536_v49 = vpop.f32.mrf.mxu1 }
 0x8c9   : > { %4221 = vst.msk [vmem:[#allocation3 + $0x48] sm:$0xff] %vm4217_vm9, %v4134_v25  ;;  %v5000_v47 = vpack.c.bf16 %v4913_v30, %v4910_v34  ;;  %10341 = vmatprep.mubr.msk.bf16.mxu1 %vm11049_vm2, %v14832_v2  ;;  %v3537_v26 = vadd.f32 %v10983_v54, %v3536_v49  ;;  %4151 = vrot.lane.b32.xlu1 %v4079_v6, %s14850_s2  ;;  %v4082_v25 = vld [vmem:[#allocation2 + $0x89] sm:$0xff] }
 0x8ca   : > { %4395 = vrot.lane.b32.xlu0 %v4680_v40, %s11053_s1  ;;  %v10283_v7 = vpop.f32.mrf.mxu1 }
 0x8cb   : > { %5272 = vmatprep.mubr.bf16.mxu0 %v5000_v47  ;;  %v3566_v42 = vadd.f32 %v3537_v26, %v14857_v56  ;;  %v3954_v21 = vpop.permute.xlu1 %3953  ;;  %v4915_v11 = vld [vmem:[#allocation3 + $0x30] sm:$0xff] }
 0x8cc   : > { %5273 = vmatmul.mubr.bf16.vlgmr.msra.gmra.mxu0 %v4999_v36  ;;  %v3774_v29 = vpop.permute.xlu0 %3773  ;;  %4040 = vst.msk [vmem:[#allocation3 + $0x60] sm:$0xff] %vm4035_vm14, %v3954_v21  ;;  %v3539_v43 = vpop.f32.mrf.mxu1  ;;  %v4084_v36 = vld [vmem:[#allocation2 + $0x99] sm:$0xff] }
 0x8cd   : > { %3859 = vst.msk [vmem:[#allocation3 + $0x78] sm:$0xff] %vm3853_vm13, %v3774_v29  ;;  %3791 = vrot.lane.b32.xlu1 %v4079_v6, %s11053_s1 }
 0x8ce   : > { %3641 = vst.msk [vmem:[#allocation2 + $0xf9] sm:$0xf] %vm3607_vm1, %v3566_v42  ;;  %4153 = vrot.lane.b32.xlu0 %v4080_v32, %s14850_s2  ;;  %v10284_v20 = vpop.f32.mrf.mxu1  ;;  %vm6195_vm1 = vcmask 334848  }
 0x8cf   : > { %v4554_v10 = vpop.permute.xlu1 %4553 }
 0x8d0   : > { %v3956_v28 = vpop.permute.xlu0 %3955  ;;  %4641 = vst.msk [vmem:[#allocation3 + $0x38] sm:$0xff] %vm4035_vm14, %v4554_v10  ;;  %v4918_v63 = vld [vmem:[#allocation3 + $0x48] sm:$0xff] }
 0x8d1   : > { %4041 = vst.msk [vmem:[#allocation3 + $0x78] sm:$0xff] %vm4035_vm14, %v3956_v28  ;;  %3973 = vrot.lane.b32.xlu1 %v12863_v4, %s14851_s24  ;;  %v5002_v41 = vpack.c.bf16 %v4918_v63, %v4915_v11  ;;  %v4683_v10 = vld [vmem:[#allocation2 + $0x93] sm:$0xff] }
 0x8d2   : > { %3793 = vrot.lane.b32.xlu0 %v4080_v32, %s11053_s1 }
 0x8d3   : > { %v4734_v9 = vpop.permute.xlu1 %4733 }
 0x8d4   : > { %v4556_v16 = vpop.permute.xlu0 %4555  ;;  %4821 = vst.msk [vmem:[#allocation3 + $0x38] sm:$0xff] %vm4217_vm9, %v4734_v9 }
 0x8d5   : > { %v4875_v48 = vld [vmem:[#allocation2 + $0xf4] sm:$0xff]  ;;  %v4876_v37 = vld [vmem:[#allocation2 + $0xfc] sm:$0xff]  ;;  %4642 = vst.msk [vmem:[#allocation3 + $0x50] sm:$0xff] %vm4035_vm14, %v4556_v16  ;;  %4573 = vrot.lane.b32.xlu1 %v12890_v62, %s14851_s24 }
 0x8d6   : > { %v13113_v31 = vld [vmem:[#allocation2 + $0xf2] sm:$0xff]  ;;  %4905 = vst.msk [vmem:[#allocation3 + $0x280] sm:$0xff] %vm2053_vm4, %v4875_v48  ;;  %4906 = vst.msk [vmem:[#allocation3 + $0x298] sm:$0xff] %vm2053_vm4, %v4876_v37  ;;  %3975 = vrot.lane.b32.xlu0 %v12874_v17, %s14851_s24  ;;  %v4278_v4 = vld [vmem:[#allocation2 + $0xfa] sm:$0x7] }
 0x8d7   : > { %4307 = vst.msk [vmem:[#allocation3 + $0x2a8] sm:$0xff] %vm2053_vm4, %v13113_v31  ;;  %v4378_v0 = vpop.permute.xlu1 %4377 }
 0x8d8   : > { %v4736_v59 = vpop.permute.xlu0 %4735  ;;  %4308 = vst.msk [vmem:[#allocation3 + $0x2c0] sm:$0x7] %vm3701_vm10, %v4278_v4 }
 0x8d9   : > { %4463 = vst.msk [vmem:[#allocation3 + $0x68] sm:$0xff] %vm3853_vm13, %v4378_v0  ;;  %4753 = vrot.lane.b32.xlu1 %v4681_v23, %s14850_s2  ;;  %v4685_v0 = vld [vmem:[#allocation2 + $0xa3] sm:$0xff] }
 0x8da   : > { %4822 = vst.msk [vmem:[#allocation3 + $0x50] sm:$0xff] %vm4217_vm9, %v4736_v59  ;;  %4575 = vrot.lane.b32.xlu0 %v12899_v15, %s14851_s24 }
 0x8db   : > { %v4136_v17 = vpop.permute.xlu1 %4135  ;;  %v4916_v39 = vld [vmem:[#allocation3 + $0x38] sm:$0xff] }
 0x8dc   : > { %v4380_v58 = vpop.permute.xlu0 %4379  ;;  %4222 = vst.msk [vmem:[#allocation3 + $0x60] sm:$0xff] %vm4217_vm9, %v4136_v17 }
 0x8dd   : > { %4464 = vst.msk [vmem:[#allocation3 + $0x80] sm:$0xff] %vm3853_vm13, %v4380_v58  ;;  %v4989_v38 = vld [vmem:[#allocation3 + $0x280] sm:$0xff]  ;;  %v4992_v55 = vld [vmem:[#allocation3 + $0x298] sm:$0xff]  ;;  %4397 = vrot.lane.b32.xlu1 %v4681_v23, %s11053_s1 }
 0x8de   : > { %4755 = vrot.lane.b32.xlu0 %v4682_v12, %s14850_s2  ;;  %v5040_v3 = vpack.c.bf16 %v4992_v55, %v4989_v38  ;;  %v4686_v58 = vld [vmem:[#allocation2 + $0xab] sm:$0xff] }
 0x8df   : > { %v3776_v8 = vpop.permute.xlu1 %3775 }
 0x8e0   : > { %v4138_v27 = vpop.permute.xlu0 %4137  ;;  %10342 = vmatmul.mubr.msk.bf16.gmra.mxu1 %vm2053_vm4, %v5040_v3  ;;  %3860 = vst.msk [vmem:[#allocation3 + $0x90] sm:$0xff] %vm3853_vm13, %v3776_v8 }
 0x8e1   : > { %v4919_v44 = vld [vmem:[#allocation3 + $0x50] sm:$0xff]  ;;  %4223 = vst.msk [vmem:[#allocation3 + $0x78] sm:$0xff] %vm4217_vm9, %v4138_v27  ;;  %10345 = vmatprep.mubr.msk.bf16.mxu1 %vm11049_vm2, %v14832_v2  ;;  %4155 = vrot.lane.b32.xlu1 %v4081_v52, %s14850_s2 }
 0x8e2   : > { %v5003_v40 = vpack.c.bf16 %v4919_v44, %v4916_v39  ;;  %4399 = vrot.lane.b32.xlu0 %v4682_v12, %s11053_s1  ;;  %v4085_v39 = vld [vmem:[#allocation2 + $0xa1] sm:$0xff] }
 0x8e3   : > { %v3958_v19 = vpop.permute.xlu1 %3957  ;;  %v4921_v43 = vld [vmem:[#allocation3 + $0x60] sm:$0xff] }
 0x8e4   : > { %5280 = vmatprep.mubr.bf16.mxu0 %v5003_v40  ;;  %v3778_v5 = vpop.permute.xlu0 %3777  ;;  %4042 = vst.msk [vmem:[#allocation3 + $0x90] sm:$0xff] %vm4035_vm14, %v3958_v19 }
 0x8e5   : > { %5281 = vmatmul.mubr.bf16.gmra.mxu0 %v5002_v41  ;;  %3861 = vst.msk [vmem:[#allocation3 + $0xa8] sm:$0xff] %vm3853_vm13, %v3778_v5  ;;  %3795 = vrot.lane.b32.xlu1 %v4081_v52, %s11053_s1 }
 0x8e6   : > { %4157 = vrot.lane.b32.xlu0 %v4082_v25, %s14850_s2 }
 0x8e7   : > { %v4558_v34 = vpop.permute.xlu1 %4557 }
 0x8e8   : > { %v3960_v30 = vpop.permute.xlu0 %3959  ;;  %4643 = vst.msk [vmem:[#allocation3 + $0x68] sm:$0xff] %vm4035_vm14, %v4558_v34 }
 0x8e9   : > { %4043 = vst.msk [vmem:[#allocation3 + $0xa8] sm:$0xff] %vm4035_vm14, %v3960_v30  ;;  %3977 = vrot.lane.b32.xlu1 %v12890_v62, %s14851_s24  ;;  %v4083_v62 = vld [vmem:[#allocation2 + $0x91] sm:$0xff] }
 0x8ea   : > { %3797 = vrot.lane.b32.xlu0 %v4082_v25, %s11053_s1  ;;  %v4086_v25 = vld [vmem:[#allocation2 + $0xa9] sm:$0xff] }
 0x8eb   : > { %v4738_v49 = vpop.permute.xlu1 %4737 }
 0x8ec   : > { %v4560_v6 = vpop.permute.xlu0 %4559  ;;  %4823 = vst.msk [vmem:[#allocation3 + $0x68] sm:$0xff] %vm4217_vm9, %v4738_v49 }
 0x8ed   : > { %4644 = vst.msk [vmem:[#allocation3 + $0x80] sm:$0xff] %vm4035_vm14, %v4560_v6  ;;  %4577 = vrot.lane.b32.xlu1 %v12908_v51, %s14851_s24 }
 0x8ee   : > { %3979 = vrot.lane.b32.xlu0 %v12899_v15, %s14851_s24  ;;  %v4924_v15 = vld [vmem:[#allocation3 + $0x78] sm:$0xff] }
 0x8ef   : > { %v4382_v47 = vpop.permute.xlu1 %4381  ;;  %v5005_v32 = vpack.c.bf16 %v4924_v15, %v4921_v43  ;;  %v4088_v43 = vld [vmem:[#allocation2 + $0xb9] sm:$0xff] }
 0x8f0   : > { %v4740_v53 = vpop.permute.xlu0 %4739  ;;  %4465 = vst.msk [vmem:[#allocation3 + $0x98] sm:$0xff] %vm3853_vm13, %v4382_v47 }
 0x8f1   : > { %4824 = vst.msk [vmem:[#allocation3 + $0x80] sm:$0xff] %vm4217_vm9, %v4740_v53  ;;  %4159 = vrot.lane.b32.xlu1 %v4083_v62, %s14850_s2 }
 0x8f2   : > { %4579 = vrot.lane.b32.xlu0 %v12917_v50, %s14851_s24 }
 0x8f3   : > { %v4140_v54 = vpop.permute.xlu1 %4139  ;;  %v4922_v42 = vld [vmem:[#allocation3 + $0x68] sm:$0xff] }
 0x8f4   : > { %v4384_v26 = vpop.permute.xlu0 %4383  ;;  %4224 = vst.msk [vmem:[#allocation3 + $0x90] sm:$0xff] %vm4217_vm9, %v4140_v54 }
 0x8f5   : > { %4466 = vst.msk [vmem:[#allocation3 + $0xb0] sm:$0xff] %vm3853_vm13, %v4384_v26  ;;  %3799 = vrot.lane.b32.xlu1 %v4083_v62, %s11053_s1 }
 0x8f6   : > { %4161 = vrot.lane.b32.xlu0 %v4084_v36, %s14850_s2 }
 0x8f7   : > { %v3780_v7 = vpop.permute.xlu1 %3779 }
 0x8f8   : > { %v4142_v56 = vpop.permute.xlu0 %4141  ;;  %v4925_v21 = vld [vmem:[#allocation3 + $0x80] sm:$0xff]  ;;  %3862 = vst.msk [vmem:[#allocation3 + $0xc0] sm:$0xff] %vm3853_vm13, %v3780_v7 }
 0x8f9   : > { %4225 = vst.msk [vmem:[#allocation3 + $0xa8] sm:$0xff] %vm4217_vm9, %v4142_v56  ;;  %v5006_v29 = vpack.c.bf16 %v4925_v21, %v4922_v42  ;;  %3981 = vrot.lane.b32.xlu1 %v12908_v51, %s14851_s24  ;;  %v4684_v51 = vld [vmem:[#allocation2 + $0x9b] sm:$0xff]  ;;  %v4087_v42 = vld [vmem:[#allocation2 + $0xb1] sm:$0xff] }
 0x8fa   : > { %3801 = vrot.lane.b32.xlu0 %v4084_v36, %s11053_s1 }
 0x8fb   : > { %5288 = vmatprep.mubr.bf16.mxu0 %v5006_v29  ;;  %v3962_v20 = vpop.permute.xlu1 %3961  ;;  %v4927_v52 = vld [vmem:[#allocation3 + $0x90] sm:$0xff] }
 0x8fc   : > { %5289 = vmatmul.mubr.bf16.gmra.mxu0 %v5005_v32  ;;  %v3782_v28 = vpop.permute.xlu0 %3781  ;;  %4044 = vst.msk [vmem:[#allocation3 + $0xc0] sm:$0xff] %vm4035_vm14, %v3962_v20 }
 0x8fd   : > { %3863 = vst.msk [vmem:[#allocation3 + $0xd8] sm:$0xff] %vm3853_vm13, %v3782_v28  ;;  %4757 = vrot.lane.b32.xlu1 %v4683_v10, %s14850_s2 }
 0x8fe   : > { %3983 = vrot.lane.b32.xlu0 %v12917_v50, %s14851_s24 }
 0x8ff   : > { %v4562_v16 = vpop.permute.xlu1 %4561 }
 0x900   : > { %v3964_v9 = vpop.permute.xlu0 %3963  ;;  %4645 = vst.msk [vmem:[#allocation3 + $0x98] sm:$0xff] %vm4035_vm14, %v4562_v16  ;;  %v4930_v38 = vld [vmem:[#allocation3 + $0xa8] sm:$0xff] }
 0x901   : > { %4045 = vst.msk [vmem:[#allocation3 + $0xd8] sm:$0xff] %vm4035_vm14, %v3964_v9  ;;  %4401 = vrot.lane.b32.xlu1 %v4683_v10, %s11053_s1  ;;  %v5008_v40 = vpack.c.bf16 %v4930_v38, %v4927_v52  ;;  %v4690_v38 = vld [vmem:[#allocation2 + $0xcb] sm:$0xff] }
 0x902   : > { %4759 = vrot.lane.b32.xlu0 %v4684_v51, %s14850_s2 }
 0x903   : > { %v4742_v48 = vpop.permute.xlu1 %4741 }
 0x904   : > { %v4564_v37 = vpop.permute.xlu0 %4563  ;;  %4825 = vst.msk [vmem:[#allocation3 + $0x98] sm:$0xff] %vm4217_vm9, %v4742_v48 }
 0x905   : > { %4646 = vst.msk [vmem:[#allocation3 + $0xb0] sm:$0xff] %vm4035_vm14, %v4564_v37  ;;  %4581 = vrot.lane.b32.xlu1 %v12941_v1, %s14851_s24 }
 0x906   : > { %4403 = vrot.lane.b32.xlu0 %v4684_v51, %s11053_s1 }
 0x907   : > { %v4386_v50 = vpop.permute.xlu1 %4385 }
 0x908   : > { %v4744_v4 = vpop.permute.xlu0 %4743  ;;  %4467 = vst.msk [vmem:[#allocation3 + $0xc8] sm:$0xff] %vm3853_vm13, %v4386_v50 }
 0x909   : > { %4826 = vst.msk [vmem:[#allocation3 + $0xb0] sm:$0xff] %vm4217_vm9, %v4744_v4  ;;  %4761 = vrot.lane.b32.xlu1 %v4685_v0, %s14850_s2 }
 0x90a   : > { %4583 = vrot.lane.b32.xlu0 %v12947_v33, %s14851_s24 }
 0x90b   : > { %v4144_v59 = vpop.permute.xlu1 %4143  ;;  %v13190_v17 = vpop.f32.mrf.mxu1  ;;  %v4928_v63 = vld [vmem:[#allocation3 + $0x98] sm:$0xff] }
 0x90c   : > { %v4388_v23 = vpop.permute.xlu0 %4387  ;;  %4226 = vst.msk [vmem:[#allocation3 + $0xc0] sm:$0xff] %vm4217_vm9, %v4144_v59  ;;  %v4689_v59 = vld [vmem:[#allocation2 + $0xc3] sm:$0xff] }
 0x90d   : > { %4468 = vst.msk [vmem:[#allocation3 + $0xe0] sm:$0xff] %vm3853_vm13, %v4388_v23  ;;  %4405 = vrot.lane.b32.xlu1 %v4685_v0, %s11053_s1  ;;  %v10291_v12 = vpop.f32.mrf.mxu1 }
 0x90e   : > { %4763 = vrot.lane.b32.xlu0 %v4686_v58, %s14850_s2 }
 0x90f   : > { %v3784_v55 = vpop.permute.xlu1 %3783  ;;  %v13196_v27 = vpop.f32.mrf.mxu1 }
 0x910   : > { %v4146_v3 = vpop.permute.xlu0 %4145  ;;  %v4931_v8 = vld [vmem:[#allocation3 + $0xb0] sm:$0xff]  ;;  %3864 = vst.msk [vmem:[#allocation3 + $0xf0] sm:$0xff] %vm3853_vm13, %v3784_v55 }
 0x911   : > { %4227 = vst.msk [vmem:[#allocation3 + $0xd8] sm:$0xff] %vm4217_vm9, %v4146_v3  ;;  %v5009_v44 = vpack.c.bf16 %v4931_v8, %v4928_v63  ;;  %4163 = vrot.lane.b32.xlu1 %v4085_v39, %s14850_s2  ;;  %v10292_v11 = vpop.f32.mrf.mxu1 }
 0x912   : > { %4407 = vrot.lane.b32.xlu0 %v4686_v58, %s11053_s1 }
 0x913   : > { %5296 = vmatprep.mubr.bf16.mxu0 %v5009_v44  ;;  %v3966_v41 = vpop.permute.xlu1 %3965  ;;  %v4933_v51 = vld [vmem:[#allocation3 + $0xc0] sm:$0xff] }
 0x914   : > { %5297 = vmatmul.mubr.bf16.gmra.mxu0 %v5008_v40  ;;  %v3786_v19 = vpop.permute.xlu0 %3785  ;;  %4046 = vst.msk [vmem:[#allocation3 + $0xf0] sm:$0xff] %vm4035_vm14, %v3966_v41  ;;  %v13202_v5 = vpop.f32.mrf.mxu1  ;;  %v4089_v40 = vld [vmem:[#allocation2 + $0xc1] sm:$0xff] }
 0x915   : > { %3865 = vst.msk [vmem:[#allocation3 + $0x108] sm:$0xff] %vm3853_vm13, %v3786_v19  ;;  %3803 = vrot.lane.b32.xlu1 %v4085_v39, %s11053_s1 }
 0x916   : > { %4165 = vrot.lane.b32.xlu0 %v4086_v25, %s14850_s2  ;;  %v10295_v34 = vpop.f32.mrf.mxu1 }
 0x917   : > { %v4148_v30 = vpop.permute.xlu1 %4147 }
 0x918   : > { %v3968_v49 = vpop.permute.xlu0 %3967  ;;  %4228 = vst.msk [vmem:[#allocation3 + $0xf0] sm:$0xff] %vm4217_vm9, %v4148_v30  ;;  %v13208_v6 = vpop.f32.mrf.mxu1  ;;  %v4936_v32 = vld [vmem:[#allocation3 + $0xd8] sm:$0xff] }
 0x919   : > { %4047 = vst.msk [vmem:[#allocation3 + $0x108] sm:$0xff] %vm4035_vm14, %v3968_v49  ;;  %3985 = vrot.lane.b32.xlu1 %v12941_v1, %s14851_s24  ;;  %v4687_v1 = vld [vmem:[#allocation2 + $0xb3] sm:$0xff]  ;;  %v5011_v48 = vpack.c.bf16 %v4936_v32, %v4933_v51 }
 0x91a   : > { %3805 = vrot.lane.b32.xlu0 %v4086_v25, %s11053_s1  ;;  %v10296_v47 = vpop.f32.mrf.mxu1 }
 0x91b   : > { %v3788_v53 = vpop.permute.xlu1 %3787  ;;  %v4090_v47 = vld [vmem:[#allocation2 + $0xc9] sm:$0xff] }
 0x91c   : > { %v4150_v62 = vpop.permute.xlu0 %4149  ;;  %3866 = vst.msk [vmem:[#allocation3 + $0x120] sm:$0xff] %vm3853_vm13, %v3788_v53 }
 0x91d   : > { %4229 = vst.msk [vmem:[#allocation3 + $0x108] sm:$0xff] %vm4217_vm9, %v4150_v62  ;;  %4585 = vrot.lane.b32.xlu1 %v12967_v57, %s14851_s24 }
 0x91e   : > { %3987 = vrot.lane.b32.xlu0 %v12947_v33, %s14851_s24  ;;  %v4688_v33 = vld [vmem:[#allocation2 + $0xbb] sm:$0xff] }
 0x91f   : > { %v4566_v54 = vpop.permute.xlu1 %4565  ;;  %v4939_v41 = vld [vmem:[#allocation3 + $0xf0] sm:$0xff] }
 0x920   : > { %v3790_v26 = vpop.permute.xlu0 %3789  ;;  %4647 = vst.msk [vmem:[#allocation3 + $0xc8] sm:$0xff] %vm4035_vm14, %v4566_v54 }
 0x921   : > { %3867 = vst.msk [vmem:[#allocation3 + $0x138] sm:$0xff] %vm3853_vm13, %v3790_v26  ;;  %4765 = vrot.lane.b32.xlu1 %v4687_v1, %s14850_s2 }
 0x922   : > { %4587 = vrot.lane.b32.xlu0 %v12974_v60, %s14851_s24 }
 0x923   : > { %v4746_v36 = vpop.permute.xlu1 %4745 }
 0x924   : > { %v4568_v15 = vpop.permute.xlu0 %4567  ;;  %4827 = vst.msk [vmem:[#allocation3 + $0xc8] sm:$0xff] %vm4217_vm9, %v4746_v36  ;;  %v4942_v3 = vld [vmem:[#allocation3 + $0x108] sm:$0xff] }
 0x925   : > { %4648 = vst.msk [vmem:[#allocation3 + $0xe0] sm:$0xff] %vm4035_vm14, %v4568_v15  ;;  %4409 = vrot.lane.b32.xlu1 %v4687_v1, %s11053_s1  ;;  %v5014_v19 = vpack.c.bf16 %v4942_v3, %v4939_v41  ;;  %v4878_v41 = vld [vmem:[#allocation2 + $0x10c] sm:$0x7] }
 0x926   : > { %4767 = vrot.lane.b32.xlu0 %v4688_v33, %s14850_s2  ;;  %4908 = vst.msk [vmem:[#allocation3 + $0x2c8] sm:$0x7] %vm3701_vm10, %v4878_v41  ;;  %vm6637_vm10 = vcmask 523268  }
 0x927   : > { %v4390_v7 = vpop.permute.xlu1 %4389 }
 0x928   : > { %v4748_v56 = vpop.permute.xlu0 %4747  ;;  %4469 = vst.msk [vmem:[#allocation3 + $0xf8] sm:$0xff] %vm3853_vm13, %v4390_v7 }
 0x929   : > { %4828 = vst.msk [vmem:[#allocation3 + $0xe0] sm:$0xff] %vm4217_vm9, %v4748_v56  ;;  %4167 = vrot.lane.b32.xlu1 %v4087_v42, %s14850_s2 }
 0x92a   : > { %4411 = vrot.lane.b32.xlu0 %v4688_v33, %s11053_s1 }
 0x92b   : > { %v3970_v21 = vpop.permute.xlu1 %3969  ;;  %v4934_v10 = vld [vmem:[#allocation3 + $0xc8] sm:$0xff] }
 0x92c   : > { %v4392_v29 = vpop.permute.xlu0 %4391  ;;  %4048 = vst.msk [vmem:[#allocation3 + $0x120] sm:$0xff] %vm4035_vm14, %v3970_v21  ;;  %v4691_v21 = vld [vmem:[#allocation2 + $0xd3] sm:$0xff] }
 0x92d   : > { %4470 = vst.msk [vmem:[#allocation3 + $0x110] sm:$0xff] %vm3853_vm13, %v4392_v29  ;;  %3807 = vrot.lane.b32.xlu1 %v4087_v42, %s11053_s1 }
 0x92e   : > { %4169 = vrot.lane.b32.xlu0 %v4088_v43, %s14850_s2 }
 0x92f   : > { %v4570_v20 = vpop.permute.xlu1 %4569 }
 0x930   : > { %v3972_v28 = vpop.permute.xlu0 %3971  ;;  %v4937_v9 = vld [vmem:[#allocation3 + $0xe0] sm:$0xff]  ;;  %4649 = vst.msk [vmem:[#allocation3 + $0xf8] sm:$0xff] %vm4035_vm14, %v4570_v20  ;;  %v4692_v20 = vld [vmem:[#allocation2 + $0xdb] sm:$0xff] }
 0x931   : > { %4049 = vst.msk [vmem:[#allocation3 + $0x138] sm:$0xff] %vm4035_vm14, %v3972_v28  ;;  %v5012_v16 = vpack.c.bf16 %v4937_v9, %v4934_v10  ;;  %3989 = vrot.lane.b32.xlu1 %v12967_v57, %s14851_s24 }
 0x932   : > { %3809 = vrot.lane.b32.xlu0 %v4088_v43, %s11053_s1 }
 0x933   : > { %5304 = vmatprep.mubr.bf16.mxu0 %v5012_v16  ;;  %v4750_v37 = vpop.permute.xlu1 %4749 }
 0x934   : > { %5305 = vmatmul.mubr.bf16.gmra.mxu0 %v5011_v48  ;;  %v4572_v50 = vpop.permute.xlu0 %4571  ;;  %4829 = vst.msk [vmem:[#allocation3 + $0xf8] sm:$0xff] %vm4217_vm9, %v4750_v37 }
 0x935   : > { %4650 = vst.msk [vmem:[#allocation3 + $0x110] sm:$0xff] %vm4035_vm14, %v4572_v50  ;;  %4589 = vrot.lane.b32.xlu1 %v12988_v45, %s14851_s24  ;;  %v4091_v50 = vld [vmem:[#allocation2 + $0xd1] sm:$0xff] }
 0x936   : > { %3991 = vrot.lane.b32.xlu0 %v12974_v60, %s14851_s24 }
 0x937   : > { %v4394_v4 = vpop.permute.xlu1 %4393  ;;  %v13249_v57 = vpop.f32.mrf.mxu1 }
 0x938   : > { %v4752_v0 = vpop.permute.xlu0 %4751  ;;  %4471 = vst.msk [vmem:[#allocation3 + $0x128] sm:$0xff] %vm3853_vm13, %v4394_v4 }
 0x939   : > { %4830 = vst.msk [vmem:[#allocation3 + $0x110] sm:$0xff] %vm4217_vm9, %v4752_v0  ;;  %4769 = vrot.lane.b32.xlu1 %v4689_v59, %s14850_s2  ;;  %v10299_v23 = vpop.f32.mrf.mxu1 }
 0x93a   : > { %4591 = vrot.lane.b32.xlu0 %v12998_v35, %s14851_s24 }
 0x93b   : > { %v4152_v58 = vpop.permute.xlu1 %4151  ;;  %v13256_v12 = vpop.f32.mrf.mxu1  ;;  %v4940_v39 = vld [vmem:[#allocation3 + $0xf8] sm:$0xff] }
 0x93c   : > { %v4396_v60 = vpop.permute.xlu0 %4395  ;;  %4230 = vst.msk [vmem:[#allocation3 + $0x120] sm:$0xff] %vm4217_vm9, %v4152_v58 }
 0x93d   : > { %4472 = vst.msk [vmem:[#allocation3 + $0x140] sm:$0xff] %vm3853_vm13, %v4396_v60  ;;  %4413 = vrot.lane.b32.xlu1 %v4689_v59, %s11053_s1  ;;  %v10300_v55 = vpop.f32.mrf.mxu1 }
 0x93e   : > { %4771 = vrot.lane.b32.xlu0 %v4690_v38, %s14850_s2  ;;  %v4092_v55 = vld [vmem:[#allocation2 + $0xd9] sm:$0xff] }
 0x93f   : > { %v3792_v63 = vpop.permute.xlu1 %3791 }
 0x940   : > { %v4154_v8 = vpop.permute.xlu0 %4153  ;;  %v4943_v44 = vld [vmem:[#allocation3 + $0x110] sm:$0xff]  ;;  %3868 = vst.msk [vmem:[#allocation3 + $0x150] sm:$0xff] %vm3853_vm13, %v3792_v63  ;;  %v13262_v52 = vpop.f32.mrf.mxu1 }
 0x941   : > { %4231 = vst.msk [vmem:[#allocation3 + $0x138] sm:$0xff] %vm4217_vm9, %v4154_v8  ;;  %v5015_v11 = vpack.c.bf16 %v4943_v44, %v4940_v39  ;;  %4171 = vrot.lane.b32.xlu1 %v4089_v40, %s14850_s2 }
 0x942   : > { %4415 = vrot.lane.b32.xlu0 %v4690_v38, %s11053_s1  ;;  %v10303_v25 = vpop.f32.mrf.mxu1 }
 0x943   : > { %5312 = vmatprep.mubr.bf16.mxu0 %v5015_v11  ;;  %v3974_v34 = vpop.permute.xlu1 %3973  ;;  %v4945_v0 = vld [vmem:[#allocation3 + $0x120] sm:$0xff] }
 0x944   : > { %5313 = vmatmul.mubr.bf16.gmra.mxu0 %v5014_v19  ;;  %v3794_v30 = vpop.permute.xlu0 %3793  ;;  %4050 = vst.msk [vmem:[#allocation3 + $0x150] sm:$0xff] %vm4035_vm14, %v3974_v34  ;;  %v13268_v49 = vpop.f32.mrf.mxu1 }
 0x945   : > { %3869 = vst.msk [vmem:[#allocation3 + $0x168] sm:$0xff] %vm3853_vm13, %v3794_v30  ;;  %3811 = vrot.lane.b32.xlu1 %v4089_v40, %s11053_s1 }
 0x946   : > { %4173 = vrot.lane.b32.xlu0 %v4090_v47, %s14850_s2  ;;  %v10304_v53 = vpop.f32.mrf.mxu1 }
 0x947   : > { %v4574_v54 = vpop.permute.xlu1 %4573  ;;  %v4094_v53 = vld [vmem:[#allocation2 + $0xe9] sm:$0xff] }
 0x948   : > { %v3976_v62 = vpop.permute.xlu0 %3975  ;;  %4651 = vst.msk [vmem:[#allocation3 + $0x128] sm:$0xff] %vm4035_vm14, %v4574_v54  ;;  %v13274_v26 = vpop.f32.mrf.mxu1  ;;  %v4948_v10 = vld [vmem:[#allocation3 + $0x138] sm:$0xff] }
 0x949   : > { %4051 = vst.msk [vmem:[#allocation3 + $0x168] sm:$0xff] %vm4035_vm14, %v3976_v62  ;;  %3993 = vrot.lane.b32.xlu1 %v12988_v45, %s14851_s24  ;;  %v5017_v59 = vpack.c.bf16 %v4948_v10, %v4945_v0 }
 0x94a   : > { %3813 = vrot.lane.b32.xlu0 %v4090_v47, %s11053_s1  ;;  %v10307_v1 = vpop.f32.mrf.mxu1  ;;  %v4693_v47 = vld [vmem:[#allocation2 + $0xe3] sm:$0xff] }
 0x94b   : > { %v4754_v36 = vpop.permute.xlu1 %4753 }
 0x94c   : > { %v4576_v15 = vpop.permute.xlu0 %4575  ;;  %4831 = vst.msk [vmem:[#allocation3 + $0x128] sm:$0xff] %vm4217_vm9, %v4754_v36  ;;  %v13281_v33 = vpop.f32.mrf.mxu1  ;;  %v3732_v36 = vld [vmem:[#allocation2 + $0xe9] sm:$0x7] }
 0x94d   : > { %4652 = vst.msk [vmem:[#allocation3 + $0x140] sm:$0xff] %vm4035_vm14, %v4576_v15  ;;  %4593 = vrot.lane.b32.xlu1 %v13016_v22, %s14851_s24 }
 0x94e   : > { %3995 = vrot.lane.b32.xlu0 %v12998_v35, %s14851_s24  ;;  %v10308_v7 = vpop.f32.mrf.mxu1 }
 0x94f   : > { %v4398_v56 = vpop.permute.xlu1 %4397 }
 0x950   : > { %v4756_v42 = vpop.permute.xlu0 %4755  ;;  %4473 = vst.msk [vmem:[#allocation3 + $0x158] sm:$0xff] %vm3853_vm13, %v4398_v56  ;;  %v13289_v45 = vpop.f32.mrf.mxu1 }
 0x951   : > { %4832 = vst.msk [vmem:[#allocation3 + $0x140] sm:$0xff] %vm4217_vm9, %v4756_v42  ;;  %4773 = vrot.lane.b32.xlu1 %v4691_v21, %s14850_s2 }
 0x952   : > { %4595 = vrot.lane.b32.xlu0 %v13026_v18, %s14851_s24  ;;  %v10311_v29 = vpop.f32.mrf.mxu1 }
 0x953   : > { %v4156_v35 = vpop.permute.xlu1 %4155  ;;  %v4946_v51 = vld [vmem:[#allocation3 + $0x128] sm:$0xff]  ;;  %v3914_v29 = vld [vmem:[#allocation2 + $0xea] sm:$0x7] }
 0x954   : > { %v4400_v43 = vpop.permute.xlu0 %4399  ;;  %4232 = vst.msk [vmem:[#allocation3 + $0x150] sm:$0xff] %vm4217_vm9, %v4156_v35  ;;  %v13296_v32 = vpop.f32.mrf.mxu1 }
 0x955   : > { %4474 = vst.msk [vmem:[#allocation3 + $0x170] sm:$0xff] %vm3853_vm13, %v4400_v43  ;;  %4417 = vrot.lane.b32.xlu1 %v4691_v21, %s11053_s1  ;;  %v4093_v21 = vld [vmem:[#allocation2 + $0xe1] sm:$0xff] }
 0x956   : > { %4775 = vrot.lane.b32.xlu0 %v4692_v20, %s14850_s2  ;;  %v10312_v28 = vpop.f32.mrf.mxu1 }
 0x957   : > { %v3796_v9 = vpop.permute.xlu1 %3795 }
 0x958   : > { %v4158_v16 = vpop.permute.xlu0 %4157  ;;  %v4949_v48 = vld [vmem:[#allocation3 + $0x140] sm:$0xff]  ;;  %3870 = vst.msk [vmem:[#allocation3 + $0x180] sm:$0xff] %vm3853_vm13, %v3796_v9  ;;  %v13302_v37 = vpop.f32.mrf.mxu1 }
 0x959   : > { %4233 = vst.msk [vmem:[#allocation3 + $0x168] sm:$0xff] %vm4217_vm9, %v4158_v16  ;;  %v5018_v4 = vpack.c.bf16 %v4949_v48, %v4946_v51  ;;  %4175 = vrot.lane.b32.xlu1 %v4091_v50, %s14850_s2  ;;  %v4694_v48 = vld [vmem:[#allocation2 + $0xeb] sm:$0xff] }
 0x95a   : > { %4419 = vrot.lane.b32.xlu0 %v4692_v20, %s11053_s1  ;;  %v10315_v23 = vpop.f32.mrf.mxu1 }
 0x95b   : > { %5320 = vmatprep.mubr.bf16.mxu0 %v5018_v4  ;;  %v3978_v58 = vpop.permute.xlu1 %3977 }
 0x95c   : > { %5321 = vmatmul.mubr.bf16.gmra.mxu0 %v5017_v59  ;;  %v3798_v60 = vpop.permute.xlu0 %3797  ;;  %4052 = vst.msk [vmem:[#allocation3 + $0x180] sm:$0xff] %vm4035_vm14, %v3978_v58  ;;  %v13308_v38 = vpop.f32.mrf.mxu1 }
 0x95d   : > { %3871 = vst.msk [vmem:[#allocation3 + $0x198] sm:$0xff] %vm3853_vm13, %v3798_v60  ;;  %3815 = vrot.lane.b32.xlu1 %v4091_v50, %s11053_s1 }
 0x95e   : > { %4177 = vrot.lane.b32.xlu0 %v4092_v55, %s14850_s2  ;;  %v10316_v3 = vpop.f32.mrf.mxu1 }
 0x95f   : > { %v4578_v63 = vpop.permute.xlu1 %4577 }
 0x960   : > { %v3980_v8 = vpop.permute.xlu0 %3979  ;;  %4653 = vst.msk [vmem:[#allocation3 + $0x158] sm:$0xff] %vm4035_vm14, %v4578_v63  ;;  %v13314_v39 = vpop.f32.mrf.mxu1  ;;  %v4954_v4 = vld [vmem:[#allocation3 + $0x168] sm:$0xff] }
 0x961   : > { %4053 = vst.msk [vmem:[#allocation3 + $0x198] sm:$0xff] %vm4035_vm14, %v3980_v8  ;;  %3997 = vrot.lane.b32.xlu1 %v13016_v22, %s14851_s24 }
 0x962   : > { %3817 = vrot.lane.b32.xlu0 %v4092_v55, %s11053_s1  ;;  %v10319_v44 = vpop.f32.mrf.mxu1  ;;  %v4951_v55 = vld [vmem:[#allocation3 + $0x150] sm:$0xff] }
 0x963   : > { %v4160_v40 = vpop.permute.xlu1 %4159 }
 0x964   : > { %v4580_v11 = vpop.permute.xlu0 %4579  ;;  %4234 = vst.msk [vmem:[#allocation3 + $0x180] sm:$0xff] %vm4217_vm9, %v4160_v40  ;;  %v13321_v19 = vpop.f32.mrf.mxu1  ;;  %v4516_v40 = vld [vmem:[#allocation2 + $0xfa] sm:$0xff] }
 0x965   : > { %4654 = vst.msk [vmem:[#allocation3 + $0x170] sm:$0xff] %vm4035_vm14, %v4580_v11  ;;  %4597 = vrot.lane.b32.xlu1 %v13041_v46, %s14851_s24  ;;  %v4695_v11 = vld [vmem:[#allocation2 + $0xf3] sm:$0xff] }
 0x966   : > { %3999 = vrot.lane.b32.xlu0 %v13026_v18, %s14851_s24  ;;  %v10320_v22 = vpop.f32.mrf.mxu1 }
 0x967   : > { %v3800_v25 = vpop.permute.xlu1 %3799 }
 0x968   : > { %v4162_v34 = vpop.permute.xlu0 %4161  ;;  %3872 = vst.msk [vmem:[#allocation3 + $0x1b0] sm:$0xff] %vm3853_vm13, %v3800_v25  ;;  %v13330_v30 = vpop.f32.mrf.mxu1 }
 0x969   : > { %4235 = vst.msk [vmem:[#allocation3 + $0x198] sm:$0xff] %vm4217_vm9, %v4162_v34  ;;  %4777 = vrot.lane.b32.xlu1 %v4693_v47, %s14850_s2 }
 0x96a   : > { %4181 = vrot.lane.b32.xlu0 %v4094_v53, %s14850_s2  ;;  %v10323_v62 = vpop.f32.mrf.mxu1 }
 0x96b   : > { %v3982_v18 = vpop.permute.xlu1 %3981  ;;  %v4698_v62 = vld [vmem:[#allocation2 + $0x10b] sm:$0x7] }
 0x96c   : > { %v3802_v54 = vpop.permute.xlu0 %3801  ;;  %4054 = vst.msk [vmem:[#allocation3 + $0x1b0] sm:$0xff] %vm4035_vm14, %v3982_v18  ;;  %v13336_v1 = vpop.f32.mrf.mxu1 }
 0x96d   : > { %3873 = vst.msk [vmem:[#allocation3 + $0x1c8] sm:$0xff] %vm3853_vm13, %v3802_v54  ;;  %4421 = vrot.lane.b32.xlu1 %v4693_v47, %s11053_s1  ;;  %v4696_v47 = vld [vmem:[#allocation2 + $0xfb] sm:$0xff]  ;;  %v4877_v54 = vld [vmem:[#allocation2 + $0x104] sm:$0xff] }
 0x96e   : > { %3821 = vrot.lane.b32.xlu0 %v3732_v36, %s11053_s1  ;;  %v10324_v15 = vpop.f32.mrf.mxu1  ;;  %4907 = vst.msk [vmem:[#allocation3 + $0x2b0] sm:$0xff] %vm2053_vm4, %v4877_v54 }
 0x96f   : > { %v4758_v7 = vpop.permute.xlu1 %4757 }
 0x970   : > { %v3984_v56 = vpop.permute.xlu0 %3983  ;;  %4833 = vst.msk [vmem:[#allocation3 + $0x158] sm:$0xff] %vm4217_vm9, %v4758_v7  ;;  %v13342_v42 = vpop.f32.mrf.mxu1  ;;  %v4960_v18 = vld [vmem:[#allocation3 + $0x198] sm:$0xff] }
 0x971   : > { %4055 = vst.msk [vmem:[#allocation3 + $0x1c8] sm:$0xff] %vm4035_vm14, %v3984_v56  ;;  %4179 = vrot.lane.b32.xlu1 %v4093_v21, %s14850_s2 }
 0x972   : > { %4003 = vrot.lane.b32.xlu0 %v3914_v29, %s14851_s24  ;;  %v10327_v35 = vpop.f32.mrf.mxu1 }
 0x973   : > { %v4402_v43 = vpop.permute.xlu1 %4401  ;;  %v4957_v35 = vld [vmem:[#allocation3 + $0x180] sm:$0xff] }
 0x974   : > { %v4760_v20 = vpop.permute.xlu0 %4759  ;;  %4475 = vst.msk [vmem:[#allocation3 + $0x188] sm:$0xff] %vm3853_vm13, %v4402_v43  ;;  %v13348_v28 = vpop.f32.mrf.mxu1  ;;  %v5023_v43 = vpack.c.bf16 %v4960_v18, %v4957_v35 }
 0x975   : > { %4834 = vst.msk [vmem:[#allocation3 + $0x170] sm:$0xff] %vm4217_vm9, %v4760_v20  ;;  %3819 = vrot.lane.b32.xlu1 %v4093_v21, %s11053_s1 }
 0x976   : > { %4599 = vrot.lane.b32.xlu0 %v13050_v61, %s14851_s24  ;;  %v10328_v10 = vpop.f32.mrf.mxu1 }
 0x977   : > { %v4582_v9 = vpop.permute.xlu1 %4581  ;;  %v4952_v61 = vld [vmem:[#allocation3 + $0x158] sm:$0xff] }
 0x978   : > { %v4404_v16 = vpop.permute.xlu0 %4403  ;;  %4655 = vst.msk [vmem:[#allocation3 + $0x188] sm:$0xff] %vm4035_vm14, %v4582_v9  ;;  %v13355_v51 = vpop.f32.mrf.mxu1 }
 0x979   : > { %4476 = vst.msk [vmem:[#allocation3 + $0x1a0] sm:$0xff] %vm3853_vm13, %v4404_v16  ;;  %4001 = vrot.lane.b32.xlu1 %v13041_v46, %s14851_s24  ;;  %v5020_v46 = vpack.c.bf16 %v4954_v4, %v4951_v55  ;;  %v4095_v4 = vld [vmem:[#allocation2 + $0xf1] sm:$0xff] }
 0x97a   : > { %4779 = vrot.lane.b32.xlu0 %v4694_v48, %s14850_s2  ;;  %v10331_v50 = vpop.f32.mrf.mxu1 }
 0x97b   : > { %v4762_v0 = vpop.permute.xlu1 %4761  ;;  %v4338_v50 = vld [vmem:[#allocation2 + $0xfb] sm:$0x7] }
 0x97c   : > { %v4584_v59 = vpop.permute.xlu0 %4583  ;;  %v4955_v23 = vld [vmem:[#allocation3 + $0x170] sm:$0xff]  ;;  %4835 = vst.msk [vmem:[#allocation3 + $0x188] sm:$0xff] %vm4217_vm9, %v4762_v0  ;;  %v13362_v58 = vpop.f32.mrf.mxu1 }
 0x97d   : > { %4656 = vst.msk [vmem:[#allocation3 + $0x1a0] sm:$0xff] %vm4035_vm14, %v4584_v59  ;;  %v5021_v60 = vpack.c.bf16 %v4955_v23, %v4952_v61  ;;  %4601 = vrot.lane.b32.xlu1 %v13113_v31, %s14851_s24  ;;  %v4697_v31 = vld [vmem:[#allocation2 + $0x103] sm:$0xff]  ;;  %v13395_v0 = vld [vmem:[%s14858_s9] ss:$0 sm:$0xff] }
 0x97e   : > { %4423 = vrot.lane.b32.xlu0 %v4694_v48, %s11053_s1  ;;  %v10332_v3 = vpop.f32.mrf.mxu1  ;;  %v4995_v23 = vld [vmem:[#allocation3 + $0x2b0] sm:$0xff] }
 0x97f   : > { %5328 = vmatprep.mubr.bf16.mxu0 %v5021_v60  ;;  %v4406_v63 = vpop.permute.xlu1 %4405  ;;  %v4998_v60 = vld [vmem:[#allocation3 + $0x2c8] sm:$0x7] }
 0x980   : > { %5329 = vmatmul.mubr.bf16.gmra.mxu0 %v5020_v46  ;;  %v4764_v8 = vpop.permute.xlu0 %4763  ;;  %4477 = vst.msk [vmem:[#allocation3 + $0x1b8] sm:$0xff] %vm3853_vm13, %v4406_v63  ;;  %v13369_v44 = vpop.f32.mrf.mxu1  ;;  %v5043_v63 = vpack.c.bf16 %v4998_v60, %v4995_v23 }
 0x981   : > { %4836 = vst.msk [vmem:[#allocation3 + $0x1a0] sm:$0xff] %vm4217_vm9, %v4764_v8  ;;  %4781 = vrot.lane.b32.xlu1 %v4695_v11, %s14850_s2 }
 0x982   : > { %4603 = vrot.lane.b32.xlu0 %v4516_v40, %s14851_s24  ;;  %v10335_v41 = vpop.f32.mrf.mxu1  ;;  %v4096_v40 = vld [vmem:[#allocation2 + $0xf9] sm:$0x7]  ;;  %10346 = vmatmul.mubr.msk.bf16.gmra.mxu1 %vm2053_vm4, %v5043_v63 }
 0x983   : > { %v4164_v22 = vpop.permute.xlu1 %4163  ;;  %v4958_v7 = vld [vmem:[#allocation3 + $0x188] sm:$0xff] }
 0x984   : > { %v4408_v25 = vpop.permute.xlu0 %4407  ;;  %4236 = vst.msk [vmem:[#allocation3 + $0x1b0] sm:$0xff] %vm4217_vm9, %v4164_v22  ;;  %v13375_v34 = vpop.f32.mrf.mxu1 }
 0x985   : > { %4478 = vst.msk [vmem:[#allocation3 + $0x1d0] sm:$0xff] %vm3853_vm13, %v4408_v25  ;;  %4785 = vrot.lane.b32.xlu1 %v4697_v31, %s14850_s2 }
 0x986   : > { %4783 = vrot.lane.b32.xlu0 %v4696_v47, %s14850_s2  ;;  %v10336_v53 = vpop.f32.mrf.mxu1 }
 0x987   : > { %v3804_v36 = vpop.permute.xlu1 %3803 }
 0x988   : > { %v4166_v15 = vpop.permute.xlu0 %4165  ;;  %v4961_v56 = vld [vmem:[#allocation3 + $0x1a0] sm:$0xff]  ;;  %3874 = vst.msk [vmem:[#allocation3 + $0x1e0] sm:$0xff] %vm3853_vm13, %v3804_v36  ;;  %v13382_v21 = vpop.f32.mrf.mxu1 }
 0x989   : > { %4237 = vst.msk [vmem:[#allocation3 + $0x1c8] sm:$0xff] %vm4217_vm9, %v4166_v15  ;;  %v5024_v29 = vpack.c.bf16 %v4961_v56, %v4958_v7  ;;  %4425 = vrot.lane.b32.xlu1 %v4695_v11, %s11053_s1 }
 0x98a   : > { %4787 = vrot.lane.b32.xlu0 %v4698_v62, %s14850_s2  ;;  %v10339_v20 = vpop.f32.mrf.mxu1 }
 0x98b   : > { %5336 = vmatprep.mubr.bf16.mxu0 %v5024_v29  ;;  %v3986_v10 = vpop.permute.xlu1 %3985 }
 0x98c   : > { %5337 = vmatmul.mubr.bf16.gmra.mxu0 %v5023_v43  ;;  %v3806_v9 = vpop.permute.xlu0 %3805  ;;  %4056 = vst.msk [vmem:[#allocation3 + $0x1e0] sm:$0xff] %vm4035_vm14, %v3986_v10  ;;  %v9608_v16 = vpop.f32.mrf.mxu0 }
 0x98d   : > { %3875 = vst.msk [vmem:[#allocation3 + $0x1f8] sm:$0xff] %vm3853_vm13, %v3806_v9  ;;  %v13388_v48 = vpop.f32.mrf.mxu1  ;;  %4183 = vrot.lane.b32.xlu1 %v4095_v4, %s14850_s2 }
 0x98e   : > { %4427 = vrot.lane.b32.xlu0 %v4338_v50, %s11053_s1  ;;  %v9609_v59 = vpop.f32.mrf.mxu0  ;;  %s10989_s1 = sshll.u32 %s11056_s5, 4  ;;  %s10990_s1 = int_to_ptr.vmem [resolvable:$false] %s10989_s1 }
 0x98f   : > { %v10340_v61 = vpop.f32.mrf.mxu1  ;;  %v9610_v55 = vadd.f32 %v9609_v59, %v9608_v16  ;;  %v4586_v3 = vpop.permute.xlu1 %4585  ;;  %v4963_v59 = vld [vmem:[#allocation3 + $0x1b0] sm:$0xff]  ;;  %s10991_s0 = scalar_lea.vmem %s10990_s1, 32  ;;  %p10992_p0 = scmp.lt.s32.totalorder %s8972_s26, %s10990_s1 }
 0x990   : > { %v3988_v46 = vpop.permute.xlu0 %3987  ;;  %4657 = vst.msk [vmem:[#allocation3 + $0x1b8] sm:$0xff] %vm4035_vm14, %v4586_v3  ;;  %v9611_v8 = vpop.f32.mrf.mxu0  ;;  %v4966_v43 = vld [vmem:[#allocation3 + $0x1c8] sm:$0xff] }
 0x991   : > { %4057 = vst.msk [vmem:[#allocation3 + $0x1f8] sm:$0xff] %vm4035_vm14, %v3988_v46  ;;  %v5275_v11 = vadd.f32 %v9610_v55, %v13395_v0  ;;  %v5026_v61 = vpack.c.bf16 %v4966_v43, %v4963_v59 }
 0x992   : > { %4185 = vrot.lane.b32.xlu0 %v4096_v40, %s14850_s2  ;;  %v9612_v41 = vpop.f32.mrf.mxu0 }
 0x993   : > { %v5428_v31 = vadd.f32 %v13190_v17, %v5275_v11  ;;  %v9613_v22 = vadd.f32 %v9612_v41, %v9611_v8  ;;  %v4766_v25 = vpop.permute.xlu1 %4765 }
 0x994   : > { %v4588_v47 = vpop.permute.xlu0 %4587  ;;  %4837 = vst.msk [vmem:[#allocation3 + $0x1b8] sm:$0xff] %vm4217_vm9, %v4766_v25 }
 0x995   : > { %4658 = vst.msk [vmem:[#allocation3 + $0x1d0] sm:$0xff] %vm4035_vm14, %v4588_v47  ;;  %v5278_v53 = vadd.f32 %v9613_v22, %v13395_v0  ;;  %v5546_v62 = vmax.f32 %v5428_v31, 0.0 }
 0x997   : > { %v5431_v18 = vadd.f32 %v13196_v27, %v5278_v53  ;;  %v4410_v54 = vpop.permute.xlu1 %4409  ;;  %v5604_v17 = vrot.slane %v5546_v62, 1 }
 0x998   : > { %v4768_v36 = vpop.permute.xlu0 %4767  ;;  %4479 = vst.msk [vmem:[#allocation3 + $0x1e8] sm:$0xff] %vm3853_vm13, %v4410_v54 }
 0x999   : > { %4838 = vst.msk [vmem:[#allocation3 + $0x1d0] sm:$0xff] %vm4217_vm9, %v4768_v36  ;;  %v5547_v15 = vmax.f32 %v5431_v18, 0.0 }
 0x99b   : > { %v5605_v7 = vrot.slane %v5547_v15, 1  ;;  %v4168_v56 = vpop.permute.xlu1 %4167  ;;  %v4964_v9 = vld [vmem:[#allocation3 + $0x1b8] sm:$0xff] }
 0x99c   : > { %v4412_v29 = vpop.permute.xlu0 %4411  ;;  %4238 = vst.msk [vmem:[#allocation3 + $0x1e0] sm:$0xff] %vm4217_vm9, %v4168_v56 }
 0x99d   : > { %4480 = vst.msk [vmem:[#allocation3 + $0x200] sm:$0xff] %vm3853_vm13, %v4412_v29  ;;  %v5606_v35 = vsel %vm2252_vm6, %v5604_v17, %v5605_v7 }
 0x99e   : > { %v13412_v20 = vmax.f32 %v5546_v62, %v5606_v35 }
 0x99f   : > { %v3808_v27 = vpop.permute.xlu1 %3807 }
 0x9a0   : > { %v4170_v10 = vpop.permute.xlu0 %4169  ;;  %v4967_v16 = vld [vmem:[#allocation3 + $0x1d0] sm:$0xff]  ;;  %3876 = vst.msk [vmem:[#allocation3 + $0x210] sm:$0xff] %vm3853_vm13, %v3808_v27  ;;  %v13416_v50 = vpop.f32.mrf.mxu1 }
 0x9a1   : > { %4239 = vst.msk [vmem:[#allocation3 + $0x1f8] sm:$0xff] %vm4217_vm9, %v4170_v10  ;;  %v5027_v4 = vpack.c.bf16 %v4967_v16, %v4964_v9 }
 0x9a2   : > { %v10343_v23 = vpop.f32.mrf.mxu1 }
 0x9a3   : > { %5344 = vmatprep.mubr.bf16.mxu0 %v5027_v4  ;;  %v3990_v60 = vpop.permute.xlu1 %3989 }
 0x9a4   : > { %5345 = vmatmul.mubr.bf16.gmra.mxu0 %v5026_v61  ;;  %v3810_v55 = vpop.permute.xlu0 %3809  ;;  %4058 = vst.msk [vmem:[#allocation3 + $0x210] sm:$0xff] %vm4035_vm14, %v3990_v60  ;;  %v13420_v3 = vpop.f32.mrf.mxu1 }
 0x9a5   : > { %3877 = vst.msk [vmem:[#allocation3 + $0x228] sm:$0xff] %vm3853_vm13, %v3810_v55  ;;  %v9614_v46 = vpop.f32.mrf.mxu0 }
 0x9a6   : > { %v10344_v8 = vpop.f32.mrf.mxu1 }
 0x9a7   : > { %v9615_v63 = vpop.f32.mrf.mxu0  ;;  %v4590_v41 = vpop.permute.xlu1 %4589 }
 0x9a8   : > { %v9616_v40 = vadd.f32 %v9615_v63, %v9614_v46  ;;  %v3992_v11 = vpop.permute.xlu0 %3991  ;;  %4659 = vst.msk [vmem:[#allocation3 + $0x1e8] sm:$0xff] %vm4035_vm14, %v4590_v41  ;;  %v4972_v4 = vld [vmem:[#allocation3 + $0x1f8] sm:$0xff] }
 0x9a9   : > { %4059 = vst.msk [vmem:[#allocation3 + $0x228] sm:$0xff] %vm4035_vm14, %v3992_v11  ;;  %v9617_v31 = vpop.f32.mrf.mxu0 }
 0x9aa   : > { %v5283_v22 = vadd.f32 %v9616_v40, %v13395_v0 }
 0x9ab   : > { %v9618_v25 = vpop.f32.mrf.mxu0  ;;  %v4770_v18 = vpop.permute.xlu1 %4769 }
 0x9ac   : > { %v5436_v47 = vadd.f32 %v13202_v5, %v5283_v22  ;;  %v9619_v53 = vadd.f32 %v9618_v25, %v9617_v31  ;;  %v4592_v62 = vpop.permute.xlu0 %4591  ;;  %4839 = vst.msk [vmem:[#allocation3 + $0x1e8] sm:$0xff] %vm4217_vm9, %v4770_v18 }
 0x9ad   : > { %4660 = vst.msk [vmem:[#allocation3 + $0x200] sm:$0xff] %vm4035_vm14, %v4592_v62 }
 0x9ae   : > { %v5548_v54 = vmax.f32 %v5436_v47, 0.0  ;;  %v5286_v36 = vadd.f32 %v9619_v53, %v13395_v0 }
 0x9af   : > { %v4414_v35 = vpop.permute.xlu1 %4413 }
 0x9b0   : > { %v5607_v17 = vrot.slane %v5548_v54, 1  ;;  %v5439_v56 = vadd.f32 %v13208_v6, %v5286_v36  ;;  %v4772_v29 = vpop.permute.xlu0 %4771  ;;  %4481 = vst.msk [vmem:[#allocation3 + $0x218] sm:$0xff] %vm3853_vm13, %v4414_v35 }
 0x9b1   : > { %4840 = vst.msk [vmem:[#allocation3 + $0x200] sm:$0xff] %vm4217_vm9, %v4772_v29 }
 0x9b2   : > { %v5608_v5 = vsel %vm2252_vm6, %v5605_v7, %v5607_v17  ;;  %v5549_v43 = vmax.f32 %v5439_v56, 0.0  ;;  %v4969_v7 = vld [vmem:[#allocation3 + $0x1e0] sm:$0xff] }
 0x9b3   : > { %v13433_v27 = vmax.f32 %v5547_v15, %v5608_v5  ;;  %v4172_v16 = vpop.permute.xlu1 %4171  ;;  %v4970_v60 = vld [vmem:[#allocation3 + $0x1e8] sm:$0xff]  ;;  %v5029_v46 = vpack.c.bf16 %v4972_v4, %v4969_v7 }
 0x9b4   : > { %v5609_v10 = vrot.slane %v5549_v43, 1  ;;  %v4416_v9 = vpop.permute.xlu0 %4415  ;;  %4240 = vst.msk [vmem:[#allocation3 + $0x210] sm:$0xff] %vm4217_vm9, %v4172_v16 }
 0x9b5   : > { %4482 = vst.msk [vmem:[#allocation3 + $0x230] sm:$0xff] %vm3853_vm13, %v4416_v9 }
 0x9b6   : > { %v5610_v6 = vsel %vm2252_vm6, %v5607_v17, %v5609_v10 }
 0x9b7   : > { %v13438_v59 = vmax.f32 %v5548_v54, %v5610_v6  ;;  %v3812_v23 = vpop.permute.xlu1 %3811 }
 0x9b8   : > { %v4174_v61 = vpop.permute.xlu0 %4173  ;;  %v4973_v55 = vld [vmem:[#allocation3 + $0x200] sm:$0xff]  ;;  %3878 = vst.msk [vmem:[#allocation3 + $0x240] sm:$0xff] %vm3853_vm13, %v3812_v23 }
 0x9b9   : > { %4241 = vst.msk [vmem:[#allocation3 + $0x228] sm:$0xff] %vm4217_vm9, %v4174_v61  ;;  %v5030_v15 = vpack.c.bf16 %v4973_v55, %v4970_v60 }
 0x9bb   : > { %5352 = vmatprep.mubr.bf16.mxu0 %v5030_v15  ;;  %v3994_v8 = vpop.permute.xlu1 %3993 }
 0x9bc   : > { %5353 = vmatmul.mubr.bf16.gmra.mxu0 %v5029_v46  ;;  %v3814_v63 = vpop.permute.xlu0 %3813  ;;  %4060 = vst.msk [vmem:[#allocation3 + $0x240] sm:$0xff] %vm4035_vm14, %v3994_v8  ;;  %v9620_v40 = vpop.f32.mrf.mxu0 }
 0x9bd   : > { %3879 = vst.msk [vmem:[#allocation3 + $0x258] sm:$0xff] %vm3853_vm13, %v3814_v63 }
 0x9be   : > { %v9621_v11 = vpop.f32.mrf.mxu0 }
 0x9bf   : > { %v9622_v41 = vadd.f32 %v9621_v11, %v9620_v40  ;;  %v4594_v22 = vpop.permute.xlu1 %4593 }
 0x9c0   : > { %v3996_v31 = vpop.permute.xlu0 %3995  ;;  %4661 = vst.msk [vmem:[#allocation3 + $0x218] sm:$0xff] %vm4035_vm14, %v4594_v22  ;;  %v9623_v25 = vpop.f32.mrf.mxu0  ;;  %v4978_v15 = vld [vmem:[#allocation3 + $0x228] sm:$0xff] }
 0x9c1   : > { %4061 = vst.msk [vmem:[#allocation3 + $0x258] sm:$0xff] %vm4035_vm14, %v3996_v31  ;;  %v5291_v47 = vadd.f32 %v9622_v41, %v13395_v0  ;;  %v4975_v41 = vld [vmem:[#allocation3 + $0x210] sm:$0xff] }
 0x9c2   : > { %v9624_v53 = vpop.f32.mrf.mxu0  ;;  %v5032_v22 = vpack.c.bf16 %v4978_v15, %v4975_v41 }
 0x9c3   : > { %v5444_v62 = vadd.f32 %v13249_v57, %v5291_v47  ;;  %v9625_v18 = vadd.f32 %v9624_v53, %v9623_v25  ;;  %v4774_v54 = vpop.permute.xlu1 %4773 }
 0x9c4   : > { %v4596_v36 = vpop.permute.xlu0 %4595  ;;  %4841 = vst.msk [vmem:[#allocation3 + $0x218] sm:$0xff] %vm4217_vm9, %v4774_v54 }
 0x9c5   : > { %4662 = vst.msk [vmem:[#allocation3 + $0x230] sm:$0xff] %vm4035_vm14, %v4596_v36  ;;  %v5550_v17 = vmax.f32 %v5444_v62, 0.0  ;;  %v5294_v56 = vadd.f32 %v9625_v18, %v13395_v0 }
 0x9c7   : > { %v5611_v29 = vrot.slane %v5550_v17, 1  ;;  %v13452_v35 = vadd.f32 %v13256_v12, %v5294_v56  ;;  %v4418_v5 = vpop.permute.xlu1 %4417  ;;  %v5755_v12 = vrot.slane %v13438_v59, 1 }
 0x9c8   : > { %v4776_v9 = vpop.permute.xlu0 %4775  ;;  %4483 = vst.msk [vmem:[#allocation3 + $0x248] sm:$0xff] %vm3853_vm13, %v4418_v5 }
 0x9c9   : > { %4842 = vst.msk [vmem:[#allocation3 + $0x230] sm:$0xff] %vm4217_vm9, %v4776_v9  ;;  %v5612_v57 = vsel %vm2252_vm6, %v5609_v10, %v5611_v29  ;;  %v5551_v16 = vmax.f32 %v13452_v35, 0.0 }
 0x9ca   : > { %v13458_v6 = vmax.f32 %v5549_v43, %v5612_v57 }
 0x9cb   : > { %v5613_v4 = vrot.slane %v5551_v16, 1  ;;  %v4176_v61 = vpop.permute.xlu1 %4175  ;;  %v4976_v63 = vld [vmem:[#allocation3 + $0x218] sm:$0xff] }
 0x9cc   : > { %v4420_v23 = vpop.permute.xlu0 %4419  ;;  %4242 = vst.msk [vmem:[#allocation3 + $0x240] sm:$0xff] %vm4217_vm9, %v4176_v61  ;;  %v5756_v60 = vrot.slane %v13458_v6, 1 }
 0x9cd   : > { %4484 = vst.msk [vmem:[#allocation3 + $0x260] sm:$0xff] %vm3853_vm13, %v4420_v23  ;;  %v5614_v55 = vsel %vm2252_vm6, %v5611_v29, %v5613_v4 }
 0x9ce   : > { %v13465_v7 = vmax.f32 %v5550_v17, %v5614_v55  ;;  %v5757_v10 = vsel %vm2252_vm6, %v5755_v12, %v5756_v60 }
 0x9cf   : > { %v3816_v43 = vpop.permute.xlu1 %3815  ;;  %v5838_v40 = vmax.f32 %v13412_v20, %v5757_v10 }
 0x9d0   : > { %v4178_v46 = vpop.permute.xlu0 %4177  ;;  %v4979_v8 = vld [vmem:[#allocation3 + $0x230] sm:$0xff]  ;;  %3880 = vst.msk [vmem:[#allocation3 + $0x270] sm:$0xff] %vm3853_vm13, %v3816_v43  ;;  %v5758_v31 = vrot.slane %v13465_v7, 1 }
 0x9d1   : > { %4243 = vst.msk [vmem:[#allocation3 + $0x258] sm:$0xff] %vm4217_vm9, %v4178_v46  ;;  %v5033_v11 = vpack.c.bf16 %v4979_v8, %v4976_v63 }
 0x9d2   : > { %v5759_v25 = vsel %vm2252_vm6, %v5756_v60, %v5758_v31 }
 0x9d3   : > { %5360 = vmatprep.mubr.bf16.mxu0 %v5033_v11  ;;  %v3998_v47 = vpop.permute.xlu1 %3997  ;;  %v5839_v62 = vmax.f32 %v13433_v27, %v5759_v25 }
 0x9d4   : > { %5361 = vmatmul.mubr.bf16.gmra.mxu0 %v5032_v22  ;;  %v3818_v53 = vpop.permute.xlu0 %3817  ;;  %4062 = vst.msk [vmem:[#allocation3 + $0x270] sm:$0xff] %vm4035_vm14, %v3998_v47  ;;  %v9626_v20 = vpop.f32.mrf.mxu0 }
 0x9d5   : > { %3881 = vst.msk [vmem:[#allocation3 + $0x288] sm:$0xff] %vm3853_vm13, %v3818_v53  ;;  %v13476_v18 = vpack.c.bf16 %v5839_v62, %v5838_v40 }
 0x9d6   : > { %v9627_v54 = vpop.f32.mrf.mxu0 }
 0x9d7   : > { %v9628_v36 = vadd.f32 %v9627_v54, %v9626_v20  ;;  %v4598_v56 = vpop.permute.xlu1 %4597 }
 0x9d8   : > { %v4000_v17 = vpop.permute.xlu0 %3999  ;;  %4663 = vst.msk [vmem:[#allocation3 + $0x248] sm:$0xff] %vm4035_vm14, %v4598_v56  ;;  %v9629_v29 = vpop.f32.mrf.mxu0 }
 0x9d9   : > { %4063 = vst.msk [vmem:[#allocation3 + $0x288] sm:$0xff] %vm4035_vm14, %v4000_v17  ;;  %v5299_v35 = vadd.f32 %v9628_v36, %v13395_v0  ;;  %v4984_v17 = vld [vmem:[#allocation3 + $0x258] sm:$0xff] }
 0x9da   : > { %v9630_v5 = vpop.f32.mrf.mxu0 }
 0x9db   : > { %v5452_v27 = vadd.f32 %v13262_v52, %v5299_v35  ;;  %v9631_v9 = vadd.f32 %v9630_v5, %v9629_v29  ;;  %v4778_v57 = vpop.permute.xlu1 %4777 }
 0x9dc   : > { %v4182_v61 = vpop.permute.xlu0 %4181  ;;  %4843 = vst.msk [vmem:[#allocation3 + $0x248] sm:$0xff] %vm4217_vm9, %v4778_v57 }
 0x9dd   : > { %4245 = vst.msk [vmem:[#allocation3 + $0x288] sm:$0xff] %vm4217_vm9, %v4182_v61  ;;  %v5552_v23 = vmax.f32 %v5452_v27, 0.0  ;;  %v5302_v12 = vadd.f32 %v9631_v9, %v13395_v0  ;;  %v4981_v9 = vld [vmem:[#allocation3 + $0x240] sm:$0xff] }
 0x9de   : > { %v5035_v57 = vpack.c.bf16 %v4984_v17, %v4981_v9 }
 0x9df   : > { %v5615_v60 = vrot.slane %v5552_v23, 1  ;;  %v13486_v55 = vadd.f32 %v13268_v49, %v5302_v12  ;;  %v4422_v15 = vpop.permute.xlu1 %4421 }
 0x9e0   : > { %v3822_v10 = vpop.permute.xlu0 %3821  ;;  %4485 = vst.msk [vmem:[#allocation3 + $0x278] sm:$0xff] %vm3853_vm13, %v4422_v15 }
 0x9e1   : > { %3884 = vst.msk [vmem:[#allocation3 + $0x2b8] sm:$0x7] %vm3883_vm12, %v3822_v10  ;;  %v5616_v52 = vsel %vm2252_vm6, %v5613_v4, %v5615_v60  ;;  %v5553_v43 = vmax.f32 %v13486_v55, 0.0 }
 0x9e2   : > { %v13492_v46 = vmax.f32 %v5551_v16, %v5616_v52 }
 0x9e3   : > { %v13496_v63 = vrot.slane %v5553_v43, 1  ;;  %v4180_v8 = vpop.permute.xlu1 %4179  ;;  %v4982_v35 = vld [vmem:[#allocation3 + $0x248] sm:$0xff] }
 0x9e4   : > { %v4004_v49 = vpop.permute.xlu0 %4003  ;;  %4244 = vst.msk [vmem:[#allocation3 + $0x270] sm:$0xff] %vm4217_vm9, %v4180_v8  ;;  %v5760_v40 = vrot.slane %v13492_v46, 1 }
 0x9e5   : > { %4066 = vst.msk [vmem:[#allocation3 + $0x2b8] sm:$0x7] %vm4065_vm15, %v4004_v49  ;;  %v5618_v4 = vsel %vm2252_vm6, %v5615_v60, %v13496_v63 }
 0x9e6   : > { %v13503_v11 = vmax.f32 %v5552_v23, %v5618_v4  ;;  %v5761_v16 = vsel %vm2252_vm6, %v5758_v31, %v5760_v40 }
 0x9e7   : > { %v3820_v41 = vpop.permute.xlu1 %3819  ;;  %v5840_v25 = vmax.f32 %v13438_v59, %v5761_v16 }
 0x9e8   : > { %v4600_v22 = vpop.permute.xlu0 %4599  ;;  %3882 = vst.msk [vmem:[#allocation3 + $0x2a0] sm:$0xff] %vm3853_vm13, %v3820_v41  ;;  %v5762_v47 = vrot.slane %v13503_v11, 1 }
 0x9e9   : > { %4664 = vst.msk [vmem:[#allocation3 + $0x260] sm:$0xff] %vm4035_vm14, %v4600_v22 }
 0x9ea   : > { %v5763_v53 = vsel %vm2252_vm6, %v5760_v40, %v5762_v47 }
 0x9eb   : > { %v4002_v62 = vpop.permute.xlu1 %4001  ;;  %v5841_v54 = vmax.f32 %v13458_v6, %v5763_v53  ;;  %v4987_v22 = vld [vmem:[#allocation3 + $0x270] sm:$0xff] }
 0x9ec   : > { %v4780_v20 = vpop.permute.xlu0 %4779  ;;  %4064 = vst.msk [vmem:[#allocation3 + $0x2a0] sm:$0xff] %vm4035_vm14, %v4002_v62 }
 0x9ed   : > { %4844 = vst.msk [vmem:[#allocation3 + $0x260] sm:$0xff] %vm4217_vm9, %v4780_v20  ;;  %v13516_v31 = vpack.c.bf16 %v5841_v54, %v5840_v25 }
 0x9ef   : > { %v4602_v36 = vpop.permute.xlu1 %4601 }
 0x9f0   : > { %v4424_v59 = vpop.permute.xlu0 %4423  ;;  %4665 = vst.msk [vmem:[#allocation3 + $0x278] sm:$0xff] %vm4035_vm14, %v4602_v36  ;;  %v4990_v36 = vld [vmem:[#allocation3 + $0x288] sm:$0xff] }
 0x9f1   : > { %4486 = vst.msk [vmem:[#allocation3 + $0x290] sm:$0xff] %vm3853_vm13, %v4424_v59 }
 0x9f3   : > { %v4782_v29 = vpop.permute.xlu1 %4781 }
 0x9f4   : > { %v4604_v56 = vpop.permute.xlu0 %4603  ;;  %v4985_v5 = vld [vmem:[#allocation3 + $0x260] sm:$0xff]  ;;  %4845 = vst.msk [vmem:[#allocation3 + $0x278] sm:$0xff] %vm4217_vm9, %v4782_v29  ;;  %v9632_v6 = vpop.f32.mrf.mxu0 }
 0x9f5   : > { %4666 = vst.msk [vmem:[#allocation3 + $0x290] sm:$0xff] %vm4035_vm14, %v4604_v56  ;;  %v5036_v27 = vpack.c.bf16 %v4985_v5, %v4982_v35  ;;  %v5038_v56 = vpack.c.bf16 %v4990_v36, %v4987_v22 }
 0x9f6   : > { %v9633_v61 = vpop.f32.mrf.mxu0 }
 0x9f7   : > { %5368 = vmatprep.mubr.bf16.mxu0 %v5036_v27  ;;  %v9634_v23 = vadd.f32 %v9633_v61, %v9632_v6  ;;  %v4786_v60 = vpop.permute.xlu1 %4785 }
 0x9f8   : > { %5369 = vmatmul.mubr.bf16.gmra.mxu0 %v5035_v57  ;;  %v4784_v12 = vpop.permute.xlu0 %4783  ;;  %v9635_v15 = vpop.f32.mrf.mxu0 }
 0x9f9   : > { %4846 = vst.msk [vmem:[#allocation3 + $0x290] sm:$0xff] %vm4217_vm9, %v4784_v12  ;;  %v5307_v10 = vadd.f32 %v9634_v23, %v13395_v0 }
 0x9fa   : > { %v9636_v52 = vpop.f32.mrf.mxu0 }
 0x9fb   : > { %v5460_v8 = vadd.f32 %v13274_v26, %v5307_v10  ;;  %v9637_v49 = vadd.f32 %v9636_v52, %v9635_v15  ;;  %v4426_v4 = vpop.permute.xlu1 %4425  ;;  %v4988_v26 = vld [vmem:[#allocation3 + $0x278] sm:$0xff] }
 0x9fc   : > { %v4788_v40 = vpop.permute.xlu0 %4787  ;;  %4487 = vst.msk [vmem:[#allocation3 + $0x2a8] sm:$0xff] %vm3853_vm13, %v4426_v4  ;;  %vm5920_vm13 = vcmask 728064  }
 0x9fd   : > { %v5554_v16 = vmax.f32 %v5460_v8, 0.0  ;;  %v5310_v41 = vadd.f32 %v9637_v49, %v13395_v0  ;;  %4667 = vst.msk [vmem:[#allocation3 + $0x2a8] sm:$0xff] %vm4035_vm14, %v12996_v24  ;;  %vm6043_vm14 = vcmask 523264  }
 0x9fe   : > { %4847 = vst.msk [vmem:[#allocation3 + $0x2a8] sm:$0xff] %vm4217_vm9, %v4786_v60 }
 0x9ff   : > { %v5619_v25 = vrot.slane %v5554_v16, 1  ;;  %v5463_v53 = vadd.f32 %v13281_v33, %v5310_v41  ;;  %v4184_v20 = vpop.permute.xlu1 %4183  ;;  %6613 = vst.msk [vmem:[#allocation4] sm:$0xff] %vm6043_vm14, %v14832_v2  ;;  %6614 = vst.msk [vmem:[#allocation4 + $0x8] sm:$0xff] %vm6043_vm14, %v14832_v2 }
 0xa00   : > { %v4428_v62 = vpop.permute.xlu0 %4427  ;;  %v4991_v54 = vld [vmem:[#allocation3 + $0x290] sm:$0xff]  ;;  %4246 = vst.msk [vmem:[#allocation3 + $0x2a0] sm:$0xff] %vm4217_vm9, %v4184_v20  ;;  %vm6635_vm9 = vcmask 519168  }
 0xa01   : > { %4488 = vst.msk [vmem:[#allocation3 + $0x2c0] sm:$0x7] %vm3883_vm12, %v4428_v62  ;;  %v5039_v59 = vpack.c.bf16 %v4991_v54, %v4988_v26  ;;  %v5620_v24 = vsel %vm2252_vm6, %v13496_v63, %v5619_v25  ;;  %v5555_v17 = vmax.f32 %v5463_v53, 0.0  ;;  %vm6627_vm12 = vcmask 521216  }
 0xa02   : > { %4668 = vst.msk [vmem:[#allocation3 + $0x2c0] sm:$0x7] %vm4065_vm15, %v13014_v14  ;;  %v5694_v33 = vmax.f32 %v5553_v43, %v5620_v24  ;;  %vm6629_vm15 = vcmask 523270  }
 0xa03   : > { %5376 = vmatprep.mubr.bf16.mxu0 %v5039_v59  ;;  %4848 = vst.msk [vmem:[#allocation3 + $0x2c0] sm:$0x7] %vm4247_vm0, %v4788_v40  ;;  %v5621_v29 = vrot.slane %v5555_v17, 1 }
 0xa04   : > { %5377 = vmatmul.mubr.bf16.gmra.mxu0 %v5038_v56  ;;  %v4186_v35 = vpop.permute.xlu0 %4185  ;;  %v9638_v5 = vpop.f32.mrf.mxu0  ;;  %v5764_v6 = vrot.slane %v5694_v33, 1  ;;  %6615 = vst.msk [vmem:[#allocation4 + $0x10] sm:$0xff] %vm6043_vm14, %v14832_v2  ;;  %6616 = vst.msk [vmem:[#allocation4 + $0x18] sm:$0xff] %vm6043_vm14, %v14832_v2 }
 0xa05   : > { %4248 = vst.msk [vmem:[#allocation3 + $0x2b8] sm:$0x7] %vm4247_vm0, %v4186_v35  ;;  %v5622_v63 = vsel %vm2252_vm6, %v5619_v25, %v5621_v29  ;;  %v4994_v60 = vld [vmem:[#allocation3 + $0x2a8] sm:$0xff]  ;;  %vm6647_vm0 = vcmask 516096  }
 0xa06   : > { %v9639_v27 = vpop.f32.mrf.mxu0  ;;  %v13542_v57 = vmax.f32 %v5554_v16, %v5622_v63  ;;  %v5765_v14 = vsel %vm2252_vm6, %v5762_v47, %v5764_v6  ;;  %6617 = vst.msk [vmem:[#allocation4 + $0x20] sm:$0xff] %vm6043_vm14, %v14832_v2  ;;  %6618 = vst.msk [vmem:[#allocation4 + $0x28] sm:$0xff] %vm6043_vm14, %v14832_v2 }
 0xa07   : > { %v9640_v9 = vadd.f32 %v9639_v27, %v9638_v5  ;;  %v5842_v55 = vmax.f32 %v13465_v7, %v5765_v14  ;;  %v4993_v40 = vld [vmem:[#allocation3 + $0x2a0] sm:$0xff]  ;;  %6619 = vst.msk [vmem:[#allocation4 + $0x30] sm:$0xff] %vm6043_vm14, %v14832_v2  ;;  %6620 = vst.msk [vmem:[#allocation4 + $0x38] sm:$0xff] %vm6043_vm14, %v14832_v2 }
 0xa08   : > { %v9641_v61 = vpop.f32.mrf.mxu0  ;;  %v5766_v23 = vrot.slane %v13542_v57, 1  ;;  %6621 = vst.msk [vmem:[#allocation4 + $0x40] sm:$0xff] %vm6043_vm14, %v14832_v2  ;;  %6622 = vst.msk [vmem:[#allocation4 + $0x48] sm:$0xff] %vm6043_vm14, %v14832_v2 }
 0xa09   : > { %v5315_v43 = vadd.f32 %v9640_v9, %v13395_v0 }
 0xa0a   : > { %v9642_v12 = vpop.f32.mrf.mxu0  ;;  %v4997_v15 = vld [vmem:[#allocation3 + $0x2c0] sm:$0x7]  ;;  %v5767_v49 = vsel %vm2252_vm6, %v5764_v6, %v5766_v23 }
 0xa0b   : > { %v5468_v10 = vadd.f32 %v13289_v45, %v5315_v43  ;;  %v9643_v52 = vadd.f32 %v9642_v12, %v9641_v61  ;;  %v5042_v8 = vpack.c.bf16 %v4997_v15, %v4994_v60  ;;  %v5843_v47 = vmax.f32 %v13492_v46, %v5767_v49 }
 0xa0c   : > { %v4996_v4 = vld [vmem:[#allocation3 + $0x2b8] sm:$0x7] }
 0xa0d   : > { %v5556_v16 = vmax.f32 %v5468_v10, 0.0  ;;  %v5318_v7 = vadd.f32 %v9643_v52, %v13395_v0  ;;  %5384 = vmatprep.mubr.bf16.mxu0 %v5042_v8  ;;  %v5041_v41 = vpack.c.bf16 %v4996_v4, %v4993_v40  ;;  %v13554_v22 = vpack.c.bf16 %v5843_v47, %v5842_v55 }
 0xa0f   : > { %v5623_v25 = vrot.slane %v5556_v16, 1  ;;  %v13557_v53 = vadd.f32 %v13296_v32, %v5318_v7  ;;  %5385 = vmatmul.mubr.bf16.gmra.mxu0 %v5041_v41 }
 0xa11   : > { %v5624_v45 = vsel %vm2252_vm6, %v5621_v29, %v5623_v25  ;;  %v5557_v62 = vmax.f32 %v13557_v53, 0.0  ;;  %v10569_v53 = vld [vmem:[%s14859_s10 + $0x4] ss:$8 sps:$4 sm:$0xff]  }
 0xa12   : > { %v13561_v20 = vmax.f32 %v5555_v17, %v5624_v45  ;;  %9242 = vmatprep.mubr.msk.bf16.mxu0 %vm5920_vm13, %v10569_v53 }
 0xa13   : > { %v13565_v46 = vrot.slane %v5557_v62, 1 }
 0xa14   : > { %v5768_v26 = vrot.slane %v13561_v20, 1 }
 0xa15   : > { %v5626_v54 = vsel %vm2252_vm6, %v5623_v25, %v13565_v46 }
 0xa16   : > { %v13570_v59 = vmax.f32 %v5556_v16, %v5626_v54  ;;  %v5769_v36 = vsel %vm2252_vm6, %v5766_v23, %v5768_v26 }
 0xa17   : > { %v5844_v17 = vmax.f32 %v13503_v11, %v5769_v36 }
 0xa18   : > { %v5770_v32 = vrot.slane %v13570_v59, 1 }
 0xa1a   : > { %v5771_v24 = vsel %vm2252_vm6, %v5768_v26, %v5770_v32 }
 0xa1b   : > { %v5845_v56 = vmax.f32 %v5694_v33, %v5771_v24 }
 0xa1c   : > { %v9644_v35 = vpop.f32.mrf.mxu0 }
 0xa1d   : > { %v13578_v29 = vpack.c.bf16 %v5845_v56, %v5844_v17 }
 0xa1e   : > { %v9645_v5 = vpop.f32.mrf.mxu0 }
 0xa1f   : > { %v9646_v41 = vadd.f32 %v9645_v5, %v9644_v35 }
 0xa20   : > { %v9647_v6 = vpop.f32.mrf.mxu0 }
 0xa22   : > { %v9648_v27 = vpop.f32.mrf.mxu0 }
 0xa23   : > { %v9649_v47 = vadd.f32 %v9648_v27, %v9647_v6 }
 0xa25   : > { %v5326_v54 = vadd.f32 %v9649_v47, %v13395_v0 }
 0xa27   : > { %v5479_v35 = vadd.f32 %v13308_v38, %v5326_v54 }
 0xa40   : > { %v9650_v63 = vpop.f32.mrf.mxu0 }
 0xa42   : > { %v9651_v9 = vpop.f32.mrf.mxu0  ;;  %v13580_v23 = vpop.f32.mrf.mxu1 }
 0xa43   : > { %v9652_v40 = vadd.f32 %v9651_v9, %v9650_v63  ;;  %v5323_v63 = vadd.f32 %v9646_v41, %v13395_v0 }
 0xa44   : > { %v9653_v14 = vpop.f32.mrf.mxu0  ;;  %v10347_v60 = vpop.f32.mrf.mxu1 }
 0xa45   : > { %v5331_v45 = vadd.f32 %v9652_v40, %v13395_v0 }
 0xa46   : > { %v9654_v61 = vpop.f32.mrf.mxu0  ;;  %v13582_v15 = vpop.f32.mrf.mxu1 }
 0xa47   : > { %v9655_v8 = vadd.f32 %v9654_v61, %v9653_v14  ;;  %v5484_v27 = vadd.f32 %v13314_v39, %v5331_v45 }
 0xa48   : > { %v10348_v33 = vpop.f32.mrf.mxu1 }
 0xa49   : > { %v5334_v16 = vadd.f32 %v9655_v8, %v13395_v0  ;;  %v5559_v33 = vmax.f32 %v5479_v35, 0.0 }
 0xa4b   : > { %v5487_v24 = vadd.f32 %v13321_v19, %v5334_v16  ;;  %v5476_v19 = vadd.f32 %v13302_v37, %v5323_v63  ;;  %v5629_v16 = vrot.slane %v5559_v33, 1 }
 0xa4c   : > { %v9656_v55 = vpop.f32.mrf.mxu0 }
 0xa4d   : > { %v5561_v14 = vmax.f32 %v5487_v24, 0.0  ;;  %v5558_v8 = vmax.f32 %v5476_v19, 0.0 }
 0xa4e   : > { %v9657_v43 = vpop.f32.mrf.mxu0 }
 0xa4f   : > { %v9658_v52 = vadd.f32 %v9657_v43, %v9656_v55  ;;  %v5560_v43 = vmax.f32 %v5484_v27, 0.0  ;;  %v5633_v39 = vrot.slane %v5561_v14, 1  ;;  %v5627_v45 = vrot.slane %v5558_v8, 1 }
 0xa50   : > { %v9659_v12 = vpop.f32.mrf.mxu0 }
 0xa51   : > { %v5339_v4 = vadd.f32 %v9658_v52, %v13395_v0 }
 0xa52   : > { %v9660_v11 = vpop.f32.mrf.mxu0 }
 0xa53   : > { %v9661_v10 = vadd.f32 %v9660_v11, %v9659_v12  ;;  %v5492_v26 = vadd.f32 %v13330_v30, %v5339_v4 }
 0xa55   : > { %v5342_v49 = vadd.f32 %v9661_v10, %v13395_v0  ;;  %v5562_v9 = vmax.f32 %v5492_v26, 0.0 }
 0xa57   : > { %v5495_v7 = vadd.f32 %v13336_v1, %v5342_v49  ;;  %v5635_v12 = vrot.slane %v5562_v9, 1  ;;  %v5631_v49 = vrot.slane %v5560_v43, 1 }
 0xa59   : > { %v5563_v17 = vmax.f32 %v5495_v7, 0.0  ;;  %v5634_v7 = vsel %vm2252_vm6, %v5631_v49, %v5633_v39  ;;  %v5632_v26 = vsel %vm2252_vm6, %v5629_v16, %v5631_v49 }
 0xa5b   : > { %v5637_v30 = vrot.slane %v5563_v17, 1 }
 0xa5d   : > { %v5638_v10 = vsel %vm2252_vm6, %v5635_v12, %v5637_v30 }
 0xa5e   : > { %v13606_v4 = vmax.f32 %v5562_v9, %v5638_v10  ;;  %v5700_v9 = vmax.f32 %v5559_v33, %v5632_v26 }
 0xa64   : > { %v9662_v25 = vpop.f32.mrf.mxu0 }
 0xa66   : > { %v9663_v36 = vpop.f32.mrf.mxu0 }
 0xa67   : > { %v9664_v56 = vadd.f32 %v9663_v36, %v9662_v25  ;;  %v5782_v36 = vrot.slane %v13606_v4, 1 }
 0xa68   : > { %v9665_v6 = vpop.f32.mrf.mxu0 }
 0xa69   : > { %v5347_v1 = vadd.f32 %v9664_v56, %v13395_v0  ;;  %v5630_v56 = vsel %vm2252_vm6, %v5627_v45, %v5629_v16 }
 0xa6a   : > { %v9666_v5 = vpop.f32.mrf.mxu0 }
 0xa6b   : > { %v5500_v61 = vadd.f32 %v13342_v42, %v5347_v1  ;;  %v9667_v55 = vadd.f32 %v9666_v5, %v9665_v6  ;;  %v5636_v42 = vsel %vm2252_vm6, %v5633_v39, %v5635_v12  ;;  %v5628_v1 = vsel %vm2252_vm6, %v13565_v46, %v5627_v45 }
 0xa6c   : > { %v5702_v25 = vmax.f32 %v5561_v14, %v5636_v42  ;;  %v5699_v14 = vmax.f32 %v5558_v8, %v5630_v56 }
 0xa6d   : > { %v5564_v60 = vmax.f32 %v5500_v61, 0.0  ;;  %v5350_v11 = vadd.f32 %v9667_v55, %v13395_v0 }
 0xa6e   : > { %v5780_v6 = vrot.slane %v5702_v25, 1  ;;  %v5774_v10 = vrot.slane %v5699_v14, 1 }
 0xa6f   : > { %v5639_v52 = vrot.slane %v5564_v60, 1  ;;  %v13601_v38 = vadd.f32 %v13348_v28, %v5350_v11 }
 0xa71   : > { %v5640_v40 = vsel %vm2252_vm6, %v5637_v30, %v5639_v52  ;;  %v5565_v37 = vmax.f32 %v13601_v38, 0.0  ;;  %v5783_v30 = vsel %vm2252_vm6, %v5780_v6, %v5782_v36 }
 0xa72   : > { %v13608_v47 = vmax.f32 %v5563_v17, %v5640_v40  ;;  %v5701_v17 = vmax.f32 %v5560_v43, %v5634_v7  ;;  %v5776_v43 = vrot.slane %v5700_v9, 1  ;;  %v5851_v33 = vmax.f32 %v5700_v9, %v5783_v30 }
 0xa73   : > { %v5641_v41 = vrot.slane %v5565_v37, 1 }
 0xa74   : > { %v5784_v28 = vrot.slane %v13608_v47, 1  ;;  %v5778_v35 = vrot.slane %v5701_v17, 1  ;;  %v5777_v40 = vsel %vm2252_vm6, %v5774_v10, %v5776_v43 }
 0xa75   : > { %v5642_v54 = vsel %vm2252_vm6, %v5639_v52, %v5641_v41 }
 0xa76   : > { %v13617_v24 = vmax.f32 %v5564_v60, %v5642_v54  ;;  %v5785_v27 = vsel %vm2252_vm6, %v5782_v36, %v5784_v28  ;;  %v5781_v12 = vsel %vm2252_vm6, %v5778_v35, %v5780_v6  ;;  %v5698_v60 = vmax.f32 %v5557_v62, %v5628_v1 }
 0xa77   : > { %v5852_v61 = vmax.f32 %v5701_v17, %v5785_v27  ;;  %v5779_v46 = vsel %vm2252_vm6, %v5776_v43, %v5778_v35  ;;  %v5850_v8 = vmax.f32 %v5699_v14, %v5781_v12  ;;  %v5848_v54 = vmax.f32 %v13570_v59, %v5777_v40 }
 0xa78   : > { %v5786_v63 = vrot.slane %v13617_v24, 1  ;;  %v5772_v42 = vrot.slane %v5698_v60, 1  ;;  %v5849_v7 = vmax.f32 %v5698_v60, %v5779_v46 }
 0xa79   : > { %v5879_v16 = vpack.c.bf16 %v5851_v33, %v5850_v8 }
 0xa7a   : > { %v5787_v5 = vsel %vm2252_vm6, %v5784_v28, %v5786_v63  ;;  %v5773_v36 = vsel %vm2252_vm6, %v5770_v32, %v5772_v42  ;;  %v5878_v6 = vpack.c.bf16 %v5849_v7, %v5848_v54 }
 0xa7b   : > { %v5853_v55 = vmax.f32 %v5702_v25, %v5787_v5  ;;  %v5775_v25 = vsel %vm2252_vm6, %v5772_v42, %v5774_v10 }
 0xa7c   : > { %v9668_v19 = vpop.f32.mrf.mxu0  ;;  %v5847_v27 = vmax.f32 %v13561_v20, %v5775_v25 }
 0xa7d   : > { %v5880_v11 = vpack.c.bf16 %v5853_v55, %v5852_v61 }
 0xa7e   : > { %v9669_v39 = vpop.f32.mrf.mxu0 }
 0xa7f   : > { %v9670_v52 = vadd.f32 %v9669_v39, %v9668_v19  ;;  %5937 = vmatpush1.bf16.msra.mxu0 %v5880_v11 }
 0xa80   : > { %v9671_v49 = vpop.f32.mrf.mxu0  ;;  %5938 = vmatprep.subr.bf16.mxu0 %v14843_v13 }
 0xa81   : > { %v5355_v62 = vadd.f32 %v9670_v52, %v13395_v0 }
 0xa82   : > { %v9672_v28 = vpop.f32.mrf.mxu0 }
 0xa83   : > { %v5508_v45 = vadd.f32 %v13355_v51, %v5355_v62  ;;  %v9673_v26 = vadd.f32 %v9672_v28, %v9671_v49  ;;  %5939 = vmatpush1.bf16.msra.mxu0 %v5879_v16  ;;  %v5846_v51 = vmax.f32 %v13542_v57, %v5773_v36 }
 0xa84   : > { %5940 = vmatprep.subr.bf16.mxu0 %v14843_v13 }
 0xa85   : > { %v5566_v17 = vmax.f32 %v5508_v45, 0.0  ;;  %v5358_v56 = vadd.f32 %v9673_v26, %v13395_v0  ;;  %v5877_v59 = vpack.c.bf16 %v5847_v27, %v5846_v51 }
 0xa87   : > { %v5643_v9 = vrot.slane %v5566_v17, 1  ;;  %v5511_v1 = vadd.f32 %v13362_v58, %v5358_v56  ;;  %5941 = vmatpush1.bf16.msra.mxu0 %v5878_v6 }
 0xa88   : > { %5942 = vmatprep.subr.bf16.mxu0 %v14843_v13 }
 0xa89   : > { %v5644_v35 = vsel %vm2252_vm6, %v5641_v41, %v5643_v9  ;;  %v5567_v5 = vmax.f32 %v5511_v1, 0.0 }
 0xa8a   : > { %v5706_v32 = vmax.f32 %v5565_v37, %v5644_v35 }
 0xa8b   : > { %v5645_v14 = vrot.slane %v5567_v5, 1  ;;  %5943 = vmatpush1.bf16.msra.mxu0 %v5877_v59 }
 0xa8c   : > { %5944 = vmatprep.subr.bf16.mxu0 %v14843_v13  ;;  %v5788_v20 = vrot.slane %v5706_v32, 1 }
 0xa8d   : > { %v5646_v30 = vsel %vm2252_vm6, %v5643_v9, %v5645_v14 }
 0xa8e   : > { %v13654_v58 = vmax.f32 %v5566_v17, %v5646_v30  ;;  %v5789_v57 = vsel %vm2252_vm6, %v5786_v63, %v5788_v20  ;;  %v10984_v30 = vld [vmem:[%s14858_s9] ss:$0 sm:$0xff] }
 0xa8f   : > { %5945 = vmatpush1.bf16.msra.mxu0 %v13578_v29  ;;  %v5854_v41 = vmax.f32 %v13606_v4, %v5789_v57 }
 0xa90   : > { %5946 = vmatprep.subr.bf16.mxu0 %v14843_v13  ;;  %v5790_v38 = vrot.slane %v13654_v58, 1 }
 0xa92   : > { %v5791_v37 = vsel %vm2252_vm6, %v5788_v20, %v5790_v38 }
 0xa93   : > { %5947 = vmatpush1.bf16.msra.mxu0 %v13554_v22  ;;  %v5855_v61 = vmax.f32 %v13608_v47, %v5791_v37 }
 0xa94   : > { %v9674_v55 = vpop.f32.mrf.mxu0  ;;  %5948 = vmatprep.subr.bf16.mxu0 %v14843_v13 }
 0xa95   : > { %v13665_v19 = vpack.c.bf16 %v5855_v61, %v5854_v41 }
 0xa96   : > { %v9675_v63 = vpop.f32.mrf.mxu0 }
 0xa97   : > { %v9676_v43 = vadd.f32 %v9675_v63, %v9674_v55  ;;  %5949 = vmatpush1.bf16.msra.mxu0 %v13516_v31 }
 0xa98   : > { %v9677_v29 = vpop.f32.mrf.mxu0  ;;  %5950 = vmatprep.subr.bf16.mxu0 %v14843_v13 }
 0xa99   : > { %v5363_v4 = vadd.f32 %v9676_v43, %v13395_v0 }
 0xa9a   : > { %v9678_v12 = vpop.f32.mrf.mxu0 }
 0xa9b   : > { %v5516_v60 = vadd.f32 %v13369_v44, %v5363_v4  ;;  %v9679_v22 = vadd.f32 %v9678_v12, %v9677_v29  ;;  %5951 = vmatpush1.bf16.msra.mxu0 %v13476_v18 }
 0xa9c   : > { %5956 = vmatprep.subr.bf16.mxu0 %v14843_v13 }
 0xa9d   : > { %v5568_v47 = vmax.f32 %v5516_v60, 0.0  ;;  %v5366_v11 = vadd.f32 %v9679_v22, %v13395_v0 }
 0xa9f   : > { %v5647_v33 = vrot.slane %v5568_v47, 1  ;;  %v13675_v39 = vadd.f32 %v13375_v34, %v5366_v11 }
 0xaa1   : > { %v5648_v31 = vsel %vm2252_vm6, %v5645_v14, %v5647_v33  ;;  %v5569_v10 = vmax.f32 %v13675_v39, 0.0 }
 0xaa2   : > { %v13679_v46 = vmax.f32 %v5567_v5, %v5648_v31 }
 0xaa3   : > { %v13683_v44 = vrot.slane %v5569_v10, 1 }
 0xaa4   : > { %v5792_v18 = vrot.slane %v13679_v46, 1 }
 0xaa5   : > { %v5650_v52 = vsel %vm2252_vm6, %v5647_v33, %v13683_v44 }
 0xaa6   : > { %v13688_v8 = vmax.f32 %v5568_v47, %v5650_v52  ;;  %v5793_v49 = vsel %vm2252_vm6, %v5790_v38, %v5792_v18 }
 0xaa7   : > { %v5856_v40 = vmax.f32 %v13617_v24, %v5793_v49 }
 0xaa8   : > { %v5794_v34 = vrot.slane %v13688_v8, 1 }
 0xaaa   : > { %v5795_v42 = vsel %vm2252_vm6, %v5792_v18, %v5794_v34 }
 0xaab   : > { %v5857_v53 = vmax.f32 %v5706_v32, %v5795_v42 }
 0xaad   : > { %v13696_v62 = vpack.c.bf16 %v5857_v53, %v5856_v40 }
 0xab8   : > { %v9680_v16 = vpop.f32.mrf.mxu0 }
 0xaba   : > { %v9681_v7 = vpop.f32.mrf.mxu0 }
 0xabb   : > { %v9682_v51 = vadd.f32 %v9681_v7, %v9680_v16 }
 0xabc   : > { %v9683_v28 = vpop.f32.mrf.mxu0 }
 0xabd   : > { %v5371_v57 = vadd.f32 %v10984_v30, %v9682_v51 }
 0xabe   : > { %v9684_v25 = vpop.f32.mrf.mxu0 }
 0xabf   : > { %v9685_v27 = vadd.f32 %v9684_v25, %v9683_v28 }
 0xac1   : > { %v5374_v59 = vadd.f32 %v9685_v27, %v13395_v0 }
 0xac3   : > { %v5527_v61 = vadd.f32 %v13388_v48, %v5374_v59 }
 0xac4   : > { %v9686_v45 = vpop.f32.mrf.mxu0 }
 0xac5   : > { %v5571_v12 = vmax.f32 %v5527_v61, 0.0 }
 0xac6   : > { %v9687_v26 = vpop.f32.mrf.mxu0 }
 0xac7   : > { %v9688_v56 = vadd.f32 %v9687_v26, %v9686_v45  ;;  %v5653_v33 = vrot.slane %v5571_v12, 1 }
 0xac8   : > { %v9689_v54 = vpop.f32.mrf.mxu0 }
 0xac9   : > { %v5379_v24 = vadd.f32 %v9688_v56, %v13395_v0 }
 0xaca   : > { %v9690_v36 = vpop.f32.mrf.mxu0 }
 0xacb   : > { %v9691_v17 = vadd.f32 %v9690_v36, %v9689_v54  ;;  %v5532_v41 = vadd.f32 %v13416_v50, %v5379_v24  ;;  %v14860_v24 = vld [vmem:[#allocation13_spill] sm:$0xff] }
 0xacd   : > { %v5382_v9 = vadd.f32 %v9691_v17, %v13395_v0  ;;  %v5572_v29 = vmax.f32 %v5532_v41, 0.0 }
 0xacf   : > { %v9692_v6 = vpop.f32.mrf.mxu0  ;;  %v5535_v32 = vadd.f32 %v13420_v3, %v5382_v9  ;;  %v5524_v3 = vadd.f32 %v13382_v21, %v5371_v57  ;;  %v5655_v11 = vrot.slane %v5572_v29, 1 }
 0xad1   : > { %v9693_v1 = vpop.f32.mrf.mxu0  ;;  %v5573_v55 = vmax.f32 %v5535_v32, 0.0  ;;  %v5570_v47 = vmax.f32 %v5524_v3, 0.0  ;;  %v5656_v42 = vsel %vm2252_vm6, %v5653_v33, %v5655_v11 }
 0xad2   : > { %v9694_v35 = vadd.f32 %v9693_v1, %v9692_v6  ;;  %v5712_v45 = vmax.f32 %v5571_v12, %v5656_v42 }
 0xad3   : > { %v9695_v5 = vpop.f32.mrf.mxu0  ;;  %v5657_v60 = vrot.slane %v5573_v55, 1  ;;  %v5651_v49 = vrot.slane %v5570_v47, 1 }
 0xad4   : > { %v5387_v14 = vadd.f32 %v9694_v35, %v13395_v0  ;;  %v5800_v9 = vrot.slane %v5712_v45, 1 }
 0xad5   : > { %v9696_v20 = vpop.f32.mrf.mxu0  ;;  %v5658_v48 = vsel %vm2252_vm6, %v5655_v11, %v5657_v60  ;;  %v5654_v16 = vsel %vm2252_vm6, %v5651_v49, %v5653_v33  ;;  %v5714_v7 = vmax.f32 %v5573_v55, %v5657_v60  ;;  %v5652_v26 = vsel %vm2252_vm6, %v13683_v44, %v5651_v49 }
 0xad6   : > { %v5540_v38 = vadd.f32 %v13580_v23, %v5387_v14  ;;  %v9697_v37 = vadd.f32 %v9696_v20, %v9695_v5  ;;  %v5713_v53 = vmax.f32 %v5572_v29, %v5658_v48  ;;  %v5711_v17 = vmax.f32 %v5570_v47, %v5654_v16  ;;  %v10579_v29 = vld [vmem:[%s14759_s11 + $0x10] sm:$0xff]  }
 0xad7   : > { %v5710_v51 = vmax.f32 %v5569_v10, %v5652_v26 }
 0xad8   : > { %v5574_v63 = vmax.f32 %v5540_v38, 0.0  ;;  %v5390_v43 = vadd.f32 %v10984_v30, %v9697_v37  ;;  %v5802_v56 = vrot.slane %v5713_v53, 1  ;;  %v5798_v59 = vrot.slane %v5711_v17, 1 }
 0xad9   : > { %v5796_v14 = vrot.slane %v5710_v51, 1 }
 0xada   : > { %v5717_v0 = vrot.slane %v5574_v63, 1  ;;  %v5543_v4 = vadd.f32 %v13582_v15, %v5390_v43  ;;  %v5803_v32 = vsel %vm2252_vm6, %v5800_v9, %v5802_v56  ;;  %v5801_v20 = vsel %vm2252_vm6, %v5798_v59, %v5800_v9 }
 0xadb   : > { %v5861_v57 = vmax.f32 %v5710_v51, %v5803_v32  ;;  %v5799_v41 = vsel %vm2252_vm6, %v5796_v14, %v5798_v59  ;;  %v5860_v39 = vmax.f32 %v13688_v8, %v5801_v20  ;;  %v5797_v10 = vsel %vm2252_vm6, %v5794_v34, %v5796_v14  ;;  %v10578_v8 = vld [vmem:[%s14759_s11 + $0x18] sm:$0xff]  }
 0xadc   : > { %v5575_v22 = vmax.f32 %v5543_v4, 0.0  ;;  %v5718_v50 = vsel %vm2252_vm6, %v5657_v60, %v5717_v0  ;;  %v5859_v37 = vmax.f32 %v13679_v46, %v5799_v41  ;;  %v5858_v61 = vmax.f32 %v13654_v58, %v5797_v10  ;;  %v10567_v46 = vld [vmem:[%s14859_s10] ss:$8 sps:$4 sm:$0xff]   ;;  %v10570_v58 = vld [vmem:[%s14859_s10 + $0x14] ss:$8 sps:$4 sm:$0xff]  }
 0xadd   : > { %v5724_v52 = vmax.f32 %v5573_v55, %v5718_v50  ;;  %v5884_v38 = vpack.c.bf16 %v5861_v57, %v5860_v39  ;;  %v10572_v34 = vld [vmem:[%s14859_s10 + $0x10] ss:$8 sps:$4 sm:$0xff]   ;;  %v10581_v4 = vld [vmem:[%s14759_s11] sm:$0xff]  }
 0xade   : > { %v5719_v23 = vrot.slane %v5575_v22, 1  ;;  %v5883_v55 = vpack.c.bf16 %v5859_v37, %v5858_v61 }
 0xadf   : > { %v5804_v28 = vrot.slane %v5724_v52, 1 }
 0xae0   : > { %v5720_v31 = vsel %vm2252_vm6, %v5717_v0, %v5719_v23  ;;  %v5726_v18 = vmax.f32 %v5575_v22, %v5719_v23  ;;  %v10580_v0 = vld [vmem:[%s14759_s11 + $0x8] sm:$0xff]  }
 0xae1   : > { %v5725_v21 = vmax.f32 %v5574_v63, %v5720_v31  ;;  %v5805_v1 = vsel %vm2252_vm6, %v5802_v56, %v5804_v28  ;;  %v10575_v63 = vld [vmem:[%s14859_s10 + $0x20] ss:$8 sps:$4 sm:$0xff]  }
 0xae2   : > { %v5808_v15 = vrot.slane %v5726_v18, 1  ;;  %v5862_v44 = vmax.f32 %v5711_v17, %v5805_v1 }
 0xae3   : > { %v5806_v40 = vrot.slane %v5725_v21, 1 }
 0xae4   : > { %v5865_v54 = vmax.f32 %v5714_v7, %v5808_v15 }
 0xae5   : > { %v5809_v25 = vsel %vm2252_vm6, %v5806_v40, %v5808_v15  ;;  %v5807_v6 = vsel %vm2252_vm6, %v5804_v28, %v5806_v40 }
 0xae6   : > { %v5864_v36 = vmax.f32 %v5713_v53, %v5809_v25  ;;  %v5863_v5 = vmax.f32 %v5712_v45, %v5807_v6  ;;  %v9246_v25 = vld [vmem:[%s14760_s12] ss:$0 sm:$0xff] }
 0xae8   : > { %v5886_v27 = vpack.c.bf16 %v5865_v54, %v5864_v36  ;;  %v5885_v30 = vpack.c.bf16 %v5863_v5, %v5862_v44 }
 0xaea   : > { %v5934_v35 = vand.u32 %v5886_v27, %v14860_v24 }
 0xaec   : > { %5957 = vmatpush2.bf16.msra.mxu0 %v5934_v35 }
 0xaed   : > { %5958 = vmatprep.subr.bf16.mxu0 %v14843_v13 }
 0xaf0   : > { %5959 = vmatpush2.bf16.msra.mxu0 %v5885_v30 }
 0xaf1   : > { %5960 = vmatprep.subr.bf16.mxu0 %v14843_v13 }
 0xaf4   : > { %5961 = vmatpush2.bf16.msra.mxu0 %v5884_v38 }
 0xaf5   : > { %5962 = vmatprep.subr.bf16.mxu0 %v14843_v13 }
 0xaf8   : > { %5963 = vmatpush2.bf16.msra.mxu0 %v5883_v55 }
 0xaf9   : > { %5964 = vmatprep.subr.bf16.mxu0 %v14843_v13 }
 0xafc   : > { %5965 = vmatpush2.bf16.msra.mxu0 %v13696_v62  ;;  %v10573_v62 = vld [vmem:[%s14859_s10 + $0x24] ss:$8 sps:$4 sm:$0xff]  }
 0xafd   : > { %5966 = vmatprep.subr.bf16.mxu0 %v14843_v13 }
 0xb00   : > { %5967 = vmatpush2.bf16.msra.mxu0 %v13665_v19  ;;  %v5872_v19 = vld [vmem:[%s14859_s10 + $0x30] sm:$0x11]  ;;  %s10985_s10 = scalar_lea.vmem %s8972_s26, 16 }
 0xb01   : > { %10349 = vmatprep.subr.bf16.mxu0 %v10578_v8  ;;  %v9241_v43 = vcombine.high %v5872_v19, %v5872_v19  ;;  %v9240_v3 = vcombine.low %v5872_v19, %v5872_v19  ;;  %p10986_p11 = scmp.ne.s32.totalorder %s8972_s26, %s10985_s10  ;;  %p10993_p1 = scmp.lt.s32.totalorder %s10991_s0, %s10985_s10 }
 0xb03   : > { %5969 = vmatmul.mubr.bf16.vlgmr.msra.gmra.mxu0 %v10567_v46  ;;  %p10987_p12 = pnand %p10986_p11, %p11215_p5  ;;  %p10994_p2 = por %p10993_p1, %p10992_p0 }
 0xb04   : > { %9243 = vmatprep.mubr.msk.bf16.mxu0 %vm5920_vm13, %v10570_v58  ;;  %10350 = vmatpush3.bf16.msra.mxu0 %v10578_v8 }
 0xb05   : > { %10351 = vmatprep.subr.bf16.mxu0 %v10579_v29  ;;  %p10988_p13 = pneg %p10987_p12 }
 0xb07   : > { %p10995_p3 = pnand %p10994_p2, %p10988_p13 }
 0xb08   : > { %10352 = vmatpush3.bf16.msra.mxu0 %v10579_v29 }
 0xb09   : > { %10353 = vmatprep.subr.bf16.mxu0 %v10580_v0 }
 0xb0b   : > { %5977 = vmatmul.mubr.bf16.gmra.mxu0 %v10572_v34 }
 0xb0c   : > { %9244 = vmatprep.mubr.msk.bf16.mxu0 %vm5920_vm13, %v10573_v62  ;;  %10354 = vmatpush3.bf16.msra.mxu0 %v10580_v0 }
 0xb0d   : > { %10355 = vmatprep.subr.bf16.mxu0 %v10581_v4 }
 0xb10   : > { %10356 = vmatpush3.bf16.msra.mxu0 %v10581_v4 }
 0xb11   : > { %10365 = vmatprep.subr.bf16.mxu0 %v14832_v2 }
 0xb13   : > { %5985 = vmatmul.mubr.bf16.gmra.mxu0 %v10575_v63 }
 0xb14   : > { %9245 = vmatprep.mubr.msk.bf16.mxu0 %vm5920_vm13, %v9241_v43  ;;  %vm6639_vm13 = vcmask 518144  }
 0xb1b   : > { %5993 = vmatmul.mubr.bf16.gmra.mxu0 %v9240_v3 }
 0xbc3   : > { %v13794_v12 = vpop.f32.mrf.mxu0 }
 0xbc5   : > { %v5972_v60 = vpop.f32.mrf.mxu0 }
 0xbc7   : > { %v13796_v22 = vpop.f32.mrf.mxu0 }
 0xbc8   : > { %v6000_v47 = vpack.c.bf16 %v13796_v22, %v13794_v12 }
 0xbc9   : > { %v5975_v11 = vpop.f32.mrf.mxu0 }
 0xbca   : > { %10357 = vmatprep.mubr.msk.bf16.mxu0 %vm6043_vm14, %v6000_v47 }
 0xbcb   : > { %v13801_v50 = vpop.f32.mrf.mxu0 }
 0xbcd   : > { %v5980_v23 = vpop.f32.mrf.mxu0 }
 0xbcf   : > { %v13803_v33 = vpop.f32.mrf.mxu0 }
 0xbd0   : > { %v6001_v48 = vpack.c.bf16 %v13803_v33, %v13801_v50 }
 0xbd1   : > { %v5983_v31 = vpop.f32.mrf.mxu0 }
 0xbd2   : > { %10358 = vmatmul.mubr.msk.bf16.vlgmr.msra.gmra.mxu0 %vm6043_vm14, %v6001_v48 }
 0xbd3   : > { %v13808_v18 = vpop.f32.mrf.mxu0 }
 0xbd5   : > { %v5988_v52 = vpop.f32.mrf.mxu0 }
 0xbd7   : > { %v13810_v21 = vpop.f32.mrf.mxu0 }
 0xbd8   : > { %v6002_v49 = vpack.c.bf16 %v13810_v21, %v13808_v18 }
 0xbd9   : > { %v5991_v42 = vpop.f32.mrf.mxu0 }
 0xbda   : > { %10361 = vmatprep.mubr.msk.bf16.mxu0 %vm6043_vm14, %v6002_v49 }
 0xbdb   : > { %v13815_v15 = vpop.f32.mrf.mxu0 }
 0xbdc   : > { %v6003_v40 = vpack.c.bf16 %v13815_v15, %v13815_v15 }
 0xbdd   : > { %v5996_v53 = vpop.f32.mrf.mxu0 }
 0xbde   : > { %10362 = vmatmul.mubr.msk.bf16.gmra.mxu0 %vm6043_vm14, %v6003_v40 }
 0xbdf   : > { %v5997_v16 = vpop.f32.mrf.mxu0  ;;  %10371 = vmatprep.mubr.msk.bf16.mxu0 %vm11049_vm2, %v14832_v2 }
 0xbe1   : > { %v5998_v7 = vpop.f32.mrf.mxu0 }
 0xc92   : > { %v10359_v28 = vpop.f32.mrf.mxu0 }
 0xc93   : > { %v6099_v54 = vadd.f32 %v10359_v28, %v9246_v25 }
 0xc94   : > { %v6090_v45 = vpop.f32.mrf.mxu0 }
 0xc95   : > { %v6091_v56 = vadd.f32 %v9246_v25, %v6090_v45  ;;  %v6129_v41 = vrot.slane %v6099_v54, 1 }
 0xc96   : > { %v10360_v26 = vpop.f32.mrf.mxu0 }
 0xc97   : > { %v6102_v36 = vadd.f32 %v10360_v26, %v9246_v25  ;;  %v6126_v11 = vrot.slane %v6091_v56, 1 }
 0xc98   : > { %v6093_v17 = vpop.f32.mrf.mxu0 }
 0xc99   : > { %v6244_v6 = vpack.c.bf16 %v6102_v36, %v6099_v54  ;;  %v6094_v27 = vadd.f32 %v9246_v25, %v6093_v17  ;;  %v6131_v14 = vrot.slane %v6102_v36, 1 }
 0xc9b   : > { %v6243_v9 = vpack.c.bf16 %v6094_v27, %v6091_v56  ;;  %6254 = vrot.lane.b32.xlu0 %v6244_v6, %s14851_s24  ;;  %v6127_v30 = vrot.slane %v6094_v27, 1  ;;  %v6132_v61 = vsel %vm2252_vm6, %v6129_v41, %v6131_v14 }
 0xc9c   : > { %v6145_v19 = vmax.f32 %v6099_v54, %v6132_v61 }
 0xc9d   : > { %6252 = vrot.lane.b32.xlu1 %v6243_v9, %s14851_s24  ;;  %v6130_v55 = vsel %vm2252_vm6, %v6127_v30, %v6129_v41  ;;  %v6154_v63 = vmax.f32 %v6091_v56, %v6127_v30  ;;  %v6128_v40 = vsel %vm2252_vm6, %v6126_v11, %v6127_v30 }
 0xc9e   : > { %v10363_v1 = vpop.f32.mrf.mxu0  ;;  %v6144_v43 = vmax.f32 %v6094_v27, %v6130_v55  ;;  %v6165_v52 = vrot.slane %v6145_v19, 7  ;;  %v6143_v45 = vmax.f32 %v6091_v56, %v6128_v40  ;;  %v10582_v27 = vld [vmem:[%s14763_s15] sm:$0x1f]  }
 0xc9f   : > { %v6115_v51 = vadd.f32 %v10363_v1, %v9246_v25  ;;  %v6162_v48 = vrot.slane %v6154_v63, 7 }
 0xca0   : > { %v6106_v35 = vpop.f32.mrf.mxu0  ;;  %v6163_v31 = vrot.slane %v6144_v43, 7 }
 0xca1   : > { %v6246_v5 = vpack.c.bf16 %v6115_v51, %v6115_v51  ;;  %v6107_v59 = vadd.f32 %v9246_v25, %v6106_v35  ;;  %v6150_v39 = vrot.slane %v6115_v51, 1 }
 0xca2   : > { %v10364_v32 = vpop.f32.mrf.mxu0  ;;  %v6166_v28 = vsel %vm3197_vm11, %v6163_v31, %v6165_v52 }
 0xca3   : > { %v6133_v44 = vrot.slane %v6107_v59, 1  ;;  %6258 = vrot.lane.b32.xlu0 %v6246_v5, %s14851_s24  ;;  %v6180_v54 = vmax.f32 %v6144_v43, %v6166_v28 }
 0xca4   : > { %v6109_v20 = vpop.f32.mrf.mxu0 }
 0xca5   : > { %v6110_v57 = vadd.f32 %v9246_v25, %v6109_v20  ;;  %v6134_v10 = vsel %vm2252_vm6, %v6131_v14, %v6133_v44  ;;  %v6164_v25 = vsel %vm3197_vm11, %v6162_v48, %v6163_v31 }
 0xca6   : > { %v6146_v58 = vmax.f32 %v6102_v36, %v6134_v10  ;;  %v6179_v17 = vmax.f32 %v6143_v45, %v6164_v25 }
 0xca7   : > { %v6135_v38 = vrot.slane %v6110_v57, 1  ;;  %v6245_v37 = vpack.c.bf16 %v6110_v57, %v6107_v59 }
 0xca8   : > { %v6167_v4 = vrot.slane %v6146_v58, 7  ;;  %v6187_v6 = vpack.c.bf16 %v6180_v54, %v6179_v17 }
 0xca9   : > { %v6136_v8 = vsel %vm2252_vm6, %v6133_v44, %v6135_v38  ;;  %v6151_v46 = vsel %vm2252_vm6, %v6135_v38, %v6150_v39  ;;  %6256 = vrot.lane.b32.xlu1 %v6245_v37, %s14851_s24  ;;  %v6148_v3 = vmax.f32 %v6110_v57, %v6135_v38 }
 0xcaa   : > { %v6155_v34 = vmax.f32 %v6110_v57, %v6151_v46  ;;  %v6147_v62 = vmax.f32 %v6107_v59, %v6136_v8  ;;  %v6168_v53 = vsel %vm3197_vm11, %v6165_v52, %v6167_v4 }
 0xcab   : > { %v6181_v26 = vmax.f32 %v6145_v19, %v6168_v53 }
 0xcac   : > { %v6171_v29 = vrot.slane %v6155_v34, 7  ;;  %v6169_v0 = vrot.slane %v6147_v62, 7 }
 0xcae   : > { %v6184_v60 = vmax.f32 %v6148_v3, %v6171_v29  ;;  %v6172_v47 = vsel %vm3197_vm11, %v6169_v0, %v6171_v29  ;;  %v6170_v49 = vsel %vm3197_vm11, %v6167_v4, %v6169_v0  ;;  %vm6357_vm11 = vcmask 65536  }
 0xcaf   : > { %v6183_v23 = vmax.f32 %v6147_v62, %v6172_v47  ;;  %v6182_v7 = vmax.f32 %v6146_v58, %v6170_v49 }
 0xcb1   : > { %v6189_v42 = vpack.c.bf16 %v6184_v60, %v6183_v23  ;;  %v6188_v36 = vpack.c.bf16 %v6182_v7, %v6181_v26 }
 0xcb3   : > { %v6200_v16 = vand.u32 %v6189_v42, %v14860_v24 }
 0xcb5   : > { %10366 = vmatpush3.bf16.msra.mxu0 %v6200_v16 }
 0xcb6   : > { %10367 = vmatprep.subr.bf16.mxu0 %v14832_v2 }
 0xcb9   : > { %10368 = vmatpush3.bf16.msra.mxu0 %v6188_v36 }
 0xcba   : > { %10369 = vmatprep.subr.bf16.mxu0 %v14832_v2 }
 0xcbd   : > { %10370 = vmatpush3.bf16.msra.mxu0 %v6187_v6 }
 0xcc0   : > { %10372 = vmatmul.mubr.msk.bf16.vlgmr.msra.gmra.mxu0 %vm6195_vm1, %v10582_v27  ;;  %vm6641_vm1 = vcmask 523267  }
 0xd0d   : > { %v6255_v32 = vpop.permute.xlu0 %6254 }
 0xd0f   : > { %v6253_v9 = vpop.permute.xlu1 %6252 }
 0xd10   : > { %10377 = vmatprep.mubr.msk.bf16.mxu0 %vm2053_vm4, %v6253_v9 }
 0xd15   : > { %v6259_v14 = vpop.permute.xlu0 %6258 }
 0xd1b   : > { %v6257_v44 = vpop.permute.xlu1 %6256 }
 0xd80   : > { %v6236_v56 = vpop.f32.mrf.mxu0 }
 0xd82   : > { %v10373_v1 = vpop.f32.mrf.mxu0 }
 0xd84   : > { %v6239_v51 = vpop.f32.mrf.mxu0 }
 0xd85   : > { %v13847_v35 = vpack.c.bf16 %v6239_v51, %v6236_v56 }
 0xd86   : > { %v10374_v5 = vpop.f32.mrf.mxu0 }
 0xd87   : > { %10435 = vmatprep.subr.msk.bf16.mxu0 %vm2053_vm4, %v13847_v35  ;;  %v6273_v59 = vsel %vm2053_vm4, %v13847_v35, 0 }
 0xd88   : > { %10376 = vmatpush3.bf16.xpose.msra.mxu0 %v6273_v59 }
 0xd8f   : > { %10378 = vmatmul.mubr.msk.bf16.vlgmr.msra.gmra.mxu0 %vm2053_vm4, %v6255_v32 }
 0xd90   : > { %10381 = vmatprep.mubr.msk.bf16.mxu0 %vm2053_vm4, %v6257_v44 }
 0xd97   : > { %10382 = vmatmul.mubr.msk.bf16.gmra.mxu0 %vm2053_vm4, %v6259_v14 }
 0xe4f   : > { %v10379_v20 = vpop.f32.mrf.mxu0 }
 0xe50   : > { %v6345_v55 = vsel %vm1066_vm3, %v10379_v20, -inf }
 0xe51   : > { %v6309_v30 = vpop.f32.mrf.mxu0 }
 0xe52   : > { %v6339_v57 = vsel %vm1066_vm3, %v6309_v30, -inf }
 0xe53   : > { %6340 = vmax.xlane.f32.xlu1 %v6339_v57  ;;  %v10380_v41 = vpop.f32.mrf.mxu0 }
 0xe54   : > { %v6348_v10 = vsel %vm1066_vm3, %v10380_v41, -inf }
 0xe55   : > { %v6312_v39 = vpop.f32.mrf.mxu0 }
 0xe56   : > { %v6342_v38 = vsel %vm1066_vm3, %v6312_v39, -inf }
 0xe57   : > { %6349 = vmax.xlane.f32.xlu1 %v6348_v10  ;;  %6343 = vmax.xlane.f32.xlu0 %v6342_v38  ;;  %v10383_v37 = vpop.f32.mrf.mxu0 }
 0xe58   : > { %v6358_v62 = vsel %vm6357_vm11, %v10383_v37, -inf }
 0xe59   : > { %v6325_v61 = vpop.f32.mrf.mxu0 }
 0xe5a   : > { %v6351_v58 = vsel %vm1066_vm3, %v6325_v61, -inf }
 0xe5b   : > { %6346 = vmax.xlane.f32.xlu0 %v6345_v55  ;;  %v10384_v8 = vpop.f32.mrf.mxu0 }
 0xe5d   : > { %v6328_v46 = vpop.f32.mrf.mxu0 }
 0xe5e   : > { %v6354_v34 = vsel %vm1066_vm3, %v6328_v46, -inf }
 0xe5f   : > { %6352 = vmax.xlane.f32.xlu0 %v6351_v58  ;;  %6355 = vmax.xlane.f32.xlu1 %v6354_v34 }
 0xe63   : > { %6359 = vmax.xlane.f32.xlu0 %v6358_v62 }
 0xedc   : > { %v6341_v19 = vpop.xlane.xlu1 %6340 }
 0xedd   : > { %v6361_v63 = vsub.f32 %v6309_v30, %v6341_v19 }
 0xedf   : > { %v6368_v43 = vmul.f32 1.442695, %v6361_v63 }
 0xee0   : > { %v6350_v3 = vpop.xlane.xlu1 %6349  ;;  %v6344_v29 = vpop.xlane.xlu0 %6343 }
 0xee1   : > { %10954 = vpow2.f32 %v6368_v43  ;;  %v6364_v0 = vsub.f32 %v10380_v41, %v6350_v3  ;;  %v6362_v4 = vsub.f32 %v6312_v39, %v6344_v29 }
 0xee3   : > { %v6374_v60 = vmul.f32 1.442695, %v6364_v0  ;;  %v6370_v47 = vmul.f32 1.442695, %v6362_v4 }
 0xee4   : > { %v6347_v11 = vpop.xlane.xlu0 %6346 }
 0xee5   : > { %10956 = vpow2.f32 %v6374_v60  ;;  %v6363_v23 = vsub.f32 %v10379_v20, %v6347_v11  ;;  %v10583_v60 = vld [vmem:[%s14761_s13 + $0x8] sm:$0xff]  }
 0xee6   : > { %10958 = vpow2.f32 %v6370_v47  ;;  %10395 = vmatprep.subr.bf16.mxu0 %v10583_v60  ;;  %v10584_v47 = vld [vmem:[%s14761_s13] sm:$0xff]  }
 0xee7   : > { %v6372_v48 = vmul.f32 1.442695, %v6363_v23  ;;  %10396 = vmatpush3.bf16.msra.mxu0 %v10583_v60 }
 0xee8   : > { %v6353_v31 = vpop.xlane.xlu0 %6352  ;;  %v6356_v52 = vpop.xlane.xlu1 %6355  ;;  %10397 = vmatprep.subr.bf16.mxu0 %v10584_v47 }
 0xee9   : > { %10960 = vpow2.f32 %v6372_v48  ;;  %v6365_v49 = vsub.f32 %v6325_v61, %v6353_v31  ;;  %v6366_v42 = vsub.f32 %v6328_v46, %v6356_v52 }
 0xeeb   : > { %v6376_v40 = vmul.f32 1.442695, %v6365_v49  ;;  %v6378_v53 = vmul.f32 1.442695, %v6366_v42  ;;  %10398 = vmatpush3.bf16.msra.mxu0 %v10584_v47 }
 0xeec   : > { %v6360_v16 = vpop.xlane.xlu0 %6359 }
 0xeed   : > { %10962 = vpow2.f32 %v6376_v40  ;;  %v6367_v7 = vsub.f32 %v10383_v37, %v6360_v16 }
 0xeee   : > { %v10955_v28 = vpop.eup %10954  ;;  %10964 = vpow2.f32 %v6378_v53 }
 0xeef   : > { %v6380_v25 = vmul.f32 1.442695, %v6367_v7  ;;  %v6382_v45 = vsel %vm1066_vm3, %v10955_v28, 0.0 }
 0xef0   : > { %6383 = vadd.xlane.f32.xlu1 %v6382_v45  ;;  %v10585_v45 = vld [vmem:[%s14764_s16 + $0x78] sm:$0xff]  }
 0xef1   : > { %10966 = vpow2.f32 %v6380_v25  ;;  %v6663_v25 = vld [vmem:[#allocation4 + $0x1] sm:$0xff] }
 0xef2   : > { %v10957_v26 = vpop.eup %10956 }
 0xef3   : > { %v6391_v54 = vsel %vm1066_vm3, %v10957_v26, 0.0  ;;  %v10959_v36 = vpop.eup %10958 }
 0xef4   : > { %6392 = vadd.xlane.f32.xlu0 %v6391_v54  ;;  %v6385_v6 = vsel %vm1066_vm3, %v10959_v36, 0.0  ;;  %v10586_v54 = vld [vmem:[%s14764_s16 + $0x38] sm:$0xff]  }
 0xef6   : > { %v10961_v17 = vpop.eup %10960 }
 0xef7   : > { %v6388_v27 = vsel %vm1066_vm3, %v10961_v17, 0.0 }
 0xef8   : > { %6386 = vadd.xlane.f32.xlu0 %v6385_v6  ;;  %6389 = vadd.xlane.f32.xlu1 %v6388_v27 }
 0xefa   : > { %v10963_v9 = vpop.eup %10962 }
 0xefb   : > { %v10965_v56 = vpop.eup %10964  ;;  %v6394_v1 = vsel %vm1066_vm3, %v10963_v9, 0.0 }
 0xefc   : > { %6395 = vadd.xlane.f32.xlu1 %v6394_v1  ;;  %v6397_v51 = vsel %vm1066_vm3, %v10965_v56, 0.0 }
 0xefd   : > { %6398 = vadd.xlane.f32.xlu0 %v6397_v51 }
 0xefe   : > { %v10967_v5 = vpop.eup %10966 }
 0xeff   : > { %v6400_v59 = vsel %vm6357_vm11, %v10967_v5, 0.0  ;;  %vm6643_vm11 = vcmask 517120  }
 0xf00   : > { %6401 = vadd.xlane.f32.xlu1 %v6400_v59 }
 0xf13   : > { %6422 = vrot.lane.b32.xlu0 %v13847_v35, %s14850_s2  ;;  %s8959_s2 = scalar_lea.sflag [#allocation8], %s701_s29 }
 0xf17   : > { %6677 = vrot.lane.b32.xlu0 %v6663_v25, %s14851_s24  ;;  %v10601_v25 = vld [vmem:[%s14764_s16 + $0xa8] sm:$0xff]  }
 0xf79   : > { %v6384_v32 = vpop.xlane.xlu1 %6383 }
 0xf7a   : > { %10968 = vrcp.f32 %v6384_v32 }
 0xf7d   : > { %v6393_v44 = vpop.xlane.xlu0 %6392 }
 0xf7e   : > { %10970 = vrcp.f32 %v6393_v44  ;;  %v6706_v44 = vld [vmem:[#allocation4 + $0x2] sm:$0xff] }
 0xf7f   : > { %6713 = vst.msk [vmem:[#allocation5 + $0x8] sm:$0xff] %vm6043_vm14, %v6706_v44 }
 0xf81   : > { %v6387_v14 = vpop.xlane.xlu0 %6386  ;;  %v6390_v20 = vpop.xlane.xlu1 %6389 }
 0xf82   : > { %10972 = vrcp.f32 %v6387_v14  ;;  %v10590_v14 = vld [vmem:[%s14764_s16 + $0x28] sm:$0xff]  }
 0xf83   : > { %10974 = vrcp.f32 %v6390_v20  ;;  %v10591_v20 = vld [vmem:[%s14764_s16 + $0xf8] sm:$0xff]  }
 0xf84   : > { %9783 = vmatprep.subr.bf16.mxu0 %v10591_v20  ;;  %v10609_v20 = vld [vmem:[%s14764_s16 + $0x98] sm:$0xff]  }
 0xf85   : > { %v6396_v30 = vpop.xlane.xlu1 %6395 }
 0xf86   : > { %v6399_v57 = vpop.xlane.xlu0 %6398  ;;  %10976 = vrcp.f32 %v6396_v30 }
 0xf87   : > { %10978 = vrcp.f32 %v6399_v57  ;;  %v10969_v38 = vpop.eup %10968  ;;  %v10592_v57 = vld [vmem:[%s14764_s16 + $0x60] sm:$0xff]  }
 0xf88   : > { %v6410_v55 = vmul.f32 %v10969_v38, %v10955_v28 }
 0xf89   : > { %v6402_v41 = vpop.xlane.xlu1 %6401 }
 0xf8a   : > { %v6423_v39 = vpop.permute.xlu0 %6422  ;;  %10980 = vrcp.f32 %v6402_v41  ;;  %v10593_v41 = vld [vmem:[%s14764_s16 + $0xb8] sm:$0xff]  }
 0xf8b   : > { %v6437_v10 = vand.u32 %v6423_v39, %v14860_v24  ;;  %v10971_v35 = vpop.eup %10970 }
 0xf8c   : > { %v6413_v46 = vmul.f32 %v10971_v35, %v10957_v26  ;;  %v6649_v26 = vld [vmem:[#allocation4] sm:$0xff] }
 0xf8d   : > { %10385 = vmatprep.subr.bf16.mxu1 %v6437_v10  ;;  %6656 = vst.msk [vmem:[#allocation5] sm:$0xff] %vm6043_vm14, %v6649_v26  ;;  %v10594_v35 = vld [vmem:[%s14764_s16 + $0x20] sm:$0xff]  }
 0xf8e   : > { %10386 = vmatpush3.bf16.msra.mxu1 %v6437_v10  ;;  %v6678_v6 = vpop.permute.xlu0 %6677 }
 0xf8f   : > { %v10973_v37 = vpop.eup %10972  ;;  %9743 = vmatprep.subr.bf16.mxu1 %v10585_v45 }
 0xf90   : > { %v10975_v61 = vpop.eup %10974  ;;  %v6411_v8 = vmul.f32 %v10973_v37, %v10959_v36  ;;  %v10587_v36 = vld [vmem:[%s14764_s16 + $0x70] sm:$0xff]  }
 0xf91   : > { %v6412_v58 = vmul.f32 %v10975_v61, %v10961_v17  ;;  %v13901_v17 = vld [vmem:[%s14762_s14] ss:$0 sm:$0xff]  ;;  %v10595_v37 = vld [vmem:[%s14764_s16 + $0xf0] sm:$0xff]   ;;  %v10596_v61 = vld [vmem:[%s14764_s16 + $0x58] sm:$0xff]  }
 0xf92   : > { %v6417_v34 = vpack.c.bf16 %v6411_v8, %v6410_v55  ;;  %v10597_v8 = vld [vmem:[%s14764_s16 + $0xb0] sm:$0xff]  }
 0xf93   : > { %v10977_v62 = vpop.eup %10976  ;;  %v6418_v19 = vpack.c.bf16 %v6413_v46, %v6412_v58 }
 0xf94   : > { %v10979_v63 = vpop.eup %10978  ;;  %10387 = vmatprep.mubr.msk.bf16.mxu1 %vm1066_vm3, %v6417_v34  ;;  %v6414_v43 = vmul.f32 %v10977_v62, %v10963_v9  ;;  %v10588_v9 = vld [vmem:[%s14764_s16 + $0x30] sm:$0xff]  }
 0xf95   : > { %10388 = vmatmul.mubr.msk.bf16.vlgmr.msra.gmra.mxu1 %vm1066_vm3, %v6418_v19  ;;  %v6415_v24 = vmul.f32 %v10979_v63, %v10965_v56  ;;  %v10589_v56 = vld [vmem:[%s14764_s16 + $0x68] sm:$0xff]  }
 0xf96   : > { %9744 = vmatpush3.bf16.msra.mxu1 %v10586_v54 }
 0xf97   : > { %v10981_v3 = vpop.eup %10980  ;;  %v6419_v29 = vpack.c.bf16 %v6415_v24, %v6414_v43  ;;  %9745 = vmatprep.subr.bf16.mxu1 %v10587_v36  ;;  %v10599_v24 = vld [vmem:[%s14764_s16 + $0xe8] sm:$0xff]  }
 0xf98   : > { %v6416_v0 = vmul.f32 %v10981_v3, %v10967_v5 }
 0xf99   : > { %10391 = vmatprep.mubr.msk.bf16.mxu1 %vm1066_vm3, %v6419_v29 }
 0xf9a   : > { %v6420_v4 = vpack.c.bf16 %v6416_v0, %v6416_v0  ;;  %9746 = vmatpush3.bf16.msra.mxu1 %v10588_v9  ;;  %v10605_v9 = vld [vmem:[%s14764_s16 + $0xa0] sm:$0xff]  }
 0xf9b   : > { %9747 = vmatprep.subr.bf16.mxu1 %v10589_v56 }
 0xf9d   : > { %10392 = vmatmul.mubr.msk.bf16.gmra.mxu1 %vm1066_vm3, %v6420_v4  ;;  %vm6698_vm3 = vcmask 1048064  }
 0xf9e   : > { %6699 = vst.msk [vmem:[#allocation5] sm:$0xff] %vm6698_vm3, %v6678_v6  ;;  %9748 = vmatpush3.bf16.msra.mxu1 %v10590_v14  ;;  %v10603_v6 = vld [vmem:[%s14764_s16 + $0xe0] sm:$0xff]  }
 0xf9f   : > { %9749 = vmatprep.subr.bf16.mxu1 %v10592_v57  ;;  %v10608_v14 = vld [vmem:[%s14764_s16 + $0x40] sm:$0xff]  }
 0xfa2   : > { %9750 = vmatpush3.bf16.msra.mxu1 %v10594_v35 }
 0xfa3   : > { %9751 = vmatprep.subr.bf16.mxu1 %v10596_v61 }
0x1055   : > { %v10389_v11 = vpop.f32.mrf.mxu1 }
0x1057   : > { %v6473_v23 = vpop.f32.mrf.mxu1 }
0x1059   : > { %v10390_v48 = vpop.f32.mrf.mxu1 }
0x105a   : > { %v6504_v49 = vpack.c.bf16 %v10390_v48, %v10389_v11  ;;  %v10600_v11 = vld [vmem:[%s14764_s16 + $0x50] sm:$0xff]  }
0x105b   : > { %v6476_v31 = vpop.f32.mrf.mxu1 }
0x105c   : > { %v6503_v52 = vpack.c.bf16 %v6476_v31, %v6473_v23 }
0x105d   : > { %v10393_v42 = vpop.f32.mrf.mxu1 }
0x105e   : > { %10399 = vmatprep.mubr.msk.bf16.mxu0 %vm2053_vm4, %v6503_v52  ;;  %v6506_v28 = vpack.c.bf16 %v10393_v42, %v10393_v42 }
0x105f   : > { %v6489_v40 = vpop.f32.mrf.mxu1  ;;  %10400 = vmatmul.mubr.msk.bf16.vlgmr.msra.gmra.mxu0 %vm2053_vm4, %v6504_v49 }
0x1060   : > { %9784 = vmatpush3.bf16.msra.mxu0 %v10593_v41  ;;  %v10610_v41 = vld [vmem:[%s14764_s16] sm:$0xff]  }
0x1061   : > { %v10394_v53 = vpop.f32.mrf.mxu1  ;;  %9785 = vmatprep.subr.bf16.mxu0 %v10595_v37  ;;  %v10613_v37 = vld [vmem:[%s14764_s16 + $0xc8] sm:$0xff]  }
0x1063   : > { %v6492_v16 = vpop.f32.mrf.mxu1 }
0x1064   : > { %v6505_v7 = vpack.c.bf16 %v6492_v16, %v6489_v40  ;;  %9786 = vmatpush3.bf16.msra.mxu0 %v10597_v8 }
0x1065   : > { %9787 = vmatprep.subr.bf16.mxu0 %v10599_v24  ;;  %v10617_v24 = vld [vmem:[%s14764_s16 + $0x118] sm:$0xff]  }
0x1066   : > { %10403 = vmatprep.mubr.msk.bf16.mxu0 %vm2053_vm4, %v6505_v7 }
0x1067   : > { %10404 = vmatmul.mubr.msk.bf16.gmra.mxu0 %vm2053_vm4, %v6506_v28  ;;  %vm6631_vm4 = vcmask 520192  }
0x1068   : > { %9788 = vmatpush3.bf16.msra.mxu0 %v10601_v25 }
0x1069   : > { %9789 = vmatprep.subr.bf16.mxu0 %v10603_v6  ;;  %v10618_v6 = vld [vmem:[%s14764_s16 + $0x110] sm:$0xff]  }
0x106c   : > { %9790 = vmatpush3.bf16.msra.mxu0 %v10605_v9 }
0x111f   : > { %v10401_v27 = vpop.f32.mrf.mxu0 }
0x1120   : > { %v6585_v1 = vadd.f32 %v10401_v27, %v13901_v17  ;;  %v10604_v27 = vld [vmem:[%s14764_s16 + $0x48] sm:$0xff]  }
0x1121   : > { %v6576_v51 = vpop.f32.mrf.mxu0 }
0x1122   : > { %v6608_v5 = vadd.f32 %v6585_v1, %v13801_v50  ;;  %v6577_v59 = vadd.f32 %v13901_v17, %v6576_v51 }
0x1123   : > { %v10402_v32 = vpop.f32.mrf.mxu0 }
0x1124   : > { %6632 = vst.msk [vmem:[#allocation4 + $0x21] sm:$0x1f] %vm6631_vm4, %v6608_v5  ;;  %v6606_v30 = vadd.f32 %v6577_v59, %v13794_v12  ;;  %v6588_v50 = vadd.f32 %v10402_v32, %v13901_v17  ;;  %vm6645_vm4 = vcmask 523266   ;;  %v10607_v32 = vld [vmem:[%s14764_s16 + $0xd8] sm:$0xff]  }
0x1125   : > { %6634 = vst.msk [vmem:[#allocation4 + $0x24] sm:$0xe0] %vm6633_vm5, %v6608_v5  ;;  %v6579_v39 = vpop.f32.mrf.mxu0  ;;  %v10606_v5 = vld [vmem:[%s14764_s16 + $0x8] sm:$0xff]   ;;  %9791 = vmatprep.subr.bf16.mxu0 %v10607_v32 }
0x1126   : > { %6624 = vst.msk [vmem:[#allocation4 + $0xb] sm:$0x7f] %vm6623_vm7, %v6606_v30  ;;  %v6609_v12 = vadd.f32 %v6588_v50, %v13803_v33  ;;  %v6580_v10 = vadd.f32 %v13901_v17, %v6579_v39  ;;  %v10612_v39 = vld [vmem:[%s14764_s16 + $0x90] sm:$0xff]   ;;  %9792 = vmatpush3.bf16.msra.mxu0 %v10609_v20 }
0x1127   : > { %6626 = vst.msk [vmem:[#allocation4 + $0xe] sm:$0x80] %vm6625_vm8, %v6606_v30  ;;  %v10405_v38 = vpop.f32.mrf.mxu0  ;;  %v10611_v30 = vld [vmem:[%s14764_s16 + $0xd0] sm:$0xff]  }
0x1128   : > { %6636 = vst.msk [vmem:[#allocation4 + $0x2c] sm:$0xf] %vm6635_vm9, %v6609_v12  ;;  %v6607_v33 = vadd.f32 %v6580_v10, %v13796_v22  ;;  %v6601_v55 = vadd.f32 %v10405_v38, %v13901_v17  ;;  %9793 = vmatprep.subr.bf16.mxu0 %v10611_v30 }
0x1129   : > { %6638 = vst.msk [vmem:[#allocation4 + $0x2f] sm:$0xf0] %vm6637_vm10, %v6609_v12  ;;  %v6592_v46 = vpop.f32.mrf.mxu0 }
0x112a   : > { %6628 = vst.msk [vmem:[#allocation4 + $0x16] sm:$0x3f] %vm6627_vm12, %v6607_v33  ;;  %v6612_v58 = vadd.f32 %v6601_v55, %v13815_v15  ;;  %v6593_v34 = vadd.f32 %v13901_v17, %v6592_v46  ;;  %v10598_v15 = vld [vmem:[%s14764_s16 + $0x18] sm:$0xff]   ;;  %9794 = vmatpush3.bf16.msra.mxu0 %v10612_v39 }
0x112b   : > { %6630 = vst.msk [vmem:[#allocation4 + $0x19] sm:$0xc0] %vm6629_vm15, %v6607_v33  ;;  %v10406_v22 = vpop.f32.mrf.mxu0  ;;  %v6667_v19 = vld [vmem:[#allocation4 + $0x21] sm:$0xff]  ;;  %9752 = vmatpush3.bf16.msra.mxu1 %v10598_v15  ;;  %9795 = vmatprep.subr.bf16.mxu0 %v10613_v37 }
0x112c   : > { %v6723_v62 = vld [vmem:[#allocation4 + $0x22] sm:$0xff]  ;;  %6648 = vst.msk [vmem:[#allocation4 + $0x4d] sm:$0x1] %vm6647_vm0, %v6612_v58  ;;  %v6610_v43 = vadd.f32 %v6593_v34, %v13808_v18  ;;  %6685 = vrot.lane.b32.xlu0 %v6667_v19, %s14851_s24  ;;  %9753 = vmatprep.subr.bf16.mxu1 %v10600_v11 }
0x112d   : > { %v13950_v63 = vld [vmem:[#allocation4 + $0x24] sm:$0xff]  ;;  %6740 = vrot.lane.b32.xlu1 %v6723_v62, %s14851_s24  ;;  %6717 = vst.msk [vmem:[#allocation5 + $0xa8] sm:$0xff] %vm6043_vm14, %v6723_v62  ;;  %v6595_v29 = vpop.f32.mrf.mxu0  ;;  %v6776_v18 = vld [vmem:[#allocation4 + $0xc] sm:$0xff] }
0x112e   : > { %6827 = vst.msk [vmem:[#allocation5 + $0x68] sm:$0xff] %vm6043_vm14, %v13950_v63  ;;  %v6765_v3 = vld [vmem:[#allocation4 + $0x23] sm:$0xff]  ;;  %v6596_v4 = vadd.f32 %v13901_v17, %v6595_v29  ;;  %v6762_v60 = vld [vmem:[#allocation4 + $0xb] sm:$0xff] }
0x112f   : > { %v6720_v0 = vld [vmem:[#allocation4 + $0xa] sm:$0xff]  ;;  %6772 = vst.msk [vmem:[#allocation5 + $0x88] sm:$0xff] %vm6043_vm14, %v6765_v3  ;;  %6769 = vst.msk [vmem:[#allocation5 + $0x10] sm:$0xff] %vm6043_vm14, %v6762_v60  ;;  %v10615_v19 = vld [vmem:[%s14764_s16 + $0xc0] sm:$0xff]  }
0x1130   : > { %6640 = vst.msk [vmem:[#allocation4 + $0x37] sm:$0x7] %vm6639_vm13, %v6610_v43  ;;  %v6650_v47 = vld [vmem:[#allocation4 + $0x8] sm:$0xff]  ;;  %v6611_v52 = vadd.f32 %v6596_v4, %v13810_v21  ;;  %6790 = vrot.lane.b32.xlu0 %v6776_v18, %s14851_s24  ;;  %v10602_v17 = vld [vmem:[%s14764_s16 + $0x10] sm:$0xff]  }
0x1131   : > { %6642 = vst.msk [vmem:[#allocation4 + $0x3a] sm:$0xf8] %vm6641_vm1, %v6610_v43  ;;  %v6876_v23 = vld [vmem:[#allocation4 + $0x26] sm:$0xff]  ;;  %v6877_v48 = vld [vmem:[#allocation4 + $0x2e] sm:$0xff]  ;;  %6734 = vrot.lane.b32.xlu1 %v6720_v0, %s14851_s24  ;;  %9754 = vmatpush3.bf16.msra.mxu1 %v10602_v17  ;;  %v6874_v55 = vld [vmem:[#allocation4 + $0x16] sm:$0xff] }
0x1132   : > { %6714 = vst.msk [vmem:[#allocation5 + $0x30] sm:$0xff] %vm6043_vm14, %v6720_v0  ;;  %v6724_v31 = vld [vmem:[#allocation4 + $0x2a] sm:$0xff]  ;;  %6657 = vst.msk [vmem:[#allocation5 + $0x28] sm:$0xff] %vm6043_vm14, %v6650_v47  ;;  %v6722_v49 = vld [vmem:[#allocation4 + $0x1a] sm:$0xff]  ;;  %9755 = vmatprep.subr.bf16.mxu1 %v10604_v27 }
0x1133   : > { %6883 = vst.msk [vmem:[#allocation5 + $0x70] sm:$0xff] %vm6043_vm14, %v6876_v23  ;;  %6884 = vst.msk [vmem:[#allocation5 + $0x98] sm:$0xff] %vm6043_vm14, %v6877_v48  ;;  %v6721_v42 = vld [vmem:[#allocation4 + $0x12] sm:$0xff]  ;;  %v6664_v40 = vld [vmem:[#allocation4 + $0x9] sm:$0xff] }
0x1134   : > { %6718 = vst.msk [vmem:[#allocation5 + $0xd0] sm:$0xff] %vm6043_vm14, %v6724_v31  ;;  %6716 = vst.msk [vmem:[#allocation5 + $0x80] sm:$0xff] %vm6043_vm14, %v6722_v49  ;;  %v13983_v53 = vld [vmem:[#allocation4 + $0x14] sm:$0xff]  ;;  %v13985_v16 = vld [vmem:[#allocation4 + $0x1c] sm:$0xff]  ;;  %6742 = vrot.lane.b32.xlu0 %v6724_v31, %s14851_s24 }
0x1135   : > { %6644 = vst.msk [vmem:[#allocation4 + $0x42] sm:$0x3] %vm6643_vm11, %v6611_v52  ;;  %v13987_v21 = vld [vmem:[#allocation4 + $0x2c] sm:$0xff]  ;;  %6679 = vrot.lane.b32.xlu1 %v6664_v40, %s14851_s24  ;;  %v6653_v7 = vld [vmem:[#allocation4 + $0x20] sm:$0xff]  ;;  %v6652_v56 = vld [vmem:[#allocation4 + $0x18] sm:$0xff]  ;;  %9756 = vmatpush3.bf16.msra.mxu1 %v10606_v5 }
0x1136   : > { %6646 = vst.msk [vmem:[#allocation4 + $0x45] sm:$0xfc] %vm6645_vm4, %v6611_v52  ;;  %v6654_v28 = vld [vmem:[#allocation4 + $0x28] sm:$0xff]  ;;  %v6651_v36 = vld [vmem:[#allocation4 + $0x10] sm:$0xff]  ;;  %v6666_v57 = vld [vmem:[#allocation4 + $0x19] sm:$0xff]  ;;  %9757 = vmatprep.subr.bf16.mxu1 %v10608_v14 }
0x1137   : > { %6715 = vst.msk [vmem:[#allocation5 + $0x58] sm:$0xff] %vm6043_vm14, %v6721_v42  ;;  %6825 = vst.msk [vmem:[#allocation5 + $0x18] sm:$0xff] %vm6043_vm14, %v13983_v53  ;;  %v14000_v45 = vld [vmem:[#allocation4 + $0x32] sm:$0xff]  ;;  %v6668_v26 = vld [vmem:[#allocation4 + $0x29] sm:$0xff] }
0x1138   : > { %6828 = vst.msk [vmem:[#allocation5 + $0x90] sm:$0xff] %vm6043_vm14, %v13987_v21  ;;  %6826 = vst.msk [vmem:[#allocation5 + $0x40] sm:$0xff] %vm6043_vm14, %v13985_v16  ;;  %v14004_v54 = vld [vmem:[#allocation4 + $0x34] sm:$0xff]  ;;  %6738 = vrot.lane.b32.xlu0 %v6722_v49, %s14851_s24  ;;  %v6766_v38 = vld [vmem:[#allocation4 + $0x2b] sm:$0xff] }
0x1139   : > { %6660 = vst.msk [vmem:[#allocation5 + $0xa0] sm:$0xff] %vm6043_vm14, %v6653_v7  ;;  %6661 = vst.msk [vmem:[#allocation5 + $0xc8] sm:$0xff] %vm6043_vm14, %v6654_v28  ;;  %6687 = vrot.lane.b32.xlu1 %v6668_v26, %s14851_s24  ;;  %v6665_v44 = vld [vmem:[#allocation4 + $0x11] sm:$0xff]  ;;  %v6764_v10 = vld [vmem:[#allocation4 + $0x1b] sm:$0xff]  ;;  %9758 = vmatpush3.bf16.msra.mxu1 %v10610_v41 }
0x113a   : > { %6719 = vst.msk [vmem:[#allocation5 + $0xf8] sm:$0xff] %vm6043_vm14, %v14000_v45  ;;  %6658 = vst.msk [vmem:[#allocation5 + $0x50] sm:$0xff] %vm6043_vm14, %v6651_v36  ;;  %v6832_v50 = vld [vmem:[#allocation4 + $0x15] sm:$0xff]  ;;  %v6875_v8 = vld [vmem:[#allocation4 + $0x1e] sm:$0xff]  ;;  %10407 = vmatprep.subr.bf16.mxu1 %v10617_v24 }
0x113b   : > { %6829 = vst.msk [vmem:[#allocation5 + $0xb8] sm:$0xff] %vm6043_vm14, %v14004_v54  ;;  %6659 = vst.msk [vmem:[#allocation5 + $0x78] sm:$0xff] %vm6043_vm14, %v6652_v56  ;;  %v6763_v12 = vld [vmem:[#allocation4 + $0x13] sm:$0xff]  ;;  %v10614_v58 = vld [vmem:[%s14764_s16 + $0x88] sm:$0xff]  }
0x113c   : > { %v6879_v1 = vld [vmem:[#allocation4 + $0x3e] sm:$0xff]  ;;  %6681 = vrot.lane.b32.xlu0 %v6665_v44, %s14851_s24  ;;  %6770 = vst.msk [vmem:[#allocation5 + $0x38] sm:$0xff] %vm6043_vm14, %v6763_v12  ;;  %6771 = vst.msk [vmem:[#allocation5 + $0x60] sm:$0xff] %vm6043_vm14, %v6764_v10  ;;  %v6655_v61 = vld [vmem:[#allocation4 + $0x30] sm:$0xff]  ;;  %9796 = vmatpush3.bf16.msra.mxu0 %v10614_v58 }
0x113d   : > { %v6880_v51 = vld [vmem:[#allocation4 + $0x46] sm:$0xff]  ;;  %6886 = vst.msk [vmem:[#allocation5 + $0xe8] sm:$0xff] %vm6043_vm14, %v6879_v1  ;;  %v14031_v59 = vld [vmem:[#allocation4 + $0x3c] sm:$0xff]  ;;  %6736 = vrot.lane.b32.xlu1 %v6721_v42, %s14851_s24  ;;  %6773 = vst.msk [vmem:[#allocation5 + $0xb0] sm:$0xff] %vm6043_vm14, %v6766_v38  ;;  %9797 = vmatprep.subr.bf16.mxu0 %v10615_v19 }
0x113e   : > { %6887 = vst.msk [vmem:[#allocation5 + $0x110] sm:$0xff] %vm6043_vm14, %v6880_v51  ;;  %6830 = vst.msk [vmem:[#allocation5 + $0xe0] sm:$0xff] %vm6043_vm14, %v14031_v59  ;;  %v6824_v35 = vld [vmem:[#allocation4 + $0x44] sm:$0xff]  ;;  %v6767_v33 = vld [vmem:[#allocation4 + $0x33] sm:$0xff] }
0x113f   : > { %6831 = vst.msk [vmem:[#allocation5 + $0x108] sm:$0xff] %vm6043_vm14, %v6824_v35  ;;  %6662 = vst.msk [vmem:[#allocation5 + $0xf0] sm:$0xff] %vm6043_vm14, %v6655_v61  ;;  %v6768_v46 = vld [vmem:[#allocation4 + $0x3b] sm:$0xff]  ;;  %v6835_v22 = vld [vmem:[#allocation4 + $0x2d] sm:$0xff] }
0x1140   : > { %6846 = vrot.lane.b32.xlu0 %v6832_v50, %s14851_s24  ;;  %6774 = vst.msk [vmem:[#allocation5 + $0xd8] sm:$0xff] %vm6043_vm14, %v6767_v33  ;;  %6881 = vst.msk [vmem:[#allocation5 + $0x20] sm:$0xff] %vm6043_vm14, %v6874_v55  ;;  %v6878_v34 = vld [vmem:[#allocation4 + $0x36] sm:$0xff]  ;;  %v10616_v43 = vld [vmem:[%s14764_s16 + $0x80] sm:$0xff]  }
0x1141   : > { %6683 = vrot.lane.b32.xlu1 %v6666_v57, %s14851_s24  ;;  %6882 = vst.msk [vmem:[#allocation5 + $0x48] sm:$0xff] %vm6043_vm14, %v6875_v8  ;;  %6775 = vst.msk [vmem:[#allocation5 + $0x100] sm:$0xff] %vm6043_vm14, %v6768_v46  ;;  %v6833_v62 = vld [vmem:[#allocation4 + $0x1d] sm:$0xff]  ;;  %9798 = vmatpush3.bf16.msra.mxu0 %v10616_v43  ;;  %v6836_v3 = vld [vmem:[#allocation4 + $0x35] sm:$0xff] }
0x1142   : > { %6885 = vst.msk [vmem:[#allocation5 + $0xc0] sm:$0xff] %vm6043_vm14, %v6878_v34  ;;  %v6726_v15 = vld [vmem:[#allocation4 + $0x3a] sm:$0xff]  ;;  %10423 = vmatprep.subr.bf16.mxu0 %v14832_v2  ;;  %v6834_v29 = vld [vmem:[#allocation4 + $0x25] sm:$0xff]  ;;  %v6669_v0 = vld [vmem:[#allocation4 + $0x31] sm:$0xff] }
0x1143   : > { %v6838_v18 = vld [vmem:[#allocation4 + $0x45] sm:$0xff]  ;;  %v6837_v4 = vld [vmem:[#allocation4 + $0x3d] sm:$0xff] }
0x1144   : > { %6852 = vrot.lane.b32.xlu0 %v6835_v22, %s14851_s24  ;;  %v10619_v1 = vld [vmem:[%s14764_s16 + $0x108] sm:$0xff]   ;;  %v10620_v50 = vld [vmem:[%s14764_s16 + $0x100] sm:$0xff]  }
0x1145   : > { %6848 = vrot.lane.b32.xlu1 %v6833_v62, %s14851_s24 }
0x1148   : > { %6746 = vrot.lane.b32.xlu0 %v6726_v15, %s14851_s24 }
0x1149   : > { %6792 = vrot.lane.b32.xlu1 %v13983_v53, %s14851_s24 }
0x114c   : > { %6794 = vrot.lane.b32.xlu0 %v13985_v16, %s14851_s24  ;;  %v6888_v16 = vld [vmem:[#allocation5] sm:$0xff] }
0x114d   : > { %6744 = vrot.lane.b32.xlu1 %v14000_v45, %s14851_s24 }
0x1150   : > { %6854 = vrot.lane.b32.xlu0 %v6836_v3, %s14851_s24 }
0x1151   : > { %6850 = vrot.lane.b32.xlu1 %v6834_v29, %s14851_s24 }
0x1154   : > { %6798 = vrot.lane.b32.xlu0 %v13987_v21, %s14851_s24 }
0x1155   : > { %6796 = vrot.lane.b32.xlu1 %v13950_v63, %s14851_s24 }
0x1158   : > { %6858 = vrot.lane.b32.xlu0 %v6838_v18, %s14851_s24 }
0x1159   : > { %6689 = vrot.lane.b32.xlu1 %v6669_v0, %s14851_s24  ;;  %v6892_v0 = vld [vmem:[#allocation5 + $0x20] sm:$0xff] }
0x115d   : > { %6856 = vrot.lane.b32.xlu1 %v6837_v4, %s14851_s24  ;;  %v6897_v4 = vld [vmem:[#allocation5 + $0x48] sm:$0xff] }
0x1161   : > { %6800 = vrot.lane.b32.xlu1 %v14004_v54, %s14851_s24 }
0x1165   : > { %6802 = vrot.lane.b32.xlu1 %v14031_v59, %s14851_s24  ;;  %s14713_s24 = scalar_lea.hbm %s14771_s23, %s9476_s3 }
0x119e   : > { %v6686_v60 = vpop.permute.xlu0 %6685 }
0x119f   : > { %v6741_v47 = vpop.permute.xlu1 %6740  ;;  %6703 = vst.msk [vmem:[#allocation5 + $0xa0] sm:$0xff] %vm6698_vm3, %v6686_v60 }
0x11a0   : > { %6758 = vst.msk [vmem:[#allocation5 + $0x80] sm:$0xff] %vm6698_vm3, %v6741_v47 }
0x11a2   : > { %v6791_v63 = vpop.permute.xlu0 %6790 }
0x11a3   : > { %v6735_v11 = vpop.permute.xlu1 %6734  ;;  %6811 = vst.msk [vmem:[#allocation5 + $0x10] sm:$0xff] %vm6698_vm3, %v6791_v63 }
0x11a4   : > { %6755 = vst.msk [vmem:[#allocation5 + $0x8] sm:$0xff] %vm6698_vm3, %v6735_v11  ;;  %v6927_v11 = vpack.c.bf16 %v6897_v4, %v6892_v0 }
0x11a6   : > { %v6743_v23 = vpop.permute.xlu0 %6742  ;;  %v6908_v46 = vld [vmem:[#allocation5 + $0xa0] sm:$0xff] }
0x11a7   : > { %v6680_v48 = vpop.permute.xlu1 %6679  ;;  %6759 = vst.msk [vmem:[#allocation5 + $0xa8] sm:$0xff] %vm6698_vm3, %v6743_v23  ;;  %v6904_v17 = vld [vmem:[#allocation5 + $0x80] sm:$0xff] }
0x11a8   : > { %6700 = vst.msk [vmem:[#allocation5 + $0x28] sm:$0xff] %vm6698_vm3, %v6680_v48 }
0x11aa   : > { %v6739_v31 = vpop.permute.xlu0 %6738  ;;  %v6890_v39 = vld [vmem:[#allocation5 + $0x10] sm:$0xff] }
0x11ab   : > { %v6688_v52 = vpop.permute.xlu1 %6687  ;;  %6757 = vst.msk [vmem:[#allocation5 + $0x58] sm:$0xff] %vm6698_vm3, %v6739_v31  ;;  %v6889_v25 = vld [vmem:[#allocation5 + $0x8] sm:$0xff] }
0x11ac   : > { %6704 = vst.msk [vmem:[#allocation5 + $0xc8] sm:$0xff] %vm6698_vm3, %v6688_v52 }
0x11ae   : > { %v6682_v49 = vpop.permute.xlu0 %6681  ;;  %v6909_v61 = vld [vmem:[#allocation5 + $0xa8] sm:$0xff] }
0x11af   : > { %v6737_v42 = vpop.permute.xlu1 %6736  ;;  %6701 = vst.msk [vmem:[#allocation5 + $0x50] sm:$0xff] %vm6698_vm3, %v6682_v49  ;;  %v6893_v21 = vld [vmem:[#allocation5 + $0x28] sm:$0xff]  ;;  %v6902_v49 = vld [vmem:[#allocation5 + $0x70] sm:$0xff] }
0x11b0   : > { %6756 = vst.msk [vmem:[#allocation5 + $0x30] sm:$0xff] %vm6698_vm3, %v6737_v42  ;;  %v6923_v36 = vpack.c.bf16 %v6893_v21, %v6888_v16  ;;  %v6907_v42 = vld [vmem:[#allocation5 + $0x98] sm:$0xff] }
0x11b2   : > { %v6847_v40 = vpop.permute.xlu0 %6846  ;;  %v6899_v26 = vld [vmem:[#allocation5 + $0x58] sm:$0xff] }
0x11b3   : > { %v6684_v53 = vpop.permute.xlu1 %6683  ;;  %6867 = vst.msk [vmem:[#allocation5 + $0x18] sm:$0xff] %vm6698_vm3, %v6847_v40  ;;  %v6929_v27 = vpack.c.bf16 %v6904_v17, %v6899_v26  ;;  %v6913_v38 = vld [vmem:[#allocation5 + $0xc8] sm:$0xff] }
0x11b4   : > { %6702 = vst.msk [vmem:[#allocation5 + $0x78] sm:$0xff] %vm6698_vm3, %v6684_v53  ;;  %v6933_v58 = vpack.c.bf16 %v6913_v38, %v6908_v46  ;;  %v6917_v53 = vld [vmem:[#allocation5 + $0xe8] sm:$0xff]  ;;  %v10657_v38 = vld [vmem:[%s14767_s19 + $0xe4] ss:$8 sps:$4 sm:$0xff]  }
0x11b6   : > { %v6853_v7 = vpop.permute.xlu0 %6852  ;;  %v6898_v20 = vld [vmem:[#allocation5 + $0x50] sm:$0xff] }
0x11b7   : > { %v6849_v28 = vpop.permute.xlu1 %6848  ;;  %v6894_v45 = vld [vmem:[#allocation5 + $0x30] sm:$0xff]  ;;  %6870 = vst.msk [vmem:[#allocation5 + $0x90] sm:$0xff] %vm6698_vm3, %v6853_v7 }
0x11b8   : > { %6868 = vst.msk [vmem:[#allocation5 + $0x40] sm:$0xff] %vm6698_vm3, %v6849_v28  ;;  %v6924_v54 = vpack.c.bf16 %v6894_v45, %v6889_v25  ;;  %v6932_v28 = vpack.c.bf16 %v6907_v42, %v6902_v49  ;;  %v6912_v25 = vld [vmem:[#allocation5 + $0xc0] sm:$0xff] }
0x11b9   : > { %v6937_v26 = vpack.c.bf16 %v6917_v53, %v6912_v25 }
0x11ba   : > { %7282 = vmatprep.mubr.bf16.mxu1 %v6924_v54  ;;  %v6747_v9 = vpop.permute.xlu0 %6746  ;;  %v6891_v32 = vld [vmem:[#allocation5 + $0x18] sm:$0xff] }
0x11bb   : > { %7283 = vmatmul.mubr.bf16.vlgmr.msra.gmra.mxu1 %v6923_v36  ;;  %v6793_v56 = vpop.permute.xlu1 %6792  ;;  %6761 = vst.msk [vmem:[#allocation5 + $0xf8] sm:$0xff] %vm6698_vm3, %v6747_v9  ;;  %v6903_v51 = vld [vmem:[#allocation5 + $0x78] sm:$0xff]  ;;  %v6922_v36 = vld [vmem:[#allocation5 + $0x110] sm:$0xff]  ;;  %v10624_v9 = vld [vmem:[%s14767_s19 + $0x74] ss:$8 sps:$4 sm:$0xff]  }
0x11bc   : > { %6812 = vst.msk [vmem:[#allocation5 + $0x38] sm:$0xff] %vm6698_vm3, %v6793_v56  ;;  %7290 = vmatprep.mubr.bf16.mxu1 %v6929_v27  ;;  %10408 = vmatpush3.bf16.msra.mxu1 %v10617_v24  ;;  %v6928_v30 = vpack.c.bf16 %v6903_v51, %v6898_v20  ;;  %v10622_v27 = vld [vmem:[%s14767_s19 + $0x70] ss:$8 sps:$4 sm:$0xff]   ;;  %v10627_v56 = vld [vmem:[%s14767_s19 + $0x64] ss:$8 sps:$4 sm:$0xff]  }
0x11bd   : > { %10409 = vmatprep.subr.bf16.mxu1 %v10618_v6  ;;  %v10630_v51 = vld [vmem:[%s14767_s19 + $0x54] ss:$8 sps:$4 sm:$0xff]   ;;  %v10639_v20 = vld [vmem:[%s14767_s19 + $0x24] ss:$8 sps:$4 sm:$0xff]  }
0x11be   : > { %v6795_v5 = vpop.permute.xlu0 %6794  ;;  %v6906_v43 = vld [vmem:[#allocation5 + $0x90] sm:$0xff] }
0x11bf   : > { %v6745_v59 = vpop.permute.xlu1 %6744  ;;  %v6896_v44 = vld [vmem:[#allocation5 + $0x40] sm:$0xff]  ;;  %6813 = vst.msk [vmem:[#allocation5 + $0x60] sm:$0xff] %vm6698_vm3, %v6795_v5 }
0x11c0   : > { %6760 = vst.msk [vmem:[#allocation5 + $0xd0] sm:$0xff] %vm6698_vm3, %v6745_v59  ;;  %v6926_v14 = vpack.c.bf16 %v6896_v44, %v6891_v32  ;;  %10410 = vmatpush3.bf16.msra.mxu1 %v10618_v6  ;;  %v6942_v6 = vpack.c.bf16 %v6922_v36, %v6922_v36  ;;  %v10628_v5 = vld [vmem:[%s14767_s19 + $0x50] ss:$8 sps:$4 sm:$0xff]   ;;  %v10633_v59 = vld [vmem:[%s14767_s19 + $0x44] ss:$8 sps:$4 sm:$0xff]  }
0x11c1   : > { %10411 = vmatprep.subr.bf16.mxu1 %v10619_v1  ;;  %v10631_v32 = vld [vmem:[%s14767_s19 + $0x40] ss:$8 sps:$4 sm:$0xff]   ;;  %v10636_v44 = vld [vmem:[%s14767_s19 + $0x34] ss:$8 sps:$4 sm:$0xff]  }
0x11c2   : > { %7346 = vmatprep.mubr.bf16.mxu0 %v6926_v14  ;;  %v6855_v57 = vpop.permute.xlu0 %6854  ;;  %v6919_v55 = vld [vmem:[#allocation5 + $0xf8] sm:$0xff]  ;;  %v10634_v14 = vld [vmem:[%s14767_s19 + $0x30] ss:$8 sps:$4 sm:$0xff]  }
0x11c3   : > { %7291 = vmatmul.mubr.bf16.gmra.mxu1 %v6928_v30  ;;  %v6851_v41 = vpop.permute.xlu1 %6850  ;;  %v6895_v12 = vld [vmem:[#allocation5 + $0x38] sm:$0xff]  ;;  %6871 = vst.msk [vmem:[#allocation5 + $0xb8] sm:$0xff] %vm6698_vm3, %v6855_v57  ;;  %v6939_v34 = vpack.c.bf16 %v6919_v55, %v6919_v55  ;;  %v10640_v57 = vld [vmem:[%s14767_s19 + $0x10] ss:$8 sps:$4 sm:$0xff]  }
0x11c4   : > { %6869 = vst.msk [vmem:[#allocation5 + $0x68] sm:$0xff] %vm6698_vm3, %v6851_v41  ;;  %v6925_v10 = vpack.c.bf16 %v6895_v12, %v6890_v39  ;;  %10412 = vmatpush3.bf16.msra.mxu1 %v10619_v1  ;;  %v10625_v1 = vld [vmem:[%s14767_s19 + $0x60] ss:$8 sps:$4 sm:$0xff]   ;;  %v10645_v41 = vld [vmem:[%s14767_s19 + $0x4] ss:$8 sps:$4 sm:$0xff]  }
0x11c5   : > { %10413 = vmatprep.subr.bf16.mxu1 %v10620_v50  ;;  %v10637_v30 = vld [vmem:[%s14767_s19 + $0x20] ss:$8 sps:$4 sm:$0xff]   ;;  %v10651_v12 = vld [vmem:[%s14767_s19 + $0xf4] ss:$8 sps:$4 sm:$0xff]  }
0x11c6   : > { %7347 = vmatmul.mubr.bf16.vlgmr.msra.gmra.mxu0 %v6925_v10  ;;  %v6799_v35 = vpop.permute.xlu0 %6798  ;;  %v6900_v3 = vld [vmem:[#allocation5 + $0x60] sm:$0xff]  ;;  %v10643_v39 = vld [vmem:[%s14767_s19] ss:$8 sps:$4 sm:$0xff]  }
0x11c7   : > { %v6797_v37 = vpop.permute.xlu1 %6796  ;;  %v6914_v33 = vld [vmem:[#allocation5 + $0xd0] sm:$0xff]  ;;  %6815 = vst.msk [vmem:[#allocation5 + $0xb0] sm:$0xff] %vm6698_vm3, %v6799_v35  ;;  %v10649_v10 = vld [vmem:[%s14767_s19 + $0xf0] ss:$8 sps:$4 sm:$0xff]  }
0x11c8   : > { %6814 = vst.msk [vmem:[#allocation5 + $0x88] sm:$0xff] %vm6698_vm3, %v6797_v37  ;;  %v6934_v8 = vpack.c.bf16 %v6914_v33, %v6909_v61  ;;  %10414 = vmatpush3.bf16.msra.mxu1 %v10620_v50  ;;  %v10642_v50 = vld [vmem:[%s14767_s19 + $0x14] ss:$8 sps:$4 sm:$0xff]   ;;  %v10655_v35 = vld [vmem:[%s14767_s19 + $0xe0] ss:$8 sps:$4 sm:$0xff]  }
0x11c9   : > { %8579 = vmatprep.subr.bf16.mxu1 %v10624_v9  ;;  %v10663_v37 = vld [vmem:[%s14767_s19 + $0xd4] ss:$8 sps:$4 sm:$0xff]   ;;  %v10661_v61 = vld [vmem:[%s14767_s19 + $0xd0] ss:$8 sps:$4 sm:$0xff]  }
0x11ca   : > { %7298 = vmatprep.mubr.bf16.mxu1 %v6934_v8  ;;  %v6859_v22 = vpop.permute.xlu0 %6858  ;;  %v6911_v48 = vld [vmem:[#allocation5 + $0xb8] sm:$0xff] }
0x11cb   : > { %7299 = vmatmul.mubr.bf16.gmra.mxu1 %v6933_v58  ;;  %v6690_v62 = vpop.permute.xlu1 %6689  ;;  %v6901_v19 = vld [vmem:[#allocation5 + $0x68] sm:$0xff]  ;;  %6873 = vst.msk [vmem:[#allocation5 + $0x108] sm:$0xff] %vm6698_vm3, %v6859_v22 }
0x11cc   : > { %6705 = vst.msk [vmem:[#allocation5 + $0xf0] sm:$0xff] %vm6698_vm3, %v6690_v62  ;;  %7306 = vmatprep.mubr.bf16.mxu1 %v6939_v34  ;;  %v6931_v15 = vpack.c.bf16 %v6906_v43, %v6901_v19 }
0x11ce   : > { %7354 = vmatprep.mubr.bf16.mxu0 %v6931_v15  ;;  %v6910_v16 = vld [vmem:[#allocation5 + $0xb0] sm:$0xff] }
0x11cf   : > { %v6857_v24 = vpop.permute.xlu1 %6856  ;;  %v6905_v29 = vld [vmem:[#allocation5 + $0x88] sm:$0xff] }
0x11d0   : > { %6872 = vst.msk [vmem:[#allocation5 + $0xe0] sm:$0xff] %vm6698_vm3, %v6857_v24  ;;  %v6930_v18 = vpack.c.bf16 %v6905_v29, %v6900_v3 }
0x11d2   : > { %7355 = vmatmul.mubr.bf16.gmra.mxu0 %v6930_v18  ;;  %v6921_v40 = vld [vmem:[#allocation5 + $0x108] sm:$0xff] }
0x11d3   : > { %v6801_v60 = vpop.permute.xlu1 %6800  ;;  %v6918_v47 = vld [vmem:[#allocation5 + $0xf0] sm:$0xff]  ;;  %v6941_v45 = vpack.c.bf16 %v6921_v40, %v6921_v40 }
0x11d4   : > { %6816 = vst.msk [vmem:[#allocation5 + $0xd8] sm:$0xff] %vm6698_vm3, %v6801_v60  ;;  %v6938_v63 = vpack.c.bf16 %v6918_v47, %v6918_v47 }
0x11d6   : > { %7307 = vmatmul.mubr.bf16.gmra.mxu1 %v6938_v63 }
0x11d7   : > { %10415 = vmatprep.mubr.msk.bf16.mxu1 %vm6043_vm14, %v6927_v11  ;;  %v6803_v23 = vpop.permute.xlu1 %6802  ;;  %v6916_v31 = vld [vmem:[#allocation5 + $0xe0] sm:$0xff] }
0x11d8   : > { %6817 = vst.msk [vmem:[#allocation5 + $0x100] sm:$0xff] %vm6698_vm3, %v6803_v23  ;;  %v6936_v52 = vpack.c.bf16 %v6916_v31, %v6911_v48 }
0x11da   : > { %7362 = vmatprep.mubr.bf16.mxu0 %v6936_v52 }
0x11db   : > { %v6915_v21 = vld [vmem:[#allocation5 + $0xd8] sm:$0xff] }
0x11dc   : > { %v6935_v7 = vpack.c.bf16 %v6915_v21, %v6910_v16 }
0x11de   : > { %7363 = vmatmul.mubr.bf16.gmra.mxu0 %v6935_v7  ;;  %10416 = vmatmul.mubr.msk.bf16.vlgmr.msra.gmra.mxu1 %vm6043_vm14, %v6932_v28  ;;  %v9272_v28 = vld [vmem:[%s14765_s17] ss:$0 sm:$0xff] }
0x11df   : > { %7370 = vmatprep.mubr.bf16.mxu0 %v6941_v45  ;;  %10419 = vmatprep.mubr.msk.bf16.mxu1 %vm6043_vm14, %v6937_v26  ;;  %v6920_v54 = vld [vmem:[#allocation5 + $0x100] sm:$0xff] }
0x11e0   : > { %v6940_v17 = vpack.c.bf16 %v6920_v54, %v6920_v54  ;;  %8580 = vmatpush1.bf16.msra.mxu1 %v10622_v27 }
0x11e1   : > { %8581 = vmatprep.subr.bf16.mxu1 %v10627_v56 }
0x11e4   : > { %8582 = vmatpush1.bf16.msra.mxu1 %v10625_v1 }
0x11e5   : > { %8583 = vmatprep.subr.bf16.mxu1 %v10630_v51 }
0x11e6   : > { %7371 = vmatmul.mubr.bf16.gmra.mxu0 %v6940_v17  ;;  %10420 = vmatmul.mubr.msk.bf16.gmra.mxu1 %vm6043_vm14, %v6942_v6 }
0x11e7   : > { %10429 = vmatprep.mubr.msk.bf16.mxu0 %vm11049_vm2, %v14832_v2  ;;  %vm7491_vm2 = vcmask 1045504  }
0x11e8   : > { %8584 = vmatpush1.bf16.msra.mxu1 %v10628_v5 }
0x11e9   : > { %8585 = vmatprep.subr.bf16.mxu1 %v10633_v59 }
0x11ec   : > { %8586 = vmatpush1.bf16.msra.mxu1 %v10631_v32 }
0x11ed   : > { %8587 = vmatprep.subr.bf16.mxu1 %v10636_v44 }
0x11f0   : > { %8588 = vmatpush1.bf16.msra.mxu1 %v10634_v14 }
0x11f1   : > { %8589 = vmatprep.subr.bf16.mxu1 %v10639_v20 }
0x11f4   : > { %8590 = vmatpush1.bf16.msra.mxu1 %v10637_v30 }
0x11f5   : > { %8591 = vmatprep.subr.bf16.mxu1 %v10642_v50 }
0x11f8   : > { %8592 = vmatpush1.bf16.msra.mxu1 %v10640_v57 }
0x11f9   : > { %8593 = vmatprep.subr.bf16.mxu1 %v10645_v41 }
0x11fc   : > { %8594 = vmatpush1.bf16.msra.mxu1 %v10643_v39 }
0x11fd   : > { %8595 = vmatprep.subr.bf16.mxu1 %v10651_v12 }
0x1200   : > { %8596 = vmatpush2.bf16.msra.mxu1 %v10649_v10 }
0x1201   : > { %8597 = vmatprep.subr.bf16.mxu1 %v10657_v38 }
0x1204   : > { %8598 = vmatpush2.bf16.msra.mxu1 %v10655_v35 }
0x1205   : > { %8599 = vmatprep.subr.bf16.mxu1 %v10663_v37 }
0x1208   : > { %8600 = vmatpush2.bf16.msra.mxu1 %v10661_v61 }
0x127b   : > { %v9759_v33 = vpop.f32.mrf.mxu1 }
0x127d   : > { %v9760_v55 = vpop.f32.mrf.mxu1 }
0x127f   : > { %v9762_v8 = vpop.f32.mrf.mxu1 }
0x1281   : > { %v9763_v46 = vpop.f32.mrf.mxu1 }
0x1282   : > { %v9764_v16 = vadd.f32 %v9763_v46, %v9762_v8  ;;  %v9761_v8 = vadd.f32 %v9760_v55, %v9759_v33 }
0x1283   : > { %v9765_v58 = vpop.f32.mrf.mxu1 }
0x1284   : > { %v7288_v1 = vadd.f32 %v9764_v16, %v9272_v28 }
0x1285   : > { %v9766_v34 = vpop.f32.mrf.mxu1 }
0x1286   : > { %v14213_v22 = vpop.f32.mrf.mxu0  ;;  %v9767_v25 = vadd.f32 %v9766_v34, %v9765_v58 }
0x1287   : > { %v9768_v62 = vpop.f32.mrf.mxu1 }
0x1288   : > { %v9800_v19 = vpop.f32.mrf.mxu0  ;;  %v7293_v32 = vadd.f32 %v9767_v25, %v9272_v28 }
0x1289   : > { %v9769_v43 = vpop.f32.mrf.mxu1 }
0x128a   : > { %v9802_v24 = vpop.f32.mrf.mxu0  ;;  %v9770_v42 = vadd.f32 %v9769_v43, %v9768_v62 }
0x128b   : > { %v9771_v15 = vpop.f32.mrf.mxu1 }
0x128c   : > { %v9803_v29 = vpop.f32.mrf.mxu0  ;;  %v7296_v54 = vadd.f32 %v9770_v42, %v9272_v28 }
0x128d   : > { %v9772_v3 = vpop.f32.mrf.mxu1  ;;  %v9804_v36 = vadd.f32 %v9803_v29, %v9802_v24 }
0x128e   : > { %v9773_v21 = vadd.f32 %v9772_v3, %v9771_v15  ;;  %v9801_v3 = vadd.f32 %v9800_v19, %v14213_v22 }
0x128f   : > { %v9774_v18 = vpop.f32.mrf.mxu1  ;;  %v7352_v50 = vadd.f32 %v9804_v36, %v7288_v1 }
0x1290   : > { %v7301_v51 = vadd.f32 %v9773_v21, %v9272_v28 }
0x1291   : > { %v9775_v4 = vpop.f32.mrf.mxu1 }
0x1292   : > { %v9805_v0 = vpop.f32.mrf.mxu0  ;;  %v9776_v6 = vadd.f32 %v9775_v4, %v9774_v18 }
0x1294   : > { %v9806_v60 = vpop.f32.mrf.mxu0  ;;  %v7304_v41 = vadd.f32 %v9776_v6, %v9272_v28 }
0x1295   : > { %v9807_v27 = vadd.f32 %v9806_v60, %v9805_v0 }
0x1296   : > { %v9777_v47 = vpop.f32.mrf.mxu1  ;;  %v9808_v63 = vpop.f32.mrf.mxu0 }
0x1297   : > { %v7357_v39 = vadd.f32 %v9807_v27, %v7293_v32 }
0x1298   : > { %v9778_v11 = vpop.f32.mrf.mxu1  ;;  %v9809_v48 = vpop.f32.mrf.mxu0 }
0x1299   : > { %v9810_v7 = vadd.f32 %v9809_v48, %v9808_v63  ;;  %v9779_v5 = vadd.f32 %v9778_v11, %v9777_v47  ;;  %v7285_v63 = vadd.f32 %v9761_v8, %v9272_v28 }
0x129a   : > { %v9780_v23 = vpop.f32.mrf.mxu1 }
0x129b   : > { %v7360_v59 = vadd.f32 %v9810_v7, %v7296_v54  ;;  %v7309_v38 = vadd.f32 %v9779_v5, %v9272_v28  ;;  %v7349_v55 = vadd.f32 %v9801_v3, %v7285_v63  ;;  %v10660_v3 = vld [vmem:[%s14767_s19 + $0x154] ss:$8 sps:$4 sm:$0xff]   ;;  %v10676_v63 = vld [vmem:[%s14767_s19 + $0x120] ss:$8 sps:$4 sm:$0xff]  }
0x129c   : > { %v9781_v31 = vpop.f32.mrf.mxu1 }
0x129e   : > { %v9811_v52 = vpop.f32.mrf.mxu0  ;;  %v10417_v49 = vpop.f32.mrf.mxu1 }
0x129f   : > { %v7421_v46 = vadd.f32 %v10417_v49, %v7357_v39 }
0x12a0   : > { %v9812_v40 = vpop.f32.mrf.mxu0  ;;  %v7412_v53 = vpop.f32.mrf.mxu1 }
0x12a1   : > { %v9813_v17 = vadd.f32 %v9812_v40, %v9811_v52  ;;  %v7444_v11 = vmax.f32 %v7421_v46, 0.0  ;;  %v7413_v40 = vadd.f32 %v7412_v53, %v7349_v55  ;;  %v14861_v53 = vmov 65535   ;;  %v10696_v55 = vld [vmem:[%s14767_s19 + $0x1f4] ss:$8 sps:$4 sm:$0xff]  }
0x12a2   : > { %v9814_v45 = vpop.f32.mrf.mxu0  ;;  %v10418_v26 = vpop.f32.mrf.mxu1 }
0x12a3   : > { %v7424_v20 = vadd.f32 %v10418_v26, %v7360_v59  ;;  %v7365_v57 = vadd.f32 %v9813_v17, %v7301_v51  ;;  %v7458_v16 = vrot.slane %v7444_v11, 1  ;;  %v7442_v6 = vmax.f32 %v7413_v40, 0.0  ;;  %v10669_v40 = vld [vmem:[%s14767_s19 + $0xc4] ss:$8 sps:$4 sm:$0xff]  }
0x12a4   : > { %v9815_v9 = vpop.f32.mrf.mxu0  ;;  %v7415_v56 = vpop.f32.mrf.mxu1  ;;  %8601 = vmatprep.subr.bf16.mxu1 %v10669_v40 }
0x12a5   : > { %v9816_v30 = vadd.f32 %v9815_v9, %v9814_v45  ;;  %v7416_v35 = vadd.f32 %v7415_v56, %v7352_v50  ;;  %v7445_v62 = vmax.f32 %v7424_v20, 0.0  ;;  %v7529_v9 = vsel %vm7491_vm2, 4294967295, %v14861_v53  ;;  %v10724_v53 = vld [vmem:[%s14767_s19 + $0x1a0] ss:$8 sps:$4 sm:$0xff]  }
0x12a6   : > { %v9817_v44 = vpop.f32.mrf.mxu0  ;;  %v10421_v14 = vpop.f32.mrf.mxu1  ;;  %v7455_v50 = vrot.slane %v7442_v6, 1 }
0x12a7   : > { %v7368_v24 = vadd.f32 %v9816_v30, %v7304_v41  ;;  %v7443_v0 = vmax.f32 %v7416_v35, 0.0  ;;  %v7460_v23 = vrot.slane %v7445_v62, 1 }
0x12a8   : > { %v9818_v12 = vpop.f32.mrf.mxu0  ;;  %v7428_v10 = vpop.f32.mrf.mxu1 }
0x12a9   : > { %v9819_v37 = vadd.f32 %v9818_v12, %v9817_v44  ;;  %v7429_v61 = vadd.f32 %v7428_v10, %v7365_v57  ;;  %v7456_v31 = vrot.slane %v7443_v0, 1  ;;  %v7461_v45 = vsel %vm2252_vm6, %v7458_v16, %v7460_v23 }
0x12aa   : > { %v9820_v58 = vpop.f32.mrf.mxu0  ;;  %v10422_v34 = vpop.f32.mrf.mxu1  ;;  %v7474_v56 = vmax.f32 %v7444_v11, %v7461_v45  ;;  %v7530_v44 = vsel %vm2252_vm6, %v7529_v9, 0  ;;  %v10684_v11 = vld [vmem:[%s14767_s19 + $0x114] ss:$8 sps:$4 sm:$0xff]   ;;  %v10679_v45 = vld [vmem:[%s14767_s19 + $0xa0] ss:$8 sps:$4 sm:$0xff]  }
0x12ab   : > { %v7373_v43 = vadd.f32 %v9819_v37, %v7309_v38  ;;  %v7446_v15 = vmax.f32 %v7429_v61, 0.0  ;;  %v7459_v26 = vsel %vm2252_vm6, %v7456_v31, %v7458_v16  ;;  %v7457_v38 = vsel %vm2252_vm6, %v7455_v50, %v7456_v31  ;;  %v10648_v34 = vld [vmem:[%s14767_s19 + $0x174] ss:$8 sps:$4 sm:$0xff]   ;;  %v10694_v31 = vld [vmem:[%s14767_s19 + $0x1f0] ss:$8 sps:$4 sm:$0xff]  }
0x12ac   : > { %v9821_v29 = vpop.f32.mrf.mxu0  ;;  %v7431_v18 = vpop.f32.mrf.mxu1  ;;  %v7473_v1 = vmax.f32 %v7443_v0, %v7459_v26  ;;  %v7493_v57 = vrot.slane %v7474_v56, 2  ;;  %v7472_v61 = vmax.f32 %v7442_v6, %v7457_v38  ;;  %v10664_v0 = vld [vmem:[%s14767_s19 + $0x140] ss:$8 sps:$4 sm:$0xff]   ;;  %v10675_v16 = vld [vmem:[%s14767_s19 + $0xb4] ss:$8 sps:$4 sm:$0xff]  }
0x12ad   : > { %v7437_v4 = vadd.f32 %v10421_v14, %v7373_v43  ;;  %v7462_v60 = vrot.slane %v7446_v15, 1  ;;  %v7432_v47 = vadd.f32 %v7431_v18, %v7368_v24  ;;  %v10621_v43 = vld [vmem:[%s14766_s18] sm:$0x1f]   ;;  %v10658_v29 = vld [vmem:[%s14767_s19 + $0x150] ss:$8 sps:$4 sm:$0xff]  }
0x12ae   : > { %v7492_v41 = vrot.slane %v7473_v1, 2  ;;  %v10652_v24 = vld [vmem:[%s14767_s19 + $0x160] ss:$8 sps:$4 sm:$0xff]   ;;  %v10666_v18 = vld [vmem:[%s14767_s19 + $0x144] ss:$8 sps:$4 sm:$0xff]  }
0x12af   : > { %v7448_v48 = vmax.f32 %v7437_v4, 0.0  ;;  %v7447_v33 = vmax.f32 %v7432_v47, 0.0  ;;  %v7463_v49 = vsel %vm2252_vm6, %v7460_v23, %v7462_v60  ;;  %v10672_v4 = vld [vmem:[%s14767_s19 + $0x134] ss:$8 sps:$4 sm:$0xff]   ;;  %v10678_v47 = vld [vmem:[%s14767_s19 + $0x124] ss:$8 sps:$4 sm:$0xff]  }
0x12b0   : > { %v7475_v7 = vmax.f32 %v7445_v62, %v7463_v49  ;;  %v7494_v37 = vsel %vm7491_vm2, %v7492_v41, %v7493_v57  ;;  %v10682_v23 = vld [vmem:[%s14767_s19 + $0x110] ss:$8 sps:$4 sm:$0xff]   ;;  %v10700_v49 = vld [vmem:[%s14767_s19 + $0x1e0] ss:$8 sps:$4 sm:$0xff]   ;;  %v10687_v26 = vld [vmem:[%s14767_s19 + $0x94] ss:$8 sps:$4 sm:$0xff]  }
0x12b1   : > { %v7479_v52 = vrot.slane %v7448_v48, 1  ;;  %v7464_v42 = vrot.slane %v7447_v33, 1  ;;  %v7509_v58 = vmax.f32 %v7472_v61, %v7494_v37  ;;  %v10693_v6 = vld [vmem:[%s14767_s19 + $0x84] ss:$8 sps:$4 sm:$0xff]   ;;  %v10691_v9 = vld [vmem:[%s14767_s19 + $0x80] ss:$8 sps:$4 sm:$0xff]  }
0x12b2   : > { %v7495_v51 = vrot.slane %v7475_v7, 2  ;;  %v10772_v41 = vld [vmem:[%s14767_s19 + $0x320] ss:$8 sps:$4 sm:$0xff]  }
0x12b3   : > { %v7484_v22 = vmax.f32 %v7448_v48, %v7479_v52  ;;  %v7465_v19 = vsel %vm2252_vm6, %v7462_v60, %v7464_v42  ;;  %v7480_v21 = vsel %vm2252_vm6, %v7464_v42, %v7479_v52  ;;  %v7477_v27 = vmax.f32 %v7447_v33, %v7464_v42  ;;  %v10670_v60 = vld [vmem:[%s14767_s19 + $0x130] ss:$8 sps:$4 sm:$0xff]   ;;  %v10690_v48 = vld [vmem:[%s14767_s19 + $0x104] ss:$8 sps:$4 sm:$0xff]   ;;  %v10667_v42 = vld [vmem:[%s14767_s19 + $0xc0] ss:$8 sps:$4 sm:$0xff]  }
0x12b4   : > { %v7476_v25 = vmax.f32 %v7446_v15, %v7465_v19  ;;  %v7483_v28 = vmax.f32 %v7447_v33, %v7480_v21  ;;  %v7496_v35 = vsel %vm7491_vm2, %v7493_v57, %v7495_v51  ;;  %vm7525_vm6 = vcmask 367616   ;;  %v10646_v15 = vld [vmem:[%s14767_s19 + $0x170] ss:$8 sps:$4 sm:$0xff]   ;;  %v10688_v33 = vld [vmem:[%s14767_s19 + $0x100] ss:$8 sps:$4 sm:$0xff]   ;;  %8602 = vmatpush2.bf16.msra.mxu1 %v10667_v42 }
0x12b5   : > { %v7501_v54 = vrot.slane %v7484_v22, 2  ;;  %v7510_v46 = vmax.f32 %v7473_v1, %v7496_v35  ;;  %v10702_v52 = vld [vmem:[%s14767_s19 + $0x1e4] ss:$8 sps:$4 sm:$0xff]   ;;  %v10673_v22 = vld [vmem:[%s14767_s19 + $0xb0] ss:$8 sps:$4 sm:$0xff]   ;;  %8603 = vmatprep.subr.bf16.mxu1 %v10675_v16 }
0x12b6   : > { %v7497_v36 = vrot.slane %v7476_v25, 2  ;;  %v7499_v17 = vrot.slane %v7483_v28, 2  ;;  %v10706_v19 = vld [vmem:[%s14767_s19 + $0x1d0] ss:$8 sps:$4 sm:$0xff]   ;;  %v10708_v21 = vld [vmem:[%s14767_s19 + $0x1d4] ss:$8 sps:$4 sm:$0xff]  }
0x12b7   : > { %v7514_v59 = vmax.f32 %v7477_v27, %v7501_v54  ;;  %v7517_v62 = vpack.c.bf16 %v7510_v46, %v7509_v58  ;;  %v10712_v28 = vld [vmem:[%s14767_s19 + $0x1c0] ss:$8 sps:$4 sm:$0xff]   ;;  %v10726_v27 = vld [vmem:[%s14767_s19 + $0x1a4] ss:$8 sps:$4 sm:$0xff]   ;;  %v10732_v1 = vld [vmem:[%s14767_s19 + $0x194] ss:$8 sps:$4 sm:$0xff]  }
0x12b8   : > { %v7502_v5 = vsel %vm7491_vm2, %v7499_v17, %v7501_v54  ;;  %v7498_v14 = vsel %vm7491_vm2, %v7495_v51, %v7497_v36  ;;  %v7500_v20 = vsel %vm7491_vm2, %v7497_v36, %v7499_v17  ;;  %8604 = vmatpush2.bf16.msra.mxu1 %v10673_v22  ;;  %v10720_v54 = vld [vmem:[%s14767_s19 + $0x1b4] ss:$8 sps:$4 sm:$0xff]   ;;  %v10718_v36 = vld [vmem:[%s14767_s19 + $0x1b0] ss:$8 sps:$4 sm:$0xff]  }
0x12b9   : > { %v7513_v32 = vmax.f32 %v7476_v25, %v7502_v5  ;;  %v7511_v12 = vmax.f32 %v7474_v56, %v7498_v14  ;;  %v7512_v10 = vmax.f32 %v7475_v7, %v7500_v20  ;;  %v10681_v7 = vld [vmem:[%s14767_s19 + $0xa4] ss:$8 sps:$4 sm:$0xff]   ;;  %v10685_v17 = vld [vmem:[%s14767_s19 + $0x90] ss:$8 sps:$4 sm:$0xff]   ;;  %v10699_v56 = vld [vmem:[%s14767_s19 + $0x274] ss:$8 sps:$4 sm:$0xff]  }
0x12ba   : > { %v10714_v25 = vld [vmem:[%s14767_s19 + $0x1c4] ss:$8 sps:$4 sm:$0xff]   ;;  %8605 = vmatprep.subr.bf16.mxu1 %v10681_v7  ;;  %v10730_v51 = vld [vmem:[%s14767_s19 + $0x190] ss:$8 sps:$4 sm:$0xff]   ;;  %v11055_v14 = vmov 1966171168  }
0x12bb   : > { %v7519_v30 = vpack.c.bf16 %v7514_v59, %v7513_v32  ;;  %v7518_v8 = vpack.c.bf16 %v7512_v10, %v7511_v12  ;;  %v10738_v5 = vld [vmem:[%s14767_s19 + $0x184] ss:$8 sps:$4 sm:$0xff]   ;;  %v10736_v59 = vld [vmem:[%s14767_s19 + $0x180] ss:$8 sps:$4 sm:$0xff]   ;;  %v10744_v32 = vld [vmem:[%s14767_s19 + $0x374] ss:$8 sps:$4 sm:$0xff]   ;;  %v7582_v20 = vunpack.c.l.s4 %v11055_v14 }
0x12bc   : > { %8606 = vmatpush2.bf16.msra.mxu1 %v10679_v45  ;;  %v10697_v22 = vld [vmem:[%s14767_s19 + $0x270] ss:$8 sps:$4 sm:$0xff]   ;;  %v10750_v45 = vld [vmem:[%s14767_s19 + $0x364] ss:$8 sps:$4 sm:$0xff]  }
0x12bd   : > { %v7532_v39 = vand.u32 %v7530_v44, %v7519_v30  ;;  %8607 = vmatprep.subr.bf16.mxu1 %v10687_v26  ;;  %v7575_v44 = vlaneseq  ;;  %v7583_v30 = vunpack.c.0.s8 %v7582_v20  ;;  %v10742_v7 = vld [vmem:[%s14767_s19 + $0x370] ss:$8 sps:$4 sm:$0xff]   ;;  %v10703_v26 = vld [vmem:[%s14767_s19 + $0x260] ss:$8 sps:$4 sm:$0xff]   ;;  %v10729_v20 = vld [vmem:[%s14767_s19 + $0x224] ss:$8 sps:$4 sm:$0xff]  }
0x12be   : > { %v10766_v14 = vld [vmem:[%s14767_s19 + $0x330] ss:$8 sps:$4 sm:$0xff]  }
0x12bf   : > { %10424 = vmatpush3.bf16.msra.mxu0 %v7532_v39  ;;  %v14370_v50 = vshrl.u32 %v7575_v44, 7  ;;  %vm14373_vm14 = vcmp.lt.s32.totalorder %v7575_v44, 128  ;;  %v10721_v44 = vld [vmem:[%s14767_s19 + $0x230] ss:$8 sps:$4 sm:$0xff]  }
0x12c0   : > { %10425 = vmatprep.subr.bf16.mxu0 %v14832_v2  ;;  %8608 = vmatpush2.bf16.msra.mxu1 %v10685_v17 }
0x12c1   : > { %8609 = vmatprep.subr.bf16.mxu1 %v10693_v6  ;;  %v7586_v57 = vsub.s32 %v7583_v30, %v14370_v50  ;;  %v10711_v6 = vld [vmem:[%s14767_s19 + $0x254] ss:$8 sps:$4 sm:$0xff]   ;;  %v10774_v30 = vld [vmem:[%s14767_s19 + $0x324] ss:$8 sps:$4 sm:$0xff]  }
0x12c3   : > { %10426 = vmatpush3.bf16.msra.mxu0 %v7518_v8 }
0x12c4   : > { %10427 = vmatprep.subr.bf16.mxu0 %v14832_v2  ;;  %v10654_v2 = vld [vmem:[%s14767_s19 + $0x164] ss:$8 sps:$4 sm:$0xff]   ;;  %8610 = vmatpush2.bf16.msra.mxu1 %v10691_v9  ;;  %v10754_v9 = vld [vmem:[%s14767_s19 + $0x350] ss:$8 sps:$4 sm:$0xff]  }
0x12c5   : > { %8661 = vmatprep.subr.bf16.mxu1 %v10699_v56  ;;  %v10717_v56 = vld [vmem:[%s14767_s19 + $0x244] ss:$8 sps:$4 sm:$0xff]  }
0x12c7   : > { %10428 = vmatpush3.bf16.msra.mxu0 %v7517_v62 }
0x12c8   : > { %8620 = vmatprep.subr.bf16.mxu0 %v10648_v34 }
0x12ca   : > { %10430 = vmatmul.mubr.msk.bf16.vlgmr.msra.gmra.mxu0 %vm7525_vm6, %v10621_v43 }
0x12cb   : > { %8621 = vmatpush1.bf16.msra.mxu0 %v10646_v15 }
0x12cc   : > { %8622 = vmatprep.subr.bf16.mxu0 %v10654_v2 }
0x12cf   : > { %8623 = vmatpush1.bf16.msra.mxu0 %v10652_v24 }
0x12d0   : > { %8624 = vmatprep.subr.bf16.mxu0 %v10660_v3 }
0x12d3   : > { %8625 = vmatpush1.bf16.msra.mxu0 %v10658_v29  ;;  %v7655_v29 = vsub.s32 1, %v14370_v50 }
0x12d4   : > { %8626 = vmatprep.subr.bf16.mxu0 %v10666_v18  ;;  %v7651_v18 = vsub.s32 0, %v14370_v50 }
0x12d7   : > { %8627 = vmatpush1.bf16.msra.mxu0 %v10664_v0  ;;  %v7663_v0 = vsub.s32 3, %v14370_v50 }
0x12d8   : > { %8628 = vmatprep.subr.bf16.mxu0 %v10672_v4  ;;  %v7659_v4 = vsub.s32 2, %v14370_v50 }
0x12db   : > { %8629 = vmatpush1.bf16.msra.mxu0 %v10670_v60  ;;  %v7671_v60 = vsub.s32 5, %v14370_v50 }
0x12dc   : > { %8630 = vmatprep.subr.bf16.mxu0 %v10678_v47  ;;  %v7667_v47 = vsub.s32 4, %v14370_v50 }
0x12df   : > { %8631 = vmatpush1.bf16.msra.mxu0 %v10676_v63  ;;  %v7679_v63 = vsub.s32 7, %v14370_v50 }
0x12e0   : > { %8632 = vmatprep.subr.bf16.mxu0 %v10684_v11  ;;  %v7675_v11 = vsub.s32 6, %v14370_v50 }
0x12e3   : > { %8633 = vmatpush1.bf16.msra.mxu0 %v10682_v23 }
0x12e4   : > { %8634 = vmatprep.subr.bf16.mxu0 %v10690_v48 }
0x12e7   : > { %8635 = vmatpush1.bf16.msra.mxu0 %v10688_v33 }
0x12e8   : > { %8636 = vmatprep.subr.bf16.mxu0 %v10696_v55 }
0x12eb   : > { %8637 = vmatpush2.bf16.msra.mxu0 %v10694_v31 }
0x12ec   : > { %8638 = vmatprep.subr.bf16.mxu0 %v10702_v52 }
0x12ef   : > { %8639 = vmatpush2.bf16.msra.mxu0 %v10700_v49 }
0x12f0   : > { %8640 = vmatprep.subr.bf16.mxu0 %v10708_v21 }
0x12f3   : > { %8641 = vmatpush2.bf16.msra.mxu0 %v10706_v19 }
0x12f4   : > { %8642 = vmatprep.subr.bf16.mxu0 %v10714_v25 }
0x12f7   : > { %8643 = vmatpush2.bf16.msra.mxu0 %v10712_v28  ;;  %v10705_v28 = vld [vmem:[%s14767_s19 + $0x264] ss:$8 sps:$4 sm:$0xff]  }
0x12f8   : > { %8644 = vmatprep.subr.bf16.mxu0 %v10720_v54  ;;  %v10748_v54 = vld [vmem:[%s14767_s19 + $0x360] ss:$8 sps:$4 sm:$0xff]  }
0x12fb   : > { %8645 = vmatpush2.bf16.msra.mxu0 %v10718_v36 }
0x12fc   : > { %8646 = vmatprep.subr.bf16.mxu0 %v10726_v27  ;;  %v10756_v27 = vld [vmem:[%s14767_s19 + $0x354] ss:$8 sps:$4 sm:$0xff]  }
0x12ff   : > { %8647 = vmatpush2.bf16.msra.mxu0 %v10724_v53  ;;  %v10709_v53 = vld [vmem:[%s14767_s19 + $0x250] ss:$8 sps:$4 sm:$0xff]  }
0x1300   : > { %8648 = vmatprep.subr.bf16.mxu0 %v10732_v1  ;;  %v10762_v1 = vld [vmem:[%s14767_s19 + $0x344] ss:$8 sps:$4 sm:$0xff]  }
0x1303   : > { %8649 = vmatpush2.bf16.msra.mxu0 %v10730_v51  ;;  %v10715_v51 = vld [vmem:[%s14767_s19 + $0x240] ss:$8 sps:$4 sm:$0xff]  }
0x1304   : > { %8650 = vmatprep.subr.bf16.mxu0 %v10738_v5  ;;  %v10760_v5 = vld [vmem:[%s14767_s19 + $0x340] ss:$8 sps:$4 sm:$0xff]  }
0x1307   : > { %8651 = vmatpush2.bf16.msra.mxu0 %v10736_v59  ;;  %v10723_v59 = vld [vmem:[%s14767_s19 + $0x234] ss:$8 sps:$4 sm:$0xff]  }
0x1308   : > { %8702 = vmatprep.subr.bf16.mxu0 %v10744_v32  ;;  %v10768_v32 = vld [vmem:[%s14767_s19 + $0x334] ss:$8 sps:$4 sm:$0xff]  }
0x138a   : > { %v7568_v39 = vpop.f32.mrf.mxu0 }
0x138b   : > { %7579 = vst.msk [vmem:[#allocation6] sm:$0x1] %vm14373_vm14, %v7568_v39  ;;  %v7587_v12 = vrot.slane %v7568_v39, %v7586_v57  ;;  %v7611_v10 = vcombine.high %v7568_v39, %v7568_v39  ;;  %v10735_v39 = vld [vmem:[%s14767_s19 + $0x214] ss:$8 sps:$4 sm:$0xff]  }
0x138c   : > { %v10431_v38 = vpop.f32.mrf.mxu0 }
0x138d   : > { %v7588_v35 = vcombine.high %v7587_v12, %v7587_v12  ;;  %v7595_v37 = vrot.slane %v7587_v12, %v7586_v57  ;;  %v7618_v61 = vrot.slane %v7611_v10, %v7586_v57  ;;  %v10780_v12 = vld [vmem:[%s14767_s19 + $0x314] ss:$8 sps:$4 sm:$0xff]   ;;  %v10733_v10 = vld [vmem:[%s14767_s19 + $0x210] ss:$8 sps:$4 sm:$0xff]  }
0x138e   : > { %v7571_v8 = vpop.f32.mrf.mxu0  ;;  %v10778_v38 = vld [vmem:[%s14767_s19 + $0x310] ss:$8 sps:$4 sm:$0xff]  }
0x138f   : > { %v7602_v46 = vrot.slane %v7588_v35, %v7586_v57  ;;  %v7605_v58 = vcombine.high %v7595_v37, %v7595_v37  ;;  %v7625_v34 = vrot.slane %v7618_v61, %v7586_v57  ;;  %v7628_v62 = vcombine.high %v7618_v61, %v7618_v61  ;;  %7644 = vst.msk [vmem:[#allocation6 + $0x8] sm:$0x1] %vm14373_vm14, %v7571_v8  ;;  %v10741_v35 = vld [vmem:[%s14767_s19 + $0x204] ss:$8 sps:$4 sm:$0xff]   ;;  %v10739_v61 = vld [vmem:[%s14767_s19 + $0x200] ss:$8 sps:$4 sm:$0xff]  }
0x1390   : > { %v10432_v43 = vpop.f32.mrf.mxu0  ;;  %v10786_v37 = vld [vmem:[%s14767_s19 + $0x304] ss:$8 sps:$4 sm:$0xff]   ;;  %v10784_v8 = vld [vmem:[%s14767_s19 + $0x300] ss:$8 sps:$4 sm:$0xff]  }
0x1391   : > { %7604 = vst.msk [vmem:[#allocation6 + $0x1] sm:$0x1] %vm14373_vm14, %v7602_v46  ;;  %7607 = vst.msk [vmem:[#allocation6 + $0x2] sm:$0x1] %vm14373_vm14, %v7605_v58  ;;  %v7608_v15 = vcombine.high %v7602_v46, %v7602_v46  ;;  %v7635_v2 = vrot.slane %v7628_v62, %v7586_v57  ;;  %v7638_v24 = vcombine.high %v7625_v34, %v7625_v34  ;;  %v10727_v57 = vld [vmem:[%s14767_s19 + $0x220] ss:$8 sps:$4 sm:$0xff]  }
0x1392   : > { %7627 = vst.msk [vmem:[#allocation6 + $0x4] sm:$0x1] %vm14373_vm14, %v7625_v34  ;;  %v10747_v46 = vld [vmem:[%s14767_s19 + $0x2f4] ss:$8 sps:$4 sm:$0xff]   ;;  %v10745_v34 = vld [vmem:[%s14767_s19 + $0x2f0] ss:$8 sps:$4 sm:$0xff]  }
0x1393   : > { %7610 = vst.msk [vmem:[#allocation6 + $0x3] sm:$0x1] %vm14373_vm14, %v7608_v15  ;;  %7637 = vst.msk [vmem:[#allocation6 + $0x5] sm:$0x1] %vm14373_vm14, %v7635_v2  ;;  %v7641_v3 = vcombine.high %v7635_v2, %v7635_v2  ;;  %v10792_v58 = vld [vmem:[%s14767_s19 + $0x3f4] ss:$8 sps:$4 sm:$0xff]  }
0x1394   : > { %7640 = vst.msk [vmem:[#allocation6 + $0x6] sm:$0x1] %vm14373_vm14, %v7638_v24  ;;  %v10790_v62 = vld [vmem:[%s14767_s19 + $0x3f0] ss:$8 sps:$4 sm:$0xff]   ;;  %v10753_v43 = vld [vmem:[%s14767_s19 + $0x2e4] ss:$8 sps:$4 sm:$0xff]  }
0x1395   : > { %7643 = vst.msk [vmem:[#allocation6 + $0x7] sm:$0x1] %vm14373_vm14, %v7641_v3  ;;  %v10798_v15 = vld [vmem:[%s14767_s19 + $0x3e4] ss:$8 sps:$4 sm:$0xff]   ;;  %v10751_v2 = vld [vmem:[%s14767_s19 + $0x2e0] ss:$8 sps:$4 sm:$0xff]  }
0x1396   : > { %v10796_v24 = vld [vmem:[%s14767_s19 + $0x3e0] ss:$8 sps:$4 sm:$0xff]   ;;  %v10759_v3 = vld [vmem:[%s14767_s19 + $0x2d4] ss:$8 sps:$4 sm:$0xff]  }
0x139c   : > { %v7645_v23 = vld [vmem:[#allocation6] sm:$0xff] }
0x139d   : > { %v7656_v48 = vrot.slane %v7645_v23, %v7655_v29  ;;  %v7652_v33 = vrot.slane %v7645_v23, %v7651_v18  ;;  %v7664_v55 = vrot.slane %v7645_v23, %v7663_v0  ;;  %v7660_v31 = vrot.slane %v7645_v23, %v7659_v4  ;;  %v10804_v0 = vld [vmem:[%s14767_s19 + $0x3d4] ss:$8 sps:$4 sm:$0xff]   ;;  %v10757_v4 = vld [vmem:[%s14767_s19 + $0x2d0] ss:$8 sps:$4 sm:$0xff]  }
0x139e   : > { %v7672_v52 = vrot.slane %v7645_v23, %v7671_v60  ;;  %v14407_v49 = vrot.slane %v7645_v23, %v7667_v47  ;;  %v7680_v42 = vrot.slane %v7645_v23, %v7679_v63  ;;  %v14409_v40 = vrot.slane %v7645_v23, %v7675_v11  ;;  %v10802_v60 = vld [vmem:[%s14767_s19 + $0x3d0] ss:$8 sps:$4 sm:$0xff]   ;;  %v10765_v47 = vld [vmem:[%s14767_s19 + $0x2c4] ss:$8 sps:$4 sm:$0xff]   ;;  %v10763_v11 = vld [vmem:[%s14767_s19 + $0x2c0] ss:$8 sps:$4 sm:$0xff]  }
0x139f   : > { %v7695_v16 = vpack.c.bf16 %v7656_v48, %v7656_v48  ;;  %v7694_v19 = vpack.c.bf16 %v7652_v33, %v7652_v33  ;;  %v7697_v21 = vpack.c.bf16 %v7664_v55, %v7664_v55  ;;  %v7696_v25 = vpack.c.bf16 %v7660_v31, %v7660_v31  ;;  %v10810_v63 = vld [vmem:[%s14767_s19 + $0x3c4] ss:$8 sps:$4 sm:$0xff]   ;;  %v10808_v23 = vld [vmem:[%s14767_s19 + $0x3c0] ss:$8 sps:$4 sm:$0xff]   ;;  %v10771_v48 = vld [vmem:[%s14767_s19 + $0x2b4] ss:$8 sps:$4 sm:$0xff]  }
0x13a0   : > { %v7699_v36 = vpack.c.bf16 %v7672_v52, %v7672_v52  ;;  %v7701_v17 = vpack.c.bf16 %v7680_v42, %v7680_v42  ;;  %v10816_v33 = vld [vmem:[%s14767_s19 + $0x3b4] ss:$8 sps:$4 sm:$0xff]   ;;  %v10769_v55 = vld [vmem:[%s14767_s19 + $0x2b0] ss:$8 sps:$4 sm:$0xff]   ;;  %v10777_v52 = vld [vmem:[%s14767_s19 + $0x2a4] ss:$8 sps:$4 sm:$0xff]  }
0x13a1   : > { %8611 = vmatprep.mubr.bf16.mxu1 %v7695_v16  ;;  %8652 = vmatprep.mubr.bf16.mxu0 %v7697_v21  ;;  %v10814_v31 = vld [vmem:[%s14767_s19 + $0x3b0] ss:$8 sps:$4 sm:$0xff]   ;;  %v10822_v42 = vld [vmem:[%s14767_s19 + $0x3a4] ss:$8 sps:$4 sm:$0xff]   ;;  %v10775_v16 = vld [vmem:[%s14767_s19 + $0x2a0] ss:$8 sps:$4 sm:$0xff]  }
0x13a2   : > { %8612 = vmatmul.mubr.bf16.vlgmr.msra.gmra.mxu1 %v7694_v19  ;;  %8653 = vmatmul.mubr.bf16.vlgmr.msra.gmra.mxu0 %v7696_v25  ;;  %v10783_v19 = vld [vmem:[%s14767_s19 + $0x294] ss:$8 sps:$4 sm:$0xff]   ;;  %v10826_v25 = vld [vmem:[%s14767_s19 + $0x390] ss:$8 sps:$4 sm:$0xff]  }
0x13a3   : > { %8662 = vmatpush1.bf16.msra.mxu1 %v10697_v22  ;;  %8703 = vmatpush1.bf16.msra.mxu0 %v10742_v7  ;;  %v10820_v22 = vld [vmem:[%s14767_s19 + $0x3a0] ss:$8 sps:$4 sm:$0xff]   ;;  %v10828_v21 = vld [vmem:[%s14767_s19 + $0x394] ss:$8 sps:$4 sm:$0xff]   ;;  %v10781_v7 = vld [vmem:[%s14767_s19 + $0x290] ss:$8 sps:$4 sm:$0xff]  }
0x13a4   : > { %8663 = vmatprep.subr.bf16.mxu1 %v10705_v28  ;;  %8704 = vmatprep.subr.bf16.mxu0 %v10750_v45  ;;  %v10789_v28 = vld [vmem:[%s14767_s19 + $0x284] ss:$8 sps:$4 sm:$0xff]  }
0x13a5   : > { %8693 = vmatprep.mubr.bf16.mxu1 %v7699_v36  ;;  %8734 = vmatprep.mubr.bf16.mxu0 %v7701_v17  ;;  %v10834_v45 = vld [vmem:[%s14767_s19 + $0x384] ss:$8 sps:$4 sm:$0xff]   ;;  %v10795_v36 = vld [vmem:[%s14767_s19 + $0x474] ss:$8 sps:$4 sm:$0xff]  }
0x13a6   : > { %v10838_v17 = vld [vmem:[%s14769_s21 + $0x78] sm:$0xff]  }
0x13a7   : > { %8664 = vmatpush1.bf16.msra.mxu1 %v10703_v26  ;;  %8705 = vmatpush1.bf16.msra.mxu0 %v10748_v54  ;;  %v10787_v26 = vld [vmem:[%s14767_s19 + $0x280] ss:$8 sps:$4 sm:$0xff]  }
0x13a8   : > { %8665 = vmatprep.subr.bf16.mxu1 %v10711_v6  ;;  %8706 = vmatprep.subr.bf16.mxu0 %v10756_v27  ;;  %v10832_v54 = vld [vmem:[%s14767_s19 + $0x380] ss:$8 sps:$4 sm:$0xff]   ;;  %v10793_v6 = vld [vmem:[%s14767_s19 + $0x470] ss:$8 sps:$4 sm:$0xff]   ;;  %v7698_v27 = vpack.c.bf16 %v14407_v49, %v14407_v49 }
0x13a9   : > { %v10799_v49 = vld [vmem:[%s14767_s19 + $0x460] ss:$8 sps:$4 sm:$0xff]  }
0x13ab   : > { %8666 = vmatpush1.bf16.msra.mxu1 %v10709_v53  ;;  %8707 = vmatpush1.bf16.msra.mxu0 %v10754_v9  ;;  %v10801_v53 = vld [vmem:[%s14767_s19 + $0x464] ss:$8 sps:$4 sm:$0xff]   ;;  %v7700_v9 = vpack.c.bf16 %v14409_v40, %v14409_v40  ;;  %v10807_v40 = vld [vmem:[%s14767_s19 + $0x454] ss:$8 sps:$4 sm:$0xff]  }
0x13ac   : > { %8667 = vmatprep.subr.bf16.mxu1 %v10717_v56  ;;  %8708 = vmatprep.subr.bf16.mxu0 %v10762_v1  ;;  %v10839_v56 = vld [vmem:[%s14769_s21 + $0x38] sm:$0xff]   ;;  %v10840_v1 = vld [vmem:[%s14769_s21 + $0x70] sm:$0xff]  }
0x13af   : > { %8668 = vmatpush1.bf16.msra.mxu1 %v10715_v51  ;;  %8709 = vmatpush1.bf16.msra.mxu0 %v10760_v5  ;;  %v10841_v51 = vld [vmem:[%s14769_s21 + $0x30] sm:$0xff]   ;;  %v10842_v5 = vld [vmem:[%s14769_s21 + $0x68] sm:$0xff]  }
0x13b0   : > { %8669 = vmatprep.subr.bf16.mxu1 %v10723_v59  ;;  %8710 = vmatprep.subr.bf16.mxu0 %v10768_v32  ;;  %v10813_v59 = vld [vmem:[%s14767_s19 + $0x444] ss:$8 sps:$4 sm:$0xff]  }
0x13b1   : > { %v10843_v32 = vld [vmem:[%s14769_s21 + $0x28] sm:$0xff]  }
0x13b3   : > { %8670 = vmatpush1.bf16.msra.mxu1 %v10721_v44  ;;  %8711 = vmatpush1.bf16.msra.mxu0 %v10766_v14  ;;  %v10844_v44 = vld [vmem:[%s14769_s21 + $0x60] sm:$0xff]  }
0x13b4   : > { %8671 = vmatprep.subr.bf16.mxu1 %v10729_v20  ;;  %8712 = vmatprep.subr.bf16.mxu0 %v10774_v30  ;;  %v10811_v14 = vld [vmem:[%s14767_s19 + $0x440] ss:$8 sps:$4 sm:$0xff]   ;;  %v10819_v20 = vld [vmem:[%s14767_s19 + $0x434] ss:$8 sps:$4 sm:$0xff]  }
0x13b5   : > { %v10845_v30 = vld [vmem:[%s14769_s21 + $0x20] sm:$0xff]  }
0x13b7   : > { %8672 = vmatpush1.bf16.msra.mxu1 %v10727_v57  ;;  %8713 = vmatpush1.bf16.msra.mxu0 %v10772_v41  ;;  %v10817_v57 = vld [vmem:[%s14767_s19 + $0x430] ss:$8 sps:$4 sm:$0xff]   ;;  %v10825_v41 = vld [vmem:[%s14767_s19 + $0x424] ss:$8 sps:$4 sm:$0xff]  }
0x13b8   : > { %8673 = vmatprep.subr.bf16.mxu1 %v10735_v39  ;;  %8714 = vmatprep.subr.bf16.mxu0 %v10780_v12  ;;  %v10823_v39 = vld [vmem:[%s14767_s19 + $0x420] ss:$8 sps:$4 sm:$0xff]   ;;  %v10831_v12 = vld [vmem:[%s14767_s19 + $0x414] ss:$8 sps:$4 sm:$0xff]  }
0x13bb   : > { %8674 = vmatpush1.bf16.msra.mxu1 %v10733_v10  ;;  %8715 = vmatpush1.bf16.msra.mxu0 %v10778_v38  ;;  %v10829_v10 = vld [vmem:[%s14767_s19 + $0x410] ss:$8 sps:$4 sm:$0xff]   ;;  %v10837_v38 = vld [vmem:[%s14767_s19 + $0x404] ss:$8 sps:$4 sm:$0xff]  }
0x13bc   : > { %8675 = vmatprep.subr.bf16.mxu1 %v10741_v35  ;;  %8716 = vmatprep.subr.bf16.mxu0 %v10786_v37  ;;  %v10835_v35 = vld [vmem:[%s14767_s19 + $0x400] ss:$8 sps:$4 sm:$0xff]   ;;  %v9315_v37 = vld [vmem:[#allocation6 + $0x8] ss:$0 sm:$0xff] }
0x13bf   : > { %8676 = vmatpush1.bf16.msra.mxu1 %v10739_v61  ;;  %8717 = vmatpush1.bf16.msra.mxu0 %v10784_v8  ;;  %v7702_v61 = vpack.c.bf16 %v9315_v37, %v9315_v37  ;;  %v10846_v8 = vld [vmem:[%s14769_s21 + $0x58] sm:$0xff]  }
0x13c0   : > { %8677 = vmatprep.subr.bf16.mxu1 %v10747_v46  ;;  %8718 = vmatprep.subr.bf16.mxu0 %v10792_v58  ;;  %v10847_v46 = vld [vmem:[%s14769_s21 + $0x18] sm:$0xff]   ;;  %v10848_v58 = vld [vmem:[%s14769_s21 + $0x50] sm:$0xff]  }
0x13c3   : > { %8678 = vmatpush2.bf16.msra.mxu1 %v10745_v34  ;;  %8719 = vmatpush2.bf16.msra.mxu0 %v10790_v62  ;;  %v10849_v34 = vld [vmem:[%s14769_s21 + $0x10] sm:$0xff]   ;;  %v10850_v62 = vld [vmem:[%s14769_s21 + $0x48] sm:$0xff]  }
0x13c4   : > { %8679 = vmatprep.subr.bf16.mxu1 %v10753_v43  ;;  %8720 = vmatprep.subr.bf16.mxu0 %v10798_v15  ;;  %v10851_v43 = vld [vmem:[%s14769_s21 + $0x8] sm:$0xff]   ;;  %v10852_v15 = vld [vmem:[%s14769_s21 + $0x40] sm:$0xff]  }
0x13c7   : > { %8680 = vmatpush2.bf16.msra.mxu1 %v10751_v2  ;;  %8721 = vmatpush2.bf16.msra.mxu0 %v10796_v24  ;;  %v10853_v2 = vld [vmem:[%s14769_s21] sm:$0xff]  }
0x13c8   : > { %8681 = vmatprep.subr.bf16.mxu1 %v10759_v3  ;;  %8722 = vmatprep.subr.bf16.mxu0 %v10804_v0  ;;  %v7847_v24 = vld [vmem:[%s14768_s20] sm:$0x3] }
0x13c9   : > { %v8572_v3 = vrot.slane %v7847_v24, %v7651_v18  ;;  %v8576_v0 = vrot.slane %v7847_v24, %v7655_v29 }
0x13cb   : > { %8682 = vmatpush2.bf16.msra.mxu1 %v10757_v4  ;;  %8723 = vmatpush2.bf16.msra.mxu0 %v10802_v60 }
0x13cc   : > { %8683 = vmatprep.subr.bf16.mxu1 %v10765_v47  ;;  %8724 = vmatprep.subr.bf16.mxu0 %v10810_v63 }
0x13cf   : > { %8684 = vmatpush2.bf16.msra.mxu1 %v10763_v11  ;;  %8725 = vmatpush2.bf16.msra.mxu0 %v10808_v23 }
0x13d0   : > { %8685 = vmatprep.subr.bf16.mxu1 %v10771_v48  ;;  %8726 = vmatprep.subr.bf16.mxu0 %v10816_v33 }
0x13d3   : > { %8686 = vmatpush2.bf16.msra.mxu1 %v10769_v55  ;;  %8727 = vmatpush2.bf16.msra.mxu0 %v10814_v31 }
0x13d4   : > { %8687 = vmatprep.subr.bf16.mxu1 %v10777_v52  ;;  %8728 = vmatprep.subr.bf16.mxu0 %v10822_v42 }
0x13d7   : > { %8688 = vmatpush2.bf16.msra.mxu1 %v10775_v16  ;;  %8729 = vmatpush2.bf16.msra.mxu0 %v10820_v22 }
0x13d8   : > { %8689 = vmatprep.subr.bf16.mxu1 %v10783_v19  ;;  %8730 = vmatprep.subr.bf16.mxu0 %v10828_v21 }
0x13db   : > { %8690 = vmatpush2.bf16.msra.mxu1 %v10781_v7  ;;  %8731 = vmatpush2.bf16.msra.mxu0 %v10826_v25 }
0x13dc   : > { %8691 = vmatprep.subr.bf16.mxu1 %v10789_v28  ;;  %8732 = vmatprep.subr.bf16.mxu0 %v10834_v45 }
0x13df   : > { %8692 = vmatpush2.bf16.msra.mxu1 %v10787_v26  ;;  %8733 = vmatpush2.bf16.msra.mxu0 %v10832_v54 }
0x13e0   : > { %8743 = vmatprep.subr.bf16.mxu1 %v10795_v36  ;;  %9835 = vmatprep.subr.bf16.mxu0 %v10838_v17 }
0x13e2   : > { %8694 = vmatmul.mubr.bf16.vlgmr.msra.gmra.mxu1 %v7698_v27  ;;  %8735 = vmatmul.mubr.bf16.vlgmr.msra.gmra.mxu0 %v7700_v9 }
0x13e3   : > { %8744 = vmatpush1.bf16.msra.mxu1 %v10793_v6  ;;  %8775 = vmatprep.mubr.bf16.mxu1 %v14843_v13  ;;  %v10805_v13 = vld [vmem:[%s14767_s19 + $0x450] ss:$8 sps:$4 sm:$0xff]  }
0x13e4   : > { %8745 = vmatprep.subr.bf16.mxu1 %v10801_v53  ;;  %9836 = vmatpush3.bf16.msra.mxu0 %v10839_v56 }
0x13e5   : > { %9837 = vmatprep.subr.bf16.mxu0 %v10840_v1 }
0x13e7   : > { %8746 = vmatpush1.bf16.msra.mxu1 %v10799_v49 }
0x13e8   : > { %8747 = vmatprep.subr.bf16.mxu1 %v10807_v40  ;;  %9838 = vmatpush3.bf16.msra.mxu0 %v10841_v51  ;;  %v8820_v51 = vld [vmem:[%s14770_s22] sm:$0x1] }
0x13e9   : > { %9839 = vmatprep.subr.bf16.mxu0 %v10842_v5 }
0x13eb   : > { %8748 = vmatpush1.bf16.msra.mxu1 %v10805_v13 }
0x13ec   : > { %8749 = vmatprep.subr.bf16.mxu1 %v10813_v59  ;;  %9840 = vmatpush3.bf16.msra.mxu0 %v10843_v32 }
0x13ed   : > { %9841 = vmatprep.subr.bf16.mxu0 %v10844_v44 }
0x13ef   : > { %8750 = vmatpush1.bf16.msra.mxu1 %v10811_v14 }
0x13f0   : > { %8751 = vmatprep.subr.bf16.mxu1 %v10819_v20  ;;  %9842 = vmatpush3.bf16.msra.mxu0 %v10845_v30 }
0x13f1   : > { %9843 = vmatprep.subr.bf16.mxu0 %v10846_v8 }
0x13f3   : > { %8752 = vmatpush1.bf16.msra.mxu1 %v10817_v57 }
0x13f4   : > { %8753 = vmatprep.subr.bf16.mxu1 %v10825_v41  ;;  %9844 = vmatpush3.bf16.msra.mxu0 %v10847_v46 }
0x13f5   : > { %9845 = vmatprep.subr.bf16.mxu0 %v10848_v58 }
0x13f7   : > { %8754 = vmatpush1.bf16.msra.mxu1 %v10823_v39 }
0x13f8   : > { %8755 = vmatprep.subr.bf16.mxu1 %v10831_v12  ;;  %9846 = vmatpush3.bf16.msra.mxu0 %v10849_v34 }
0x13f9   : > { %9847 = vmatprep.subr.bf16.mxu0 %v10850_v62 }
0x13fb   : > { %8756 = vmatpush1.bf16.msra.mxu1 %v10829_v10 }
0x13fc   : > { %8757 = vmatprep.subr.bf16.mxu1 %v10837_v38  ;;  %9848 = vmatpush3.bf16.msra.mxu0 %v10851_v43 }
0x13fd   : > { %9849 = vmatprep.subr.bf16.mxu0 %v10852_v15 }
0x13ff   : > { %8758 = vmatpush1.bf16.msra.mxu1 %v10835_v35 }
0x1400   : > { %9850 = vmatpush3.bf16.msra.mxu0 %v10853_v2 }
0x1402   : > { %8776 = vmatmul.mubr.bf16.vlgmr.msra.gmra.mxu1 %v7702_v61 }
0x1462   : > { %v8613_v4 = vpop.f32.mrf.mxu1  ;;  %v8654_v60 = vpop.f32.mrf.mxu0 }
0x1463   : > { %v8614_v47 = vadd.f32 %v8613_v4, %v8572_v3 }
0x1464   : > { %v8615_v63 = vpop.f32.mrf.mxu1  ;;  %v8656_v11 = vpop.f32.mrf.mxu0 }
0x1465   : > { %v8616_v23 = vadd.f32 %v8615_v63, %v8576_v0  ;;  %v8655_v48 = vadd.f32 %v8654_v60, %v8614_v47 }
0x1466   : > { %v8617_v33 = vpop.f32.mrf.mxu1  ;;  %v8658_v55 = vpop.f32.mrf.mxu0 }
0x1467   : > { %v8657_v31 = vadd.f32 %v8656_v11, %v8616_v23 }
0x1468   : > { %v8618_v52 = vpop.f32.mrf.mxu1  ;;  %v8659_v42 = vpop.f32.mrf.mxu0 }
0x14a2   : > { %v8695_v16 = vpop.f32.mrf.mxu1  ;;  %v8736_v22 = vpop.f32.mrf.mxu0 }
0x14a3   : > { %v8696_v25 = vadd.f32 %v8695_v16, %v8655_v48 }
0x14a4   : > { %v8697_v19 = vpop.f32.mrf.mxu1  ;;  %v8738_v21 = vpop.f32.mrf.mxu0 }
0x14a5   : > { %v8698_v28 = vadd.f32 %v8697_v19, %v8657_v31  ;;  %v8737_v45 = vadd.f32 %v8736_v22, %v8696_v25 }
0x14a6   : > { %v8699_v18 = vpop.f32.mrf.mxu1  ;;  %v8740_v7 = vpop.f32.mrf.mxu0 }
0x14a7   : > { %v8739_v54 = vadd.f32 %v8738_v21, %v8698_v28 }
0x14a8   : > { %v8700_v50 = vpop.f32.mrf.mxu1  ;;  %v8741_v29 = vpop.f32.mrf.mxu0 }
0x14c2   : > { %v8777_v26 = vpop.f32.mrf.mxu1 }
0x14c3   : > { %v8778_v36 = vadd.f32 %v8777_v26, %v8737_v45 }
0x14c4   : > { %v8779_v17 = vpop.f32.mrf.mxu1 }
0x14c5   : > { %v8780_v6 = vadd.f32 %v8779_v17, %v8739_v54  ;;  %v8784_v27 = vmax.f32 %v8778_v36, 0.0 }
0x14c6   : > { %v8781_v53 = vpop.f32.mrf.mxu1 }
0x14c7   : > { %v8785_v9 = vmax.f32 %v8780_v6, 0.0  ;;  %v8786_v49 = vpack.c.bf16 %v8784_v27, %v8784_v27 }
0x14c8   : > { %v8782_v56 = vpop.f32.mrf.mxu1 }
0x14c9   : > { %v8787_v1 = vpack.c.bf16 %v8785_v9, %v8785_v9 }
0x14cb   : > { %8949 = vmatprep.mubr.bf16.mxu0 %v8787_v1 }
0x14cc   : > { %8950 = vmatmul.mubr.bf16.vlgmr.msra.gmra.mxu0 %v8786_v49 }
0x158c   : > { %v9851_v40 = vpop.f32.mrf.mxu0 }
0x158e   : > { %v9852_v5 = vpop.f32.mrf.mxu0 }
0x158f   : > { %v9853_v13 = vadd.f32 %v9852_v5, %v9851_v40 }
0x1590   : > { %v9854_v59 = vpop.f32.mrf.mxu0 }
0x1591   : > { %v8952_v32 = vadd.f32 %v9853_v13, %v8820_v51 }
0x1592   : > { %v9855_v44 = vpop.f32.mrf.mxu0 }
0x1593   : > { %8957 = vst [vmem:[%s702_s6] sm:$0x1] %v8952_v32 }
0x1594   : > { %10998 = shalt.err (!%p10995_p3)
}
0x1595   : > { %s10999_s3 = scalar_lea.hbm %s14713_s24, 16  ;;  %s11003_s8 = scalar_lea.hbm %s14771_s23, 32 }
0x1596   : > { %p11000_p4 = scmp.ne.s32.totalorder %s14713_s24, %s10999_s3  ;;  %p11004_p9 = scmp.lt.s32.totalorder %s14713_s24, %s14771_s23 }
0x1597   : > { %p11005_p10 = scmp.lt.s32.totalorder %s11003_s8, %s10999_s3 }
0x1598   : > { %p11001_p7 = pnand %p11000_p4, %p11215_p5 }
0x1599   : > { %p11006_p11 = por %p11005_p10, %p11004_p9 }
0x159a   : > { %p11002_p8 = pneg %p11001_p7 }
0x159c   : > { %p11007_p12 = pnand %p11006_p11, %p11002_p8 }
0x159e   : > { %11010 = shalt.err (!%p11007_p12)
}
0x159f   : > { %10437 = dma.vmem_to_hbm [thread:$0]  (%p11215_p5), %s8972_s26, 16, %s14713_s24, %s8959_s2  }
0x15a0 PF: > { %p10443_p13 = scmp.ge.s32.totalorder %s11045_s25, 2  ;;  %s8983_s10 = sand.u32 1, %s11033_s4  }
0x15a1   : > { %s8984_s1 = scalar_lea.sflag [#allocation8], %s8983_s10 }
0x15a2   : > { %p10440_p0 = pnand %p10443_p13, %p11219_p6 }
0x15a4   : > { %p10441_p1 = pneg %p10440_p0 }
0x15a6   : > { %11028 = dma.done.wait (%p10441_p1), %s8984_s1, 16  }
0x15a7   : > { %11030 = vsyncadd (%p10441_p1), %s8984_s1, 4294967280  ;;  %s14864_s25 = sld [smem:[#allocation11_spill]]  ;;  %s14867_s4 = smov %s11037_s30 }
0x15a8   : > { %s14865_s0 = sld [smem:[#allocation10_spill]] }
0x15a9   : > { %s14866_s24 = sld [smem:[#allocation12_spill]] }
0x15ad   : > { %p33_p2 = scmp.ge.s32.totalorder %s14864_s25, 4  }
0x15ae   : > { %s14868_s30 = smov %s14865_s0 }
0x15af   :  { %35 = sbr.rel (!%p33_p2) target bundleno = 15 (0xf), region = 147 }
0x15b4   :  { %8988 = vsyncpa [#allocation8], 1 }
0x15b5   :  { %8990 = vsyncpa [#allocation8 + $0x1], 1 }

</bundles_post_ra>
